<compile_context>
chip_gen: v7x
topology: tpu7x:2x2x1
jax: 0.10.0
libtpu: 0.0.40
codegen_flags: <defaults>
</compile_context>

<pallas_src>
import functools
import math

import jax
import jax.numpy as jnp
from jax.experimental import pallas as pl
from jax.experimental.pallas import tpu as pltpu


_BB_CH = (16, 32, 64, 128)       # stand-in backbone level widths
_NUM_LEVELS = 4
_DET_DIM = 7


def _round_up(x, m):
    return (x + m - 1) // m * m


def _pack_rows(entries, width):
    """Stack 2-D f32 matrices on the sublane axis, zero-padded to `width` lanes.

    Every entry starts on a row offset that is a multiple of 8 so the static
    in-kernel ref slices stay sublane-aligned.  Returns (packed, offsets) with
    offsets[name] = (row_start, n_rows, n_cols).
    """
    rows, offs, r = [], {}, 0
    for name, m in entries:
        m = jnp.asarray(m, jnp.float32)
        nr, nc = m.shape
        offs[name] = (r, nr, nc)
        rows.append(jnp.pad(m, ((0, 0), (0, width - nc))))
        r += nr
        pad = (-r) % 8
        if pad:
            rows.append(jnp.zeros((pad, width), jnp.float32))
            r += pad
    return jnp.concatenate(rows, axis=0), offs


# ---------------------------------------------------------------------------
# Single fused forward kernel (one grid step per core; batch block inside)
# ---------------------------------------------------------------------------
def _fused_forward_kernel(vox_ref, voxt_ref, c240_ref, wpk_ref, out_ref, *,
                          num_heads, d_model, num_classes, det_dim, out_w,
                          x_min, x_max, y_min, y_max, c_offs, w_offs):
    f32 = jnp.float32
    D = d_model
    dh = D // num_heads
    L = _NUM_LEVELS
    bb_total = sum(_BB_CH)

    def cw(name):
        r, nr, nc = c_offs[name]
        return c240_ref[r:r + nr, 0:nc]

    def ww(name):
        r, nr, nc = w_offs[name]
        return wpk_ref[r:r + nr, 0:nc]

    # ---- loop-invariant weight views (static, sublane-aligned ref slices) --
    fc_w = ww("fc_w")          # (3, 12)
    fc_b = ww("fc_b")          # (1, 12)
    bb_w = cw("bb_w")          # (12, 240)
    bb_b = cw("bb_b")          # (1, 240)
    lmask = cw("lmask")        # (4, 240)
    ft_w = ww("ft_w")          # (240, D)
    ft_b = ww("ft_b")          # (4, D)
    wqkv = ww("wqkv")          # (D, 3D)
    bqkv = ww("bqkv")          # (1, 3D)
    wo = ww("wo")              # (D, D)
    bo = ww("bo")              # (1, D)
    repT = ww("repT")          # (H*L, L)   row h*L+q -> one-hot of q
    hmask = ww("hmask")        # (H*L, D)   keep only head h's lane block
    bsum = ww("bsum")          # (H*L, H*L) per-head block-sum matrix
    head_w = ww("head_w")      # (4D, out_w) fused [cls_w | det_w], lane-padded
    head_b = ww("head_b")      # (1, out_w)

    # ---- 1) per-voxel point self-attention, fully on the VPU (K == 3) ------
    x = vox_ref[...].astype(f32)          # (Bb, N, P, 3)
    xt = voxt_ref[...].astype(f32)        # (Bb, N, 3, P)
    Bb, N, P, dim = x.shape
    inv_scale = 1.0 / math.sqrt(float(dim))

    s = x[:, :, :, 0:1] * xt[:, :, 0:1, :]
    for d in range(1, dim):
        s = s + x[:, :, :, d:d + 1] * xt[:, :, d:d + 1, :]
    s = s * inv_scale                                        # (Bb, N, P, P)
    s = s - jnp.max(s, axis=-1, keepdims=True)
    e = jnp.exp(s)
    attn = e * pl.reciprocal(jnp.sum(e, axis=-1, keepdims=True), approx=True)

    # fc(3 -> 12) folded through the attention:
    #   relu((attn @ X) @ W + b) == relu(attn @ (X @ W) + b)
    # X @ W (K == 3) and attn @ XW (K == P) as VPU broadcast mul-adds.
    xw = x[:, :, :, 0:1] * fc_w[0:1, :]
    for d in range(1, dim):
        xw = xw + x[:, :, :, d:d + 1] * fc_w[d:d + 1, :]     # (Bb, N, P, 12)

    feat = attn[:, :, :, 0:1] * xw[:, :, 0:1, :]
    for q in range(1, P):
        feat = feat + attn[:, :, :, q:q + 1] * xw[:, :, q:q + 1, :]
    feat = jnp.maximum(feat + fc_b, 0.0)                     # (Bb, N, P, 12)

    pooled = jnp.max(feat, axis=2)                           # (Bb, N, 12)

    inv_sd = 1.0 / math.sqrt(float(dh))
    lane = jax.lax.broadcasted_iota(jnp.int32, (1, out_w), 1)

    # ---- per-sample tail (Bb is 1 or 2; every matmul is one MXU push) ------
    for bi in range(Bb):
        # 2) backbone stand-in: fused level MLP + voxel max-pool
        h = jnp.dot(pooled[bi], bb_w, preferred_element_type=f32) + bb_b
        h = jnp.maximum(h, 0.0)                              # (N, 240)
        levels = jnp.max(h, axis=0, keepdims=True)           # (1, 240)

        # 3) features stand-in: per-level Linear -> ONE masked matmul
        lvl4 = jnp.broadcast_to(levels, (L, bb_total)) * lmask
        feats = jnp.dot(lvl4, ft_w, preferred_element_type=f32) + ft_b
        feats = jnp.maximum(feats, 0.0)                      # (L, D)

        # 4) 4-head attention over the levels, all heads fused
        qkv = jnp.dot(feats, wqkv, preferred_element_type=f32) + bqkv
        q_all = qkv[:, 0:D]
        k_all = qkv[:, D:2 * D]
        v_all = qkv[:, 2 * D:3 * D]
        # head-blocked K / V: row h*L+q holds K[q]/V[q], masked to head h lanes
        kb = jnp.dot(repT, k_all, preferred_element_type=f32) * hmask
        vb = jnp.dot(repT, v_all, preferred_element_type=f32) * hmask
        # all (query level, head, key level) scores in one matmul; the rhs
        # transpose is absorbed by the contraction on the trailing dims.
        sc = jnp.einsum("pd,rd->pr", q_all, kb,
                        preferred_element_type=f32) * inv_sd  # (L, H*L)
        # row-wide max is constant within every head block -> exact softmax
        sc = sc - jnp.max(sc, axis=-1, keepdims=True)
        ex = jnp.exp(sc)
        den = jnp.dot(ex, bsum, preferred_element_type=f32)   # per-head sums
        attn_s = ex * pl.reciprocal(den, approx=True)
        ctx = jnp.dot(attn_s, vb, preferred_element_type=f32)  # (L, D)
        mha = jnp.dot(ctx, wo, preferred_element_type=f32) + bo

        # 5) fused cls+det head: flat(mha) @ [cls_w | det_w] as 4 row matmuls
        acc = head_b
        for i in range(L):
            acc = acc + jnp.dot(mha[i:i + 1, :],
                                head_w[i * D:(i + 1) * D, :],
                                preferred_element_type=f32)   # (1, out_w)

        # TODO(synk): DetectionHead internals unknown; clamp predicted x/y
        # centers into the point-cloud range, leave remaining box params raw.
        sig = pl.reciprocal(1.0 + jnp.exp(-acc), approx=True)
        dx = x_min + sig * (x_max - x_min)
        dy = y_min + sig * (y_max - y_min)
        res = jnp.where(lane == num_classes, dx,
                        jnp.where(lane == num_classes + 1, dy, acc))
        out_ref[bi] = res.astype(out_ref.dtype)


# ---------------------------------------------------------------------------
# Wrapper: weight repacking + single pallas_call
# ---------------------------------------------------------------------------
def _grid_steps(batch):
    """1 step on single-TensorCore chips (v5e/v6e), 2 on dual-core chips."""
    cores = 1
    try:
        kind = jax.devices()[0].device_kind.lower()
        if "lite" not in kind and ("v4" in kind or "v5p" in kind or "v7" in kind):
            cores = 2
    except Exception:
        cores = 1
    if batch <= 0 or batch % cores != 0:
        return 1
    return min(cores, batch)


def network_forward(voxels, params, *, point_cloud_range, d_model, num_classes,
                    num_heads=4, det_dim=_DET_DIM):
    x_min, y_min, _z0, x_max, y_max, _z1 = point_cloud_range
    B, N, P, dim = voxels.shape
    bb_total = sum(_BB_CH)
    D = d_model
    dh = D // num_heads
    L = _NUM_LEVELS
    HL = num_heads * L
    out_w = _round_up(num_classes + det_dim, 128)
    pack_w = _round_up(max(128, 3 * D, HL, out_w), 128)

    # --- wrapper-side weight repacking (tiny jnp ops, fused under jit) ------
    bb_w = jnp.concatenate([params[f"bb_w{i}"] for i in range(L)], axis=1)
    bb_b = jnp.concatenate([params[f"bb_b{i}"] for i in range(L)], axis=1)
    ft_w = jnp.concatenate([params[f"ft_w{i}"] for i in range(L)], axis=0)
    ft_b = jnp.concatenate([params[f"ft_b{i}"] for i in range(L)], axis=0)
    wqkv = jnp.concatenate([params["mha_wq"], params["mha_wk"],
                            params["mha_wv"]], axis=1)
    bqkv = jnp.concatenate([params["mha_bq"], params["mha_bk"],
                            params["mha_bv"]], axis=1)
    head_w = jnp.concatenate([params["cls_w"], params["det_w"]], axis=1)
    head_b = jnp.concatenate([params["cls_b"], params["det_b"]], axis=1)
    head_w = jnp.pad(head_w, ((0, 0), (0, out_w - head_w.shape[1])))
    head_b = jnp.pad(head_b, ((0, 0), (0, out_w - head_b.shape[1])))

    # level mask (4, 240): row i selects backbone level i's channel block
    offs = [0]
    for c in _BB_CH:
        offs.append(offs[-1] + c)
    col = jnp.arange(bb_total)[None, :]
    lo = jnp.asarray(offs[:-1])[:, None]
    hi = jnp.asarray(offs[1:])[:, None]
    lmask = ((col >= lo) & (col < hi)).astype(jnp.float32)

    # MHA helper constants: repT replicates K/V rows per head, hmask keeps
    # only the head's own lane block, bsum broadcasts per-head softmax sums.
    r = jnp.arange(HL)[:, None]
    repT = (jnp.arange(L)[None, :] == (r % L)).astype(jnp.float32)            # (HL, L)
    hmask = ((jnp.arange(D)[None, :] // dh) == (r // L)).astype(jnp.float32)  # (HL, D)
    bsum = ((r // L) == (jnp.arange(HL)[None, :] // L)).astype(jnp.float32)   # (HL, HL)

    c240, c_offs = _pack_rows(
        [("bb_w", bb_w), ("bb_b", bb_b), ("lmask", lmask)], bb_total)
    wpk, w_offs = _pack_rows(
        [("fc_w", params["fc_w"]), ("fc_b", params["fc_b"]),
         ("ft_w", ft_w), ("ft_b", ft_b),
         ("wqkv", wqkv), ("bqkv", bqkv),
         ("wo", params["mha_wo"]), ("bo", params["mha_bo"]),
         ("repT", repT), ("hmask", hmask), ("bsum", bsum),
         ("head_w", head_w), ("head_b", head_b)], pack_w)

    # Transposed copy so the in-kernel QK^T needs no transpose.
    voxels_t = jnp.swapaxes(voxels, 2, 3)              # (B, N, dim, P)

    steps = _grid_steps(B)
    Bb = B // steps

    kernel = functools.partial(
        _fused_forward_kernel,
        num_heads=num_heads, d_model=d_model, num_classes=num_classes,
        det_dim=det_dim, out_w=out_w,
        x_min=float(x_min), x_max=float(x_max),
        y_min=float(y_min), y_max=float(y_max),
        c_offs=c_offs, w_offs=w_offs)

    out = pl.pallas_call(
        kernel,
        out_shape=jax.ShapeDtypeStruct((B, 1, out_w), jnp.float32),
        grid=(steps,),
        in_specs=[
            pl.BlockSpec((Bb, N, P, dim), lambda g: (g, 0, 0, 0)),
            pl.BlockSpec((Bb, N, dim, P), lambda g: (g, 0, 0, 0)),
            pl.BlockSpec(c240.shape, lambda g: (0, 0)),
            pl.BlockSpec(wpk.shape, lambda g: (0, 0)),
        ],
        out_specs=pl.BlockSpec((Bb, 1, out_w), lambda g: (g, 0, 0)),
        compiler_params=pltpu.CompilerParams(
            dimension_semantics=("parallel",)),
    )(voxels, voxels_t, c240, wpk)

    cls = out[:, 0, :num_classes]
    det = out[:, 0, num_classes:num_classes + det_dim]
    return det, cls


# ---------------------------------------------------------------------------
# Parameters (same deterministic stand-ins as the reference implementation)
# ---------------------------------------------------------------------------
def init_params(key, d_model, num_classes, det_dim=_DET_DIM):
    keys = jax.random.split(key, 40)
    ki = iter(range(40))

    def w(shape, scale=0.1):
        return (scale * jax.random.normal(keys[next(ki)], shape)).astype(jnp.float32)

    p = {}
    p["fc_w"] = w((3, 12))
    p["fc_b"] = w((1, 12), 0.01)
    for i, ch in enumerate(_BB_CH):
        p[f"bb_w{i}"] = w((12, ch))
        p[f"bb_b{i}"] = w((1, ch), 0.01)
        p[f"ft_w{i}"] = w((ch, d_model))
        p[f"ft_b{i}"] = w((1, d_model), 0.01)
    for name in ("q", "k", "v", "o"):
        p[f"mha_w{name}"] = w((d_model, d_model))
        p[f"mha_b{name}"] = w((1, d_model), 0.01)
    flat = 4 * d_model
    p["cls_w"] = w((flat, num_classes))
    p["cls_b"] = w((1, num_classes), 0.01)
    p["det_w"] = w((flat, det_dim))
    p["det_b"] = w((1, det_dim), 0.01)
    return p


# ---------------------------------------------------------------------------
# Pure-JAX reference (mirrors the same stand-in math) for a sanity check
# ---------------------------------------------------------------------------
def _reference_forward(voxels, params, *, point_cloud_range, d_model,
                       num_classes, num_heads=4, det_dim=_DET_DIM):
    hi = "highest"
    x_min, y_min, _z0, x_max, y_max, _z1 = point_cloud_range
    B, N, P, dim = voxels.shape
    attn = jax.nn.softmax(
        jnp.einsum("bvpd,bvqd->bvpq", voxels, voxels, precision=hi)
        / math.sqrt(dim), axis=-1)
    feat = jnp.einsum("bvpq,bvqd->bvpd", attn, voxels, precision=hi)
    feat = jnp.maximum(jnp.dot(feat, params["fc_w"], precision=hi)
                       + params["fc_b"], 0.0)
    pooled = jnp.max(feat, axis=2)
    lvls = []
    for i in range(4):
        h = jnp.maximum(jnp.dot(pooled, params[f"bb_w{i}"], precision=hi)
                        + params[f"bb_b{i}"], 0.0)
        lvls.append(jnp.max(h, axis=1))
    lv = [jnp.maximum(jnp.dot(l, params[f"ft_w{i}"], precision=hi)
                      + params[f"ft_b{i}"], 0.0) for i, l in enumerate(lvls)]
    feats = jnp.stack(lv, axis=1)                                  # (B, 4, D)
    D, dh = d_model, d_model // num_heads
    q = jnp.dot(feats, params["mha_wq"], precision=hi) + params["mha_bq"]
    k = jnp.dot(feats, params["mha_wk"], precision=hi) + params["mha_bk"]
    v = jnp.dot(feats, params["mha_wv"], precision=hi) + params["mha_bv"]
    sp = lambda t: t.reshape(B, 4, num_heads, dh).transpose(0, 2, 1, 3)
    qh, kh, vh = sp(q), sp(k), sp(v)
    sc = jnp.einsum("bhqd,bhkd->bhqk", qh, kh, precision=hi) / math.sqrt(dh)
    pa = jax.nn.softmax(sc, axis=-1)
    ctx = jnp.einsum("bhqk,bhkd->bhqd", pa, vh,
                     precision=hi).transpose(0, 2, 1, 3).reshape(B, 4, D)
    mha = jnp.dot(ctx, params["mha_wo"], precision=hi) + params["mha_bo"]
    flat = mha.reshape(B, 4 * D)
    cls = jnp.dot(flat, params["cls_w"], precision=hi) + params["cls_b"]
    det_raw = jnp.dot(flat, params["det_w"], precision=hi) + params["det_b"]
    dx = x_min + jax.nn.sigmoid(det_raw[:, 0:1]) * (x_max - x_min)
    dy = y_min + jax.nn.sigmoid(det_raw[:, 1:2]) * (y_max - y_min)
    det = jnp.concatenate([dx, dy, det_raw[:, 2:]], axis=-1)
    return det, cls


# ---------------------------------------------------------------------------
if __name__ == "__main__":
    voxel_size = [0.5, 0.5, 0.5]
    point_cloud_range = [0.0, -10.0, -3.0, 20.0, 10.0, 3.0]
    max_num_points = 8       # points per voxel
    max_voxels = 16          # voxels per sample
    d_model = 32
    num_classes = 4
    batch = 2

    key = jax.random.PRNGKey(0)
    k_in, k_par = jax.random.split(key)
    voxels = jax.random.uniform(
        k_in, (batch, max_voxels, max_num_points, 3), dtype=jnp.float32,
        minval=-1.0, maxval=1.0)
    params = init_params(k_par, d_model, num_classes)

    fwd = jax.jit(functools.partial(
        network_forward,
        point_cloud_range=point_cloud_range,
        d_model=d_model,
        num_classes=num_classes))

    det_out, cls_out = fwd(voxels, params)
    jax.block_until_ready((det_out, cls_out))

    assert det_out.shape == (batch, 7)
    assert cls_out.shape == (batch, num_classes)
    assert jnp.all(jnp.isfinite(det_out)) and jnp.all(jnp.isfinite(cls_out))

    det_ref, cls_ref = _reference_forward(
        voxels, params, point_cloud_range=point_cloud_range,
        d_model=d_model, num_classes=num_classes)
    assert jnp.allclose(det_out, det_ref, atol=5e-2, rtol=5e-2)
    assert jnp.allclose(cls_out, cls_ref, atol=5e-2, rtol=5e-2)

    print("KERNEL_OK")
</pallas_src>

<mosaic_0001>
module attributes {stable_mosaic.version = 11 : i64} {
  func.func @_fused_forward_kernel(%arg0: i32, %arg1: memref<2x16x8x3xf32, #tpu.memory_space<vmem>>, %arg2: memref<2x16x3x8xf32, #tpu.memory_space<vmem>>, %arg3: memref<32x240xf32, #tpu.memory_space<vmem>>, %arg4: memref<528x128xf32, #tpu.memory_space<vmem>>, %arg5: memref<2x1x128xf32, #tpu.memory_space<vmem>>) attributes {dimension_semantics = [#tpu.dimension_semantics<parallel>], iteration_bounds = array<i64: 1>, scalar_prefetch = 0 : i64, scratch_operands = 0 : i64, tpu.core_type = #tpu.core_type<tc>, window_params = [{transform_indices = @transform_0, window_bounds = array<i64: 2, 16, 8, 3>}, {transform_indices = @transform_1, window_bounds = array<i64: 2, 16, 3, 8>}, {pipeline_mode = #tpu.pipeline_mode<synchronous>, transform_indices = @transform_2, window_bounds = array<i64: 32, 240>}, {pipeline_mode = #tpu.pipeline_mode<synchronous>, transform_indices = @transform_3, window_bounds = array<i64: 528, 128>}, {transform_indices = @transform_4, window_bounds = array<i64: 2, 1, 128>}]} {
    %c0 = arith.constant 0 : index
    %c0_0 = arith.constant 0 : index
    %0 = vector.load %arg4[%c0, %c0_0] : memref<528x128xf32, #tpu.memory_space<vmem>>, vector<3x12xf32>
    %c8 = arith.constant 8 : index
    %c0_1 = arith.constant 0 : index
    %1 = vector.load %arg4[%c8, %c0_1] : memref<528x128xf32, #tpu.memory_space<vmem>>, vector<1x12xf32>
    %c0_2 = arith.constant 0 : index
    %c0_3 = arith.constant 0 : index
    %2 = vector.load %arg3[%c0_2, %c0_3] : memref<32x240xf32, #tpu.memory_space<vmem>>, vector<12x240xf32>
    %c16 = arith.constant 16 : index
    %c0_4 = arith.constant 0 : index
    %3 = vector.load %arg3[%c16, %c0_4] : memref<32x240xf32, #tpu.memory_space<vmem>>, vector<1x240xf32>
    %c24 = arith.constant 24 : index
    %c0_5 = arith.constant 0 : index
    %4 = vector.load %arg3[%c24, %c0_5] : memref<32x240xf32, #tpu.memory_space<vmem>>, vector<4x240xf32>
    %c16_6 = arith.constant 16 : index
    %c0_7 = arith.constant 0 : index
    %5 = vector.load %arg4[%c16_6, %c0_7] : memref<528x128xf32, #tpu.memory_space<vmem>>, vector<240x32xf32>
    %c256 = arith.constant 256 : index
    %c0_8 = arith.constant 0 : index
    %6 = vector.load %arg4[%c256, %c0_8] : memref<528x128xf32, #tpu.memory_space<vmem>>, vector<4x32xf32>
    %c264 = arith.constant 264 : index
    %c0_9 = arith.constant 0 : index
    %7 = vector.load %arg4[%c264, %c0_9] : memref<528x128xf32, #tpu.memory_space<vmem>>, vector<32x96xf32>
    %c296 = arith.constant 296 : index
    %c0_10 = arith.constant 0 : index
    %8 = vector.load %arg4[%c296, %c0_10] : memref<528x128xf32, #tpu.memory_space<vmem>>, vector<1x96xf32>
    %c304 = arith.constant 304 : index
    %c0_11 = arith.constant 0 : index
    %9 = vector.load %arg4[%c304, %c0_11] : memref<528x128xf32, #tpu.memory_space<vmem>>, vector<32x32xf32>
    %c336 = arith.constant 336 : index
    %c0_12 = arith.constant 0 : index
    %10 = vector.load %arg4[%c336, %c0_12] : memref<528x128xf32, #tpu.memory_space<vmem>>, vector<1x32xf32>
    %c344 = arith.constant 344 : index
    %c0_13 = arith.constant 0 : index
    %11 = vector.load %arg4[%c344, %c0_13] : memref<528x128xf32, #tpu.memory_space<vmem>>, vector<16x4xf32>
    %c360 = arith.constant 360 : index
    %c0_14 = arith.constant 0 : index
    %12 = vector.load %arg4[%c360, %c0_14] : memref<528x128xf32, #tpu.memory_space<vmem>>, vector<16x32xf32>
    %c376 = arith.constant 376 : index
    %c0_15 = arith.constant 0 : index
    %13 = vector.load %arg4[%c376, %c0_15] : memref<528x128xf32, #tpu.memory_space<vmem>>, vector<16x16xf32>
    %c392 = arith.constant 392 : index
    %c0_16 = arith.constant 0 : index
    %14 = vector.load %arg4[%c392, %c0_16] : memref<528x128xf32, #tpu.memory_space<vmem>>, vector<128x128xf32>
    %c520 = arith.constant 520 : index
    %c0_17 = arith.constant 0 : index
    %15 = vector.load %arg4[%c520, %c0_17] : memref<528x128xf32, #tpu.memory_space<vmem>>, vector<1x128xf32>
    %c0_18 = arith.constant 0 : index
    %c0_19 = arith.constant 0 : index
    %c0_20 = arith.constant 0 : index
    %c0_21 = arith.constant 0 : index
    %16 = vector.load %arg1[%c0_18, %c0_19, %c0_20, %c0_21] : memref<2x16x8x3xf32, #tpu.memory_space<vmem>>, vector<2x16x8x3xf32>
    %c0_22 = arith.constant 0 : index
    %c0_23 = arith.constant 0 : index
    %c0_24 = arith.constant 0 : index
    %c0_25 = arith.constant 0 : index
    %17 = vector.load %arg2[%c0_22, %c0_23, %c0_24, %c0_25] : memref<2x16x3x8xf32, #tpu.memory_space<vmem>>, vector<2x16x3x8xf32>
    %18 = vector.extract_strided_slice %16 {offsets = [0, 0, 0, 0], sizes = [2, 16, 8, 1], strides = [1, 1, 1, 1]} : vector<2x16x8x3xf32> to vector<2x16x8x1xf32>
    %19 = vector.extract_strided_slice %17 {offsets = [0, 0, 0, 0], sizes = [2, 16, 1, 8], strides = [1, 1, 1, 1]} : vector<2x16x3x8xf32> to vector<2x16x1x8xf32>
    %20 = vector.broadcast %18 : vector<2x16x8x1xf32> to vector<2x16x8x8xf32>
    %21 = vector.broadcast %19 : vector<2x16x1x8xf32> to vector<2x16x8x8xf32>
    %22 = arith.mulf %20, %21 : vector<2x16x8x8xf32>
    %23 = vector.extract_strided_slice %16 {offsets = [0, 0, 0, 1], sizes = [2, 16, 8, 1], strides = [1, 1, 1, 1]} : vector<2x16x8x3xf32> to vector<2x16x8x1xf32>
    %24 = vector.extract_strided_slice %17 {offsets = [0, 0, 1, 0], sizes = [2, 16, 1, 8], strides = [1, 1, 1, 1]} : vector<2x16x3x8xf32> to vector<2x16x1x8xf32>
    %25 = vector.broadcast %23 : vector<2x16x8x1xf32> to vector<2x16x8x8xf32>
    %26 = vector.broadcast %24 : vector<2x16x1x8xf32> to vector<2x16x8x8xf32>
    %27 = arith.mulf %25, %26 : vector<2x16x8x8xf32>
    %28 = arith.addf %22, %27 : vector<2x16x8x8xf32>
    %29 = vector.extract_strided_slice %16 {offsets = [0, 0, 0, 2], sizes = [2, 16, 8, 1], strides = [1, 1, 1, 1]} : vector<2x16x8x3xf32> to vector<2x16x8x1xf32>
    %30 = vector.extract_strided_slice %17 {offsets = [0, 0, 2, 0], sizes = [2, 16, 1, 8], strides = [1, 1, 1, 1]} : vector<2x16x3x8xf32> to vector<2x16x1x8xf32>
    %31 = vector.broadcast %29 : vector<2x16x8x1xf32> to vector<2x16x8x8xf32>
    %32 = vector.broadcast %30 : vector<2x16x1x8xf32> to vector<2x16x8x8xf32>
    %33 = arith.mulf %31, %32 : vector<2x16x8x8xf32>
    %34 = arith.addf %28, %33 : vector<2x16x8x8xf32>
    %cst = arith.constant 0.577350259 : f32
    %35 = vector.broadcast %cst : f32 to vector<2x16x8x8xf32>
    %36 = arith.mulf %34, %35 : vector<2x16x8x8xf32>
    %cst_26 = arith.constant dense<0xFF800000> : vector<2x16x8xf32>
    %37 = vector.multi_reduction <maximumf>, %36, %cst_26 [3] : vector<2x16x8x8xf32> to vector<2x16x8xf32>
    %38 = vector.shape_cast %37 : vector<2x16x8xf32> to vector<2x16x8x1xf32>
    %39 = vector.broadcast %38 : vector<2x16x8x1xf32> to vector<2x16x8x8xf32>
    %40 = arith.subf %36, %39 : vector<2x16x8x8xf32>
    %41 = math.exp %40 : vector<2x16x8x8xf32>
    %cst_27 = arith.constant dense<0.000000e+00> : vector<2x16x8xf32>
    %42 = vector.multi_reduction <add>, %41, %cst_27 [3] : vector<2x16x8x8xf32> to vector<2x16x8xf32>
    %43 = vector.shape_cast %42 : vector<2x16x8xf32> to vector<2x16x8x1xf32>
    %44 = tpu.reciprocal %43 {approx = true} : vector<2x16x8x1xf32> -> vector<2x16x8x1xf32>
    %45 = vector.broadcast %44 : vector<2x16x8x1xf32> to vector<2x16x8x8xf32>
    %46 = arith.mulf %41, %45 : vector<2x16x8x8xf32>
    %47 = vector.extract_strided_slice %16 {offsets = [0, 0, 0, 0], sizes = [2, 16, 8, 1], strides = [1, 1, 1, 1]} : vector<2x16x8x3xf32> to vector<2x16x8x1xf32>
    %48 = vector.extract_strided_slice %0 {offsets = [0, 0], sizes = [1, 12], strides = [1, 1]} : vector<3x12xf32> to vector<1x12xf32>
    %49 = vector.shape_cast %48 : vector<1x12xf32> to vector<1x1x1x12xf32>
    %50 = vector.broadcast %47 : vector<2x16x8x1xf32> to vector<2x16x8x12xf32>
    %51 = vector.broadcast %49 : vector<1x1x1x12xf32> to vector<2x16x8x12xf32>
    %52 = arith.mulf %50, %51 : vector<2x16x8x12xf32>
    %53 = vector.extract_strided_slice %16 {offsets = [0, 0, 0, 1], sizes = [2, 16, 8, 1], strides = [1, 1, 1, 1]} : vector<2x16x8x3xf32> to vector<2x16x8x1xf32>
    %54 = vector.extract_strided_slice %0 {offsets = [1, 0], sizes = [1, 12], strides = [1, 1]} : vector<3x12xf32> to vector<1x12xf32>
    %55 = vector.shape_cast %54 : vector<1x12xf32> to vector<1x1x1x12xf32>
    %56 = vector.broadcast %53 : vector<2x16x8x1xf32> to vector<2x16x8x12xf32>
    %57 = vector.broadcast %55 : vector<1x1x1x12xf32> to vector<2x16x8x12xf32>
    %58 = arith.mulf %56, %57 : vector<2x16x8x12xf32>
    %59 = arith.addf %52, %58 : vector<2x16x8x12xf32>
    %60 = vector.extract_strided_slice %16 {offsets = [0, 0, 0, 2], sizes = [2, 16, 8, 1], strides = [1, 1, 1, 1]} : vector<2x16x8x3xf32> to vector<2x16x8x1xf32>
    %61 = vector.extract_strided_slice %0 {offsets = [2, 0], sizes = [1, 12], strides = [1, 1]} : vector<3x12xf32> to vector<1x12xf32>
    %62 = vector.shape_cast %61 : vector<1x12xf32> to vector<1x1x1x12xf32>
    %63 = vector.broadcast %60 : vector<2x16x8x1xf32> to vector<2x16x8x12xf32>
    %64 = vector.broadcast %62 : vector<1x1x1x12xf32> to vector<2x16x8x12xf32>
    %65 = arith.mulf %63, %64 : vector<2x16x8x12xf32>
    %66 = arith.addf %59, %65 : vector<2x16x8x12xf32>
    %67 = vector.extract_strided_slice %46 {offsets = [0, 0, 0, 0], sizes = [2, 16, 8, 1], strides = [1, 1, 1, 1]} : vector<2x16x8x8xf32> to vector<2x16x8x1xf32>
    %68 = vector.extract_strided_slice %66 {offsets = [0, 0, 0, 0], sizes = [2, 16, 1, 12], strides = [1, 1, 1, 1]} : vector<2x16x8x12xf32> to vector<2x16x1x12xf32>
    %69 = vector.broadcast %67 : vector<2x16x8x1xf32> to vector<2x16x8x12xf32>
    %70 = vector.broadcast %68 : vector<2x16x1x12xf32> to vector<2x16x8x12xf32>
    %71 = arith.mulf %69, %70 : vector<2x16x8x12xf32>
    %72 = vector.extract_strided_slice %46 {offsets = [0, 0, 0, 1], sizes = [2, 16, 8, 1], strides = [1, 1, 1, 1]} : vector<2x16x8x8xf32> to vector<2x16x8x1xf32>
    %73 = vector.extract_strided_slice %66 {offsets = [0, 0, 1, 0], sizes = [2, 16, 1, 12], strides = [1, 1, 1, 1]} : vector<2x16x8x12xf32> to vector<2x16x1x12xf32>
    %74 = vector.broadcast %72 : vector<2x16x8x1xf32> to vector<2x16x8x12xf32>
    %75 = vector.broadcast %73 : vector<2x16x1x12xf32> to vector<2x16x8x12xf32>
    %76 = arith.mulf %74, %75 : vector<2x16x8x12xf32>
    %77 = arith.addf %71, %76 : vector<2x16x8x12xf32>
    %78 = vector.extract_strided_slice %46 {offsets = [0, 0, 0, 2], sizes = [2, 16, 8, 1], strides = [1, 1, 1, 1]} : vector<2x16x8x8xf32> to vector<2x16x8x1xf32>
    %79 = vector.extract_strided_slice %66 {offsets = [0, 0, 2, 0], sizes = [2, 16, 1, 12], strides = [1, 1, 1, 1]} : vector<2x16x8x12xf32> to vector<2x16x1x12xf32>
    %80 = vector.broadcast %78 : vector<2x16x8x1xf32> to vector<2x16x8x12xf32>
    %81 = vector.broadcast %79 : vector<2x16x1x12xf32> to vector<2x16x8x12xf32>
    %82 = arith.mulf %80, %81 : vector<2x16x8x12xf32>
    %83 = arith.addf %77, %82 : vector<2x16x8x12xf32>
    %84 = vector.extract_strided_slice %46 {offsets = [0, 0, 0, 3], sizes = [2, 16, 8, 1], strides = [1, 1, 1, 1]} : vector<2x16x8x8xf32> to vector<2x16x8x1xf32>
    %85 = vector.extract_strided_slice %66 {offsets = [0, 0, 3, 0], sizes = [2, 16, 1, 12], strides = [1, 1, 1, 1]} : vector<2x16x8x12xf32> to vector<2x16x1x12xf32>
    %86 = vector.broadcast %84 : vector<2x16x8x1xf32> to vector<2x16x8x12xf32>
    %87 = vector.broadcast %85 : vector<2x16x1x12xf32> to vector<2x16x8x12xf32>
    %88 = arith.mulf %86, %87 : vector<2x16x8x12xf32>
    %89 = arith.addf %83, %88 : vector<2x16x8x12xf32>
    %90 = vector.extract_strided_slice %46 {offsets = [0, 0, 0, 4], sizes = [2, 16, 8, 1], strides = [1, 1, 1, 1]} : vector<2x16x8x8xf32> to vector<2x16x8x1xf32>
    %91 = vector.extract_strided_slice %66 {offsets = [0, 0, 4, 0], sizes = [2, 16, 1, 12], strides = [1, 1, 1, 1]} : vector<2x16x8x12xf32> to vector<2x16x1x12xf32>
    %92 = vector.broadcast %90 : vector<2x16x8x1xf32> to vector<2x16x8x12xf32>
    %93 = vector.broadcast %91 : vector<2x16x1x12xf32> to vector<2x16x8x12xf32>
    %94 = arith.mulf %92, %93 : vector<2x16x8x12xf32>
    %95 = arith.addf %89, %94 : vector<2x16x8x12xf32>
    %96 = vector.extract_strided_slice %46 {offsets = [0, 0, 0, 5], sizes = [2, 16, 8, 1], strides = [1, 1, 1, 1]} : vector<2x16x8x8xf32> to vector<2x16x8x1xf32>
    %97 = vector.extract_strided_slice %66 {offsets = [0, 0, 5, 0], sizes = [2, 16, 1, 12], strides = [1, 1, 1, 1]} : vector<2x16x8x12xf32> to vector<2x16x1x12xf32>
    %98 = vector.broadcast %96 : vector<2x16x8x1xf32> to vector<2x16x8x12xf32>
    %99 = vector.broadcast %97 : vector<2x16x1x12xf32> to vector<2x16x8x12xf32>
    %100 = arith.mulf %98, %99 : vector<2x16x8x12xf32>
    %101 = arith.addf %95, %100 : vector<2x16x8x12xf32>
    %102 = vector.extract_strided_slice %46 {offsets = [0, 0, 0, 6], sizes = [2, 16, 8, 1], strides = [1, 1, 1, 1]} : vector<2x16x8x8xf32> to vector<2x16x8x1xf32>
    %103 = vector.extract_strided_slice %66 {offsets = [0, 0, 6, 0], sizes = [2, 16, 1, 12], strides = [1, 1, 1, 1]} : vector<2x16x8x12xf32> to vector<2x16x1x12xf32>
    %104 = vector.broadcast %102 : vector<2x16x8x1xf32> to vector<2x16x8x12xf32>
    %105 = vector.broadcast %103 : vector<2x16x1x12xf32> to vector<2x16x8x12xf32>
    %106 = arith.mulf %104, %105 : vector<2x16x8x12xf32>
    %107 = arith.addf %101, %106 : vector<2x16x8x12xf32>
    %108 = vector.extract_strided_slice %46 {offsets = [0, 0, 0, 7], sizes = [2, 16, 8, 1], strides = [1, 1, 1, 1]} : vector<2x16x8x8xf32> to vector<2x16x8x1xf32>
    %109 = vector.extract_strided_slice %66 {offsets = [0, 0, 7, 0], sizes = [2, 16, 1, 12], strides = [1, 1, 1, 1]} : vector<2x16x8x12xf32> to vector<2x16x1x12xf32>
    %110 = vector.broadcast %108 : vector<2x16x8x1xf32> to vector<2x16x8x12xf32>
    %111 = vector.broadcast %109 : vector<2x16x1x12xf32> to vector<2x16x8x12xf32>
    %112 = arith.mulf %110, %111 : vector<2x16x8x12xf32>
    %113 = arith.addf %107, %112 : vector<2x16x8x12xf32>
    %114 = vector.shape_cast %1 : vector<1x12xf32> to vector<1x1x1x12xf32>
    %115 = vector.broadcast %114 : vector<1x1x1x12xf32> to vector<2x16x8x12xf32>
    %116 = arith.addf %113, %115 : vector<2x16x8x12xf32>
    %cst_28 = arith.constant 0.000000e+00 : f32
    %117 = vector.broadcast %cst_28 : f32 to vector<2x16x8x12xf32>
    %118 = arith.maximumf %116, %117 : vector<2x16x8x12xf32>
    %cst_29 = arith.constant dense<0xFF800000> : vector<2x16x12xf32>
    %119 = vector.multi_reduction <maximumf>, %118, %cst_29 [2] : vector<2x16x8x12xf32> to vector<2x16x12xf32>
    %120 = tpu.iota {dimensions = array<i32: 1>} : vector<1x128xi32>
    %121 = vector.extract_strided_slice %119 {offsets = [0, 0, 0], sizes = [1, 16, 12], strides = [1, 1, 1]} : vector<2x16x12xf32> to vector<1x16x12xf32>
    %122 = vector.shape_cast %121 : vector<1x16x12xf32> to vector<16x12xf32>
    %cst_30 = arith.constant dense<0.000000e+00> : vector<16x240xf32>
    %123 = tpu.matmul %122, %2, %cst_30 {dimension_numbers = #tpu.dot_dimension_numbers<[1], [0], [0], [1], [0, 0, 1, 1], [], []>} : vector<16x12xf32>, vector<12x240xf32>, vector<16x240xf32> -> vector<16x240xf32>
    %124 = vector.broadcast %3 : vector<1x240xf32> to vector<16x240xf32>
    %125 = arith.addf %123, %124 : vector<16x240xf32>
    %cst_31 = arith.constant 0.000000e+00 : f32
    %126 = vector.broadcast %cst_31 : f32 to vector<16x240xf32>
    %127 = arith.maximumf %125, %126 : vector<16x240xf32>
    %cst_32 = arith.constant dense<0xFF800000> : vector<240xf32>
    %128 = vector.multi_reduction <maximumf>, %127, %cst_32 [0] : vector<16x240xf32> to vector<240xf32>
    %129 = vector.shape_cast %128 : vector<240xf32> to vector<1x240xf32>
    %130 = vector.shape_cast %129 : vector<1x240xf32> to vector<1x240xf32>
    %131 = vector.broadcast %130 : vector<1x240xf32> to vector<4x240xf32>
    %132 = arith.mulf %131, %4 : vector<4x240xf32>
    %cst_33 = arith.constant dense<0.000000e+00> : vector<4x32xf32>
    %133 = tpu.matmul %132, %5, %cst_33 {dimension_numbers = #tpu.dot_dimension_numbers<[1], [0], [0], [1], [0, 0, 1, 1], [], []>} : vector<4x240xf32>, vector<240x32xf32>, vector<4x32xf32> -> vector<4x32xf32>
    %134 = arith.addf %133, %6 : vector<4x32xf32>
    %cst_34 = arith.constant 0.000000e+00 : f32
    %135 = vector.broadcast %cst_34 : f32 to vector<4x32xf32>
    %136 = arith.maximumf %134, %135 : vector<4x32xf32>
    %cst_35 = arith.constant dense<0.000000e+00> : vector<4x96xf32>
    %137 = tpu.matmul %136, %7, %cst_35 {dimension_numbers = #tpu.dot_dimension_numbers<[1], [0], [0], [1], [0, 0, 1, 1], [], []>} : vector<4x32xf32>, vector<32x96xf32>, vector<4x96xf32> -> vector<4x96xf32>
    %138 = vector.broadcast %8 : vector<1x96xf32> to vector<4x96xf32>
    %139 = arith.addf %137, %138 : vector<4x96xf32>
    %140 = vector.extract_strided_slice %139 {offsets = [0, 0], sizes = [4, 32], strides = [1, 1]} : vector<4x96xf32> to vector<4x32xf32>
    %141 = vector.extract_strided_slice %139 {offsets = [0, 32], sizes = [4, 32], strides = [1, 1]} : vector<4x96xf32> to vector<4x32xf32>
    %142 = vector.extract_strided_slice %139 {offsets = [0, 64], sizes = [4, 32], strides = [1, 1]} : vector<4x96xf32> to vector<4x32xf32>
    %cst_36 = arith.constant dense<0.000000e+00> : vector<16x32xf32>
    %143 = tpu.matmul %11, %141, %cst_36 {dimension_numbers = #tpu.dot_dimension_numbers<[1], [0], [0], [1], [0, 0, 1, 1], [], []>} : vector<16x4xf32>, vector<4x32xf32>, vector<16x32xf32> -> vector<16x32xf32>
    %144 = arith.mulf %143, %12 : vector<16x32xf32>
    %cst_37 = arith.constant dense<0.000000e+00> : vector<16x32xf32>
    %145 = tpu.matmul %11, %142, %cst_37 {dimension_numbers = #tpu.dot_dimension_numbers<[1], [0], [0], [1], [0, 0, 1, 1], [], []>} : vector<16x4xf32>, vector<4x32xf32>, vector<16x32xf32> -> vector<16x32xf32>
    %146 = arith.mulf %145, %12 : vector<16x32xf32>
    "tpu.trace_start"() <{level = 10 : i32, message = "pd,rd->pr"}> : () -> ()
    %cst_38 = arith.constant dense<0.000000e+00> : vector<4x16xf32>
    %147 = tpu.matmul %140, %144, %cst_38 {dimension_numbers = #tpu.dot_dimension_numbers<[1], [1], [0], [0], [0, 0, 1, 0], [], []>} : vector<4x32xf32>, vector<16x32xf32>, vector<4x16xf32> -> vector<4x16xf32>
    "tpu.trace_stop"() : () -> ()
    %cst_39 = arith.constant 0.353553385 : f32
    %148 = vector.broadcast %cst_39 : f32 to vector<4x16xf32>
    %149 = arith.mulf %147, %148 : vector<4x16xf32>
    %cst_40 = arith.constant dense<0xFF800000> : vector<4xf32>
    %150 = vector.multi_reduction <maximumf>, %149, %cst_40 [1] : vector<4x16xf32> to vector<4xf32>
    %151 = vector.shape_cast %150 : vector<4xf32> to vector<4x1xf32>
    %152 = vector.broadcast %151 : vector<4x1xf32> to vector<4x16xf32>
    %153 = arith.subf %149, %152 : vector<4x16xf32>
    %154 = math.exp %153 : vector<4x16xf32>
    %cst_41 = arith.constant dense<0.000000e+00> : vector<4x16xf32>
    %155 = tpu.matmul %154, %13, %cst_41 {dimension_numbers = #tpu.dot_dimension_numbers<[1], [0], [0], [1], [0, 0, 1, 1], [], []>} : vector<4x16xf32>, vector<16x16xf32>, vector<4x16xf32> -> vector<4x16xf32>
    %156 = tpu.reciprocal %155 {approx = true} : vector<4x16xf32> -> vector<4x16xf32>
    %157 = arith.mulf %154, %156 : vector<4x16xf32>
    %cst_42 = arith.constant dense<0.000000e+00> : vector<4x32xf32>
    %158 = tpu.matmul %157, %146, %cst_42 {dimension_numbers = #tpu.dot_dimension_numbers<[1], [0], [0], [1], [0, 0, 1, 1], [], []>} : vector<4x16xf32>, vector<16x32xf32>, vector<4x32xf32> -> vector<4x32xf32>
    %cst_43 = arith.constant dense<0.000000e+00> : vector<4x32xf32>
    %159 = tpu.matmul %158, %9, %cst_43 {dimension_numbers = #tpu.dot_dimension_numbers<[1], [0], [0], [1], [0, 0, 1, 1], [], []>} : vector<4x32xf32>, vector<32x32xf32>, vector<4x32xf32> -> vector<4x32xf32>
    %160 = vector.broadcast %10 : vector<1x32xf32> to vector<4x32xf32>
    %161 = arith.addf %159, %160 : vector<4x32xf32>
    %162 = vector.extract_strided_slice %161 {offsets = [0, 0], sizes = [1, 32], strides = [1, 1]} : vector<4x32xf32> to vector<1x32xf32>
    %163 = vector.extract_strided_slice %14 {offsets = [0, 0], sizes = [32, 128], strides = [1, 1]} : vector<128x128xf32> to vector<32x128xf32>
    %cst_44 = arith.constant dense<0.000000e+00> : vector<1x128xf32>
    %164 = tpu.matmul %162, %163, %cst_44 {dimension_numbers = #tpu.dot_dimension_numbers<[1], [0], [0], [1], [0, 0, 1, 1], [], []>} : vector<1x32xf32>, vector<32x128xf32>, vector<1x128xf32> -> vector<1x128xf32>
    %165 = arith.addf %15, %164 : vector<1x128xf32>
    %166 = vector.extract_strided_slice %161 {offsets = [1, 0], sizes = [1, 32], strides = [1, 1]} : vector<4x32xf32> to vector<1x32xf32>
    %167 = vector.extract_strided_slice %14 {offsets = [32, 0], sizes = [32, 128], strides = [1, 1]} : vector<128x128xf32> to vector<32x128xf32>
    %cst_45 = arith.constant dense<0.000000e+00> : vector<1x128xf32>
    %168 = tpu.matmul %166, %167, %cst_45 {dimension_numbers = #tpu.dot_dimension_numbers<[1], [0], [0], [1], [0, 0, 1, 1], [], []>} : vector<1x32xf32>, vector<32x128xf32>, vector<1x128xf32> -> vector<1x128xf32>
    %169 = arith.addf %165, %168 : vector<1x128xf32>
    %170 = vector.extract_strided_slice %161 {offsets = [2, 0], sizes = [1, 32], strides = [1, 1]} : vector<4x32xf32> to vector<1x32xf32>
    %171 = vector.extract_strided_slice %14 {offsets = [64, 0], sizes = [32, 128], strides = [1, 1]} : vector<128x128xf32> to vector<32x128xf32>
    %cst_46 = arith.constant dense<0.000000e+00> : vector<1x128xf32>
    %172 = tpu.matmul %170, %171, %cst_46 {dimension_numbers = #tpu.dot_dimension_numbers<[1], [0], [0], [1], [0, 0, 1, 1], [], []>} : vector<1x32xf32>, vector<32x128xf32>, vector<1x128xf32> -> vector<1x128xf32>
    %173 = arith.addf %169, %172 : vector<1x128xf32>
    %174 = vector.extract_strided_slice %161 {offsets = [3, 0], sizes = [1, 32], strides = [1, 1]} : vector<4x32xf32> to vector<1x32xf32>
    %175 = vector.extract_strided_slice %14 {offsets = [96, 0], sizes = [32, 128], strides = [1, 1]} : vector<128x128xf32> to vector<32x128xf32>
    %cst_47 = arith.constant dense<0.000000e+00> : vector<1x128xf32>
    %176 = tpu.matmul %174, %175, %cst_47 {dimension_numbers = #tpu.dot_dimension_numbers<[1], [0], [0], [1], [0, 0, 1, 1], [], []>} : vector<1x32xf32>, vector<32x128xf32>, vector<1x128xf32> -> vector<1x128xf32>
    %177 = arith.addf %173, %176 : vector<1x128xf32>
    %cst_48 = arith.constant 0.000000e+00 : f32
    %178 = vector.broadcast %cst_48 : f32 to vector<1x128xf32>
    %179 = arith.subf %178, %177 : vector<1x128xf32>
    %180 = math.exp %179 : vector<1x128xf32>
    %cst_49 = arith.constant 1.000000e+00 : f32
    %181 = vector.broadcast %cst_49 : f32 to vector<1x128xf32>
    %182 = arith.addf %181, %180 : vector<1x128xf32>
    %183 = tpu.reciprocal %182 {approx = true} : vector<1x128xf32> -> vector<1x128xf32>
    %cst_50 = arith.constant 2.000000e+01 : f32
    %184 = vector.broadcast %cst_50 : f32 to vector<1x128xf32>
    %185 = arith.mulf %183, %184 : vector<1x128xf32>
    %cst_51 = arith.constant 0.000000e+00 : f32
    %186 = vector.broadcast %cst_51 : f32 to vector<1x128xf32>
    %187 = arith.addf %186, %185 : vector<1x128xf32>
    %cst_52 = arith.constant 2.000000e+01 : f32
    %188 = vector.broadcast %cst_52 : f32 to vector<1x128xf32>
    %189 = arith.mulf %183, %188 : vector<1x128xf32>
    %cst_53 = arith.constant -1.000000e+01 : f32
    %190 = vector.broadcast %cst_53 : f32 to vector<1x128xf32>
    %191 = arith.addf %190, %189 : vector<1x128xf32>
    %c4_i32 = arith.constant 4 : i32
    %192 = vector.broadcast %c4_i32 : i32 to vector<1x128xi32>
    %193 = arith.cmpi eq, %120, %192 : vector<1x128xi32>
    %c5_i32 = arith.constant 5 : i32
    %194 = vector.broadcast %c5_i32 : i32 to vector<1x128xi32>
    %195 = arith.cmpi eq, %120, %194 : vector<1x128xi32>
    %196 = arith.select %195, %191, %177 : vector<1x128xi1>, vector<1x128xf32>
    %197 = arith.select %193, %187, %196 : vector<1x128xi1>, vector<1x128xf32>
    %c0_54 = arith.constant 0 : index
    %c0_55 = arith.constant 0 : index
    %c0_56 = arith.constant 0 : index
    %198 = vector.load %arg5[%c0_54, %c0_55, %c0_56] : memref<2x1x128xf32, #tpu.memory_space<vmem>>, vector<1x1x128xf32>
    %199 = vector.shape_cast %198 : vector<1x1x128xf32> to vector<1x128xf32>
    %200 = vector.shape_cast %197 : vector<1x128xf32> to vector<1x1x128xf32>
    tpu.vector_store %arg5[%c0_54, %c0_55, %c0_56], %200 {strides = array<i32>} : memref<2x1x128xf32, #tpu.memory_space<vmem>>, vector<1x1x128xf32>,
    %201 = vector.extract_strided_slice %119 {offsets = [1, 0, 0], sizes = [1, 16, 12], strides = [1, 1, 1]} : vector<2x16x12xf32> to vector<1x16x12xf32>
    %202 = vector.shape_cast %201 : vector<1x16x12xf32> to vector<16x12xf32>
    %cst_57 = arith.constant dense<0.000000e+00> : vector<16x240xf32>
    %203 = tpu.matmul %202, %2, %cst_57 {dimension_numbers = #tpu.dot_dimension_numbers<[1], [0], [0], [1], [0, 0, 1, 1], [], []>} : vector<16x12xf32>, vector<12x240xf32>, vector<16x240xf32> -> vector<16x240xf32>
    %204 = vector.broadcast %3 : vector<1x240xf32> to vector<16x240xf32>
    %205 = arith.addf %203, %204 : vector<16x240xf32>
    %cst_58 = arith.constant 0.000000e+00 : f32
    %206 = vector.broadcast %cst_58 : f32 to vector<16x240xf32>
    %207 = arith.maximumf %205, %206 : vector<16x240xf32>
    %cst_59 = arith.constant dense<0xFF800000> : vector<240xf32>
    %208 = vector.multi_reduction <maximumf>, %207, %cst_59 [0] : vector<16x240xf32> to vector<240xf32>
    %209 = vector.shape_cast %208 : vector<240xf32> to vector<1x240xf32>
    %210 = vector.shape_cast %209 : vector<1x240xf32> to vector<1x240xf32>
    %211 = vector.broadcast %210 : vector<1x240xf32> to vector<4x240xf32>
    %212 = arith.mulf %211, %4 : vector<4x240xf32>
    %cst_60 = arith.constant dense<0.000000e+00> : vector<4x32xf32>
    %213 = tpu.matmul %212, %5, %cst_60 {dimension_numbers = #tpu.dot_dimension_numbers<[1], [0], [0], [1], [0, 0, 1, 1], [], []>} : vector<4x240xf32>, vector<240x32xf32>, vector<4x32xf32> -> vector<4x32xf32>
    %214 = arith.addf %213, %6 : vector<4x32xf32>
    %cst_61 = arith.constant 0.000000e+00 : f32
    %215 = vector.broadcast %cst_61 : f32 to vector<4x32xf32>
    %216 = arith.maximumf %214, %215 : vector<4x32xf32>
    %cst_62 = arith.constant dense<0.000000e+00> : vector<4x96xf32>
    %217 = tpu.matmul %216, %7, %cst_62 {dimension_numbers = #tpu.dot_dimension_numbers<[1], [0], [0], [1], [0, 0, 1, 1], [], []>} : vector<4x32xf32>, vector<32x96xf32>, vector<4x96xf32> -> vector<4x96xf32>
    %218 = vector.broadcast %8 : vector<1x96xf32> to vector<4x96xf32>
    %219 = arith.addf %217, %218 : vector<4x96xf32>
    %220 = vector.extract_strided_slice %219 {offsets = [0, 0], sizes = [4, 32], strides = [1, 1]} : vector<4x96xf32> to vector<4x32xf32>
    %221 = vector.extract_strided_slice %219 {offsets = [0, 32], sizes = [4, 32], strides = [1, 1]} : vector<4x96xf32> to vector<4x32xf32>
    %222 = vector.extract_strided_slice %219 {offsets = [0, 64], sizes = [4, 32], strides = [1, 1]} : vector<4x96xf32> to vector<4x32xf32>
    %cst_63 = arith.constant dense<0.000000e+00> : vector<16x32xf32>
    %223 = tpu.matmul %11, %221, %cst_63 {dimension_numbers = #tpu.dot_dimension_numbers<[1], [0], [0], [1], [0, 0, 1, 1], [], []>} : vector<16x4xf32>, vector<4x32xf32>, vector<16x32xf32> -> vector<16x32xf32>
    %224 = arith.mulf %223, %12 : vector<16x32xf32>
    %cst_64 = arith.constant dense<0.000000e+00> : vector<16x32xf32>
    %225 = tpu.matmul %11, %222, %cst_64 {dimension_numbers = #tpu.dot_dimension_numbers<[1], [0], [0], [1], [0, 0, 1, 1], [], []>} : vector<16x4xf32>, vector<4x32xf32>, vector<16x32xf32> -> vector<16x32xf32>
    %226 = arith.mulf %225, %12 : vector<16x32xf32>
    "tpu.trace_start"() <{level = 10 : i32, message = "pd,rd->pr"}> : () -> ()
    %cst_65 = arith.constant dense<0.000000e+00> : vector<4x16xf32>
    %227 = tpu.matmul %220, %224, %cst_65 {dimension_numbers = #tpu.dot_dimension_numbers<[1], [1], [0], [0], [0, 0, 1, 0], [], []>} : vector<4x32xf32>, vector<16x32xf32>, vector<4x16xf32> -> vector<4x16xf32>
    "tpu.trace_stop"() : () -> ()
    %cst_66 = arith.constant 0.353553385 : f32
    %228 = vector.broadcast %cst_66 : f32 to vector<4x16xf32>
    %229 = arith.mulf %227, %228 : vector<4x16xf32>
    %cst_67 = arith.constant dense<0xFF800000> : vector<4xf32>
    %230 = vector.multi_reduction <maximumf>, %229, %cst_67 [1] : vector<4x16xf32> to vector<4xf32>
    %231 = vector.shape_cast %230 : vector<4xf32> to vector<4x1xf32>
    %232 = vector.broadcast %231 : vector<4x1xf32> to vector<4x16xf32>
    %233 = arith.subf %229, %232 : vector<4x16xf32>
    %234 = math.exp %233 : vector<4x16xf32>
    %cst_68 = arith.constant dense<0.000000e+00> : vector<4x16xf32>
    %235 = tpu.matmul %234, %13, %cst_68 {dimension_numbers = #tpu.dot_dimension_numbers<[1], [0], [0], [1], [0, 0, 1, 1], [], []>} : vector<4x16xf32>, vector<16x16xf32>, vector<4x16xf32> -> vector<4x16xf32>
    %236 = tpu.reciprocal %235 {approx = true} : vector<4x16xf32> -> vector<4x16xf32>
    %237 = arith.mulf %234, %236 : vector<4x16xf32>
    %cst_69 = arith.constant dense<0.000000e+00> : vector<4x32xf32>
    %238 = tpu.matmul %237, %226, %cst_69 {dimension_numbers = #tpu.dot_dimension_numbers<[1], [0], [0], [1], [0, 0, 1, 1], [], []>} : vector<4x16xf32>, vector<16x32xf32>, vector<4x32xf32> -> vector<4x32xf32>
    %cst_70 = arith.constant dense<0.000000e+00> : vector<4x32xf32>
    %239 = tpu.matmul %238, %9, %cst_70 {dimension_numbers = #tpu.dot_dimension_numbers<[1], [0], [0], [1], [0, 0, 1, 1], [], []>} : vector<4x32xf32>, vector<32x32xf32>, vector<4x32xf32> -> vector<4x32xf32>
    %240 = vector.broadcast %10 : vector<1x32xf32> to vector<4x32xf32>
    %241 = arith.addf %239, %240 : vector<4x32xf32>
    %242 = vector.extract_strided_slice %241 {offsets = [0, 0], sizes = [1, 32], strides = [1, 1]} : vector<4x32xf32> to vector<1x32xf32>
    %243 = vector.extract_strided_slice %14 {offsets = [0, 0], sizes = [32, 128], strides = [1, 1]} : vector<128x128xf32> to vector<32x128xf32>
    %cst_71 = arith.constant dense<0.000000e+00> : vector<1x128xf32>
    %244 = tpu.matmul %242, %243, %cst_71 {dimension_numbers = #tpu.dot_dimension_numbers<[1], [0], [0], [1], [0, 0, 1, 1], [], []>} : vector<1x32xf32>, vector<32x128xf32>, vector<1x128xf32> -> vector<1x128xf32>
    %245 = arith.addf %15, %244 : vector<1x128xf32>
    %246 = vector.extract_strided_slice %241 {offsets = [1, 0], sizes = [1, 32], strides = [1, 1]} : vector<4x32xf32> to vector<1x32xf32>
    %247 = vector.extract_strided_slice %14 {offsets = [32, 0], sizes = [32, 128], strides = [1, 1]} : vector<128x128xf32> to vector<32x128xf32>
    %cst_72 = arith.constant dense<0.000000e+00> : vector<1x128xf32>
    %248 = tpu.matmul %246, %247, %cst_72 {dimension_numbers = #tpu.dot_dimension_numbers<[1], [0], [0], [1], [0, 0, 1, 1], [], []>} : vector<1x32xf32>, vector<32x128xf32>, vector<1x128xf32> -> vector<1x128xf32>
    %249 = arith.addf %245, %248 : vector<1x128xf32>
    %250 = vector.extract_strided_slice %241 {offsets = [2, 0], sizes = [1, 32], strides = [1, 1]} : vector<4x32xf32> to vector<1x32xf32>
    %251 = vector.extract_strided_slice %14 {offsets = [64, 0], sizes = [32, 128], strides = [1, 1]} : vector<128x128xf32> to vector<32x128xf32>
    %cst_73 = arith.constant dense<0.000000e+00> : vector<1x128xf32>
    %252 = tpu.matmul %250, %251, %cst_73 {dimension_numbers = #tpu.dot_dimension_numbers<[1], [0], [0], [1], [0, 0, 1, 1], [], []>} : vector<1x32xf32>, vector<32x128xf32>, vector<1x128xf32> -> vector<1x128xf32>
    %253 = arith.addf %249, %252 : vector<1x128xf32>
    %254 = vector.extract_strided_slice %241 {offsets = [3, 0], sizes = [1, 32], strides = [1, 1]} : vector<4x32xf32> to vector<1x32xf32>
    %255 = vector.extract_strided_slice %14 {offsets = [96, 0], sizes = [32, 128], strides = [1, 1]} : vector<128x128xf32> to vector<32x128xf32>
    %cst_74 = arith.constant dense<0.000000e+00> : vector<1x128xf32>
    %256 = tpu.matmul %254, %255, %cst_74 {dimension_numbers = #tpu.dot_dimension_numbers<[1], [0], [0], [1], [0, 0, 1, 1], [], []>} : vector<1x32xf32>, vector<32x128xf32>, vector<1x128xf32> -> vector<1x128xf32>
    %257 = arith.addf %253, %256 : vector<1x128xf32>
    %cst_75 = arith.constant 0.000000e+00 : f32
    %258 = vector.broadcast %cst_75 : f32 to vector<1x128xf32>
    %259 = arith.subf %258, %257 : vector<1x128xf32>
    %260 = math.exp %259 : vector<1x128xf32>
    %cst_76 = arith.constant 1.000000e+00 : f32
    %261 = vector.broadcast %cst_76 : f32 to vector<1x128xf32>
    %262 = arith.addf %261, %260 : vector<1x128xf32>
    %263 = tpu.reciprocal %262 {approx = true} : vector<1x128xf32> -> vector<1x128xf32>
    %cst_77 = arith.constant 2.000000e+01 : f32
    %264 = vector.broadcast %cst_77 : f32 to vector<1x128xf32>
    %265 = arith.mulf %263, %264 : vector<1x128xf32>
    %cst_78 = arith.constant 0.000000e+00 : f32
    %266 = vector.broadcast %cst_78 : f32 to vector<1x128xf32>
    %267 = arith.addf %266, %265 : vector<1x128xf32>
    %cst_79 = arith.constant 2.000000e+01 : f32
    %268 = vector.broadcast %cst_79 : f32 to vector<1x128xf32>
    %269 = arith.mulf %263, %268 : vector<1x128xf32>
    %cst_80 = arith.constant -1.000000e+01 : f32
    %270 = vector.broadcast %cst_80 : f32 to vector<1x128xf32>
    %271 = arith.addf %270, %269 : vector<1x128xf32>
    %c4_i32_81 = arith.constant 4 : i32
    %272 = vector.broadcast %c4_i32_81 : i32 to vector<1x128xi32>
    %273 = arith.cmpi eq, %120, %272 : vector<1x128xi32>
    %c5_i32_82 = arith.constant 5 : i32
    %274 = vector.broadcast %c5_i32_82 : i32 to vector<1x128xi32>
    %275 = arith.cmpi eq, %120, %274 : vector<1x128xi32>
    %276 = arith.select %275, %271, %257 : vector<1x128xi1>, vector<1x128xf32>
    %277 = arith.select %273, %267, %276 : vector<1x128xi1>, vector<1x128xf32>
    %c1 = arith.constant 1 : index
    %c0_83 = arith.constant 0 : index
    %c0_84 = arith.constant 0 : index
    %278 = vector.load %arg5[%c1, %c0_83, %c0_84] : memref<2x1x128xf32, #tpu.memory_space<vmem>>, vector<1x1x128xf32>
    %279 = vector.shape_cast %278 : vector<1x1x128xf32> to vector<1x128xf32>
    %280 = vector.shape_cast %277 : vector<1x128xf32> to vector<1x1x128xf32>
    tpu.vector_store %arg5[%c1, %c0_83, %c0_84], %280 {strides = array<i32>} : memref<2x1x128xf32, #tpu.memory_space<vmem>>, vector<1x1x128xf32>,
    return
  }
  func.func @transform_0(%arg0: i32) -> (i32, i32, i32, i32) {
    %c0_i32 = arith.constant 0 : i32
    %c0_i32_0 = arith.constant 0 : i32
    %c0_i32_1 = arith.constant 0 : i32
    %c0_i32_2 = arith.constant 0 : i32
    return %arg0, %c0_i32, %c0_i32_0, %c0_i32_1 : i32, i32, i32, i32
  }
  func.func @transform_1(%arg0: i32) -> (i32, i32, i32, i32) {
    %c0_i32 = arith.constant 0 : i32
    %c0_i32_0 = arith.constant 0 : i32
    %c0_i32_1 = arith.constant 0 : i32
    %c0_i32_2 = arith.constant 0 : i32
    return %arg0, %c0_i32, %c0_i32_0, %c0_i32_1 : i32, i32, i32, i32
  }
  func.func @transform_2(%arg0: i32) -> (i32, i32) {
    %c0_i32 = arith.constant 0 : i32
    %c0_i32_0 = arith.constant 0 : i32
    %c0_i32_1 = arith.constant 0 : i32
    return %c0_i32, %c0_i32_0 : i32, i32
  }
  func.func @transform_3(%arg0: i32) -> (i32, i32) {
    %c0_i32 = arith.constant 0 : i32
    %c0_i32_0 = arith.constant 0 : i32
    %c0_i32_1 = arith.constant 0 : i32
    return %c0_i32, %c0_i32_0 : i32, i32
  }
  func.func @transform_4(%arg0: i32) -> (i32, i32, i32) {
    %c0_i32 = arith.constant 0 : i32
    %c0_i32_0 = arith.constant 0 : i32
    %c0_i32_1 = arith.constant 0 : i32
    return %arg0, %c0_i32, %c0_i32_0 : i32, i32, i32
  }
}

</mosaic_0001>

<bundles_post_ra>
// kernel: network_forward.1
= control target key start
LH: loop header
LB: loop body
LE: loop exit
PB: predicated region body
PF: predicated region fallthrough
CT: control target
= control target key end

     0   :  { %v11830_v0 = vmov 1   ;;  %v11826_v8 = vmov 2   ;;  %v11828_v10 = vmov 0   ;;  %v11825_v29 = vlaneseq  ;;  %s7631_s6 = smov 64   ;;  %s11820_s0 = inlined_call_operand.vmem [shape: f32[2,16,8,3], index: 0, kind: input, shape index: {}]   ;;  %s11821_s1 = inlined_call_operand.vmem [shape: f32[2,16,3,8], index: 1, kind: input, shape index: {}]   ;;  %s11822_s3 = inlined_call_operand.vmem [shape: f32[528,128], index: 3, kind: input, shape index: {}]   ;;  %s11823_s2 = inlined_call_operand.vmem [shape: f32[32,240], index: 2, kind: input, shape index: {}]   ;;  %s11824_s4 = inlined_call_operand.vmem [shape: f32[2,1,128], index: 4, kind: output, shape index: {}]  }
   0x1   :  { %7248 = vset.pattern.permute.xlu0 %v11830_v0  ;;  %7245 = vset.pattern.permute.xlu1 %v11830_v0  ;;  %v95_v1 = vld [vmem:[%s11820_s0 + $0x20] sm:$0xff]  ;;  %v92_v4 = vld [vmem:[%s11820_s0 + $0x8] sm:$0xff]  ;;  %v101_v5 = vld [vmem:[%s11820_s0 + $0x50] sm:$0xff]  ;;  %vm1147_vm0 = vcmask 64512   ;;  %vm4579_vm1 = vcmask 1043456   ;;  %vm7626_vm2 = vmmov 1  }
   0x2   :  { %v91_v2 = vld [vmem:[%s11820_s0] sm:$0xff]  ;;  %492 = vperm.xlu0 %7248, %v95_v1   ;;  %v93_v6 = vld [vmem:[%s11820_s0 + $0x10] sm:$0xff]  ;;  %v94_v7 = vld [vmem:[%s11820_s0 + $0x18] sm:$0xff]  ;;  %v7761_v32 = vshrl.u32 %v11825_v29, 7  ;;  %vm4300_vm4 = vcmask 97280   ;;  %vm4554_vm5 = vcmask 1041409  }
   0x3   :  { %476 = vperm.xlu1 %7245, %v91_v2   ;;  %v7668_v3 = vld [vmem:[%s11820_s0 + $0x40] sm:$0xff]  ;;  %v96_v9 = vld [vmem:[%s11820_s0 + $0x28] sm:$0xff]  ;;  %v98_v11 = vld [vmem:[%s11820_s0 + $0x38] sm:$0xff]  ;;  %vm4556_vm6 = vcmask 1042434   ;;  %vm4558_vm7 = vcmask 1043459   ;;  %vm4560_vm8 = vcmask 1044484  }
   0x4   :  { %v104_v12 = vld [vmem:[%s11820_s0 + $0x68] sm:$0xff]  ;;  %v97_v14 = vld [vmem:[%s11820_s0 + $0x30] sm:$0xff]  ;;  %v102_v15 = vld [vmem:[%s11820_s0 + $0x58] sm:$0xff]  ;;  %v7771_v36 = vsub.s32 1, %v7761_v32  ;;  %v7774_v37 = vsub.s32 2, %v7761_v32  ;;  %v7777_v38 = vsub.s32 0, %v7761_v32 }
   0x5   :  { %v100_v13 = vld [vmem:[%s11820_s0 + $0x48] sm:$0xff]  ;;  %v103_v16 = vld [vmem:[%s11820_s0 + $0x60] sm:$0xff]  ;;  %v105_v17 = vld [vmem:[%s11820_s0 + $0x70] sm:$0xff]  ;;  %vm4562_vm9 = vcmask 1045509   ;;  %vm4564_vm10 = vcmask 1046534   ;;  %vm4566_vm11 = vcmask 1047559  }
   0x6   :  { %508 = vperm.xlu0 %7248, %v7668_v3   ;;  %v106_v18 = vld [vmem:[%s11820_s0 + $0x78] sm:$0xff]  ;;  %v123_v35 = vld [vmem:[%s11821_s1] sm:$0x7]  ;;  %11985 = vst [vmem:[#allocation2_spill] sm:$0xff] %v7771_v36  ;;  %11986 = vst [vmem:[#allocation3_spill] sm:$0xff] %v7774_v37  ;;  %vm4674_vm12 = vcmask 916480  }
   0x7   :  { %480 = vperm.xlu1 %7245, %v92_v4   ;;  %11987 = vst [vmem:[#allocation4_spill] sm:$0xff] %v7777_v38  ;;  %v606_v40 = vrot.slane %v123_v35, %v7771_v36  ;;  %v318_v41 = vrot.slane %v123_v35, %v7777_v38  ;;  %v124_v42 = vld [vmem:[%s11821_s1 + $0x4] sm:$0x7]  ;;  %v926_v44 = vrot.slane %v123_v35, %v7774_v37  ;;  %v125_v48 = vld [vmem:[%s11821_s1 + $0x8] sm:$0x7]  ;;  %vm8776_vm3 = vmpackc.low %vm4579_vm1, %vm7626_vm2  ;;  %vm7629_vm13 = vmmov 0  }
   0x8   :  { %v610_v47 = vrot.slane %v124_v42, %v7771_v36  ;;  %v322_v50 = vrot.slane %v124_v42, %v7777_v38  ;;  %v614_v54 = vrot.slane %v125_v48, %v7771_v36  ;;  %v930_v55 = vrot.slane %v124_v42, %v7774_v37  ;;  %v128_v61 = vld [vmem:[%s11821_s1 + $0x14] sm:$0x7] }
   0x9   :  { %v326_v59 = vrot.slane %v125_v48, %v7777_v38  ;;  %v934_v62 = vrot.slane %v125_v48, %v7774_v37  ;;  %v626_v63 = vrot.slane %v128_v61, %v7771_v36  ;;  %vm4764_vm14 = vcmask 261120  }
   0xa   :  { %516 = vperm.xlu0 %7248, %v101_v5   ;;  %vm4841_vm15 = vcmask 31744   ;;  %vm10380_vm2 = vmpackc.low %vm4764_vm14, %vm4764_vm14 }
   0xb   :  { %484 = vperm.xlu1 %7245, %v93_v6  }
   0xe   :  { %7255 = vset.pattern.permute.xlu0 %v11826_v8 }
   0xf   :  { %488 = vperm.xlu1 %7245, %v94_v7   ;;  %796 = vperm.xlu0 %7255, %v91_v2  }
  0x13   :  { %7246 = vset.pattern.permute.xlu1 %v11826_v8  ;;  %816 = vperm.xlu0 %7255, %v96_v9  }
  0x14   :  { %800 = vperm.xlu1 %7246, %v92_v4  }
  0x17   :  { %836 = vperm.xlu0 %7255, %v101_v5  }
  0x18   :  { %7247 = vset.pattern.permute.xlu1 %v11828_v10 }
  0x19   :  { %177 = vperm.xlu1 %7247, %v95_v1  }
  0x1b   :  { %824 = vperm.xlu0 %7255, %v98_v11  }
  0x1d   :  { %7249 = vset.pattern.permute.xlu1 %v11826_v8 }
  0x1e   :  { %804 = vperm.xlu1 %7249, %v93_v6  }
  0x1f   :  { %848 = vperm.xlu0 %7255, %v104_v12  }
  0x22   :  { %7250 = vset.pattern.permute.xlu1 %v11828_v10 }
  0x23   :  { %182 = vperm.xlu1 %7250, %v96_v9   ;;  %7268 = vset.pattern.permute.xlu0 %v11828_v10 }
  0x24   :  { %157 = vperm.xlu0 %7268, %v91_v2  }
  0x27   :  { %202 = vperm.xlu1 %7250, %v100_v13  }
  0x28   :  { %162 = vperm.xlu0 %7268, %v92_v4   ;;  %v126_v4 = vld [vmem:[%s11821_s1 + $0xc] sm:$0x7] }
  0x2b   :  { %7251 = vset.pattern.permute.xlu1 %v11830_v0 }
  0x2c   :  { %496 = vperm.xlu1 %7251, %v96_v9   ;;  %167 = vperm.xlu0 %7268, %v93_v6   ;;  %v338_v6 = vrot.slane %v128_v61, %v7777_v38 }
  0x30   :  { %512 = vperm.xlu1 %7251, %v100_v13   ;;  %172 = vperm.xlu0 %7268, %v94_v7  }
  0x34   :  { %7252 = vset.pattern.permute.xlu1 %v11826_v8  ;;  %197 = vperm.xlu0 %7268, %v7668_v3  }
  0x35   :  { %808 = vperm.xlu1 %7252, %v94_v7  }
  0x38   :  { %187 = vperm.xlu0 %7268, %v97_v14  }
  0x39   :  { %7253 = vset.pattern.permute.xlu1 %v11828_v10 }
  0x3a   :  { %207 = vperm.xlu1 %7253, %v101_v5  }
  0x3c   :  { %212 = vperm.xlu0 %7268, %v102_v15  }
  0x3e   :  { %7254 = vset.pattern.permute.xlu1 %v11830_v0 }
  0x3f   :  { %500 = vperm.xlu1 %7254, %v97_v14  }
  0x40   :  { %217 = vperm.xlu0 %7268, %v103_v16  }
  0x43   :  { %7256 = vset.pattern.permute.xlu1 %v11826_v8 }
  0x44   :  { %812 = vperm.xlu1 %7256, %v95_v1   ;;  %227 = vperm.xlu0 %7268, %v105_v17  }
  0x48   :  { %7257 = vset.pattern.permute.xlu1 %v11828_v10  ;;  %232 = vperm.xlu0 %7268, %v106_v18  }
  0x49   :  { %192 = vperm.xlu1 %7257, %v98_v11  }
  0x4d   :  { %7258 = vset.pattern.permute.xlu1 %v11830_v0 }
  0x4e   :  { %504 = vperm.xlu1 %7258, %v98_v11  }
  0x52   :  { %520 = vperm.xlu1 %7258, %v102_v15  }
  0x56   :  { %7259 = vset.pattern.permute.xlu1 %v11826_v8 }
  0x57   :  { %828 = vperm.xlu1 %7259, %v7668_v3  }
  0x5b   :  { %832 = vperm.xlu1 %7259, %v100_v13   ;;  %v330_v13 = vrot.slane %v126_v4, %v7777_v38 }
  0x5f   :  { %7260 = vset.pattern.permute.xlu1 %v11830_v0 }
  0x60   :  { %524 = vperm.xlu1 %7260, %v103_v16  }
  0x64   :  { %7261 = vset.pattern.permute.xlu1 %v11826_v8 }
  0x65   :  { %820 = vperm.xlu1 %7261, %v97_v14  }
  0x69   :  { %7262 = vset.pattern.permute.xlu1 %v11828_v10 }
  0x6a   :  { %222 = vperm.xlu1 %7262, %v104_v12  }
  0x6e   :  { %7263 = vset.pattern.permute.xlu1 %v11830_v0 }
  0x6f   :  { %528 = vperm.xlu1 %7263, %v104_v12  }
  0x73   :  { %7264 = vset.pattern.permute.xlu1 %v11826_v8 }
  0x74   :  { %840 = vperm.xlu1 %7264, %v102_v15   ;;  %v618_v15 = vrot.slane %v126_v4, %v7771_v36 }
  0x78   :  { %7265 = vset.pattern.permute.xlu1 %v11830_v0 }
  0x79   :  { %532 = vperm.xlu1 %7265, %v105_v17  }
  0x7d   :  { %7266 = vset.pattern.permute.xlu1 %v11826_v8 }
  0x7e   :  { %844 = vperm.xlu1 %7266, %v103_v16  }
  0x81   :  { %v7733_v19 = vpop.permute.xlu0 %492 }
  0x82   :  { %7267 = vset.pattern.permute.xlu1 %v11830_v0  ;;  %v7736_v20 = vpop.permute.xlu1 %476 }
  0x83   :  { %536 = vperm.xlu1 %7267, %v106_v18   ;;  %v731_v46 = vmul.f32 %v606_v40, %v7736_v20  ;;  %v946_v40 = vrot.slane %v128_v61, %v7774_v37 }
  0x85   :  { %v7738_v21 = vpop.permute.xlu0 %508 }
  0x86   :  { %v7740_v22 = vpop.permute.xlu1 %480 }
  0x87   :  { %7269 = vset.pattern.permute.xlu1 %v11826_v8  ;;  %v732_v57 = vmul.f32 %v610_v47, %v7740_v22  ;;  %v938_v47 = vrot.slane %v126_v4, %v7774_v37 }
  0x88   :  { %852 = vperm.xlu1 %7269, %v105_v17  }
  0x89   :  { %v7743_v23 = vpop.permute.xlu0 %516 }
  0x8a   :  { %v7745_v24 = vpop.permute.xlu1 %484 }
  0x8b   :  { %v733_v9 = vmul.f32 %v614_v54, %v7745_v24 }
  0x8c   :  { %856 = vperm.xlu1 %7269, %v106_v18  }
  0x8e   :  { %v7747_v25 = vpop.permute.xlu1 %488  ;;  %v7749_v26 = vpop.permute.xlu0 %796 }
  0x8f   :  { %v1051_v52 = vmul.f32 %v926_v44, %v7749_v26 }
  0x90   :  { %7270 = vset.pattern.permute.xlu1 %v11828_v10 }
  0x92   :  { %v7752_v27 = vpop.permute.xlu0 %816 }
  0x93   :  { %v7754_v28 = vpop.permute.xlu1 %800 }
  0x94   :  { %v1052_v5 = vmul.f32 %v930_v55, %v7754_v28  ;;  %v1056_v55 = vmul.f32 %v946_v40, %v7752_v27 }
  0x96   :  { %v7756_v30 = vpop.permute.xlu0 %836 }
  0x98   :  { %v7758_v31 = vpop.permute.xlu1 %177 }
  0x9a   :  { %v7763_v33 = vpop.permute.xlu0 %824 }
  0x9d   :  { %v7765_v34 = vpop.permute.xlu1 %804 }
  0x9e   :  { %v7779_v39 = vpop.permute.xlu0 %848  ;;  %v1053_v16 = vmul.f32 %v934_v62, %v7765_v34 }
  0xa2   :  { %v7786_v43 = vpop.permute.xlu1 %182 }
  0xa3   :  { %v7789_v45 = vpop.permute.xlu0 %157  ;;  %v448_v44 = vmul.f32 %v338_v6, %v7786_v43 }
  0xa4   :  { %v443_v49 = vmul.f32 %v318_v41, %v7789_v45 }
  0xa6   :  { %v7798_v51 = vpop.permute.xlu1 %202  ;;  %v763_v53 = vadd.f32 %v731_v46, %v443_v49 }
  0xa7   :  { %v7803_v56 = vpop.permute.xlu0 %162 }
  0xa8   :  { %v444_v58 = vmul.f32 %v322_v50, %v7803_v56  ;;  %v1083_v60 = vadd.f32 %v1051_v52, %v763_v53  ;;  %v734_v50 = vmul.f32 %v618_v15, %v7747_v25 }
  0xaa   :  { %v7815_v2 = vmul.f32 0.57735026, %v1083_v60  ;;  %v764_v3 = vadd.f32 %v732_v57, %v444_v58 }
  0xab   :  { %v7813_v1 = vpop.permute.xlu1 %496  ;;  %v7822_v7 = vpop.permute.xlu0 %167 }
  0xac   :  { %v445_v11 = vmul.f32 %v326_v59, %v7822_v7  ;;  %v1148_v12 = vsel %vm1147_vm0, %v7815_v2, -inf  ;;  %v1084_v14 = vadd.f32 %v1052_v5, %v764_v3  ;;  %v736_v17 = vmul.f32 %v626_v63, %v7813_v1  ;;  %v127_v3 = vld [vmem:[%s11821_s1 + $0x10] sm:$0x7] }
  0xad   :  { %1149 = vmax.xlane.f32.xlu0 %v1148_v12  ;;  %v334_v6 = vrot.slane %v127_v3, %v7777_v38 }
  0xae   :  { %v765_v35 = vadd.f32 %v733_v9, %v445_v11  ;;  %v7837_v42 = vmul.f32 0.57735026, %v1084_v14  ;;  %v768_v53 = vadd.f32 %v736_v17, %v448_v44  ;;  %v622_v9 = vrot.slane %v127_v3, %v7771_v36 }
  0xaf   :  { %v7832_v18 = vpop.permute.xlu1 %512  ;;  %v7835_v41 = vpop.permute.xlu0 %172  ;;  %v942_v14 = vrot.slane %v127_v3, %v7774_v37 }
  0xb0   :  { %v446_v46 = vmul.f32 %v330_v13, %v7835_v41  ;;  %v1085_v48 = vadd.f32 %v1053_v16, %v765_v35  ;;  %v1151_v49 = vsel %vm1147_vm0, %v7837_v42, -inf  ;;  %v1088_v61 = vadd.f32 %v1056_v55, %v768_v53  ;;  %v133_v53 = vld [vmem:[%s11821_s1 + $0x28] sm:$0x7] }
  0xb1   :  { %1152 = vmax.xlane.f32.xlu1 %v1151_v49  ;;  %v447_v13 = vmul.f32 %v334_v6, %v7758_v31  ;;  %v735_v15 = vmul.f32 %v622_v9, %v7733_v19  ;;  %v131_v49 = vld [vmem:[%s11821_s1 + $0x20] sm:$0x7] }
  0xb2   :  { %v7845_v52 = vmul.f32 0.57735026, %v1085_v48  ;;  %v766_v58 = vadd.f32 %v734_v50, %v446_v46  ;;  %v7862_v5 = vmul.f32 0.57735026, %v1088_v61  ;;  %v350_v50 = vrot.slane %v131_v49, %v7777_v38 }
  0xb3   :  { %v767_v35 = vadd.f32 %v735_v15, %v447_v13  ;;  %v7891_v55 = vpop.permute.xlu0 %197  ;;  %v646_v61 = vrot.slane %v133_v53, %v7771_v36  ;;  %v958_v6 = vrot.slane %v131_v49, %v7774_v37 }
  0xb4   :  { %v7847_v54 = vpop.permute.xlu1 %808  ;;  %v1154_v59 = vsel %vm1147_vm0, %v7845_v52, -inf  ;;  %v1163_v12 = vsel %vm1147_vm0, %v7862_v5, -inf  ;;  %11992 = vst [vmem:[#allocation9_spill] sm:$0xff] %v7891_v55 }
  0xb5   :  { %v1054_v57 = vmul.f32 %v938_v47, %v7847_v54  ;;  %1155 = vmax.xlane.f32.xlu0 %v1154_v59 }
  0xb7   :  { %v1086_v60 = vadd.f32 %v1054_v57, %v766_v58  ;;  %v638_v57 = vrot.slane %v131_v49, %v7771_v36  ;;  %v358_v58 = vrot.slane %v133_v53, %v7777_v38  ;;  %v130_v49 = vld [vmem:[%s11821_s1 + $0x1c] sm:$0x7]  ;;  %v7940_v10 = vpop.permute.xlu0 %187 }
  0xb8   :  { %v634_v8 = vrot.slane %v130_v49, %v7771_v36  ;;  %11997 = vst [vmem:[#allocation14_spill] sm:$0xff] %v7940_v10 }
  0xb9   :  { %v7853_v62 = vpop.permute.xlu1 %207  ;;  %v7855_v63 = vmul.f32 0.57735026, %v1086_v60  ;;  %v132_v60 = vld [vmem:[%s11821_s1 + $0x24] sm:$0x7]  ;;  %v739_v9 = vmul.f32 %v638_v57, %v7738_v21 }
  0xba   :  { %v642_v3 = vrot.slane %v132_v60, %v7771_v36  ;;  %v453_v13 = vmul.f32 %v358_v58, %v7853_v62 }
  0xbb   :  { %v1157_v4 = vsel %vm1147_vm0, %v7855_v63, -inf }
  0xbc   :  { %1158 = vmax.xlane.f32.xlu0 %v1157_v4  ;;  %v451_v4 = vmul.f32 %v350_v50, %v7891_v55 }
  0xbe   :  { %v7866_v11 = vpop.permute.xlu1 %500  ;;  %v771_v50 = vadd.f32 %v739_v9, %v451_v4  ;;  %v129_v9 = vld [vmem:[%s11821_s1 + $0x18] sm:$0x7] }
  0xbf   :  { %11988 = vst [vmem:[#allocation5_spill] sm:$0xff] %v7866_v11 }
  0xc0   :  { %1164 = vmax.xlane.f32.xlu0 %v1163_v12  ;;  %v354_v12 = vrot.slane %v132_v60, %v7777_v38 }
  0xc2   :  { %v452_v57 = vmul.f32 %v354_v12, %v7798_v51  ;;  %v630_v12 = vrot.slane %v129_v9, %v7771_v36 }
  0xc3   :  { %v7873_v16 = vpop.permute.xlu1 %812 }
  0xc4   :  { %11989 = vst [vmem:[#allocation6_spill] sm:$0xff] %v7873_v16  ;;  %v1055_v17 = vmul.f32 %v942_v14, %v7873_v16  ;;  %v966_v14 = vrot.slane %v133_v53, %v7774_v37  ;;  %v346_v53 = vrot.slane %v130_v49, %v7777_v38  ;;  %v737_v0 = vmul.f32 %v630_v12, %v7866_v11 }
  0xc6   :  { %v1087_v40 = vadd.f32 %v1055_v17, %v767_v35  ;;  %v962_v17 = vrot.slane %v132_v60, %v7774_v37  ;;  %v741_v35 = vmul.f32 %v646_v61, %v7743_v23  ;;  %v1061_v61 = vmul.f32 %v966_v14, %v7756_v30 }
  0xc8   :  { %v7876_v44 = vpop.permute.xlu1 %192  ;;  %v7878_v46 = vmul.f32 0.57735026, %v1087_v40  ;;  %v740_v40 = vmul.f32 %v642_v3, %v7832_v18  ;;  %v773_v29 = vadd.f32 %v741_v35, %v453_v13 }
  0xc9   :  { %11990 = vst [vmem:[#allocation7_spill] sm:$0xff] %v7876_v44  ;;  %v450_v14 = vmul.f32 %v346_v53, %v7876_v44 }
  0xca   :  { %v1160_v47 = vsel %vm1147_vm0, %v7878_v46, -inf  ;;  %v772_v4 = vadd.f32 %v740_v40, %v452_v57  ;;  %v954_v57 = vrot.slane %v130_v49, %v7774_v37 }
  0xcb   :  { %1161 = vmax.xlane.f32.xlu1 %v1160_v47 }
  0xcd   :  { %v7882_v48 = vpop.permute.xlu1 %504 }
  0xce   :  { %11991 = vst [vmem:[#allocation8_spill] sm:$0xff] %v7882_v48 }
  0xd1   :  { %v7895_v59 = vpop.permute.xlu1 %520 }
  0xd2   :  { %11993 = vst [vmem:[#allocation10_spill] sm:$0xff] %v7895_v59 }
  0xd6   :  { %v7908_v15 = vpop.permute.xlu1 %828 }
  0xd7   :  { %11994 = vst [vmem:[#allocation11_spill] sm:$0xff] %v7908_v15  ;;  %v1059_v47 = vmul.f32 %v958_v6, %v7908_v15 }
  0xd9   :  { %v1091_v58 = vadd.f32 %v1059_v47, %v771_v50  ;;  %v1093_v47 = vadd.f32 %v1061_v61, %v773_v29  ;;  %v342_v50 = vrot.slane %v129_v9, %v7777_v38  ;;  %v950_v61 = vrot.slane %v129_v9, %v7774_v37  ;;  %v136_v9 = vld [vmem:[%s11821_s1 + $0x34] sm:$0x7] }
  0xda   :  { %v7920_v60 = vpop.permute.xlu1 %832 }
  0xdb   :  { %11995 = vst [vmem:[#allocation12_spill] sm:$0xff] %v7920_v60  ;;  %v1060_v3 = vmul.f32 %v962_v17, %v7920_v60  ;;  %v7924_v6 = vmul.f32 0.57735026, %v1091_v58  ;;  %v738_v17 = vmul.f32 %v634_v8, %v7882_v48  ;;  %v449_v8 = vmul.f32 %v342_v50, %v7940_v10 }
  0xdd   :  { %v1172_v13 = vsel %vm1147_vm0, %v7924_v6, -inf  ;;  %v1092_v35 = vadd.f32 %v1060_v3, %v772_v4  ;;  %v7946_v3 = vmul.f32 0.57735026, %v1093_v47  ;;  %v770_v53 = vadd.f32 %v738_v17, %v450_v14  ;;  %v134_v17 = vld [vmem:[%s11821_s1 + $0x2c] sm:$0x7] }
  0xde   :  { %1173 = vmax.xlane.f32.xlu1 %v1172_v13  ;;  %v1058_v13 = vmul.f32 %v954_v57, %v7763_v33  ;;  %v370_v14 = vrot.slane %v136_v9, %v7777_v38  ;;  %v658_v57 = vrot.slane %v136_v9, %v7771_v36 }
  0xdf   :  { %v7935_v58 = vpop.permute.xlu1 %524  ;;  %v7937_v40 = vmul.f32 0.57735026, %v1092_v35  ;;  %v1178_v12 = vsel %vm1147_vm0, %v7946_v3, -inf  ;;  %v769_v35 = vadd.f32 %v737_v0, %v449_v8  ;;  %v362_v8 = vrot.slane %v134_v17, %v7777_v38 }
  0xe0   :  { %11996 = vst [vmem:[#allocation13_spill] sm:$0xff] %v7935_v58  ;;  %v1090_v15 = vadd.f32 %v1058_v13, %v770_v53  ;;  %v7976_v13 = vpop.permute.xlu0 %212 }
  0xe1   :  { %v1175_v29 = vsel %vm1147_vm0, %v7937_v40, -inf  ;;  %12001 = vst [vmem:[#allocation18_spill] sm:$0xff] %v7976_v13 }
  0xe2   :  { %1176 = vmax.xlane.f32.xlu0 %v1175_v29  ;;  %v7969_v29 = vmul.f32 0.57735026, %v1090_v15 }
  0xe4   :  { %v7949_v4 = vpop.permute.xlu1 %820 }
  0xe5   :  { %11998 = vst [vmem:[#allocation15_spill] sm:$0xff] %v7949_v4  ;;  %v1057_v49 = vmul.f32 %v950_v61, %v7949_v4  ;;  %v650_v61 = vrot.slane %v134_v17, %v7771_v36  ;;  %v454_v4 = vmul.f32 %v362_v8, %v7976_v13 }
  0xe6   :  { %1179 = vmax.xlane.f32.xlu0 %v1178_v12  ;;  %v1169_v12 = vsel %vm1147_vm0, %v7969_v29, -inf }
  0xe7   :  { %v1089_v60 = vadd.f32 %v1057_v49, %v769_v35  ;;  %v978_v35 = vrot.slane %v136_v9, %v7774_v37  ;;  %v742_v15 = vmul.f32 %v650_v61, %v7895_v59 }
  0xe9   :  { %v7958_v47 = vpop.permute.xlu1 %222  ;;  %v7960_v50 = vmul.f32 0.57735026, %v1089_v60 }
  0xea   :  { %11999 = vst [vmem:[#allocation16_spill] sm:$0xff] %v7958_v47  ;;  %v456_v60 = vmul.f32 %v370_v14, %v7958_v47  ;;  %v1064_v47 = vmul.f32 %v978_v35, %v7779_v39 }
  0xeb   :  { %v1166_v0 = vsel %vm1147_vm0, %v7960_v50, -inf }
  0xec   :  { %1167 = vmax.xlane.f32.xlu1 %v1166_v0  ;;  %v970_v0 = vrot.slane %v134_v17, %v7774_v37 }
  0xee   :  { %v7974_v53 = vpop.permute.xlu1 %528 }
  0xef   :  { %12000 = vst [vmem:[#allocation17_spill] sm:$0xff] %v7974_v53  ;;  %v744_v49 = vmul.f32 %v658_v57, %v7974_v53  ;;  %v774_v57 = vadd.f32 %v742_v15, %v454_v4  ;;  %v135_v53 = vld [vmem:[%s11821_s1 + $0x30] sm:$0x7] }
  0xf0   :  { %1170 = vmax.xlane.f32.xlu1 %v1169_v12  ;;  %v654_v9 = vrot.slane %v135_v53, %v7771_v36  ;;  %v366_v17 = vrot.slane %v135_v53, %v7777_v38  ;;  %v974_v35 = vrot.slane %v135_v53, %v7774_v37 }
  0xf1   :  { %v776_v48 = vadd.f32 %v744_v49, %v456_v60  ;;  %v7998_v60 = vpop.permute.xlu0 %217 }
  0xf2   :  { %12004 = vst [vmem:[#allocation21_spill] sm:$0xff] %v7998_v60  ;;  %v743_v49 = vmul.f32 %v654_v9, %v7935_v58  ;;  %v137_v9 = vld [vmem:[%s11821_s1 + $0x38] sm:$0x7] }
  0xf3   :  { %v7985_v14 = vpop.permute.xlu1 %840  ;;  %v1096_v12 = vadd.f32 %v1064_v47, %v776_v48  ;;  %v662_v53 = vrot.slane %v137_v9, %v7771_v36 }
  0xf4   :  { %12002 = vst [vmem:[#allocation19_spill] sm:$0xff] %v7985_v14  ;;  %v1062_v44 = vmul.f32 %v970_v0, %v7985_v14 }
  0xf5   :  { %v8004_v15 = vmul.f32 0.57735026, %v1096_v12  ;;  %v8016_v12 = vpop.permute.xlu0 %227 }
  0xf6   :  { %v1094_v61 = vadd.f32 %v1062_v44, %v774_v57  ;;  %v455_v44 = vmul.f32 %v366_v17, %v7998_v60  ;;  %12006 = vst [vmem:[#allocation23_spill] sm:$0xff] %v8016_v12  ;;  %v374_v17 = vrot.slane %v137_v9, %v7777_v38 }
  0xf7   :  { %v1187_v0 = vsel %vm1147_vm0, %v8004_v15, -inf }
  0xf8   :  { %v7994_v59 = vpop.permute.xlu1 %532  ;;  %v7996_v8 = vmul.f32 0.57735026, %v1094_v61  ;;  %v775_v57 = vadd.f32 %v743_v49, %v455_v44  ;;  %v138_v49 = vld [vmem:[%s11821_s1 + $0x3c] sm:$0x7] }
  0xf9   :  { %12003 = vst [vmem:[#allocation20_spill] sm:$0xff] %v7994_v59  ;;  %v666_v44 = vrot.slane %v138_v49, %v7771_v36 }
  0xfa   :  { %v1181_v4 = vsel %vm1147_vm0, %v7996_v8, -inf }
  0xfb   :  { %1182 = vmax.xlane.f32.xlu0 %v1181_v4 }
  0xfd   :  { %v8007_v48 = vpop.permute.xlu1 %844 }
  0xfe   :  { %12005 = vst [vmem:[#allocation22_spill] sm:$0xff] %v8007_v48  ;;  %v1063_v47 = vmul.f32 %v974_v35, %v8007_v48  ;;  %v745_v35 = vmul.f32 %v662_v53, %v7994_v59  ;;  %v378_v48 = vrot.slane %v138_v49, %v7777_v38  ;;  %v986_v59 = vrot.slane %v138_v49, %v7774_v37 }
  0xff   :  { %1188 = vmax.xlane.f32.xlu0 %v1187_v0 }
 0x100   :  { %v1095_v61 = vadd.f32 %v1063_v47, %v775_v57  ;;  %v982_v47 = vrot.slane %v137_v9, %v7774_v37  ;;  %v457_v57 = vmul.f32 %v374_v17, %v8016_v12 }
 0x102   :  { %v8019_v4 = vpop.permute.xlu1 %536  ;;  %v8021_v14 = vmul.f32 0.57735026, %v1095_v61  ;;  %v8033_v61 = vpop.permute.xlu0 %232  ;;  %v777_v16 = vadd.f32 %v745_v35, %v457_v57 }
 0x103   :  { %v746_v60 = vmul.f32 %v666_v44, %v8019_v4  ;;  %v458_v11 = vmul.f32 %v378_v48, %v8033_v61 }
 0x104   :  { %v1184_v0 = vsel %vm1147_vm0, %v8021_v14, -inf }
 0x105   :  { %1185 = vmax.xlane.f32.xlu1 %v1184_v0  ;;  %v778_v12 = vadd.f32 %v746_v60, %v458_v11 }
 0x107   :  { %v8035_v58 = vpop.permute.xlu1 %852 }
 0x108   :  { %v1065_v53 = vmul.f32 %v982_v47, %v8035_v58 }
 0x10a   :  { %v1097_v13 = vadd.f32 %v1065_v53, %v777_v16 }
 0x10b   :  { %v8041_v9 = vpop.permute.xlu1 %856 }
 0x10c   :  { %v1066_v17 = vmul.f32 %v986_v59, %v8041_v9  ;;  %v8044_v0 = vmul.f32 0.57735026, %v1097_v13 }
 0x10e   :  { %v1190_v10 = vsel %vm1147_vm0, %v8044_v0, -inf  ;;  %v1098_v55 = vadd.f32 %v1066_v17, %v778_v12 }
 0x10f   :  { %1191 = vmax.xlane.f32.xlu1 %v1190_v10 }
 0x110   :  { %v8048_v44 = vmul.f32 0.57735026, %v1098_v55 }
 0x112   :  { %v1193_v49 = vsel %vm1147_vm0, %v8048_v44, -inf }
 0x113   :  { %1194 = vmax.xlane.f32.xlu0 %v1193_v49 }
 0x13a   :  { %v1150_v48 = vpop.xlane.xlu0 %1149 }
 0x13b   :  { %v1244_v16 = vsub.f32 %v7815_v2, %v1150_v48 }
 0x13d   :  { %v1276_v35 = vmul.f32 1.442695, %v1244_v16 }
 0x13e   :  { %v1153_v59 = vpop.xlane.xlu1 %1152 }
 0x13f   :  { %7465 = vpow2.f32 %v1276_v35  ;;  %v1245_v13 = vsub.f32 %v7837_v42, %v1153_v59 }
 0x141   :  { %v1278_v11 = vmul.f32 1.442695, %v1245_v13 }
 0x142   :  { %v1156_v60 = vpop.xlane.xlu0 %1155 }
 0x143   :  { %7467 = vpow2.f32 %v1278_v11  ;;  %v1246_v12 = vsub.f32 %v7845_v52, %v1156_v60 }
 0x145   :  { %v1280_v10 = vmul.f32 1.442695, %v1246_v12 }
 0x147   :  { %7469 = vpow2.f32 %v1280_v10 }
 0x149   :  { %v1159_v55 = vpop.xlane.xlu0 %1158  ;;  %v8055_v47 = vpop.eup %7465 }
 0x14a   :  { %v1247_v57 = vsub.f32 %v7855_v63, %v1159_v55  ;;  %v1340_v2 = vsel %vm1147_vm0, %v8055_v47, 0.0 }
 0x14b   :  { %1341 = vadd.xlane.f32.xlu1 %v1340_v2 }
 0x14c   :  { %v1282_v53 = vmul.f32 1.442695, %v1247_v57 }
 0x14d   :  { %v1165_v17 = vpop.xlane.xlu0 %1164  ;;  %v8061_v49 = vpop.eup %7467 }
 0x14e   :  { %7471 = vpow2.f32 %v1282_v53  ;;  %v1249_v42 = vsub.f32 %v7862_v5, %v1165_v17  ;;  %v1343_v52 = vsel %vm1147_vm0, %v8061_v49, 0.0 }
 0x14f   :  { %1344 = vadd.xlane.f32.xlu0 %v1343_v52 }
 0x150   :  { %v1286_v48 = vmul.f32 1.442695, %v1249_v42 }
 0x151   :  { %v8065_v16 = vpop.eup %7469 }
 0x152   :  { %7473 = vpow2.f32 %v1286_v48  ;;  %v1346_v63 = vsel %vm1147_vm0, %v8065_v16, 0.0 }
 0x153   :  { %1347 = vadd.xlane.f32.xlu1 %v1346_v63 }
 0x158   :  { %v8069_v35 = vpop.eup %7471  ;;  %v1162_v59 = vpop.xlane.xlu1 %1161 }
 0x159   :  { %v1248_v13 = vsub.f32 %v7878_v46, %v1162_v59  ;;  %v1349_v5 = vsel %vm1147_vm0, %v8069_v35, 0.0 }
 0x15a   :  { %1350 = vadd.xlane.f32.xlu0 %v1349_v5 }
 0x15b   :  { %v1284_v11 = vmul.f32 1.442695, %v1248_v13 }
 0x15c   :  { %v8074_v60 = vpop.eup %7473 }
 0x15d   :  { %7475 = vpow2.f32 %v1284_v11  ;;  %v1355_v12 = vsel %vm1147_vm0, %v8074_v60, 0.0 }
 0x15e   :  { %1356 = vadd.xlane.f32.xlu0 %v1355_v12 }
 0x167   :  { %v8078_v10 = vpop.eup %7475 }
 0x168   :  { %v1352_v55 = vsel %vm1147_vm0, %v8078_v10, 0.0 }
 0x169   :  { %1353 = vadd.xlane.f32.xlu1 %v1352_v55 }
 0x16b   :  { %v1174_v57 = vpop.xlane.xlu1 %1173 }
 0x16c   :  { %v1252_v46 = vsub.f32 %v7924_v6, %v1174_v57 }
 0x16e   :  { %v1292_v2 = vmul.f32 1.442695, %v1252_v46 }
 0x16f   :  { %v1177_v53 = vpop.xlane.xlu0 %1176 }
 0x170   :  { %7477 = vpow2.f32 %v1292_v2  ;;  %v1253_v17 = vsub.f32 %v7937_v40, %v1177_v53 }
 0x172   :  { %v1294_v42 = vmul.f32 1.442695, %v1253_v17 }
 0x173   :  { %v1180_v48 = vpop.xlane.xlu0 %1179 }
 0x174   :  { %7479 = vpow2.f32 %v1294_v42  ;;  %v1254_v52 = vsub.f32 %v7946_v3, %v1180_v48 }
 0x176   :  { %v1296_v63 = vmul.f32 1.442695, %v1254_v52 }
 0x178   :  { %7481 = vpow2.f32 %v1296_v63 }
 0x179   :  { %v1168_v59 = vpop.xlane.xlu1 %1167 }
 0x17a   :  { %v8085_v13 = vpop.eup %7477  ;;  %v1250_v5 = vsub.f32 %v7960_v50, %v1168_v59 }
 0x17b   :  { %v1364_v6 = vsel %vm1147_vm0, %v8085_v13, 0.0 }
 0x17c   :  { %v1288_v11 = vmul.f32 1.442695, %v1250_v5  ;;  %1365 = vadd.xlane.f32.xlu1 %v1364_v6 }
 0x17d   :  { %v1171_v12 = vpop.xlane.xlu1 %1170 }
 0x17e   :  { %v8090_v55 = vpop.eup %7479  ;;  %7483 = vpow2.f32 %v1288_v11  ;;  %v1251_v40 = vsub.f32 %v7969_v29, %v1171_v12 }
 0x17f   :  { %v1367_v3 = vsel %vm1147_vm0, %v8090_v55, 0.0 }
 0x180   :  { %v1290_v57 = vmul.f32 1.442695, %v1251_v40  ;;  %1368 = vadd.xlane.f32.xlu0 %v1367_v3 }
 0x182   :  { %v8095_v46 = vpop.eup %7481  ;;  %7485 = vpow2.f32 %v1290_v57 }
 0x183   :  { %v1370_v50 = vsel %vm1147_vm0, %v8095_v46, 0.0 }
 0x184   :  { %1371 = vadd.xlane.f32.xlu0 %v1370_v50 }
 0x188   :  { %v8099_v2 = vpop.eup %7483  ;;  %v1183_v53 = vpop.xlane.xlu0 %1182 }
 0x189   :  { %v1255_v17 = vsub.f32 %v7996_v8, %v1183_v53  ;;  %v1358_v29 = vsel %vm1147_vm0, %v8099_v2, 0.0 }
 0x18a   :  { %1359 = vadd.xlane.f32.xlu1 %v1358_v29 }
 0x18b   :  { %v1298_v42 = vmul.f32 1.442695, %v1255_v17 }
 0x18c   :  { %v8104_v48 = vpop.eup %7485  ;;  %v1189_v52 = vpop.xlane.xlu0 %1188 }
 0x18d   :  { %7487 = vpow2.f32 %v1298_v42  ;;  %v1257_v63 = vsub.f32 %v8004_v15, %v1189_v52  ;;  %v1361_v59 = vsel %vm1147_vm0, %v8104_v48, 0.0 }
 0x18e   :  { %1362 = vadd.xlane.f32.xlu1 %v1361_v59 }
 0x18f   :  { %v1302_v5 = vmul.f32 1.442695, %v1257_v63 }
 0x191   :  { %7489 = vpow2.f32 %v1302_v5 }
 0x192   :  { %v1186_v6 = vpop.xlane.xlu1 %1185 }
 0x193   :  { %v1256_v8 = vsub.f32 %v8021_v14, %v1186_v6 }
 0x195   :  { %v1300_v11 = vmul.f32 1.442695, %v1256_v8 }
 0x197   :  { %v8110_v12 = vpop.eup %7487  ;;  %7491 = vpow2.f32 %v1300_v11 }
 0x198   :  { %v1373_v40 = vsel %vm1147_vm0, %v8110_v12, 0.0 }
 0x199   :  { %1374 = vadd.xlane.f32.xlu0 %v1373_v40 }
 0x19b   :  { %v8114_v3 = vpop.eup %7489 }
 0x19c   :  { %v1192_v15 = vpop.xlane.xlu1 %1191  ;;  %v1379_v57 = vsel %vm1147_vm0, %v8114_v3, 0.0 }
 0x19d   :  { %v1258_v50 = vsub.f32 %v8044_v0, %v1192_v15  ;;  %1380 = vadd.xlane.f32.xlu0 %v1379_v57 }
 0x19f   :  { %v1304_v53 = vmul.f32 1.442695, %v1258_v50  ;;  %v12007_v50 = vmov 1  }
 0x1a0   :  { %v1195_v17 = vpop.xlane.xlu0 %1194 }
 0x1a1   :  { %v8119_v14 = vpop.eup %7491  ;;  %7493 = vpow2.f32 %v1304_v53  ;;  %v1259_v29 = vsub.f32 %v8048_v44, %v1195_v17 }
 0x1a2   :  { %v1376_v42 = vsel %vm1147_vm0, %v8119_v14, 0.0 }
 0x1a3   :  { %v1306_v52 = vmul.f32 1.442695, %v1259_v29  ;;  %1377 = vadd.xlane.f32.xlu1 %v1376_v42  ;;  %v12008_v29 = vmov 0  }
 0x1a5   :  { %7495 = vpow2.f32 %v1306_v52 }
 0x1ab   :  { %v8124_v63 = vpop.eup %7493 }
 0x1ac   :  { %v1382_v59 = vsel %vm1147_vm0, %v8124_v63, 0.0 }
 0x1ad   :  { %1383 = vadd.xlane.f32.xlu1 %v1382_v59 }
 0x1af   :  { %v8128_v0 = vpop.eup %7495 }
 0x1b0   :  { %v1385_v5 = vsel %vm1147_vm0, %v8128_v0, 0.0 }
 0x1b1   :  { %1386 = vadd.xlane.f32.xlu0 %v1385_v5 }
 0x1d8   :  { %v1342_v6 = vpop.xlane.xlu1 %1341 }
 0x1d9   :  { %7497 = vrcp.f32 %v1342_v6  ;;  %v12009_v6 = vmov 2  }
 0x1dc   :  { %v1345_v44 = vpop.xlane.xlu0 %1344 }
 0x1dd   :  { %7499 = vrcp.f32 %v1345_v44 }
 0x1e0   :  { %v1348_v8 = vpop.xlane.xlu1 %1347 }
 0x1e1   :  { %7501 = vrcp.f32 %v1348_v8 }
 0x1e3   :  { %v7498_v11 = vpop.eup %7497 }
 0x1e4   :  { %v8133_v40 = vmul.f32 %v7498_v11, %v8055_v47 }
 0x1e6   :  { %1674 = vperm.xlu1 %7270, %v8133_v40  }
 0x1e7   :  { %v7500_v15 = vpop.eup %7499  ;;  %v1351_v53 = vpop.xlane.xlu0 %1350 }
 0x1e8   :  { %v8137_v57 = vmul.f32 %v7500_v15, %v8061_v49  ;;  %7503 = vrcp.f32 %v1351_v53 }
 0x1ea   :  { %7271 = vset.pattern.permute.xlu1 %v12007_v50  ;;  %1679 = vperm.xlu0 %7268, %v8137_v57  }
 0x1eb   :  { %1993 = vperm.xlu1 %7271, %v8133_v40   ;;  %v7502_v17 = vpop.eup %7501  ;;  %v1357_v5 = vpop.xlane.xlu0 %1356 }
 0x1ec   :  { %v8144_v47 = vmul.f32 %v7502_v17, %v8065_v16 }
 0x1ef   :  { %1997 = vperm.xlu1 %7271, %v8137_v57  }
 0x1f2   :  { %v7504_v42 = vpop.eup %7503 }
 0x1f3   :  { %7272 = vset.pattern.permute.xlu1 %v12008_v29  ;;  %v8151_v52 = vmul.f32 %v7504_v42, %v8069_v35  ;;  %v11853_v42 = vmov 3  }
 0x1f4   :  { %1684 = vperm.xlu1 %7272, %v8144_v47  }
 0x1f6   :  { %v1354_v49 = vpop.xlane.xlu1 %1353 }
 0x1f7   :  { %7505 = vrcp.f32 %v1354_v49 }
 0x1f8   :  { %7273 = vset.pattern.permute.xlu1 %v12007_v50  ;;  %7507 = vrcp.f32 %v1357_v5 }
 0x1f9   :  { %2001 = vperm.xlu1 %7273, %v8144_v47  }
 0x1fd   :  { %7274 = vset.pattern.permute.xlu1 %v12008_v29 }
 0x1fe   :  { %1689 = vperm.xlu1 %7274, %v8151_v52  }
 0x201   :  { %v7506_v16 = vpop.eup %7505 }
 0x202   :  { %v8156_v59 = vmul.f32 %v7506_v16, %v8078_v10  ;;  %7275 = vset.pattern.permute.xlu1 %v12007_v50  ;;  %v7508_v44 = vpop.eup %7507 }
 0x203   :  { %2005 = vperm.xlu1 %7275, %v8151_v52   ;;  %v8170_v8 = vmul.f32 %v7508_v44, %v8074_v60 }
 0x204   :  { %1694 = vperm.xlu0 %7268, %v8156_v59  }
 0x207   :  { %7276 = vset.pattern.permute.xlu1 %v12009_v6 }
 0x208   :  { %7278 = vset.pattern.permute.xlu0 %v12009_v6  ;;  %2313 = vperm.xlu1 %7276, %v8133_v40  }
 0x209   :  { %2321 = vperm.xlu0 %7278, %v8144_v47   ;;  %v1366_v35 = vpop.xlane.xlu1 %1365 }
 0x20a   :  { %7509 = vrcp.f32 %v1366_v35 }
 0x20c   :  { %2317 = vperm.xlu1 %7276, %v8137_v57  }
 0x20d   :  { %v1369_v10 = vpop.xlane.xlu0 %1368  ;;  %7280 = vset.pattern.permute.xlu0 %v12008_v29 }
 0x20e   :  { %7511 = vrcp.f32 %v1369_v10 }
 0x210   :  { %7277 = vset.pattern.permute.xlu1 %v12007_v50 }
 0x211   :  { %2009 = vperm.xlu1 %7277, %v8156_v59  }
 0x214   :  { %v7510_v11 = vpop.eup %7509 }
 0x215   :  { %7279 = vset.pattern.permute.xlu1 %v12008_v29  ;;  %v8175_v17 = vmul.f32 %v7510_v11, %v8085_v13 }
 0x216   :  { %1699 = vperm.xlu1 %7279, %v8170_v8  }
 0x217   :  { %v1360_v53 = vpop.xlane.xlu1 %1359 }
 0x218   :  { %v7512_v15 = vpop.eup %7511  ;;  %7513 = vrcp.f32 %v1360_v53 }
 0x219   :  { %v8178_v49 = vmul.f32 %v7512_v15, %v8090_v55  ;;  %v1372_v55 = vpop.xlane.xlu0 %1371  ;;  %v11851_v15 = vmov 4  }
 0x21a   :  { %1714 = vperm.xlu1 %7279, %v8175_v17  }
 0x21b   :  { %1719 = vperm.xlu0 %7280, %v8178_v49   ;;  %v1363_v60 = vpop.xlane.xlu1 %1362 }
 0x21c   :  { %7515 = vrcp.f32 %v1363_v60 }
 0x21d   :  { %7517 = vrcp.f32 %v1372_v55 }
 0x21e   :  { %7281 = vset.pattern.permute.xlu1 %v12007_v50 }
 0x21f   :  { %7282 = vset.pattern.permute.xlu0 %v12007_v50  ;;  %2013 = vperm.xlu1 %7281, %v8170_v8  }
 0x220   :  { %2029 = vperm.xlu0 %7282, %v8178_v49  }
 0x222   :  { %v7514_v13 = vpop.eup %7513 }
 0x223   :  { %2025 = vperm.xlu1 %7281, %v8175_v17   ;;  %v8190_v16 = vmul.f32 %v7514_v13, %v8099_v2 }
 0x224   :  { %7285 = vset.pattern.permute.xlu0 %v11853_v42 }
 0x225   :  { %2637 = vperm.xlu0 %7285, %v8137_v57  }
 0x226   :  { %v7516_v5 = vpop.eup %7515  ;;  %v1375_v11 = vpop.xlane.xlu0 %1374 }
 0x227   :  { %7283 = vset.pattern.permute.xlu1 %v12009_v6  ;;  %v7518_v2 = vpop.eup %7517  ;;  %v8201_v10 = vmul.f32 %v7516_v5, %v8104_v48 }
 0x228   :  { %2325 = vperm.xlu1 %7283, %v8151_v52   ;;  %v8208_v44 = vmul.f32 %v7518_v2, %v8095_v46 }
 0x229   :  { %7287 = vset.pattern.permute.xlu0 %v12007_v50 }
 0x22a   :  { %2017 = vperm.xlu0 %7287, %v8190_v16   ;;  %v1381_v48 = vpop.xlane.xlu0 %1380 }
 0x22c   :  { %7284 = vset.pattern.permute.xlu1 %v11853_v42 }
 0x22d   :  { %2633 = vperm.xlu1 %7284, %v8133_v40  }
 0x22e   :  { %7290 = vset.pattern.permute.xlu0 %v11853_v42 }
 0x22f   :  { %2641 = vperm.xlu0 %7290, %v8144_v47  }
 0x230   :  { %v1378_v35 = vpop.xlane.xlu1 %1377 }
 0x231   :  { %7286 = vset.pattern.permute.xlu1 %v12008_v29  ;;  %7519 = vrcp.f32 %v1378_v35  ;;  %v11855_v35 = vmov 5  }
 0x232   :  { %1704 = vperm.xlu1 %7286, %v8190_v16   ;;  %7521 = vrcp.f32 %v1375_v11 }
 0x233   :  { %7292 = vset.pattern.permute.xlu0 %v12007_v50  ;;  %7523 = vrcp.f32 %v1381_v48 }
 0x234   :  { %2021 = vperm.xlu0 %7292, %v8201_v10  }
 0x236   :  { %1724 = vperm.xlu1 %7286, %v8208_v44  }
 0x238   :  { %7295 = vset.pattern.permute.xlu0 %v12009_v6 }
 0x239   :  { %2345 = vperm.xlu0 %7295, %v8175_v17  }
 0x23a   :  { %7288 = vset.pattern.permute.xlu1 %v12007_v50 }
 0x23b   :  { %2033 = vperm.xlu1 %7288, %v8208_v44   ;;  %v7520_v53 = vpop.eup %7519 }
 0x23c   :  { %v8219_v46 = vmul.f32 %v7520_v53, %v8119_v14  ;;  %v7522_v60 = vpop.eup %7521  ;;  %v1384_v14 = vpop.xlane.xlu1 %1383 }
 0x23d   :  { %7297 = vset.pattern.permute.xlu0 %v11851_v15  ;;  %v7524_v13 = vpop.eup %7523  ;;  %v8228_v55 = vmul.f32 %v7522_v60, %v8110_v12  ;;  %7525 = vrcp.f32 %v1384_v14 }
 0x23e   :  { %2953 = vperm.xlu0 %7297, %v8133_v40   ;;  %v8233_v5 = vmul.f32 %v7524_v13, %v8114_v3  ;;  %v1387_v11 = vpop.xlane.xlu0 %1386 }
 0x23f   :  { %7289 = vset.pattern.permute.xlu1 %v12009_v6  ;;  %7527 = vrcp.f32 %v1387_v11 }
 0x240   :  { %2329 = vperm.xlu1 %7289, %v8156_v59  }
 0x242   :  { %7300 = vset.pattern.permute.xlu0 %v12007_v50 }
 0x243   :  { %2041 = vperm.xlu0 %7300, %v8219_v46  }
 0x244   :  { %7291 = vset.pattern.permute.xlu1 %v12008_v29 }
 0x245   :  { %1709 = vperm.xlu1 %7291, %v8201_v10  }
 0x247   :  { %7302 = vset.pattern.permute.xlu0 %v11853_v42  ;;  %v7526_v12 = vpop.eup %7525 }
 0x248   :  { %2649 = vperm.xlu0 %7302, %v8156_v59   ;;  %v8247_v3 = vmul.f32 %v7526_v12, %v8124_v63 }
 0x249   :  { %1729 = vperm.xlu1 %7291, %v8228_v55   ;;  %v7528_v13 = vpop.eup %7527 }
 0x24a   :  { %v8287_v14 = vmul.f32 %v7528_v13, %v8128_v0 }
 0x24c   :  { %7305 = vset.pattern.permute.xlu0 %v12007_v50 }
 0x24d   :  { %2045 = vperm.xlu0 %7305, %v8233_v5   ;;  %7293 = vset.pattern.permute.xlu1 %v12007_v50 }
 0x24e   :  { %2037 = vperm.xlu1 %7293, %v8228_v55  }
 0x251   :  { %7307 = vset.pattern.permute.xlu0 %v11853_v42 }
 0x252   :  { %2653 = vperm.xlu0 %7307, %v8170_v8   ;;  %7294 = vset.pattern.permute.xlu1 %v12009_v6 }
 0x253   :  { %2333 = vperm.xlu1 %7294, %v8170_v8  }
 0x256   :  { %7309 = vset.pattern.permute.xlu0 %v11851_v15 }
 0x257   :  { %2965 = vperm.xlu0 %7309, %v8151_v52   ;;  %2349 = vperm.xlu1 %7294, %v8178_v49  }
 0x25b   :  { %7311 = vset.pattern.permute.xlu0 %v12008_v29  ;;  %7296 = vset.pattern.permute.xlu1 %v11853_v42 }
 0x25c   :  { %1744 = vperm.xlu0 %7311, %v8247_v3   ;;  %2645 = vperm.xlu1 %7296, %v8151_v52  }
 0x260   :  { %7314 = vset.pattern.permute.xlu0 %v11853_v42  ;;  %7298 = vset.pattern.permute.xlu1 %v11851_v15 }
 0x261   :  { %2657 = vperm.xlu0 %7314, %v8190_v16   ;;  %2957 = vperm.xlu1 %7298, %v8137_v57  }
 0x265   :  { %7317 = vset.pattern.permute.xlu0 %v11855_v35  ;;  %7299 = vset.pattern.permute.xlu1 %v12008_v29  ;;  %v8260_v63 = vpop.permute.xlu1 %1674 }
 0x266   :  { %3281 = vperm.xlu0 %7317, %v8144_v47   ;;  %1734 = vperm.xlu1 %7299, %v8219_v46  }
 0x26a   :  { %7320 = vset.pattern.permute.xlu0 %v12009_v6  ;;  %7301 = vset.pattern.permute.xlu1 %v12009_v6  ;;  %v8266_v2 = vpop.permute.xlu1 %1993 }
 0x26b   :  { %2365 = vperm.xlu0 %7320, %v8233_v5   ;;  %2337 = vperm.xlu1 %7301, %v8190_v16  }
 0x26e   :  { %v8270_v48 = vpop.permute.xlu1 %1997 }
 0x26f   :  { %7322 = vset.pattern.permute.xlu0 %v11851_v15  ;;  %2353 = vperm.xlu1 %7301, %v8208_v44  }
 0x270   :  { %2973 = vperm.xlu0 %7322, %v8170_v8  }
 0x273   :  { %7303 = vset.pattern.permute.xlu1 %v11851_v15  ;;  %v8276_v53 = vpop.permute.xlu1 %1684 }
 0x274   :  { %7325 = vset.pattern.permute.xlu0 %v12009_v6  ;;  %12010 = vst [vmem:[#allocation24_spill] sm:$0xff] %v8276_v53  ;;  %2961 = vperm.xlu1 %7303, %v8144_v47  }
 0x275   :  { %2369 = vperm.xlu0 %7325, %v8247_v3  }
 0x278   :  { %7304 = vset.pattern.permute.xlu1 %v12008_v29  ;;  %v8282_v60 = vpop.permute.xlu1 %2001 }
 0x279   :  { %7328 = vset.pattern.permute.xlu0 %v11851_v15  ;;  %1739 = vperm.xlu1 %7304, %v8233_v5  }
 0x27a   :  { %2993 = vperm.xlu0 %7328, %v8208_v44  }
 0x27d   :  { %7306 = vset.pattern.permute.xlu1 %v12009_v6  ;;  %v8291_v12 = vpop.permute.xlu1 %1689 }
 0x27e   :  { %7331 = vset.pattern.permute.xlu0 %v12009_v6  ;;  %12011 = vst [vmem:[#allocation25_spill] sm:$0xff] %v8291_v12  ;;  %2341 = vperm.xlu1 %7306, %v8201_v10   ;;  %v11858_v12 = vmov 6  }
 0x27f   :  { %2373 = vperm.xlu0 %7331, %v8287_v14  }
 0x282   :  { %2357 = vperm.xlu1 %7306, %v8228_v55   ;;  %v8297_v11 = vpop.permute.xlu1 %2005 }
 0x283   :  { %7334 = vset.pattern.permute.xlu0 %v11851_v15 }
 0x284   :  { %2997 = vperm.xlu0 %7334, %v8228_v55  }
 0x286   :  { %7308 = vset.pattern.permute.xlu1 %v11853_v42 }
 0x287   :  { %2665 = vperm.xlu1 %7308, %v8175_v17   ;;  %v8303_v0 = vpop.permute.xlu1 %2313 }
 0x288   :  { %3009 = vperm.xlu0 %7334, %v8247_v3   ;;  %12012 = vst [vmem:[#allocation26_spill] sm:$0xff] %v8303_v0 }
 0x28b   :  { %2669 = vperm.xlu1 %7308, %v8178_v49   ;;  %v8307_v13 = vpop.permute.xlu1 %2317 }
 0x28c   :  { %7347 = vset.pattern.permute.xlu0 %v11855_v35  ;;  %12013 = vst [vmem:[#allocation27_spill] sm:$0xff] %v8307_v13 }
 0x28d   :  { %3285 = vperm.xlu0 %7347, %v8151_v52  }
 0x28f   :  { %7310 = vset.pattern.permute.xlu1 %v11855_v35 }
 0x290   :  { %3273 = vperm.xlu1 %7310, %v8133_v40   ;;  %v8313_v15 = vpop.permute.xlu1 %2009 }
 0x291   :  { %3309 = vperm.xlu0 %7347, %v8178_v49   ;;  %12014 = vst [vmem:[#allocation28_spill] sm:$0xff] %v8313_v15  ;;  %v12018_v15 = vmov 3  }
 0x294   :  { %3277 = vperm.xlu1 %7310, %v8137_v57  }
 0x295   :  { %3297 = vperm.xlu0 %7347, %v8190_v16   ;;  %v8317_v42 = vpop.permute.xlu1 %1699 }
 0x296   :  { %12015 = vst [vmem:[#allocation29_spill] sm:$0xff] %v8317_v42 }
 0x298   :  { %7312 = vset.pattern.permute.xlu1 %v12007_v50 }
 0x299   :  { %3301 = vperm.xlu0 %7347, %v8201_v10   ;;  %2049 = vperm.xlu1 %7312, %v8247_v3   ;;  %v8322_v13 = vpop.permute.xlu1 %1714 }
 0x29a   :  { %12016 = vst [vmem:[#allocation30_spill] sm:$0xff] %v8322_v13  ;;  %v12020_v13 = vmov 4  }
 0x29d   :  { %3325 = vperm.xlu0 %7347, %v8233_v5   ;;  %7313 = vset.pattern.permute.xlu1 %v12009_v6 }
 0x29e   :  { %2361 = vperm.xlu1 %7313, %v8219_v46   ;;  %v8327_v35 = vpop.permute.xlu1 %2013 }
 0x29f   :  { %12017 = vst [vmem:[#allocation31_spill] sm:$0xff] %v8327_v35 }
 0x2a1   :  { %3329 = vperm.xlu0 %7347, %v8247_v3  }
 0x2a2   :  { %7315 = vset.pattern.permute.xlu1 %v12018_v15  ;;  %v8331_v42 = vpop.permute.xlu1 %2025 }
 0x2a3   :  { %12019 = vst [vmem:[#allocation32_spill] sm:$0xff] %v8331_v42  ;;  %2673 = vperm.xlu1 %7315, %v8208_v44  }
 0x2a5   :  { %7354 = vset.pattern.permute.xlu0 %v11858_v12  ;;  %v11860_v12 = vmov 7  }
 0x2a6   :  { %3625 = vperm.xlu0 %7354, %v8175_v17  }
 0x2a7   :  { %7316 = vset.pattern.permute.xlu1 %v12020_v13  ;;  %v8337_v6 = vpop.permute.xlu1 %2325 }
 0x2a8   :  { %12021 = vst [vmem:[#allocation33_spill] sm:$0xff] %v8337_v6  ;;  %2969 = vperm.xlu1 %7316, %v8156_v59  }
 0x2aa   :  { %3633 = vperm.xlu0 %7354, %v8208_v44  }
 0x2ac   :  { %7318 = vset.pattern.permute.xlu1 %v12008_v29  ;;  %v8342_v35 = vpop.permute.xlu1 %2633 }
 0x2ad   :  { %12022 = vst [vmem:[#allocation34_spill] sm:$0xff] %v8342_v35  ;;  %1749 = vperm.xlu1 %7318, %v8287_v14  }
 0x2ae   :  { %3649 = vperm.xlu0 %7354, %v8247_v3  }
 0x2b1   :  { %7319 = vset.pattern.permute.xlu1 %v12007_v50  ;;  %v8348_v42 = vpop.permute.xlu1 %1704 }
 0x2b2   :  { %7360 = vset.pattern.permute.xlu0 %v11860_v12  ;;  %12023 = vst [vmem:[#allocation35_spill] sm:$0xff] %v8348_v42  ;;  %2053 = vperm.xlu1 %7319, %v8287_v14   ;;  %v12028_v42 = vmov 6  }
 0x2b3   :  { %3917 = vperm.xlu0 %7360, %v8137_v57  }
 0x2b5   :  { %v8352_v6 = vpop.permute.xlu1 %1724 }
 0x2b6   :  { %12024 = vst [vmem:[#allocation36_spill] sm:$0xff] %v8352_v6  ;;  %7321 = vset.pattern.permute.xlu1 %v12018_v15 }
 0x2b7   :  { %3921 = vperm.xlu0 %7360, %v8144_v47   ;;  %2661 = vperm.xlu1 %7321, %v8201_v10  }
 0x2ba   :  { %v8358_v35 = vpop.permute.xlu1 %2033 }
 0x2bb   :  { %3933 = vperm.xlu0 %7360, %v8170_v8   ;;  %12025 = vst [vmem:[#allocation37_spill] sm:$0xff] %v8358_v35  ;;  %2677 = vperm.xlu1 %7321, %v8228_v55  }
 0x2bf   :  { %3953 = vperm.xlu0 %7360, %v8208_v44   ;;  %7323 = vset.pattern.permute.xlu1 %v12020_v13  ;;  %v8363_v12 = vpop.permute.xlu1 %2329 }
 0x2c0   :  { %12026 = vst [vmem:[#allocation38_spill] sm:$0xff] %v8363_v12  ;;  %2985 = vperm.xlu1 %7323, %v8175_v17  }
 0x2c3   :  { %3941 = vperm.xlu0 %7360, %v8201_v10  }
 0x2c4   :  { %2989 = vperm.xlu1 %7323, %v8178_v49   ;;  %v8368_v6 = vpop.permute.xlu1 %1709 }
 0x2c5   :  { %12027 = vst [vmem:[#allocation39_spill] sm:$0xff] %v8368_v6 }
 0x2c7   :  { %3965 = vperm.xlu0 %7360, %v8233_v5  }
 0x2c8   :  { %7324 = vset.pattern.permute.xlu1 %v12028_v42  ;;  %v8372_v35 = vpop.permute.xlu1 %1729 }
 0x2c9   :  { %12029 = vst [vmem:[#allocation40_spill] sm:$0xff] %v8372_v35  ;;  %3593 = vperm.xlu1 %7324, %v8133_v40   ;;  %v12033_v35 = vmov 5  }
 0x2cb   :  { %7367 = vset.pattern.permute.xlu0 %v12007_v50  ;;  %v8395_v50 = vpop.permute.xlu0 %1679 }
 0x2cc   :  { %12036 = vst [vmem:[#allocation46_spill] sm:$0xff] %v8395_v50 }
 0x2cd   :  { %3597 = vperm.xlu1 %7324, %v8137_v57   ;;  %v8377_v12 = vpop.permute.xlu1 %2037 }
 0x2ce   :  { %12030 = vst [vmem:[#allocation41_spill] sm:$0xff] %v8377_v12 }
 0x2d1   :  { %7326 = vset.pattern.permute.xlu1 %v12018_v15 }
 0x2d2   :  { %2681 = vperm.xlu1 %7326, %v8219_v46   ;;  %v8381_v0 = vpop.permute.xlu1 %2333 }
 0x2d3   :  { %12031 = vst [vmem:[#allocation42_spill] sm:$0xff] %v8381_v0 }
 0x2d6   :  { %7327 = vset.pattern.permute.xlu1 %v12020_v13  ;;  %v8384_v6 = vpop.permute.xlu1 %2349 }
 0x2d7   :  { %12032 = vst [vmem:[#allocation43_spill] sm:$0xff] %v8384_v6  ;;  %2977 = vperm.xlu1 %7327, %v8190_v16   ;;  %v8401_v6 = vpop.permute.xlu0 %1694 }
 0x2d8   :  { %12038 = vst [vmem:[#allocation48_spill] sm:$0xff] %v8401_v6 }
 0x2db   :  { %7329 = vset.pattern.permute.xlu1 %v12033_v35  ;;  %v8388_v53 = vpop.permute.xlu1 %2645 }
 0x2dc   :  { %12034 = vst [vmem:[#allocation44_spill] sm:$0xff] %v8388_v53  ;;  %3289 = vperm.xlu1 %7329, %v8156_v59  }
 0x2e0   :  { %7330 = vset.pattern.permute.xlu1 %v12028_v42  ;;  %v8392_v57 = vpop.permute.xlu1 %2957 }
 0x2e1   :  { %12035 = vst [vmem:[#allocation45_spill] sm:$0xff] %v8392_v57  ;;  %3601 = vperm.xlu1 %7330, %v8144_v47   ;;  %v8409_v57 = vpop.permute.xlu0 %2321 }
 0x2e2   :  { %12041 = vst [vmem:[#allocation51_spill] sm:$0xff] %v8409_v57 }
 0x2e5   :  { %7332 = vset.pattern.permute.xlu1 %v12018_v15  ;;  %v8398_v12 = vpop.permute.xlu1 %1734  ;;  %v8413_v47 = vpop.permute.xlu0 %1719 }
 0x2e6   :  { %12037 = vst [vmem:[#allocation47_spill] sm:$0xff] %v8398_v12  ;;  %2685 = vperm.xlu1 %7332, %v8233_v5   ;;  %12042 = vst [vmem:[#allocation52_spill] sm:$0xff] %v8413_v47 }
 0x2ea   :  { %7333 = vset.pattern.permute.xlu1 %v12020_v13  ;;  %v8404_v53 = vpop.permute.xlu1 %2337 }
 0x2eb   :  { %12039 = vst [vmem:[#allocation49_spill] sm:$0xff] %v8404_v53  ;;  %2981 = vperm.xlu1 %7333, %v8201_v10   ;;  %v8421_v53 = vpop.permute.xlu0 %2029 }
 0x2ec   :  { %12045 = vst [vmem:[#allocation55_spill] sm:$0xff] %v8421_v53 }
 0x2ee   :  { %v8407_v0 = vpop.permute.xlu1 %2353 }
 0x2ef   :  { %12040 = vst [vmem:[#allocation50_spill] sm:$0xff] %v8407_v0  ;;  %7335 = vset.pattern.permute.xlu1 %v12033_v35  ;;  %v12046_v0 = vmov 7   ;;  %v8428_v50 = vpop.permute.xlu0 %2637 }
 0x2f0   :  { %3293 = vperm.xlu1 %7335, %v8170_v8  }
 0x2f3   :  { %v8415_v12 = vpop.permute.xlu1 %2961 }
 0x2f4   :  { %12043 = vst [vmem:[#allocation53_spill] sm:$0xff] %v8415_v12  ;;  %3305 = vperm.xlu1 %7335, %v8175_v17   ;;  %v8434_v12 = vpop.permute.xlu0 %2017 }
 0x2f5   :  { %12049 = vst [vmem:[#allocation58_spill] sm:$0xff] %v8434_v12 }
 0x2f8   :  { %7336 = vset.pattern.permute.xlu1 %v12028_v42  ;;  %v8419_v6 = vpop.permute.xlu1 %1739 }
 0x2f9   :  { %12044 = vst [vmem:[#allocation54_spill] sm:$0xff] %v8419_v6  ;;  %3605 = vperm.xlu1 %7336, %v8151_v52  }
 0x2fd   :  { %7337 = vset.pattern.permute.xlu1 %v12046_v0  ;;  %v8425_v57 = vpop.permute.xlu1 %2341 }
 0x2fe   :  { %12047 = vst [vmem:[#allocation56_spill] sm:$0xff] %v8425_v57  ;;  %3913 = vperm.xlu1 %7337, %v8133_v40   ;;  %v8442_v57 = vpop.permute.xlu0 %2641 }
 0x301   :  { %v8430_v47 = vpop.permute.xlu1 %2357 }
 0x302   :  { %12048 = vst [vmem:[#allocation57_spill] sm:$0xff] %v8430_v47  ;;  %7338 = vset.pattern.permute.xlu1 %v12018_v15  ;;  %v8448_v47 = vpop.permute.xlu0 %2021 }
 0x303   :  { %2689 = vperm.xlu1 %7338, %v8247_v3   ;;  %12053 = vst [vmem:[#allocation62_spill] sm:$0xff] %v8448_v47 }
 0x306   :  { %v8436_v6 = vpop.permute.xlu1 %2665  ;;  %v8455_v12 = vpop.permute.xlu0 %2345 }
 0x307   :  { %12050 = vst [vmem:[#allocation59_spill] sm:$0xff] %v8436_v6  ;;  %7339 = vset.pattern.permute.xlu1 %v12020_v13 }
 0x308   :  { %3001 = vperm.xlu1 %7339, %v8219_v46  }
 0x30a   :  { %v8440_v53 = vpop.permute.xlu1 %2669 }
 0x30b   :  { %12051 = vst [vmem:[#allocation60_spill] sm:$0xff] %v8440_v53 }
 0x30c   :  { %7340 = vset.pattern.permute.xlu1 %v12033_v35 }
 0x30d   :  { %3313 = vperm.xlu1 %7340, %v8208_v44   ;;  %v8462_v44 = vpop.permute.xlu0 %2953 }
 0x30e   :  { %12056 = vst [vmem:[#allocation65_spill] sm:$0xff] %v8462_v44 }
 0x30f   :  { %v8446_v40 = vpop.permute.xlu1 %3273 }
 0x310   :  { %12052 = vst [vmem:[#allocation61_spill] sm:$0xff] %v8446_v40 }
 0x311   :  { %7341 = vset.pattern.permute.xlu1 %v12028_v42 }
 0x312   :  { %3609 = vperm.xlu1 %7341, %v8156_v59  }
 0x313   :  { %v8452_v6 = vpop.permute.xlu1 %3277 }
 0x314   :  { %12054 = vst [vmem:[#allocation63_spill] sm:$0xff] %v8452_v6 }
 0x316   :  { %7342 = vset.pattern.permute.xlu1 %v12018_v15  ;;  %v8470_v15 = vpop.permute.xlu0 %2041 }
 0x317   :  { %2693 = vperm.xlu1 %7342, %v8287_v14   ;;  %12059 = vst [vmem:[#allocation68_spill] sm:$0xff] %v8470_v15 }
 0x318   :  { %v8458_v53 = vpop.permute.xlu1 %2049 }
 0x319   :  { %12055 = vst [vmem:[#allocation64_spill] sm:$0xff] %v8458_v53 }
 0x31a   :  { %v8476_v47 = vpop.permute.xlu0 %2649 }
 0x31b   :  { %7343 = vset.pattern.permute.xlu1 %v12020_v13 }
 0x31c   :  { %3005 = vperm.xlu1 %7343, %v8233_v5  }
 0x31d   :  { %v8464_v40 = vpop.permute.xlu1 %2361 }
 0x31e   :  { %12057 = vst [vmem:[#allocation66_spill] sm:$0xff] %v8464_v40  ;;  %v8482_v40 = vpop.permute.xlu0 %2045 }
 0x320   :  { %7344 = vset.pattern.permute.xlu1 %v12033_v35 }
 0x321   :  { %3317 = vperm.xlu1 %7344, %v8228_v55  }
 0x322   :  { %v8468_v6 = vpop.permute.xlu1 %2673 }
 0x323   :  { %12058 = vst [vmem:[#allocation67_spill] sm:$0xff] %v8468_v6 }
 0x325   :  { %7345 = vset.pattern.permute.xlu1 %v12028_v42 }
 0x326   :  { %3613 = vperm.xlu1 %7345, %v8170_v8   ;;  %v8489_v8 = vpop.permute.xlu0 %2653 }
 0x327   :  { %v8474_v53 = vpop.permute.xlu1 %2969  ;;  %12063 = vst [vmem:[#allocation72_spill] sm:$0xff] %v8489_v8 }
 0x328   :  { %12060 = vst [vmem:[#allocation69_spill] sm:$0xff] %v8474_v53 }
 0x32a   :  { %3629 = vperm.xlu1 %7345, %v8178_v49   ;;  %v8497_v15 = vpop.permute.xlu0 %2965 }
 0x32c   :  { %v8479_v44 = vpop.permute.xlu1 %1749 }
 0x32d   :  { %12061 = vst [vmem:[#allocation70_spill] sm:$0xff] %v8479_v44 }
 0x32e   :  { %7346 = vset.pattern.permute.xlu1 %v12046_v0 }
 0x32f   :  { %3925 = vperm.xlu1 %7346, %v8151_v52  }
 0x331   :  { %v8485_v6 = vpop.permute.xlu1 %2053 }
 0x332   :  { %12062 = vst [vmem:[#allocation71_spill] sm:$0xff] %v8485_v6  ;;  %v8503_v6 = vpop.permute.xlu0 %1744 }
 0x333   :  { %7348 = vset.pattern.permute.xlu1 %v12033_v35  ;;  %12067 = vst [vmem:[#allocation76_spill] sm:$0xff] %v8503_v6 }
 0x334   :  { %3321 = vperm.xlu1 %7348, %v8219_v46  }
 0x336   :  { %v8491_v53 = vpop.permute.xlu1 %2661  ;;  %v8509_v8 = vpop.permute.xlu0 %2657 }
 0x337   :  { %12064 = vst [vmem:[#allocation73_spill] sm:$0xff] %v8491_v53  ;;  %12069 = vst [vmem:[#allocation78_spill] sm:$0xff] %v8509_v8 }
 0x338   :  { %7349 = vset.pattern.permute.xlu1 %v12028_v42 }
 0x339   :  { %3617 = vperm.xlu1 %7349, %v8190_v16  }
 0x33a   :  { %v8495_v44 = vpop.permute.xlu1 %2677 }
 0x33b   :  { %12065 = vst [vmem:[#allocation74_spill] sm:$0xff] %v8495_v44 }
 0x33d   :  { %7350 = vset.pattern.permute.xlu1 %v12046_v0 }
 0x33e   :  { %3929 = vperm.xlu1 %7350, %v8156_v59  }
 0x33f   :  { %v8501_v52 = vpop.permute.xlu1 %2985 }
 0x340   :  { %12066 = vst [vmem:[#allocation75_spill] sm:$0xff] %v8501_v52  ;;  %v8518_v52 = vpop.permute.xlu0 %3281 }
 0x341   :  { %12071 = vst [vmem:[#allocation80_spill] sm:$0xff] %v8518_v52 }
 0x342   :  { %7351 = vset.pattern.permute.xlu1 %v12020_v13 }
 0x343   :  { %3013 = vperm.xlu1 %7351, %v8287_v14   ;;  %v8507_v53 = vpop.permute.xlu1 %2989 }
 0x344   :  { %12068 = vst [vmem:[#allocation77_spill] sm:$0xff] %v8507_v53  ;;  %v8524_v53 = vpop.permute.xlu0 %2365 }
 0x345   :  { %12073 = vst [vmem:[#allocation82_spill] sm:$0xff] %v8524_v53 }
 0x347   :  { %7352 = vset.pattern.permute.xlu1 %v12028_v42 }
 0x348   :  { %3621 = vperm.xlu1 %7352, %v8201_v10   ;;  %v8513_v44 = vpop.permute.xlu1 %3593  ;;  %v8529_v10 = vpop.permute.xlu0 %2973 }
 0x349   :  { %12070 = vst [vmem:[#allocation79_spill] sm:$0xff] %v8513_v44  ;;  %12075 = vst [vmem:[#allocation84_spill] sm:$0xff] %v8529_v10 }
 0x34c   :  { %3637 = vperm.xlu1 %7352, %v8228_v55   ;;  %v8516_v59 = vpop.permute.xlu1 %3597  ;;  %v8536_v6 = vpop.permute.xlu0 %2369 }
 0x34d   :  { %12077 = vst [vmem:[#allocation86_spill] sm:$0xff] %v8536_v6 }
 0x350   :  { %7353 = vset.pattern.permute.xlu1 %v12046_v0 }
 0x351   :  { %3945 = vperm.xlu1 %7353, %v8175_v17   ;;  %v8522_v13 = vpop.permute.xlu1 %2681 }
 0x352   :  { %12072 = vst [vmem:[#allocation81_spill] sm:$0xff] %v8522_v13 }
 0x355   :  { %3949 = vperm.xlu1 %7353, %v8178_v49   ;;  %v8543_v49 = vpop.permute.xlu0 %2993 }
 0x356   :  { %v8527_v8 = vpop.permute.xlu1 %2977  ;;  %12079 = vst [vmem:[#allocation88_spill] sm:$0xff] %v8543_v49 }
 0x357   :  { %12074 = vst [vmem:[#allocation83_spill] sm:$0xff] %v8527_v8 }
 0x359   :  { %7355 = vset.pattern.permute.xlu1 %v12028_v42 }
 0x35a   :  { %3641 = vperm.xlu1 %7355, %v8219_v46  }
 0x35b   :  { %v8533_v44 = vpop.permute.xlu1 %3289 }
 0x35c   :  { %12076 = vst [vmem:[#allocation85_spill] sm:$0xff] %v8533_v44  ;;  %v8554_v44 = vpop.permute.xlu0 %2373 }
 0x35d   :  { %12082 = vst [vmem:[#allocation91_spill] sm:$0xff] %v8554_v44 }
 0x35e   :  { %7356 = vset.pattern.permute.xlu1 %v12046_v0 }
 0x35f   :  { %3937 = vperm.xlu1 %7356, %v8190_v16   ;;  %v17_v16 = vld [vmem:[%s11822_s3] sm:$0x7] }
 0x360   :  { %v8539_v17 = vpop.permute.xlu1 %3601  ;;  %v8561_v49 = vrot.slane %v17_v16, %v7771_v36  ;;  %v8573_v6 = vrot.slane %v17_v16, %v7774_v37 }
 0x361   :  { %12078 = vst [vmem:[#allocation87_spill] sm:$0xff] %v8539_v17  ;;  %v8598_v17 = vsub.s32 6, %v7761_v32 }
 0x362   :  { %12084 = vst [vmem:[#allocation93_spill] sm:$0xff] %v8561_v49  ;;  %v1540_v44 = vmul.f32 %v8561_v49, %v7736_v20  ;;  %12086 = vst [vmem:[#allocation95_spill] sm:$0xff] %v8573_v6  ;;  %v1541_v10 = vmul.f32 %v8561_v49, %v7740_v22  ;;  %v1542_v20 = vmul.f32 %v8561_v49, %v7745_v24 }
 0x363   :  { %7357 = vset.pattern.permute.xlu1 %v12033_v35  ;;  %v8557_v35 = vrot.slane %v17_v16, %v7777_v38  ;;  %v8589_v16 = vsub.s32 4, %v7761_v32  ;;  %12091 = vst [vmem:[#allocation100_spill] sm:$0xff] %v8598_v17 }
 0x364   :  { %3333 = vperm.xlu1 %7357, %v8287_v14  }
 0x365   :  { %v8545_v13 = vpop.permute.xlu1 %2685  ;;  %12083 = vst [vmem:[#allocation92_spill] sm:$0xff] %v8557_v35  ;;  %v1506_v53 = vmul.f32 %v8557_v35, %v7822_v7  ;;  %12089 = vst [vmem:[#allocation98_spill] sm:$0xff] %v8589_v16  ;;  %v8592_v7 = vsub.s32 5, %v7761_v32  ;;  %v1509_v22 = vmul.f32 %v8557_v35, %v7786_v43  ;;  %v1548_v43 = vmul.f32 %v8561_v49, %v7738_v21 }
 0x366   :  { %12080 = vst [vmem:[#allocation89_spill] sm:$0xff] %v8545_v13  ;;  %v1504_v13 = vmul.f32 %v8557_v35, %v7789_v45  ;;  %v1545_v45 = vmul.f32 %v8561_v49, %v7813_v1  ;;  %v1613_v21 = vmul.f32 %v8573_v6, %v7752_v27  ;;  %v1514_v27 = vmul.f32 %v8557_v35, %v7853_v62  ;;  %v20_v62 = vld [vmem:[%s11823_s2 + $0x8] sm:$0xff] }
 0x367   :  { %12090 = vst [vmem:[#allocation99_spill] sm:$0xff] %v8592_v7  ;;  %v1574_v52 = vadd.f32 %v1542_v20, %v1506_v53  ;;  %v8649_v20 = vmul.f32 %v8573_v6, %v7763_v33  ;;  %v19_v33 = vld [vmem:[%s11823_s2] sm:$0xff] }
 0x368   :  { %7358 = vset.pattern.permute.xlu1 %v12028_v42 }
 0x369   :  { %3645 = vperm.xlu1 %7358, %v8233_v5   ;;  %v1505_v5 = vmul.f32 %v8557_v35, %v7803_v56  ;;  %v8584_v56 = vpop.permute.xlu0 %2997 }
 0x36a   :  { %v8549_v8 = vpop.permute.xlu1 %2981  ;;  %12088 = vst [vmem:[#allocation97_spill] sm:$0xff] %v8584_v56  ;;  %v8601_v56 = vsub.s32 7, %v7761_v32 }
 0x36b   :  { %12081 = vst [vmem:[#allocation90_spill] sm:$0xff] %v8549_v8  ;;  %v1573_v1 = vadd.f32 %v1541_v10, %v1505_v5  ;;  %v1609_v10 = vmul.f32 %v8573_v6, %v7754_v28  ;;  %v1507_v5 = vmul.f32 %v8557_v35, %v7835_v41  ;;  %v1618_v28 = vmul.f32 %v8573_v6, %v7756_v30 }
 0x36c   :  { %12092 = vst [vmem:[#allocation101_spill] sm:$0xff] %v8601_v56 }
 0x36d   :  { %7359 = vset.pattern.permute.xlu1 %v12046_v0  ;;  %v8630_v41 = vadd.f32 %v1609_v10, %v1573_v1  ;;  %v1513_v1 = vmul.f32 %v8557_v35, %v7798_v51  ;;  %v12096_v51 = vld [vmem:[#allocation14_spill] sm:$0xff] }
 0x36e   :  { %3957 = vperm.xlu1 %7359, %v8228_v55   ;;  %v8582_v55 = vsub.s32 3, %v7761_v32  ;;  %v1577_v32 = vadd.f32 %v1545_v45, %v1509_v22  ;;  %v8634_v45 = vpop.permute.xlu0 %3009 }
 0x36f   :  { %v8568_v8 = vpop.permute.xlu1 %3293  ;;  %12094 = vst [vmem:[#allocation103_spill] sm:$0xff] %v8634_v45  ;;  %v12189_v45 = vld [vmem:[#allocation39_spill] sm:$0xff] }
 0x370   :  { %12085 = vst [vmem:[#allocation94_spill] sm:$0xff] %v8568_v8  ;;  %12087 = vst [vmem:[#allocation96_spill] sm:$0xff] %v8582_v55  ;;  %v1572_v8 = vadd.f32 %v1540_v44, %v1504_v13  ;;  %v1544_v13 = vmul.f32 %v8561_v49, %v7733_v19  ;;  %v1608_v44 = vmul.f32 %v8573_v6, %v7749_v26 }
 0x371   :  { %v1550_v19 = vmul.f32 %v8561_v49, %v7743_v23  ;;  %v1543_v26 = vmul.f32 %v8561_v49, %v7747_v25  ;;  %v1611_v23 = vmul.f32 %v8573_v6, %v7847_v54  ;;  %v8653_v54 = vmul.f32 %v8573_v6, %v7779_v39 }
 0x372   :  { %3961 = vperm.xlu1 %7359, %v8219_v46   ;;  %v1508_v46 = vmul.f32 %v8557_v35, %v7758_v31  ;;  %v1610_v31 = vmul.f32 %v8573_v6, %v7765_v34  ;;  %v8623_v53 = vadd.f32 %v1608_v44, %v1572_v8  ;;  %v1549_v8 = vmul.f32 %v8561_v49, %v7832_v18  ;;  %v12095_v18 = vld [vmem:[#allocation9_spill] sm:$0xff] }
 0x373   :  { %v8603_v24 = vpop.permute.xlu1 %3305  ;;  %v8655_v22 = vadd.f32 %v1613_v21, %v1577_v32  ;;  %v1582_v32 = vadd.f32 %v1550_v19, %v1514_v27  ;;  %v12098_v19 = vld [vmem:[#allocation5_spill] sm:$0xff] }
 0x374   :  { %12093 = vst [vmem:[#allocation102_spill] sm:$0xff] %v8603_v24  ;;  %v8637_v25 = vadd.f32 %v1544_v13, %v1508_v46  ;;  %v8639_v34 = vadd.f32 %v1610_v31, %v1574_v52  ;;  %v1575_v52 = vadd.f32 %v1543_v26, %v1507_v5  ;;  %v1512_v13 = vmul.f32 %v8557_v35, %v12095_v18  ;;  %v12152_v24 = vld [vmem:[#allocation28_spill] sm:$0xff] }
 0x375   :  { %v8674_v10 = vadd.f32 %v1549_v8, %v1513_v1  ;;  %v8689_v8 = vpop.permute.xlu0 %3285  ;;  %v12103_v1 = vld [vmem:[#allocation8_spill] sm:$0xff] }
 0x376   :  { %7361 = vset.pattern.permute.xlu1 %v12028_v42  ;;  %v8665_v44 = vadd.f32 %v1611_v23, %v1575_v52  ;;  %v8693_v52 = vadd.f32 %v1548_v43, %v1512_v13  ;;  %v1510_v23 = vmul.f32 %v8557_v35, %v12096_v51  ;;  %v8709_v13 = vadd.f32 %v1618_v28, %v1582_v32  ;;  %v12097_v43 = vld [vmem:[#allocation18_spill] sm:$0xff] }
 0x377   :  { %3653 = vperm.xlu1 %7361, %v8287_v14   ;;  %v8728_v18 = vmul.f32 %v8557_v35, %v12097_v43  ;;  %v1546_v51 = vmul.f32 %v8561_v49, %v12098_v19  ;;  %v1547_v28 = vmul.f32 %v8561_v49, %v12103_v1  ;;  %v12104_v19 = vld [vmem:[#allocation21_spill] sm:$0xff]  ;;  %v12114_v1 = vld [vmem:[#allocation10_spill] sm:$0xff] }
 0x378   :  { %v8645_v30 = vpop.permute.xlu1 %3605  ;;  %v22_v43 = vld [vmem:[%s11823_s2 + $0x18] sm:$0xf] }
 0x379   :  { %v8740_v21 = vpop.permute.xlu0 %3309  ;;  %v8759_v32 = vadd.f32 %v1546_v51, %v1510_v23  ;;  %v12105_v23 = vmov 0  ;;  %v11866_v51 = vmov 0.0   ;;  %v8789_v5 = vpack.c.bf16 %v22_v43, %v20_v62 }
 0x37a   :  { %12100 = vst [vmem:[#allocation14_spill] sm:$0xff] %v8740_v21  ;;  %v12106_v23 = vsel %vm8776_vm3, 4294967295, %v12105_v23  ;;  %4650 = vmatprep.mubr.f32.mxu1 %v11866_v51  ;;  %v21_v51 = vld [vmem:[%s11823_s2 + $0x10] sm:$0xf]  ;;  %v1551_v43 = vmul.f32 %v8561_v49, %v12114_v1  ;;  %v12122_v1 = vld [vmem:[#allocation13_spill] sm:$0xff]  ;;  %v12176_v21 = vld [vmem:[#allocation35_spill] sm:$0xff] }
 0x37b   :  { %7362 = vset.pattern.permute.xlu1 %v12046_v0  ;;  %12107 = vst [vmem:[#allocation18_spill] sm:$0xff] %v12106_v23  ;;  %7025 = vmatprep.subr.msk.bf16.mxu1 %vm8776_vm3, %v8789_v5  ;;  %v12118_v23 = vld [vmem:[#allocation16_spill] sm:$0xff] }
 0x37c   :  { %3969 = vperm.xlu1 %7362, %v8247_v3   ;;  %v12102_v3 = vld [vmem:[#allocation7_spill] sm:$0xff] }
 0x37d   :  { %v8691_v27 = vpop.permute.xlu1 %3913  ;;  %v1511_v39 = vmul.f32 %v8557_v35, %v12102_v3  ;;  %v8802_v3 = vpack.c.bf16 %v21_v51, %v19_v33  ;;  %v8804_v42 = vpop.permute.xlu0 %3297  ;;  %v12112_v33 = vld [vmem:[#allocation23_spill] sm:$0xff] }
 0x37e   :  { %12111 = vst [vmem:[#allocation8_spill] sm:$0xff] %v8804_v42 }
 0x37f   :  { %v1579_v0 = vadd.f32 %v1547_v28, %v1511_v39  ;;  %12110 = vst [vmem:[#allocation7_spill] sm:$0xff] %v8802_v3  ;;  %v8819_v39 = vmul.f32 %v8557_v35, %v12112_v33  ;;  %7028 = vmatpush1.bf16.msk.msra.mxu1 %vm8776_vm3, %v8802_v3  ;;  %v12116_v33 = vld [vmem:[#allocation12_spill] sm:$0xff] }
 0x380   :  { %3973 = vperm.xlu1 %7362, %v8287_v14   ;;  %v12101_v14 = vld [vmem:[#allocation6_spill] sm:$0xff] }
 0x381   :  { %v1612_v26 = vmul.f32 %v8573_v6, %v12101_v14  ;;  %v8763_v14 = vmul.f32 %v8557_v35, %v12104_v19  ;;  %12109 = vst [vmem:[#allocation6_spill] sm:$0xff] %v8789_v5  ;;  %v8839_v51 = vadd.f32 %v8649_v20, %v1579_v0  ;;  %v1517_v0 = vmul.f32 %v8557_v35, %v12118_v23  ;;  %v12119_v5 = vld [vmem:[#allocation17_spill] sm:$0xff] }
 0x382   :  { %v8736_v46 = vpop.permute.xlu1 %2689  ;;  %v1553_v20 = vmul.f32 %v8561_v49, %v12119_v5 }
 0x383   :  { %12099 = vst [vmem:[#allocation9_spill] sm:$0xff] %v8736_v46  ;;  %v8798_v19 = vadd.f32 %v1612_v26, %v8637_v25  ;;  %v12113_v26 = vld [vmem:[#allocation11_spill] sm:$0xff]  ;;  %v8851_v25 = vmul.f32 %v8557_v35, %v8033_v61  ;;  %v1552_v35 = vmul.f32 %v8561_v49, %v12122_v1 }
 0x384   :  { %7363 = vset.pattern.permute.xlu1 %v12008_v29  ;;  %v1616_v28 = vmul.f32 %v8573_v6, %v12113_v26  ;;  %v1617_v26 = vmul.f32 %v8573_v6, %v12116_v33  ;;  %v1583_v33 = vadd.f32 %v1551_v43, %v8728_v18  ;;  %v1585_v5 = vadd.f32 %v1553_v20, %v1517_v0  ;;  %v12126_v18 = vld [vmem:[#allocation20_spill] sm:$0xff] }
 0x385   :  { %v1554_v0 = vmul.f32 %v8561_v49, %v12126_v18  ;;  %v12141_v18 = vld [vmem:[#allocation24_spill] sm:$0xff] }
 0x386   :  { %v8860_v62 = vadd.f32 %v1616_v28, %v8693_v52  ;;  %v12121_v28 = vld [vmem:[#allocation15_spill] sm:$0xff]  ;;  %v8886_v43 = vadd.f32 %v1617_v26, %v8674_v10  ;;  %v8938_v20 = vadd.f32 %v8653_v54, %v1585_v5  ;;  %v11877_v26 = vmov 0.0|0.0  }
 0x387   :  { %v8787_v31 = vpop.permute.xlu1 %3001  ;;  %v1614_v29 = vmul.f32 %v8573_v6, %v12121_v28  ;;  %7029 = vmatprep.subr.bf16.mxu1 %v11877_v26  ;;  %7074 = vmatprep.subr.bf16.mxu0 %v11877_v26  ;;  %v1622_v26 = vmul.f32 %v8573_v6, %v8035_v58  ;;  %v12137_v58 = vrot.slane %v8623_v53, %v7777_v38 }
 0x388   :  { %12108 = vst [vmem:[#allocation5_spill] sm:$0xff] %v8787_v31  ;;  %12117 = vst [vmem:[#allocation23_spill] sm:$0xff] %v8860_v62  ;;  %v8873_v31 = vpop.permute.xlu0 %3301 }
 0x389   :  { %12120 = vst [vmem:[#allocation11_spill] sm:$0xff] %v8873_v31  ;;  %v8913_v23 = vadd.f32 %v1614_v29, %v8759_v32  ;;  %v12124_v32 = vld [vmem:[#allocation19_spill] sm:$0xff]  ;;  %v12127_v29 = vld [vmem:[#allocation22_spill] sm:$0xff] }
 0x38a   :  { %v1619_v1 = vmul.f32 %v8573_v6, %v12124_v32  ;;  %v1584_v32 = vadd.f32 %v1552_v35, %v8763_v14  ;;  %v1586_v35 = vadd.f32 %v1554_v0, %v8819_v39  ;;  %v12133_v39 = vrot.slane %v8623_v53, %v7771_v36  ;;  %v12212_v31 = vld [vmem:[#allocation43_spill] sm:$0xff] }
 0x38c   :  { %v8845_v3 = vpop.permute.xlu1 %3313  ;;  %v8925_v28 = vpop.permute.xlu0 %3325  ;;  %v8961_v14 = vadd.f32 %v1619_v1, %v1583_v33  ;;  %v9005_v0 = vadd.f32 %v1622_v26, %v1586_v35 }
 0x38d   :  { %12115 = vst [vmem:[#allocation21_spill] sm:$0xff] %v8845_v3  ;;  %12123 = vst [vmem:[#allocation10_spill] sm:$0xff] %v8925_v28  ;;  %v12150_v3 = vld [vmem:[#allocation27_spill] sm:$0xff]  ;;  %v12172_v28 = vld [vmem:[#allocation30_spill] sm:$0xff] }
 0x390   :  { %v8975_v33 = vpop.permute.xlu0 %3329 }
 0x391   :  { %v8894_v61 = vpop.permute.xlu1 %3609  ;;  %12128 = vst [vmem:[#allocation16_spill] sm:$0xff] %v8975_v33  ;;  %v12145_v33 = vld [vmem:[#allocation26_spill] sm:$0xff] }
 0x394   :  { %v9029_v10 = vpop.permute.xlu0 %3625 }
 0x395   :  { %12132 = vst [vmem:[#allocation19_spill] sm:$0xff] %v9029_v10 }
 0x396   :  { %v8935_v52 = vpop.permute.xlu1 %2693 }
 0x397   :  { %12125 = vst [vmem:[#allocation12_spill] sm:$0xff] %v8935_v52  ;;  %v1620_v52 = vmul.f32 %v8573_v6, %v12127_v29  ;;  %v1555_v29 = vmul.f32 %v8561_v49, %v8019_v4  ;;  %v1623_v49 = vmul.f32 %v8573_v6, %v8041_v9  ;;  %v12134_v9 = vrot.slane %v8630_v41, %v7771_v36  ;;  %v12143_v6 = vld [vmem:[#allocation51_spill] sm:$0xff] }
 0x399   :  { %v8990_v54 = vadd.f32 %v1620_v52, %v1584_v32  ;;  %v1587_v52 = vadd.f32 %v1555_v29, %v8851_v25  ;;  %v2249_v29 = vmul.f32 %v12134_v9, %v8270_v48  ;;  %v12135_v32 = vrot.slane %v8639_v34, %v7771_v36 }
 0x39a   :  { %v12138_v48 = vrot.slane %v8665_v44, %v7771_v36 }
 0x39b   :  { %v8977_v1 = vpop.permute.xlu1 %3005  ;;  %v9021_v26 = vadd.f32 %v1623_v49, %v1587_v52  ;;  %v2248_v49 = vmul.f32 %v12133_v39, %v8266_v2  ;;  %v2250_v5 = vmul.f32 %v12135_v32, %v8282_v60  ;;  %v1960_v52 = vmul.f32 %v12137_v58, %v8260_v63  ;;  %v12139_v2 = vld [vmem:[#allocation46_spill] sm:$0xff] }
 0x39c   :  { %12129 = vst [vmem:[#allocation17_spill] sm:$0xff] %v8977_v1  ;;  %v2251_v9 = vmul.f32 %v12138_v48, %v8297_v11  ;;  %v12140_v39 = vrot.slane %v8630_v41, %v7777_v38  ;;  %v12142_v63 = vrot.slane %v8639_v34, %v7777_v38  ;;  %v12144_v11 = vrot.slane %v8639_v34, %v7774_v37  ;;  %v12148_v1 = vld [vmem:[#allocation25_spill] sm:$0xff] }
 0x39d   :  { %12131 = vst [vmem:[#allocation13_spill] sm:$0xff] %v9021_v26  ;;  %v12146_v60 = vrot.slane %v8623_v53, %v7774_v37  ;;  %v2280_v46 = vadd.f32 %v2248_v49, %v1960_v52  ;;  %v12153_v49 = vrot.slane %v8798_v19, %v7771_v36 }
 0x39e   :  { %v1961_v35 = vmul.f32 %v12140_v39, %v12139_v2  ;;  %v1962_v58 = vmul.f32 %v12142_v63, %v12141_v18  ;;  %v2570_v48 = vmul.f32 %v12144_v11, %v12143_v6  ;;  %v12149_v2 = vrot.slane %v8665_v44, %v7777_v38 }
 0x39f   :  { %v2568_v32 = vmul.f32 %v12146_v60, %v12145_v33  ;;  %v12151_v33 = vrot.slane %v8630_v41, %v7774_v37  ;;  %v2252_v52 = vmul.f32 %v12153_v49, %v12152_v24  ;;  %v12161_v49 = vld [vmem:[#allocation32_spill] sm:$0xff] }
 0x3a0   :  { %v9015_v4 = vpop.permute.xlu1 %3317  ;;  %v1963_v39 = vmul.f32 %v12149_v2, %v12148_v1  ;;  %v2281_v6 = vadd.f32 %v2249_v29, %v1961_v35  ;;  %v2282_v11 = vadd.f32 %v2250_v5, %v1962_v58  ;;  %v12155_v1 = vld [vmem:[#allocation48_spill] sm:$0xff]  ;;  %v12156_v2 = vrot.slane %v8798_v19, %v7777_v38  ;;  %v12157_v35 = vld [vmem:[#allocation55_spill] sm:$0xff] }
 0x3a1   :  { %12130 = vst [vmem:[#allocation15_spill] sm:$0xff] %v9015_v4  ;;  %v9099_v4 = vpop.permute.xlu0 %3633  ;;  %v2569_v60 = vmul.f32 %v12151_v33, %v12150_v3  ;;  %v12158_v5 = vrot.slane %v8886_v43, %v7771_v36  ;;  %v12159_v58 = vld [vmem:[#allocation31_spill] sm:$0xff]  ;;  %v12160_v3 = vrot.slane %v8655_v22, %v7771_v36  ;;  %v2600_v24 = vadd.f32 %v2568_v32, %v2280_v46  ;;  %v12168_v32 = vld [vmem:[#allocation33_spill] sm:$0xff] }
 0x3a2   :  { %12147 = vst [vmem:[#allocation22_spill] sm:$0xff] %v9099_v4  ;;  %v1964_v18 = vmul.f32 %v12156_v2, %v12155_v1  ;;  %v2283_v63 = vadd.f32 %v2251_v9, %v1963_v39  ;;  %v2602_v10 = vadd.f32 %v2570_v48, %v2282_v11  ;;  %v12163_v9 = vrot.slane %v8630_v41, %v8582_v55  ;;  %v12164_v1 = vld [vmem:[#allocation29_spill] sm:$0xff] }
 0x3a3   :  { %v2257_v29 = vmul.f32 %v12158_v5, %v12157_v35  ;;  %v2253_v33 = vmul.f32 %v12160_v3, %v12159_v58  ;;  %v12165_v2 = vrot.slane %v8655_v22, %v7777_v38  ;;  %v12166_v5 = vld [vmem:[#allocation52_spill] sm:$0xff]  ;;  %v12167_v48 = vrot.slane %v8886_v43, %v7777_v38  ;;  %v12170_v58 = vld [vmem:[#allocation34_spill] sm:$0xff] }
 0x3a4   :  { %v2889_v39 = vmul.f32 %v12163_v9, %v8428_v50  ;;  %v12169_v11 = vrot.slane %v8665_v44, %v7774_v37  ;;  %v12171_v3 = vrot.slane %v8623_v53, %v8582_v55  ;;  %v2284_v9 = vadd.f32 %v2252_v52, %v1964_v18 }
 0x3a5   :  { %v9069_v25 = vpop.permute.xlu1 %3613  ;;  %v1965_v35 = vmul.f32 %v12165_v2, %v12164_v1  ;;  %v1969_v46 = vmul.f32 %v12167_v48, %v12166_v5  ;;  %v12173_v1 = vrot.slane %v8860_v62, %v7777_v38  ;;  %v12174_v5 = vrot.slane %v8639_v34, %v8582_v55  ;;  %v9163_v42 = vpop.permute.xlu0 %3649 }
 0x3a6   :  { %12136 = vst [vmem:[#allocation20_spill] sm:$0xff] %v9069_v25  ;;  %v2888_v50 = vmul.f32 %v12171_v3, %v12170_v58  ;;  %12175 = vst [vmem:[#allocation24_spill] sm:$0xff] %v9163_v42  ;;  %v12177_v58 = vrot.slane %v8913_v23, %v7777_v38  ;;  %v12178_v18 = vrot.slane %v8860_v62, %v7774_v37  ;;  %v12185_v42 = vld [vmem:[#allocation38_spill] sm:$0xff]  ;;  %v12214_v25 = vld [vmem:[#allocation49_spill] sm:$0xff] }
 0x3a7   :  { %v1968_v2 = vmul.f32 %v12173_v1, %v12172_v28  ;;  %v2890_v48 = vmul.f32 %v12174_v5, %v8442_v57  ;;  %v12179_v1 = vld [vmem:[#allocation37_spill] sm:$0xff]  ;;  %v12180_v57 = vrot.slane %v8709_v13, %v7771_v36  ;;  %v12183_v5 = vld [vmem:[#allocation58_spill] sm:$0xff] }
 0x3a9   :  { %v9117_v4 = vpop.permute.xlu1 %3629 }
 0x3aa   :  { %12154 = vst [vmem:[#allocation46_spill] sm:$0xff] %v9117_v4  ;;  %v12162_v4 = vrot.slane %v8860_v62, %v7771_v36 }
 0x3ac   :  { %v2256_v26 = vmul.f32 %v12162_v4, %v12161_v49  ;;  %v2571_v4 = vmul.f32 %v12169_v11, %v12168_v32  ;;  %v2601_v49 = vadd.f32 %v2569_v60, %v2281_v6  ;;  %v2289_v32 = vadd.f32 %v2257_v29, %v1969_v46 }
 0x3ad   :  { %v2285_v11 = vadd.f32 %v2253_v33, %v1965_v35  ;;  %v1966_v6 = vmul.f32 %v12177_v58, %v12176_v21  ;;  %v2576_v60 = vmul.f32 %v12178_v18, %v8455_v12  ;;  %v2258_v29 = vmul.f32 %v12180_v57, %v12179_v1  ;;  %v12181_v33 = vld [vmem:[#allocation65_spill] sm:$0xff] }
 0x3ae   :  { %v9173_v28 = vpop.permute.xlu1 %3925  ;;  %v2288_v52 = vadd.f32 %v2256_v26, %v1968_v2  ;;  %v2921_v3 = vadd.f32 %v2889_v39, %v2601_v49  ;;  %v12182_v35 = vrot.slane %v8623_v53, %v8589_v16  ;;  %v2603_v21 = vadd.f32 %v2571_v4, %v2283_v63  ;;  %v12187_v2 = vld [vmem:[#allocation36_spill] sm:$0xff] }
 0x3af   :  { %v12184_v58 = vrot.slane %v8913_v23, %v7771_v36  ;;  %v2920_v18 = vadd.f32 %v2888_v50, %v2600_v24  ;;  %v12186_v26 = vrot.slane %v8798_v19, %v7774_v37  ;;  %v2922_v49 = vadd.f32 %v2890_v48, %v2602_v10 }
 0x3b0   :  { %v3208_v46 = vmul.f32 %v12182_v35, %v12181_v33  ;;  %v12188_v1 = vrot.slane %v8709_v13, %v7777_v38  ;;  %v12190_v63 = vrot.slane %v8839_v51, %v7777_v38  ;;  %v12191_v33 = vld [vmem:[#allocation42_spill] sm:$0xff]  ;;  %v12192_v24 = vrot.slane %v8655_v22, %v7774_v37 }
 0x3b1   :  { %v2254_v12 = vmul.f32 %v12184_v58, %v12183_v5  ;;  %v2572_v39 = vmul.f32 %v12186_v26, %v12185_v42  ;;  %v12193_v5 = vld [vmem:[#allocation62_spill] sm:$0xff]  ;;  %v12194_v42 = vrot.slane %v8839_v51, %v7771_v36  ;;  %v9207_v48 = vadd.f32 %v2576_v60, %v2288_v52  ;;  %v12196_v58 = vld [vmem:[#allocation45_spill] sm:$0xff] }
 0x3b2   :  { %v1970_v57 = vmul.f32 %v12188_v1, %v12187_v2  ;;  %v1967_v4 = vmul.f32 %v12190_v63, %v12189_v45  ;;  %v2573_v50 = vmul.f32 %v12192_v24, %v12191_v33  ;;  %v12197_v26 = vrot.slane %v8630_v41, %v8589_v16 }
 0x3b3   :  { %v2286_v35 = vadd.f32 %v2254_v12, %v1966_v6  ;;  %v2255_v10 = vmul.f32 %v12194_v42, %v12193_v5  ;;  %12195 = vst [vmem:[#allocation51_spill] sm:$0xff] %v9207_v48  ;;  %v3240_v45 = vadd.f32 %v3208_v46, %v2920_v18  ;;  %v12198_v63 = vrot.slane %v8798_v19, %v8582_v55  ;;  %v12199_v6 = vld [vmem:[#allocation53_spill] sm:$0xff]  ;;  %v3918_v5 = vpop.permute.xlu0 %3917  ;;  %v9221_v60 = vpop.permute.xlu1 %3321  ;;  %v12204_v46 = vld [vmem:[#allocation44_spill] sm:$0xff] }
 0x3b4   :  { %v3209_v2 = vmul.f32 %v12197_v26, %v12196_v58  ;;  %v2290_v1 = vadd.f32 %v2258_v29, %v1970_v57  ;;  %v12200_v12 = vrot.slane %v8639_v34, %v8589_v16  ;;  %12201 = vst [vmem:[#allocation26_spill] sm:$0xff] %v9221_v60  ;;  %v2604_v52 = vadd.f32 %v2572_v39, %v2284_v9  ;;  %v12202_v42 = vld [vmem:[#allocation41_spill] sm:$0xff]  ;;  %v12210_v60 = vld [vmem:[#allocation40_spill] sm:$0xff] }
 0x3b5   :  { %v2892_v33 = vmul.f32 %v12198_v63, %v8476_v47  ;;  %v12203_v58 = vrot.slane %v8961_v14, %v7771_v36  ;;  %v12205_v18 = vrot.slane %v8665_v44, %v8582_v55  ;;  %v12206_v47 = vld [vmem:[#allocation63_spill] sm:$0xff]  ;;  %v12207_v26 = vrot.slane %v8630_v41, %v8592_v7 }
 0x3b6   :  { %v3210_v24 = vmul.f32 %v12200_v12, %v12199_v6  ;;  %v12208_v6 = vld [vmem:[#allocation68_spill] sm:$0xff]  ;;  %v12209_v12 = vrot.slane %v8990_v54, %v7771_v36  ;;  %v2287_v39 = vadd.f32 %v2255_v10, %v1967_v4  ;;  %v2605_v48 = vadd.f32 %v2573_v50, %v2285_v11 }
 0x3b7   :  { %v2259_v29 = vmul.f32 %v12203_v58, %v12202_v42  ;;  %v2891_v57 = vmul.f32 %v12205_v18, %v12204_v46  ;;  %v3529_v63 = vmul.f32 %v12207_v26, %v12206_v47  ;;  %v12211_v42 = vrot.slane %v8961_v14, %v7777_v38 }
 0x3b8   :  { %v2260_v9 = vmul.f32 %v12209_v12, %v12208_v6  ;;  %v12213_v46 = vrot.slane %v8886_v43, %v7774_v37  ;;  %v3241_v62 = vadd.f32 %v3209_v2, %v2921_v3  ;;  %v12215_v47 = vrot.slane %v8913_v23, %v7774_v37 }
 0x3b9   :  { %v1971_v58 = vmul.f32 %v12211_v42, %v12210_v60  ;;  %v12216_v4 = vrot.slane %v8630_v41, %v8598_v17  ;;  %v2924_v6 = vadd.f32 %v2892_v33, %v2604_v52  ;;  %v12217_v11 = vrot.slane %v8938_v20, %v7771_v36  ;;  %v12218_v60 = vld [vmem:[#allocation72_spill] sm:$0xff]  ;;  %v12220_v42 = vld [vmem:[#allocation47_spill] sm:$0xff]  ;;  %v9269_v52 = vpop.permute.xlu1 %3617 }
 0x3ba   :  { %v2577_v18 = vmul.f32 %v12213_v46, %v12212_v31  ;;  %v2574_v26 = vmul.f32 %v12215_v47, %v12214_v25  ;;  %v12219_v31 = vrot.slane %v8655_v22, %v8582_v55  ;;  %v3242_v2 = vadd.f32 %v3210_v24, %v2922_v49  ;;  %12222 = vst [vmem:[#allocation25_spill] sm:$0xff] %v9269_v52  ;;  %v12241_v52 = vld [vmem:[#allocation54_spill] sm:$0xff] }
 0x3bb   :  { %v3849_v10 = vmul.f32 %v12216_v4, %v8516_v59  ;;  %v2261_v50 = vmul.f32 %v12217_v11, %v8482_v40  ;;  %v9263_v12 = vadd.f32 %v2259_v29, %v1971_v58  ;;  %v2923_v25 = vadd.f32 %v2891_v57, %v2603_v21  ;;  %v12224_v4 = vld [vmem:[#allocation80_spill] sm:$0xff]  ;;  %v3922_v21 = vpop.permute.xlu0 %3921  ;;  %v12226_v57 = vld [vmem:[#allocation87_spill] sm:$0xff] }
 0x3bc   :  { %v2893_v3 = vmul.f32 %v12219_v31, %v12218_v60  ;;  %v12221_v46 = vrot.slane %v8990_v54, %v7777_v38  ;;  %v3561_v33 = vadd.f32 %v3529_v63, %v3241_v62  ;;  %v12223_v40 = vrot.slane %v8665_v44, %v8589_v16  ;;  %v12228_v60 = vld [vmem:[#allocation84_spill] sm:$0xff] }
 0x3bd   :  { %v12225_v49 = vrot.slane %v8639_v34, %v8592_v7  ;;  %v12227_v58 = vrot.slane %v8639_v34, %v8598_v17  ;;  %v9283_v62 = vadd.f32 %v2577_v18, %v2289_v32  ;;  %v2606_v63 = vadd.f32 %v2574_v26, %v2286_v35  ;;  %v12234_v32 = vld [vmem:[#allocation61_spill] sm:$0xff] }
 0x3be   :  { %v1972_v59 = vmul.f32 %v12221_v46, %v12220_v42  ;;  %v3211_v47 = vmul.f32 %v12223_v40, %v8497_v15  ;;  %v2925_v29 = vadd.f32 %v2893_v3, %v2605_v48  ;;  %v12229_v31 = vrot.slane %v8655_v22, %v8589_v16  ;;  %v12230_v46 = vld [vmem:[#allocation76_spill] sm:$0xff]  ;;  %v12232_v3 = vld [vmem:[#allocation78_spill] sm:$0xff] }
 0x3bf   :  { %v3530_v24 = vmul.f32 %v12225_v49, %v12224_v4  ;;  %v3850_v11 = vmul.f32 %v12227_v58, %v12226_v57  ;;  %v3881_v42 = vadd.f32 %v3849_v10, %v3561_v33  ;;  %v12231_v40 = vrot.slane %v9005_v0, %v7777_v38  ;;  %v12236_v10 = vld [vmem:[#allocation50_spill] sm:$0xff] }
 0x3c0   :  { %v3213_v15 = vmul.f32 %v12229_v31, %v12228_v60  ;;  %v12233_v4 = vrot.slane %v8913_v23, %v8582_v55  ;;  %v12235_v35 = vrot.slane %v8623_v53, %v8592_v7  ;;  %v9303_v57 = vadd.f32 %v2260_v9, %v1972_v59  ;;  %v12243_v59 = vld [vmem:[#allocation79_spill] sm:$0xff] }
 0x3c1   :  { %v9293_v48 = vmul.f32 %v12231_v40, %v12230_v46  ;;  %v3562_v26 = vadd.f32 %v3530_v24, %v3242_v2  ;;  %v12237_v33 = vrot.slane %v8709_v13, %v7774_v37  ;;  %v3243_v60 = vadd.f32 %v3211_v47, %v2923_v25  ;;  %v12239_v40 = vld [vmem:[#allocation82_spill] sm:$0xff]  ;;  %v3930_v47 = vpop.permute.xlu1 %3929 }
 0x3c2   :  { %v2894_v49 = vmul.f32 %v12233_v4, %v12232_v3  ;;  %v3528_v18 = vmul.f32 %v12235_v35, %v12234_v32  ;;  %v12238_v31 = vrot.slane %v8630_v41, %v8601_v56  ;;  %v12240_v3 = vrot.slane %v8938_v20, %v7774_v37  ;;  %v12245_v41 = vld [vmem:[#allocation56_spill] sm:$0xff] }
 0x3c3   :  { %v2578_v58 = vmul.f32 %v12237_v33, %v12236_v10  ;;  %v12242_v9 = vrot.slane %v8938_v20, %v7777_v38  ;;  %v12244_v24 = vrot.slane %v8623_v53, %v8598_v17  ;;  %v3882_v25 = vadd.f32 %v3850_v11, %v3562_v26  ;;  %v3934_v26 = vpop.permute.xlu0 %3933 }
 0x3c4   :  { %v4169_v46 = vmul.f32 %v12238_v31, %v3918_v5  ;;  %v2581_v4 = vmul.f32 %v12240_v3, %v12239_v40  ;;  %v3245_v35 = vadd.f32 %v3213_v15, %v2925_v29  ;;  %v12246_v5 = vrot.slane %v8839_v51, %v7774_v37  ;;  %v12247_v3 = vld [vmem:[#allocation69_spill] sm:$0xff]  ;;  %v9340_v29 = vld [vmem:[%s11822_s3 + $0x8] ss:$0 sm:$0xff] }
 0x3c5   :  { %v1973_v2 = vmul.f32 %v12242_v9, %v12241_v52  ;;  %v3848_v32 = vmul.f32 %v12244_v24, %v12243_v59  ;;  %v9328_v31 = vadd.f32 %v2894_v49, %v2606_v63  ;;  %v3560_v40 = vadd.f32 %v3528_v18, %v3240_v45 }
 0x3c6   :  { %v2575_v10 = vmul.f32 %v12246_v5, %v12245_v41  ;;  %v4201_v33 = vadd.f32 %v4169_v46, %v3881_v42  ;;  %v12248_v52 = vrot.slane %v8798_v19, %v8589_v16  ;;  %v12249_v59 = vrot.slane %v8639_v34, %v8601_v56  ;;  %v12251_v42 = vld [vmem:[#allocation86_spill] sm:$0xff]  ;;  %v12254_v46 = vld [vmem:[#allocation73_spill] sm:$0xff] }
 0x3c7   :  { %v12250_v45 = vrot.slane %v8623_v53, %v8601_v56  ;;  %v9346_v15 = vadd.f32 %v2578_v58, %v2290_v1  ;;  %v12252_v49 = vrot.slane %v9005_v0, %v7774_v37  ;;  %v12255_v24 = vrot.slane %v8839_v51, %v8582_v55  ;;  %v12256_v1 = vld [vmem:[#allocation85_spill] sm:$0xff] }
 0x3c8   :  { %v3212_v9 = vmul.f32 %v12248_v52, %v12247_v3  ;;  %v4170_v11 = vmul.f32 %v12249_v59, %v3922_v21  ;;  %v12253_v21 = vrot.slane %v8665_v44, %v8592_v7  ;;  %v2293_v53 = vadd.f32 %v2261_v50, %v1973_v2  ;;  %v9375_v2 = vpop.permute.xlu1 %3013 }
 0x3c9   :  { %v4168_v63 = vmul.f32 %v12250_v45, %v8691_v27  ;;  %v9352_v34 = vmul.f32 %v12252_v49, %v12251_v42  ;;  %v2895_v41 = vmul.f32 %v12255_v24, %v12254_v46  ;;  %v3880_v27 = vadd.f32 %v3848_v32, %v3560_v40  ;;  %v12258_v45 = vld [vmem:[#allocation90_spill] sm:$0xff]  ;;  %12261 = vst [vmem:[#allocation27_spill] sm:$0xff] %v9375_v2  ;;  %v12262_v32 = vld [vmem:[#allocation88_spill] sm:$0xff] }
 0x3ca   :  { %v3531_v18 = vmul.f32 %v12253_v21, %v8689_v8  ;;  %v12257_v58 = vrot.slane %v8798_v19, %v8592_v7  ;;  %v4202_v3 = vadd.f32 %v4170_v11, %v3882_v25  ;;  %v2607_v52 = vadd.f32 %v2575_v10, %v2287_v39  ;;  %v12265_v24 = vld [vmem:[#allocation94_spill] sm:$0xff] }
 0x3cb   :  { %v4237_v59 = vadd.f32 %v9340_v29, %v4201_v33  ;;  %v12259_v8 = vrot.slane %v8839_v51, %v8589_v16  ;;  %v12260_v49 = vrot.slane %v8665_v44, %v8598_v17  ;;  %v12263_v40 = vrot.slane %v8709_v13, %v8589_v16 }
 0x3cc   :  { %v3532_v5 = vmul.f32 %v12257_v58, %v12256_v1  ;;  %v3244_v39 = vadd.f32 %v3212_v9, %v2924_v6  ;;  %v4200_v10 = vadd.f32 %v4168_v63, %v3880_v27  ;;  %v12264_v33 = vrot.slane %v8798_v19, %v8598_v17 }
 0x3cd   :  { %v3215_v42 = vmul.f32 %v12259_v8, %v12258_v45  ;;  %v3851_v50 = vmul.f32 %v12260_v49, %v8645_v30  ;;  %v9381_v25 = vmul.f32 %v12263_v40, %v12262_v32  ;;  %v3563_v21 = vadd.f32 %v3531_v18, %v3243_v60  ;;  %v9395_v8 = vpop.permute.xlu0 %3953 }
 0x3ce   :  { %v3852_v11 = vmul.f32 %v12264_v33, %v8894_v61  ;;  %v2927_v46 = vadd.f32 %v2895_v41, %v2607_v52  ;;  %v12266_v30 = vrot.slane %v8655_v22, %v8592_v7  ;;  %v12267_v58 = vrot.slane %v8665_v44, %v8601_v56  ;;  %v12269_v52 = vld [vmem:[#allocation20_spill] sm:$0xff] }
 0x3cf   :  { %v3564_v6 = vadd.f32 %v3532_v5, %v3244_v39  ;;  %v4238_v9 = vadd.f32 %v9340_v29, %v4202_v3  ;;  %v9398_v63 = vadd.f32 %v2581_v4, %v2293_v53  ;;  %v12268_v61 = vrot.slane %v8798_v19, %v8601_v56  ;;  %v12273_v3 = vld [vmem:[#allocation59_spill] sm:$0xff] }
 0x3d0   :  { %v3533_v1 = vmul.f32 %v12266_v30, %v12265_v24  ;;  %v4171_v45 = vmul.f32 %v12267_v58, %v9173_v28  ;;  %v4269_v18 = vmax.f32 %v4237_v59, 0.0  ;;  %v3247_v41 = vadd.f32 %v3215_v42, %v2927_v46  ;;  %v12271_v28 = vld [vmem:[#allocation57_spill] sm:$0xff]  ;;  %v12274_v4 = vld [vmem:[#allocation23_spill] sm:$0xff]  ;;  %v3622_v59 = vpop.permute.xlu1 %3621 }
 0x3d1   :  { %v4172_v60 = vmul.f32 %v12268_v61, %v3930_v47  ;;  %v3883_v27 = vadd.f32 %v3851_v50, %v3563_v21  ;;  %v12270_v49 = vrot.slane %v8655_v22, %v8598_v17  ;;  %v12272_v5 = vrot.slane %v8961_v14, %v7774_v37  ;;  %v12276_v42 = vld [vmem:[#allocation11_spill] sm:$0xff]  ;;  %v12279_v30 = vld [vmem:[#allocation97_spill] sm:$0xff] }
 0x3d2   :  { %v12275_v53 = vrot.slane %v12274_v4, %v8582_v55  ;;  %v4236_v19 = vadd.f32 %v9340_v29, %v4200_v10  ;;  %v3884_v47 = vadd.f32 %v3852_v11, %v3564_v6  ;;  %v12277_v50 = vrot.slane %v8839_v51, %v8592_v7 }
 0x3d3   :  { %v3853_v44 = vmul.f32 %v12270_v49, %v12269_v52  ;;  %v2579_v32 = vmul.f32 %v12272_v5, %v12271_v28  ;;  %v3565_v33 = vadd.f32 %v3533_v1, %v3245_v35  ;;  %v4203_v21 = vadd.f32 %v4171_v45, %v3883_v27  ;;  %v12281_v52 = vld [vmem:[#allocation64_spill] sm:$0xff] }
 0x3d4   :  { %v2896_v40 = vmul.f32 %v12275_v53, %v12273_v3  ;;  %v3535_v39 = vmul.f32 %v12277_v50, %v12276_v42  ;;  %v12278_v46 = vrot.slane %v8839_v51, %v8598_v17  ;;  %v12280_v58 = vrot.slane %v8961_v14, %v8589_v16  ;;  %v12283_v28 = vld [vmem:[#allocation60_spill] sm:$0xff]  ;;  %v12285_v53 = vld [vmem:[#allocation103_spill] sm:$0xff] }
 0x3d5   :  { %v12282_v10 = vrot.slane %v9005_v0, %v7771_v36  ;;  %v4270_v6 = vmax.f32 %v4238_v9, 0.0  ;;  %v4204_v49 = vadd.f32 %v4172_v60, %v3884_v47  ;;  %v12284_v35 = vrot.slane %v8886_v43, %v8582_v55  ;;  %v12287_v50 = vld [vmem:[#allocation67_spill] sm:$0xff]  ;;  %v3942_v47 = vpop.permute.xlu0 %3941 }
 0x3d6   :  { %v3855_v24 = vmul.f32 %v12278_v46, %v3622_v59  ;;  %v3219_v61 = vmul.f32 %v12280_v58, %v12279_v30  ;;  %v4308_v45 = vsel %vm4300_vm4, %v4269_v18, -inf  ;;  %v3885_v27 = vadd.f32 %v3853_v44, %v3565_v33  ;;  %v9447_v30 = vpop.permute.xlu1 %3637  ;;  %v12289_v18 = vld [vmem:[#allocation51_spill] sm:$0xff] }
 0x3d7   :  { %v2262_v11 = vmul.f32 %v12282_v10, %v12281_v52  ;;  %v2897_v1 = vmul.f32 %v12284_v35, %v12283_v28  ;;  %v3567_v5 = vadd.f32 %v3535_v39, %v3247_v41  ;;  %v2611_v3 = vadd.f32 %v2579_v32, %v9263_v12  ;;  %v12291_v28 = vld [vmem:[#allocation66_spill] sm:$0xff] }
 0x3d8   :  { %v12286_v59 = vrot.slane %v9005_v0, %v8589_v16  ;;  %v12288_v9 = vrot.slane %v8709_v13, %v8582_v55  ;;  %v4268_v46 = vmax.f32 %v4236_v19, 0.0  ;;  %v2928_v44 = vadd.f32 %v2896_v40, %v12289_v18  ;;  %v12300_v18 = vld [vmem:[#allocation10_spill] sm:$0xff] }
 0x3d9   :  { %v12290_v12 = vrot.slane %v8655_v22, %v8601_v56  ;;  %v4239_v32 = vadd.f32 %v9340_v29, %v4203_v21  ;;  %v3887_v39 = vadd.f32 %v3855_v24, %v3567_v5  ;;  %v2294_v33 = vadd.f32 %v2262_v11, %v9293_v48  ;;  %v12294_v24 = vld [vmem:[#allocation14_spill] sm:$0xff] }
 0x3da   :  { %v9441_v42 = vmul.f32 %v12286_v59, %v12285_v53  ;;  %v2898_v60 = vmul.f32 %v12288_v9, %v12287_v50  ;;  %v4309_v58 = vrot.slane %v4308_v45, 4  ;;  %v4315_v52 = vsel %vm4300_vm4, %v4270_v6, -inf  ;;  %v12298_v53 = vld [vmem:[#allocation8_spill] sm:$0xff] }
 0x3db   :  { %v4173_v41 = vmul.f32 %v12290_v12, %v3934_v26  ;;  %v4240_v10 = vadd.f32 %v9340_v29, %v4204_v49  ;;  %v2929_v19 = vadd.f32 %v2897_v1, %v9283_v62  ;;  %v12292_v40 = vrot.slane %v8990_v54, %v7774_v37  ;;  %v12296_v49 = vld [vmem:[#allocation74_spill] sm:$0xff] }
 0x3dc   :  { %v12293_v22 = vrot.slane %v8839_v51, %v8601_v56  ;;  %v12295_v48 = vrot.slane %v8886_v43, %v8592_v7  ;;  %v2930_v6 = vadd.f32 %v2898_v60, %v9346_v15  ;;  %v12297_v62 = vrot.slane %v8961_v14, %v8582_v55 }
 0x3dd   :  { %v2580_v35 = vmul.f32 %v12292_v40, %v12291_v28  ;;  %v4205_v21 = vadd.f32 %v4173_v41, %v3885_v27  ;;  %v4301_v5 = vsel %vm4300_vm4, %v4268_v46, -inf  ;;  %v12299_v51 = vrot.slane %v8913_v23, %v8592_v7  ;;  %v12302_v40 = vld [vmem:[#allocation71_spill] sm:$0xff] }
 0x3de   :  { %v4175_v26 = vmul.f32 %v12293_v22, %v3942_v47  ;;  %v3537_v11 = vmul.f32 %v12295_v48, %v12294_v24  ;;  %v2899_v1 = vmul.f32 %v12297_v62, %v12296_v49  ;;  %v4316_v27 = vrot.slane %v4315_v52, 4  ;;  %v9479_v47 = vpop.permute.xlu1 %3945  ;;  %v12303_v22 = vld [vmem:[#allocation13_spill] sm:$0xff]  ;;  %v12305_v48 = vld [vmem:[#allocation19_spill] sm:$0xff] }
 0x3df   :  { %v3534_v59 = vmul.f32 %v12299_v51, %v12298_v53  ;;  %v4271_v50 = vmax.f32 %v4239_v32, 0.0  ;;  %v12301_v15 = vrot.slane %v8938_v20, %v8592_v7  ;;  %v4310_v12 = vmax.f32 %v4308_v45, %v4309_v58  ;;  %v12307_v58 = vld [vmem:[#allocation77_spill] sm:$0xff] }
 0x3e0   :  { %v4207_v9 = vadd.f32 %v4175_v26, %v3887_v39  ;;  %v9488_v41 = vadd.f32 %v9352_v34, %v2294_v33  ;;  %v4272_v46 = vmax.f32 %v4240_v10, 0.0  ;;  %v2612_v28 = vadd.f32 %v2580_v35, %v9303_v57  ;;  %v12309_v10 = vld [vmem:[#allocation70_spill] sm:$0xff] }
 0x3e1   :  { %v9485_v60 = vmul.f32 %v12301_v15, %v12300_v18  ;;  %v12304_v32 = vrot.slane %v12303_v22, %v7771_v36  ;;  %v4302_v26 = vrot.slane %v4301_v5, 4  ;;  %v4241_v24 = vadd.f32 %v9340_v29, %v4205_v21 }
 0x3e2   :  { %v12306_v49 = vrot.slane %v12274_v4, %v8598_v17  ;;  %v2931_v45 = vadd.f32 %v2899_v1, %v2611_v3  ;;  %v12308_v34 = vrot.slane %v8886_v43, %v8589_v16  ;;  %v3250_v57 = vadd.f32 %v9381_v25, %v2930_v6  ;;  %v3950_v15 = vpop.permute.xlu1 %3949 }
 0x3e3   :  { %v2263_v39 = vmul.f32 %v12304_v32, %v12302_v40  ;;  %v12310_v35 = vrot.slane %v12303_v22, %v7777_v38  ;;  %v4317_v51 = vmax.f32 %v4315_v52, %v4316_v27  ;;  %v4322_v21 = vsel %vm4300_vm4, %v4271_v50, -inf  ;;  %v12311_v40 = vld [vmem:[#allocation75_spill] sm:$0xff]  ;;  %v12319_v38 = vld [vmem:[#allocation102_spill] sm:$0xff] }
 0x3e4   :  { %v3856_v62 = vmul.f32 %v12306_v49, %v12305_v48  ;;  %v3217_v33 = vmul.f32 %v12308_v34, %v12307_v58  ;;  %v4243_v18 = vadd.f32 %v9340_v29, %v4207_v9  ;;  %v12312_v3 = vrot.slane %v12274_v4, %v8589_v16  ;;  %v12313_v48 = vld [vmem:[#allocation83_spill] sm:$0xff]  ;;  %v12315_v58 = vld [vmem:[#allocation22_spill] sm:$0xff] }
 0x3e5   :  { %v1975_v53 = vmul.f32 %v12310_v35, %v12309_v10  ;;  %v4311_v32 = vrot.slane %v4310_v12, 2  ;;  %v12314_v25 = vrot.slane %v8913_v23, %v8589_v16  ;;  %v4329_v49 = vsel %vm4300_vm4, %v4272_v46, -inf  ;;  %v3966_v46 = vpop.permute.xlu0 %3965 }
 0x3e6   :  { %v3216_v1 = vmul.f32 %v12312_v3, %v12311_v40  ;;  %v12316_v52 = vrot.slane %v8709_v13, %v8598_v17  ;;  %v4303_v9 = vmax.f32 %v4301_v5, %v4302_v26  ;;  %v4273_v34 = vmax.f32 %v4241_v24, 0.0 }
 0x3e7   :  { %v3214_v6 = vmul.f32 %v12314_v25, %v12313_v48  ;;  %v9524_v50 = vadd.f32 %v2263_v39, %v1975_v53  ;;  %v12318_v10 = vrot.slane %v8709_v13, %v8601_v56  ;;  %v3249_v40 = vadd.f32 %v3217_v33, %v2929_v19  ;;  %v9543_v19 = vpop.permute.xlu1 %3641 }
 0x3e8   :  { %v3858_v27 = vmul.f32 %v12316_v52, %v12315_v58  ;;  %v9532_v3 = vadd.f32 %v3219_v61, %v2931_v45  ;;  %v4323_v48 = vrot.slane %v4322_v21, 4  ;;  %v4318_v25 = vrot.slane %v4317_v51, 2  ;;  %v12321_v52 = vld [vmem:[#allocation81_spill] sm:$0xff] }
 0x3e9   :  { %12317 = vst [vmem:[#allocation28_spill] sm:$0xff] %v9524_v50  ;;  %v9530_v35 = vmul.f32 %v12318_v10, %v9395_v8  ;;  %v12320_v58 = vrot.slane %v12274_v4, %v8592_v7  ;;  %v4330_v53 = vrot.slane %v4329_v49, 4  ;;  %v4275_v5 = vmax.f32 %v4243_v18, 0.0  ;;  %v12323_v45 = vld [vmem:[#allocation89_spill] sm:$0xff] }
 0x3ea   :  { %v3248_v26 = vadd.f32 %v3216_v1, %v2928_v44  ;;  %v4312_v24 = vmax.f32 %v4310_v12, %v4311_v32  ;;  %v12322_v8 = vrot.slane %v8990_v54, %v8582_v55  ;;  %v3246_v61 = vadd.f32 %v3214_v6, %v9328_v31 }
 0x3eb   :  { %v3536_v39 = vmul.f32 %v12320_v58, %v12319_v38  ;;  %v12324_v33 = vrot.slane %v8938_v20, %v8582_v55  ;;  %v4304_v2 = vrot.slane %v4303_v9, 2  ;;  %v12325_v38 = vld [vmem:[#allocation21_spill] sm:$0xff]  ;;  %v12326_v44 = vrot.slane %v8709_v13, %v8592_v7 }
 0x3ec   :  { %v2900_v10 = vmul.f32 %v12322_v8, %v12321_v52  ;;  %v4336_v18 = vsel %vm4300_vm4, %v4273_v34, -inf  ;;  %v12327_v1 = vrot.slane %v8938_v20, %v8601_v56  ;;  %v3569_v31 = vadd.f32 %v3537_v11, %v3249_v40  ;;  %v12328_v58 = vld [vmem:[#allocation25_spill] sm:$0xff]  ;;  %v12330_v11 = vld [vmem:[#allocation46_spill] sm:$0xff] }
 0x3ed   :  { %v2901_v36 = vmul.f32 %v12324_v33, %v12323_v45  ;;  %v3538_v12 = vmul.f32 %v12326_v44, %v12325_v38  ;;  %v4324_v6 = vmax.f32 %v4322_v21, %v4323_v48  ;;  %v12329_v52 = vrot.slane %v8913_v23, %v8598_v17  ;;  %v3938_v48 = vpop.permute.xlu1 %3937 }
 0x3ee   :  { %v9557_v32 = vmul.f32 %v12327_v1, %v3966_v46  ;;  %v4319_v45 = vmax.f32 %v4317_v51, %v4318_v25  ;;  %v3568_v33 = vadd.f32 %v3536_v39, %v3248_v26  ;;  %v4331_v50 = vmax.f32 %v4329_v49, %v4330_v53 }
 0x3ef   :  { %v3854_v8 = vmul.f32 %v12329_v52, %v12328_v58  ;;  %v4350_v13 = vsel %vm4300_vm4, %v4275_v5, -inf  ;;  %v4313_v38 = vrot.slane %v4312_v24, 1  ;;  %v2932_v44 = vadd.f32 %v2900_v10, %v2612_v28  ;;  %v12339_v52 = vld [vmem:[#allocation5_spill] sm:$0xff] }
 0x3f0   :  { %v4337_v34 = vrot.slane %v4336_v18, 4  ;;  %v3566_v37 = vadd.f32 %v3534_v59, %v3246_v61  ;;  %v2933_v22 = vadd.f32 %v2901_v36, %v9398_v63  ;;  %v4305_v46 = vmax.f32 %v4303_v9, %v4304_v2  ;;  %v12334_v63 = vld [vmem:[#allocation17_spill] sm:$0xff] }
 0x3f1   :  { %v3570_v1 = vadd.f32 %v3538_v12, %v3250_v57  ;;  %v12331_v21 = vrot.slane %v8886_v43, %v8598_v17  ;;  %v4325_v58 = vrot.slane %v4324_v6, 2  ;;  %v4351_v25 = vrot.slane %v4350_v13, 4  ;;  %v12337_v61 = vld [vmem:[#allocation9_spill] sm:$0xff] }
 0x3f2   :  { %v3886_v51 = vadd.f32 %v3854_v8, %v3566_v37  ;;  %v12332_v49 = vrot.slane %v8913_v23, %v8601_v56  ;;  %v4320_v28 = vrot.slane %v4319_v45, 1  ;;  %v4332_v59 = vrot.slane %v4331_v50, 2 }
 0x3f3   :  { %v3857_v40 = vmul.f32 %v12331_v21, %v12330_v11  ;;  %v3888_v53 = vadd.f32 %v3856_v62, %v3568_v33  ;;  %v12333_v36 = vrot.slane %v8886_v43, %v8601_v56  ;;  %v12335_v57 = vrot.slane %v8938_v20, %v8589_v16 }
 0x3f4   :  { %v4174_v39 = vmul.f32 %v12332_v49, %v3938_v48  ;;  %v4338_v5 = vmax.f32 %v4336_v18, %v4337_v34  ;;  %v12336_v37 = vrot.slane %v12274_v4, %v8601_v56  ;;  %v4306_v10 = vrot.slane %v4305_v46, 1 }
 0x3f5   :  { %v4177_v2 = vmul.f32 %v12333_v36, %v3950_v15  ;;  %v3221_v9 = vmul.f32 %v12335_v57, %v12334_v63  ;;  %v12338_v62 = vrot.slane %v9005_v0, %v8582_v55  ;;  %v3890_v43 = vadd.f32 %v3858_v27, %v3570_v1 }
 0x3f6   :  { %v4176_v23 = vmul.f32 %v12336_v37, %v9479_v47  ;;  %v4206_v26 = vadd.f32 %v4174_v39, %v3886_v51  ;;  %v3889_v15 = vadd.f32 %v3857_v40, %v3569_v31  ;;  %v12340_v8 = vrot.slane %v8990_v54, %v8589_v16  ;;  %v9592_v47 = vpop.permute.xlu1 %3333 }
 0x3f7   :  { %v2902_v12 = vmul.f32 %v12338_v62, %v12337_v61  ;;  %v4326_v33 = vmax.f32 %v4324_v6, %v4325_v58  ;;  %v4352_v34 = vmax.f32 %v4350_v13, %v4351_v25  ;;  %v4314_v11 = vmax.f32 %v4312_v24, %v4313_v38  ;;  %v12341_v24 = vld [vmem:[#allocation15_spill] sm:$0xff] }
 0x3f8   :  { %v3220_v18 = vmul.f32 %v12340_v8, %v12339_v52  ;;  %v4242_v4 = vadd.f32 %v9340_v29, %v4206_v26  ;;  %v4333_v21 = vmax.f32 %v4331_v50, %v4332_v59  ;;  %v4209_v48 = vadd.f32 %v4177_v2, %v3889_v15 }
 0x3f9   :  { %v3253_v51 = vadd.f32 %v3221_v9, %v2933_v22  ;;  %v4339_v49 = vrot.slane %v4338_v5, 2  ;;  %v4208_v27 = vadd.f32 %v4176_v23, %v3888_v53  ;;  %v4321_v1 = vmax.f32 %v4319_v45, %v4320_v28  ;;  %v12345_v23 = vld [vmem:[#allocation26_spill] sm:$0xff] }
 0x3fa   :  { %v4274_v31 = vmax.f32 %v4242_v4, 0.0  ;;  %v4307_v40 = vmax.f32 %v4305_v46, %v4306_v10  ;;  %v2934_v39 = vadd.f32 %v2902_v12, %v9488_v41  ;;  %v4210_v6 = vadd.f32 %v9530_v35, %v3890_v43  ;;  %v3646_v45 = vpop.permute.xlu1 %3645 }
 0x3fb   :  { %v3252_v13 = vadd.f32 %v3220_v18, %v2932_v44  ;;  %v4327_v58 = vrot.slane %v4326_v33, 1  ;;  %v4353_v36 = vrot.slane %v4352_v34, 2  ;;  %v12342_v50 = vrot.slane %v8961_v14, %v8592_v7 }
 0x3fc   :  { %v4343_v25 = vsel %vm4300_vm4, %v4274_v31, -inf  ;;  %v4334_v38 = vrot.slane %v4333_v21, 1  ;;  %v4245_v59 = vadd.f32 %v9340_v29, %v4209_v48  ;;  %v4340_v46 = vmax.f32 %v4338_v5, %v4339_v49 }
 0x3fd   :  { %v3539_v22 = vmul.f32 %v12342_v50, %v12341_v24  ;;  %v4344_v53 = vrot.slane %v4343_v25, 4  ;;  %v4244_v41 = vadd.f32 %v9340_v29, %v4208_v27  ;;  %v3573_v35 = vadd.f32 %v9485_v60, %v3253_v51 }
 0x3fe   :  { %v12343_v44 = vrot.slane %v8938_v20, %v8598_v17  ;;  %v4246_v2 = vadd.f32 %v9340_v29, %v4210_v6  ;;  %v12344_v63 = vrot.slane %v8961_v14, %v8598_v17  ;;  %v4555_v37 = vsel %vm4554_vm5, %v4314_v11, %v4307_v40  ;;  %v3958_v8 = vpop.permute.xlu1 %3957 }
 0x3ff   :  { %v4345_v9 = vmax.f32 %v4343_v25, %v4344_v53  ;;  %v4328_v5 = vmax.f32 %v4326_v33, %v4327_v58  ;;  %v12346_v60 = vrot.slane %v8990_v54, %v8592_v7  ;;  %v4354_v10 = vmax.f32 %v4352_v34, %v4353_v36 }
 0x400   :  { %v3861_v28 = vmul.f32 %v12343_v44, %v3646_v45  ;;  %v3859_v57 = vmul.f32 %v12344_v63, %v9447_v30  ;;  %v3571_v61 = vadd.f32 %v3539_v22, %v9532_v3  ;;  %v4335_v62 = vmax.f32 %v4333_v21, %v4334_v38  ;;  %v12353_v63 = vld [vmem:[#allocation3_spill] sm:$0xff] }
 0x401   :  { %v3540_v26 = vmul.f32 %v12346_v60, %v12345_v23  ;;  %v4277_v12 = vmax.f32 %v4245_v59, 0.0  ;;  %v4346_v43 = vrot.slane %v4345_v9, 2  ;;  %v4276_v15 = vmax.f32 %v4244_v41, 0.0 }
 0x402   :  { %v3893_v20 = vadd.f32 %v3861_v28, %v3573_v35  ;;  %v12347_v30 = vrot.slane %v8990_v54, %v8598_v17  ;;  %v4341_v18 = vrot.slane %v4340_v46, 1  ;;  %v4557_v33 = vsel %vm4556_vm6, %v4321_v1, %v4555_v37  ;;  %v27_v1 = vld [vmem:[%s11822_s3 + $0x10] sm:$0xff]  ;;  %v3962_v25 = vpop.permute.xlu1 %3961  ;;  %v12351_v28 = vld [vmem:[#allocation91_spill] sm:$0xff] }
 0x403   :  { %v3891_v4 = vadd.f32 %v3859_v57, %v3571_v61  ;;  %v4347_v11 = vmax.f32 %v4345_v9, %v4346_v43  ;;  %v12348_v3 = vrot.slane %v8961_v14, %v8601_v56  ;;  %v4278_v21 = vmax.f32 %v4246_v2, 0.0  ;;  %v28_v14 = vld [vmem:[%s11822_s3 + $0x18] sm:$0xff] }
 0x404   :  { %v3860_v52 = vmul.f32 %v12347_v30, %v9543_v19  ;;  %v4213_v48 = vadd.f32 %v9557_v32, %v3893_v20  ;;  %v3572_v51 = vadd.f32 %v3540_v26, %v3252_v13  ;;  %v4355_v49 = vrot.slane %v4354_v10, 1  ;;  %v12352_v2 = vld [vmem:[#allocation13_spill] sm:$0xff]  ;;  %v12357_v26 = vld [vmem:[#allocation12_spill] sm:$0xff] }
 0x405   :  { %v4179_v34 = vmul.f32 %v12348_v3, %v3958_v8  ;;  %v4559_v27 = vsel %vm4558_vm7, %v4328_v5, %v4557_v33  ;;  %v4364_v31 = vsel %vm4300_vm4, %v4277_v12, -inf  ;;  %v4348_v40 = vrot.slane %v4347_v11, 1  ;;  %v12360_v33 = vld [vmem:[#allocation28_spill] sm:$0xff] }
 0x406   :  { %v4561_v6 = vsel %vm4560_vm8, %v4335_v62, %v4559_v27  ;;  %v3254_v32 = vadd.f32 %v9441_v42, %v2934_v39  ;;  %v4357_v13 = vsel %vm4300_vm4, %v4276_v15, -inf  ;;  %v3892_v58 = vadd.f32 %v3860_v52, %v3572_v51  ;;  %v3654_v43 = vpop.permute.xlu1 %3653 }
 0x407   :  { %v4211_v19 = vadd.f32 %v4179_v34, %v3891_v4  ;;  %v4342_v36 = vmax.f32 %v4340_v46, %v4341_v18  ;;  %v4249_v24 = vadd.f32 %v9340_v29, %v4213_v48  ;;  %v12349_v22 = vrot.slane %v8990_v54, %v8601_v56  ;;  %v12355_v54 = vld [vmem:[#allocation16_spill] sm:$0xff] }
 0x408   :  { %v4349_v59 = vmax.f32 %v4347_v11, %v4348_v40  ;;  %v4365_v53 = vrot.slane %v4364_v31, 4  ;;  %v4356_v45 = vmax.f32 %v4354_v10, %v4355_v49  ;;  %v9644_v35 = vpack.c.bf16 %v28_v14, %v27_v1  ;;  %v12361_v11 = vld [vmem:[#allocation27_spill] sm:$0xff]  ;;  %v12364_v49 = vld [vmem:[#allocation24_spill] sm:$0xff] }
 0x409   :  { %v4247_v50 = vadd.f32 %v9340_v29, %v4211_v19  ;;  %v4180_v38 = vmul.f32 %v12349_v22, %v3962_v25  ;;  %v4563_v41 = vsel %vm4562_vm9, %v4342_v36, %v4561_v6  ;;  %v4371_v42 = vsel %vm4300_vm4, %v4278_v21, -inf }
 0x40a   :  { %12350 = vst [vmem:[#allocation48_spill] sm:$0xff] %v9644_v35  ;;  %v4565_v46 = vsel %vm4564_vm10, %v4349_v59, %v4563_v41  ;;  %v12354_v57 = vrot.slane %v12352_v2, %v12353_v63  ;;  %v12356_v37 = vrot.slane %v9005_v0, %v8592_v7  ;;  %v4358_v23 = vrot.slane %v4357_v13, 4  ;;  %v3970_v22 = vpop.permute.xlu1 %3969 }
 0x40b   :  { %v4279_v39 = vmax.f32 %v4247_v50, 0.0  ;;  %v4212_v44 = vadd.f32 %v4180_v38, %v3892_v58  ;;  %v4567_v60 = vsel %vm4566_vm11, %v4356_v45, %v4565_v46  ;;  %v12358_v20 = vrot.slane %v12352_v2, %v8582_v55 }
 0x40c   :  { %v2583_v9 = vmul.f32 %v12354_v57, %v12351_v28  ;;  %v3542_v5 = vmul.f32 %v12356_v37, %v12355_v54  ;;  %v4281_v61 = vmax.f32 %v4249_v24, 0.0  ;;  %6694 = vmatmul.mubr.msk.f32.vlgmr.msra.gmra.mrb[0].mxu1 %vm4300_vm4, %v4567_v60  ;;  %v4372_v15 = vrot.slane %v4371_v42, 4 }
 0x40d   :  { %v2903_v10 = vmul.f32 %v12358_v20, %v12357_v26  ;;  %v4378_v62 = vsel %vm4300_vm4, %v4279_v39, -inf  ;;  %v4248_v12 = vadd.f32 %v9340_v29, %v4212_v44  ;;  %v4366_v30 = vmax.f32 %v4364_v31, %v4365_v53  ;;  %7031 = vmatpush1.bf16.msra.mxu1 %v9644_v35 }
 0x40e   :  { %v3463_v52 = vrot.slane %v12352_v2, %v8592_v7  ;;  %v4379_v8 = vrot.slane %v4378_v62, 4  ;;  %v12359_v18 = vmov 0.0   ;;  %v2615_v4 = vadd.f32 %v2583_v9, %v12360_v33 }
 0x40f   :  { %4656 = vmatprep.mubr.f32.mxu1 %v12359_v18  ;;  %v12362_v48 = vrot.slane %v12352_v2, %v8589_v16  ;;  %v4280_v34 = vmax.f32 %v4248_v12, 0.0  ;;  %v3574_v21 = vadd.f32 %v3542_v5, %v3254_v32  ;;  %v12363_v51 = vmov 0.0|0.0   ;;  %6837 = vmatprep.mubr.msk.f32.mxu0 %vm7629_vm13, %v12359_v18 }
 0x410   :  { %7032 = vmatprep.subr.bf16.mxu1 %v12363_v51  ;;  %v12365_v27 = vrot.slane %v9005_v0, %v8598_v17  ;;  %v4359_v19 = vmax.f32 %v4357_v13, %v4358_v23  ;;  %v3783_v40 = vrot.slane %v12352_v2, %v8598_v17  ;;  %v4099_v6 = vrot.slane %v9005_v0, %v8601_v56  ;;  %v10146_v17 = vld [vmem:[%s11821_s1 + $0x5c] sm:$0x7] }
 0x411   :  { %v3223_v3 = vmul.f32 %v12362_v48, %v12361_v11  ;;  %v2935_v1 = vadd.f32 %v2903_v10, %v2615_v4  ;;  %v3543_v14 = vmul.f32 %v3463_v52, %v9592_v47  ;;  %v4392_v58 = vsel %vm4300_vm4, %v4281_v61, -inf }
 0x412   :  { %v3862_v31 = vmul.f32 %v12365_v27, %v12364_v49  ;;  %v4385_v32 = vsel %vm4300_vm4, %v4280_v34, -inf  ;;  %v4373_v25 = vmax.f32 %v4371_v42, %v4372_v15  ;;  %v4367_v36 = vrot.slane %v4366_v30, 2  ;;  %v3974_v42 = vpop.permute.xlu1 %3973 }
 0x413   :  { %v4380_v24 = vmax.f32 %v4378_v62, %v4379_v8  ;;  %v4386_v50 = vrot.slane %v4385_v32, 4  ;;  %v3255_v38 = vadd.f32 %v3223_v3, %v2935_v1  ;;  %v3863_v13 = vmul.f32 %v3783_v40, %v3654_v43 }
 0x414   :  { %v3894_v59 = vadd.f32 %v3862_v31, %v3574_v21  ;;  %v4182_v53 = vmul.f32 %v4099_v6, %v3970_v22  ;;  %v4360_v45 = vrot.slane %v4359_v19, 2  ;;  %v4393_v41 = vrot.slane %v4392_v58, 4 }
 0x415   :  { %v4387_v39 = vmax.f32 %v4385_v32, %v4386_v50  ;;  %v3575_v0 = vadd.f32 %v3543_v14, %v3255_v38  ;;  %v4103_v47 = vrot.slane %v12352_v2, %v8601_v56  ;;  %v4374_v46 = vrot.slane %v4373_v25, 2 }
 0x416   :  { %v4214_v44 = vadd.f32 %v4182_v53, %v3894_v59  ;;  %v4368_v28 = vmax.f32 %v4366_v30, %v4367_v36  ;;  %v4381_v57 = vrot.slane %v4380_v24, 2  ;;  %v4361_v23 = vmax.f32 %v4359_v19, %v4360_v45 }
 0x417   :  { %v4388_v9 = vrot.slane %v4387_v39, 2  ;;  %v3895_v54 = vadd.f32 %v3863_v13, %v3575_v0  ;;  %v4183_v5 = vmul.f32 %v4103_v47, %v3974_v42  ;;  %v4394_v60 = vmax.f32 %v4392_v58, %v4393_v41  ;;  %v29_v0 = vld [vmem:[%s11822_s3 + $0x20] sm:$0xff]  ;;  %v31_v47 = vld [vmem:[%s11822_s3 + $0x30] sm:$0xff] }
 0x418   :  { %v4250_v37 = vadd.f32 %v9340_v29, %v4214_v44  ;;  %v4369_v10 = vrot.slane %v4368_v28, 1  ;;  %v4382_v61 = vmax.f32 %v4380_v24, %v4381_v57  ;;  %v4375_v62 = vmax.f32 %v4373_v25, %v4374_v46  ;;  %v30_v44 = vld [vmem:[%s11822_s3 + $0x28] sm:$0xff]  ;;  %v33_v42 = vld [vmem:[%s11822_s3 + $0x40] sm:$0xff] }
 0x419   :  { %v4215_v20 = vadd.f32 %v4183_v5, %v3895_v54  ;;  %v4389_v12 = vmax.f32 %v4387_v39, %v4388_v9  ;;  %v4362_v15 = vrot.slane %v4361_v23, 1  ;;  %v4395_v30 = vrot.slane %v4394_v60, 2  ;;  %v34_v9 = vld [vmem:[%s11822_s3 + $0x48] sm:$0xff]  ;;  %v36_v5 = vld [vmem:[%s11822_s3 + $0x58] sm:$0xff] }
 0x41a   :  { %v4282_v26 = vmax.f32 %v4250_v37, 0.0  ;;  %v4370_v33 = vmax.f32 %v4368_v28, %v4369_v10  ;;  %v4383_v4 = vrot.slane %v4382_v61, 1  ;;  %v4376_v48 = vrot.slane %v4375_v62, 1  ;;  %v32_v28 = vld [vmem:[%s11822_s3 + $0x38] sm:$0xff]  ;;  %v35_v37 = vld [vmem:[%s11822_s3 + $0x50] sm:$0xff] }
 0x41b   :  { %v4251_v2 = vadd.f32 %v9340_v29, %v4215_v20  ;;  %v4390_v3 = vrot.slane %v4389_v12, 1  ;;  %v4363_v21 = vmax.f32 %v4361_v23, %v4362_v15  ;;  %v4396_v49 = vmax.f32 %v4394_v60, %v4395_v30  ;;  %v37_v60 = vld [vmem:[%s11822_s3 + $0x60] sm:$0xff]  ;;  %v39_v10 = vld [vmem:[%s11822_s3 + $0x70] sm:$0xff]  ;;  %v44_v30 = vld [vmem:[%s11822_s3 + $0x98] sm:$0xff] }
 0x41c   :  { %v4399_v43 = vsel %vm4300_vm4, %v4282_v26, -inf  ;;  %v4384_v19 = vmax.f32 %v4382_v61, %v4383_v4  ;;  %v4377_v1 = vmax.f32 %v4375_v62, %v4376_v48  ;;  %v9708_v46 = vpack.c.bf16 %v30_v44, %v29_v0  ;;  %v38_v26 = vld [vmem:[%s11822_s3 + $0x68] sm:$0xff]  ;;  %v40_v61 = vld [vmem:[%s11822_s3 + $0x78] sm:$0xff]  ;;  %v43_v15 = vld [vmem:[%s11822_s3 + $0x90] sm:$0xff] }
 0x41d   :  { %v4400_v52 = vrot.slane %v4399_v43, 4  ;;  %v4283_v8 = vmax.f32 %v4251_v2, 0.0  ;;  %v4568_v29 = vsel %vm4554_vm5, %v4370_v33, %v4363_v21  ;;  %v4391_v14 = vmax.f32 %v4389_v12, %v4390_v3  ;;  %v41_v12 = vld [vmem:[%s11822_s3 + $0x80] sm:$0xff]  ;;  %v46_v33 = vld [vmem:[%s11822_s3 + $0xa8] sm:$0xff]  ;;  %v47_v4 = vld [vmem:[%s11822_s3 + $0xb0] sm:$0xff] }
 0x41e   :  { %v4397_v32 = vrot.slane %v4396_v49, 1  ;;  %v4569_v36 = vsel %vm4556_vm6, %v4377_v1, %v4568_v29  ;;  %12366 = vst [vmem:[#allocation55_spill] sm:$0xff] %v9708_v46  ;;  %7034 = vmatpush1.bf16.msra.mxu1 %v9708_v46  ;;  %v9714_v57 = vpack.c.bf16 %v32_v28, %v31_v47  ;;  %v9724_v54 = vpack.c.bf16 %v34_v9, %v33_v42  ;;  %v48_v48 = vld [vmem:[%s11822_s3 + $0xb8] sm:$0xff]  ;;  %v50_v21 = vld [vmem:[%s11822_s3 + $0xc8] sm:$0xff]  ;;  %v53_v1 = vld [vmem:[%s11822_s3 + $0xe0] sm:$0xff] }
 0x41f   :  { %v4401_v11 = vmax.f32 %v4399_v43, %v4400_v52  ;;  %v4406_v34 = vsel %vm4300_vm4, %v4283_v8, -inf  ;;  %v4570_v50 = vsel %vm4558_vm7, %v4384_v19, %v4569_v36  ;;  %7035 = vmatprep.subr.bf16.mxu1 %v12363_v51  ;;  %v9734_v23 = vpack.c.bf16 %v36_v5, %v35_v37  ;;  %v42_v43 = vld [vmem:[%s11822_s3 + $0x88] sm:$0xff]  ;;  %v45_v8 = vld [vmem:[%s11822_s3 + $0xa0] sm:$0xff] }
 0x420   :  { %v4407_v31 = vrot.slane %v4406_v34, 4  ;;  %v4571_v38 = vsel %vm4560_vm8, %v4391_v14, %v4570_v50  ;;  %v4398_v13 = vmax.f32 %v4396_v49, %v4397_v32  ;;  %12367 = vst [vmem:[#allocation31_spill] sm:$0xff] %v9714_v57  ;;  %12368 = vst [vmem:[#allocation32_spill] sm:$0xff] %v9724_v54  ;;  %v9744_v20 = vpack.c.bf16 %v38_v26, %v37_v60  ;;  %v58_v49 = vld [vmem:[%s11822_s3 + $0x108] sm:$0xff]  ;;  %v55_v32 = vld [vmem:[%s11822_s3 + $0xf0] sm:$0xff] }
 0x421   :  { %v4402_v27 = vrot.slane %v4401_v11, 2  ;;  %12369 = vst [vmem:[#allocation29_spill] sm:$0xff] %v9734_v23  ;;  %v9754_v62 = vpack.c.bf16 %v40_v61, %v39_v10  ;;  %v9764_v2 = vpack.c.bf16 %v42_v43, %v41_v12  ;;  %v9774_v52 = vpack.c.bf16 %v44_v30, %v43_v15  ;;  %v54_v14 = vld [vmem:[%s11822_s3 + $0xe8] sm:$0xff] }
 0x422   :  { %v4408_v6 = vmax.f32 %v4406_v34, %v4407_v31  ;;  %v4572_v45 = vsel %vm4562_vm9, %v4398_v13, %v4571_v38  ;;  %7037 = vmatpush1.bf16.msra.mxu1 %v9714_v57  ;;  %12370 = vst [vmem:[#allocation52_spill] sm:$0xff] %v9744_v20  ;;  %v9794_v3 = vpack.c.bf16 %v48_v48, %v47_v4  ;;  %v49_v34 = vld [vmem:[%s11822_s3 + $0xc0] sm:$0xff] }
 0x423   :  { %v4403_v40 = vmax.f32 %v4401_v11, %v4402_v27  ;;  %7038 = vmatprep.subr.bf16.mxu1 %v12363_v51  ;;  %12371 = vst [vmem:[#allocation33_spill] sm:$0xff] %v9754_v62  ;;  %12372 = vst [vmem:[#allocation34_spill] sm:$0xff] %v9764_v2  ;;  %v9788_v11 = vpack.c.bf16 %v46_v33, %v45_v8  ;;  %v59_v27 = vld [vmem:[%s11822_s3 + $0x110] sm:$0xff]  ;;  %v9812_v19 = vpack.c.bf16 %v50_v21, %v49_v34  ;;  %v12381_v38 = vld [vmem:[#allocation2_spill] sm:$0xff] }
 0x424   :  { %v4409_v58 = vrot.slane %v4408_v6, 2  ;;  %12373 = vst [vmem:[#allocation30_spill] sm:$0xff] %v9774_v52  ;;  %12375 = vst [vmem:[#allocation37_spill] sm:$0xff] %v9794_v3  ;;  %v9809_v31 = vpack.c.bf16 %v59_v27, %v58_v49  ;;  %v26_v49 = vld [vmem:[%s11823_s2 + $0x38] sm:$0xf] }
 0x425   :  { %v4404_v25 = vrot.slane %v4403_v40, 1  ;;  %12374 = vst [vmem:[#allocation35_spill] sm:$0xff] %v9788_v11  ;;  %12377 = vst [vmem:[#allocation58_spill] sm:$0xff] %v9812_v19  ;;  %v25_v27 = vld [vmem:[%s11823_s2 + $0x30] sm:$0xf] }
 0x426   :  { %v4410_v24 = vmax.f32 %v4408_v6, %v4409_v58  ;;  %7040 = vmatpush1.bf16.msra.mxu1 %v9724_v54  ;;  %12376 = vst [vmem:[#allocation65_spill] sm:$0xff] %v9809_v31  ;;  %v52_v6 = vld [vmem:[%s11822_s3 + $0xd8] sm:$0xff]  ;;  %7076 = vmatpush3.bf16.msra.mxu0 %v9809_v31  ;;  %v9834_v58 = vpack.c.bf16 %v54_v14, %v53_v1 }
 0x427   :  { %v4405_v22 = vmax.f32 %v4403_v40, %v4404_v25  ;;  %7041 = vmatprep.subr.bf16.mxu1 %v12363_v51  ;;  %v51_v40 = vld [vmem:[%s11822_s3 + $0xd0] sm:$0xff]  ;;  %7077 = vmatprep.subr.bf16.mxu0 %v12363_v51  ;;  %v56_v25 = vld [vmem:[%s11822_s3 + $0xf8] sm:$0xff] }
 0x428   :  { %v4411_v59 = vrot.slane %v4410_v24, 1  ;;  %v9824_v29 = vpack.c.bf16 %v52_v6, %v51_v40  ;;  %12379 = vst [vmem:[#allocation36_spill] sm:$0xff] %v9834_v58  ;;  %v9844_v36 = vpack.c.bf16 %v56_v25, %v55_v32  ;;  %v60_v14 = vld [vmem:[%s11822_s3 + $0x118] sm:$0xff]  ;;  %v61_v32 = vld [vmem:[%s11822_s3 + $0x120] sm:$0xff] }
 0x429   :  { %v4573_v41 = vsel %vm4564_vm10, %v4405_v22, %v4572_v45  ;;  %v6690_v22 = vld [vmem:[%s11823_s2 + $0x20] ss:$8 sm:$0x3]  ;;  %v9877_v25 = vpack.c.bf16 %v61_v32, %v60_v14 }
 0x42a   :  { %v4412_v53 = vmax.f32 %v4410_v24, %v4411_v59  ;;  %7043 = vmatpush1.bf16.msra.mxu1 %v9734_v23  ;;  %12378 = vst [vmem:[#allocation38_spill] sm:$0xff] %v9824_v29  ;;  %12380 = vst [vmem:[#allocation39_spill] sm:$0xff] %v9844_v36  ;;  %v9853_v13 = vrot.slane %v6690_v22, %v12381_v38  ;;  %v12383_v59 = vld [vmem:[#allocation4_spill] sm:$0xff] }
 0x42b   :  { %7044 = vmatprep.subr.bf16.mxu1 %v12363_v51  ;;  %12385 = vst [vmem:[#allocation45_spill] sm:$0xff] %v9877_v25  ;;  %7079 = vmatpush3.bf16.msra.mxu0 %v9877_v25 }
 0x42c   :  { %v4574_v39 = vsel %vm4566_vm11, %v4412_v53, %v4573_v41  ;;  %12382 = vst [vmem:[#allocation42_spill] sm:$0xff] %v9853_v13  ;;  %v9856_v53 = vrot.slane %v6690_v22, %v12383_v59  ;;  %v9895_v22 = vld [vmem:[%s11820_s0 + $0x88] sm:$0xff] }
 0x42d   :  { %6695 = vmatmul.mubr.msk.f32.gmra.mrb[2].mxu1 %vm4300_vm4, %v4574_v39 }
 0x42e   :  { %7046 = vmatpush1.bf16.msra.mxu1 %v9744_v20  ;;  %12384 = vst [vmem:[#allocation62_spill] sm:$0xff] %v9856_v53 }
 0x42f   :  { %7047 = vmatprep.subr.bf16.mxu1 %v12363_v51 }
 0x432   :  { %7049 = vmatpush1.bf16.msra.mxu1 %v9754_v62 }
 0x433   :  { %7050 = vmatprep.subr.bf16.mxu1 %v12363_v51 }
 0x436   :  { %7052 = vmatpush1.bf16.msra.mxu1 %v9764_v2 }
 0x437   :  { %7053 = vmatprep.subr.bf16.mxu1 %v12363_v51 }
 0x43a   :  { %7055 = vmatpush1.bf16.msra.mxu1 %v9774_v52 }
 0x43b   :  { %7056 = vmatprep.subr.bf16.mxu1 %v12363_v51 }
 0x43e   :  { %7058 = vmatpush1.bf16.msra.mxu1 %v9788_v11 }
 0x43f   :  { %7059 = vmatprep.subr.bf16.mxu1 %v12363_v51 }
 0x442   :  { %7061 = vmatpush1.bf16.msra.mxu1 %v9794_v3 }
 0x443   :  { %7062 = vmatprep.subr.bf16.mxu1 %v12363_v51 }
 0x446   :  { %7064 = vmatpush1.bf16.msra.mxu1 %v9812_v19 }
 0x447   :  { %7065 = vmatprep.subr.bf16.mxu1 %v12363_v51 }
 0x44a   :  { %7067 = vmatpush1.bf16.msra.mxu1 %v9824_v29 }
 0x44b   :  { %7068 = vmatprep.subr.bf16.mxu1 %v12363_v51 }
 0x44e   :  { %7070 = vmatpush1.bf16.msra.mxu1 %v9834_v58 }
 0x44f   :  { %7071 = vmatprep.subr.bf16.mxu1 %v12363_v51 }
 0x452   :  { %7073 = vmatpush1.bf16.msra.mxu1 %v9844_v36 }
 0x453   :  { %7080 = vmatprep.subr.bf16.mxu1 %v12363_v51 }
 0x4df   :  { %v4652_v24 = vpop.f32.mrb[0].mxu1 }
 0x4e0   :  { %v4654_v50 = vpop.f32.mrb[1].mxu1  ;;  %v4653_v41 = vadd.f32 %v4652_v24, %v9856_v53  ;;  %v9886_v24 = vld [vmem:[%s11820_s0 + $0x80] sm:$0xff] }
 0x4e1   :  { %v4655_v45 = vadd.f32 %v4654_v50, %v9853_v13  ;;  %237 = vperm.xlu1 %7363, %v9886_v24   ;;  %v12386_v50 = vmov 1  }
 0x4e2   :  { %v4663_v42 = vmax.f32 %v4653_v41, 0.0  ;;  %v9907_v41 = vld [vmem:[%s11820_s0 + $0x98] sm:$0xff] }
 0x4e3   :  { %v4664_v47 = vmax.f32 %v4655_v45, 0.0  ;;  %v9901_v45 = vld [vmem:[%s11820_s0 + $0x90] sm:$0xff] }
 0x4e5   :  { %v4675_v60 = vsel %vm4674_vm12, %v4664_v47, -inf  ;;  %7364 = vset.pattern.permute.xlu1 %v12386_v50  ;;  %v9924_v47 = vld [vmem:[%s11820_s0 + $0xa8] sm:$0xff] }
 0x4e6   :  { %540 = vperm.xlu1 %7364, %v9886_v24  }
 0x4ea   :  { %544 = vperm.xlu1 %7364, %v9895_v22  }
 0x4ee   :  { %548 = vperm.xlu1 %7364, %v9901_v45  }
 0x4f2   :  { %552 = vperm.xlu1 %7364, %v9907_v41  }
 0x500   :  { %v4658_v39 = vpop.f32.mrb[2].mxu1 }
 0x501   :  { %v4659_v0 = vadd.f32 %v4658_v39, %v9856_v53  ;;  %v4660_v44 = vpop.f32.mrb[3].mxu1  ;;  %v12387_v39 = vmov 2  }
 0x502   :  { %v4661_v28 = vadd.f32 %v4660_v44, %v9853_v13  ;;  %7365 = vset.pattern.permute.xlu1 %v12387_v39  ;;  %v12388_v44 = vmov 0  }
 0x503   :  { %v4665_v9 = vmax.f32 %v4659_v0, 0.0  ;;  %864 = vperm.xlu1 %7365, %v9895_v22   ;;  %v9915_v0 = vld [vmem:[%s11820_s0 + $0xa0] sm:$0xff] }
 0x504   :  { %v4666_v37 = vmax.f32 %v4661_v28, 0.0  ;;  %v116_v28 = vld [vmem:[%s11820_s0 + $0xc8] sm:$0xff] }
 0x505   :  { %v4667_v5 = vmax.f32 %v4663_v42, %v4665_v9  ;;  %v9938_v42 = vld [vmem:[%s11820_s0 + $0xd0] sm:$0xff] }
 0x506   :  { %v4676_v26 = vsel %vm4674_vm12, %v4666_v37, -inf  ;;  %v9945_v9 = vld [vmem:[%s11820_s0 + $0xb0] sm:$0xff]  ;;  %v57_v37 = vld [vmem:[%s11822_s3 + $0x100] sm:$0xf] }
 0x507   :  { %v4668_v10 = vrot.slane %v4667_v5, 4  ;;  %v4677_v61 = vmax.f32 %v4675_v60, %v4676_v26  ;;  %7366 = vset.pattern.permute.xlu1 %v12388_v44 }
 0x508   :  { %257 = vperm.xlu1 %7366, %v9915_v0  }
 0x509   :  { %v4669_v12 = vmax.f32 %v4667_v5, %v4668_v10  ;;  %v4678_v43 = vrot.slane %v4677_v61, 4 }
 0x50b   :  { %v4670_v15 = vrot.slane %v4669_v12, 2  ;;  %v4679_v30 = vmax.f32 %v4677_v61, %v4678_v43  ;;  %v114_v61 = vld [vmem:[%s11820_s0 + $0xb8] sm:$0xff]  ;;  %v115_v43 = vld [vmem:[%s11820_s0 + $0xc0] sm:$0xff] }
 0x50c   :  { %7368 = vset.pattern.permute.xlu1 %v12387_v39 }
 0x50d   :  { %v4671_v8 = vmax.f32 %v4669_v12, %v4670_v15  ;;  %v4680_v33 = vrot.slane %v4679_v30, 2  ;;  %868 = vperm.xlu1 %7368, %v9901_v45   ;;  %v118_v12 = vld [vmem:[%s11820_s0 + $0xd8] sm:$0xff]  ;;  %v119_v15 = vld [vmem:[%s11820_s0 + $0xe0] sm:$0xff] }
 0x50f   :  { %v4672_v4 = vrot.slane %v4671_v8, 1  ;;  %v4681_v48 = vmax.f32 %v4679_v30, %v4680_v33  ;;  %v120_v30 = vld [vmem:[%s11820_s0 + $0xe8] sm:$0xff]  ;;  %v122_v33 = vld [vmem:[%s11820_s0 + $0xf8] sm:$0xff] }
 0x511   :  { %v4682_v34 = vrot.slane %v4681_v48, 1  ;;  %v4673_v21 = vmax.f32 %v4671_v8, %v4672_v4  ;;  %7369 = vset.pattern.permute.xlu1 %v12388_v44  ;;  %v121_v8 = vld [vmem:[%s11820_s0 + $0xf0] sm:$0xff]  ;;  %v68_v4 = vld [vmem:[%s11822_s3 + $0x158] sm:$0xff]  ;;  %s7630_s0 = smov 96  }
 0x512   :  { %262 = vperm.xlu1 %7369, %v9924_v47  }
 0x513   :  { %v4683_v40 = vmax.f32 %v4681_v48, %v4682_v34  ;;  %v4684_v1 = vmul.f32 %v4673_v21, %v25_v27  ;;  %v6697_v48 = vld [vmem:[%s11822_s3 + $0x128] ss:$0 sm:$0xff] }
 0x515   :  { %v4685_v6 = vmul.f32 %v4683_v40, %v26_v49 }
 0x516   :  { %282 = vperm.xlu1 %7369, %v116_v28  }
 0x517   :  { %6696 = vmatprep.mubr.msk.f32.mxu1 %vm4674_vm12, %v4685_v6 }
 0x518   :  { %4754 = vmatmul.mubr.f32.vlgmr.msra.gmra.mrb[4].mxu1 %v4684_v1 }
 0x519   :  { %6854 = vmatprep.mubr.msk.f32.mxu1 %vm7629_vm13, %v12359_v18 }
 0x51a   :  { %7370 = vset.pattern.permute.xlu1 %v12386_v50 }
 0x51b   :  { %560 = vperm.xlu1 %7370, %v9924_v47  }
 0x51f   :  { %576 = vperm.xlu1 %7370, %v116_v28  }
 0x523   :  { %7371 = vset.pattern.permute.xlu1 %v12387_v39 }
 0x524   :  { %872 = vperm.xlu1 %7371, %v9907_v41  }
 0x528   :  { %7372 = vset.pattern.permute.xlu1 %v12388_v44 }
 0x529   :  { %287 = vperm.xlu1 %7372, %v9938_v42  }
 0x52d   :  { %7373 = vset.pattern.permute.xlu1 %v12386_v50 }
 0x52e   :  { %564 = vperm.xlu1 %7373, %v9945_v9  }
 0x532   :  { %7375 = vset.pattern.permute.xlu1 %v12387_v39 }
 0x533   :  { %876 = vperm.xlu1 %7375, %v9915_v0  }
 0x537   :  { %7376 = vset.pattern.permute.xlu1 %v12388_v44 }
 0x538   :  { %272 = vperm.xlu1 %7376, %v114_v61  }
 0x53c   :  { %7377 = vset.pattern.permute.xlu1 %v12386_v50 }
 0x53d   :  { %568 = vperm.xlu1 %7377, %v114_v61  }
 0x541   :  { %584 = vperm.xlu1 %7377, %v118_v12  }
 0x545   :  { %7378 = vset.pattern.permute.xlu1 %v12387_v39 }
 0x546   :  { %892 = vperm.xlu1 %7378, %v115_v43  }
 0x54a   :  { %896 = vperm.xlu1 %7378, %v116_v28  }
 0x54e   :  { %7379 = vset.pattern.permute.xlu1 %v12386_v50 }
 0x54f   :  { %588 = vperm.xlu1 %7379, %v119_v15  }
 0x553   :  { %7380 = vset.pattern.permute.xlu1 %v12387_v39 }
 0x554   :  { %884 = vperm.xlu1 %7380, %v9945_v9  }
 0x558   :  { %7381 = vset.pattern.permute.xlu1 %v12388_v44 }
 0x559   :  { %302 = vperm.xlu1 %7381, %v120_v30  }
 0x55d   :  { %7382 = vset.pattern.permute.xlu1 %v12386_v50 }
 0x55e   :  { %592 = vperm.xlu1 %7382, %v120_v30  }
 0x560   :  { %v10003_v27 = vpop.permute.xlu1 %237 }
 0x561   :  { %12389 = vst [vmem:[#allocation53_spill] sm:$0xff] %v10003_v27 }
 0x562   :  { %7383 = vset.pattern.permute.xlu1 %v12387_v39 }
 0x563   :  { %904 = vperm.xlu1 %7383, %v118_v12  }
 0x565   :  { %v10008_v40 = vpop.permute.xlu1 %540 }
 0x566   :  { %12390 = vst [vmem:[#allocation41_spill] sm:$0xff] %v10008_v40 }
 0x567   :  { %7384 = vset.pattern.permute.xlu1 %v12386_v50 }
 0x568   :  { %596 = vperm.xlu1 %7384, %v121_v8  }
 0x569   :  { %v10011_v6 = vpop.permute.xlu1 %544 }
 0x56a   :  { %12391 = vst [vmem:[#allocation44_spill] sm:$0xff] %v10011_v6 }
 0x56c   :  { %7385 = vset.pattern.permute.xlu1 %v12387_v39 }
 0x56d   :  { %908 = vperm.xlu1 %7385, %v119_v15   ;;  %v10013_v1 = vpop.permute.xlu1 %548 }
 0x56e   :  { %12392 = vst [vmem:[#allocation63_spill] sm:$0xff] %v10013_v1 }
 0x571   :  { %7386 = vset.pattern.permute.xlu1 %v12386_v50  ;;  %v10017_v14 = vpop.permute.xlu1 %552 }
 0x572   :  { %600 = vperm.xlu1 %7386, %v122_v33   ;;  %12393 = vst [vmem:[#allocation68_spill] sm:$0xff] %v10017_v14 }
 0x576   :  { %7388 = vset.pattern.permute.xlu1 %v12387_v39 }
 0x577   :  { %916 = vperm.xlu1 %7388, %v121_v8  }
 0x57b   :  { %920 = vperm.xlu1 %7388, %v122_v33  }
 0x57f   :  { %7389 = vset.pattern.permute.xlu1 %v12388_v44 }
 0x582   :  { %v10020_v32 = vpop.permute.xlu1 %864 }
 0x583   :  { %12394 = vst [vmem:[#allocation40_spill] sm:$0xff] %v10020_v32 }
 0x5eb   :  { %v4755_v5 = vpop.f32.mrb[4].mxu1 }
 0x5ec   :  { %v4756_v60 = vadd.f32 %v4755_v5, %v57_v37  ;;  %v4757_v26 = vpop.f32.mrb[5].mxu1 }
 0x5ed   :  { %v10049_v26 = vld [vmem:[%s11822_s3 + $0x160] sm:$0xff] }
 0x5ee   :  { %v4759_v10 = vmax.f32 %v4756_v60, 0.0 }
 0x5f0   :  { %6838 = vmatmul.mubr.msk.f32.vlgmr.msra.gmra.mrb[0].mxu0 %vm4764_vm14, %v4759_v10 }
 0x5f1   :  { %6842 = vmatprep.mubr.msk.f32.mxu0 %vm4841_vm15, %v68_v4 }
 0x6c3   :  { %v4834_v34 = vpop.f32.mrb[0].mxu0 }
 0x6c4   :  { %v9997_v21 = vadd.f32 %v6697_v48, %v4834_v34  ;;  %v6839_v49 = vpop.f32.mrb[1].mxu0 }
 0x6c6   :  { %4839 = vrot.lane.b32.xlu0 %v9997_v21, %s7630_s0 }
 0x6ca   :  { %556 = vperm.xlu0 %7367, %v9915_v0  }
 0x6ce   :  { %572 = vperm.xlu0 %7367, %v115_v43  }
 0x6d2   :  { %580 = vperm.xlu0 %7367, %v9938_v42  }
 0x6d6   :  { %7374 = vset.pattern.permute.xlu0 %v12387_v39 }
 0x6d7   :  { %860 = vperm.xlu0 %7374, %v9886_v24   ;;  %v10023_v24 = vpop.permute.xlu1 %257 }
 0x6d8   :  { %12395 = vst [vmem:[#allocation43_spill] sm:$0xff] %v10023_v24 }
 0x6db   :  { %880 = vperm.xlu0 %7374, %v9924_v47   ;;  %v10026_v0 = vpop.permute.xlu1 %868 }
 0x6dc   :  { %12396 = vst [vmem:[#allocation49_spill] sm:$0xff] %v10026_v0 }
 0x6df   :  { %900 = vperm.xlu0 %7374, %v9938_v42   ;;  %v10028_v47 = vpop.permute.xlu1 %262 }
 0x6e0   :  { %12397 = vst [vmem:[#allocation72_spill] sm:$0xff] %v10028_v47 }
 0x6e3   :  { %888 = vperm.xlu0 %7374, %v114_v61  }
 0x6e7   :  { %912 = vperm.xlu0 %7374, %v120_v30   ;;  %v139_v30 = vld [vmem:[%s11821_s1 + $0x40] sm:$0x7] }
 0x6e8   :  { %v670_v48 = vrot.slane %v139_v30, %v12381_v38  ;;  %v990_v19 = vrot.slane %v139_v30, %v12353_v63 }
 0x6ea   :  { %v747_v13 = vmul.f32 %v670_v48, %v10008_v40 }
 0x6eb   :  { %7387 = vset.pattern.permute.xlu0 %v12388_v44 }
 0x6ec   :  { %242 = vperm.xlu0 %7387, %v9895_v22   ;;  %v10030_v22 = vpop.permute.xlu1 %282 }
 0x6ed   :  { %12398 = vst [vmem:[#allocation47_spill] sm:$0xff] %v10030_v22 }
 0x6f0   :  { %247 = vperm.xlu0 %7387, %v9901_v45   ;;  %v10032_v45 = vpop.permute.xlu1 %560 }
 0x6f1   :  { %12399 = vst [vmem:[#allocation80_spill] sm:$0xff] %v10032_v45 }
 0x6f4   :  { %252 = vperm.xlu0 %7387, %v9907_v41   ;;  %v10034_v28 = vpop.permute.xlu1 %576 }
 0x6f5   :  { %12400 = vst [vmem:[#allocation87_spill] sm:$0xff] %v10034_v28 }
 0x6f8   :  { %277 = vperm.xlu0 %7387, %v115_v43   ;;  %v10036_v41 = vpop.permute.xlu1 %872  ;;  %v143_v43 = vld [vmem:[%s11821_s1 + $0x50] sm:$0x7] }
 0x6f9   :  { %12401 = vst [vmem:[#allocation84_spill] sm:$0xff] %v10036_v41  ;;  %v1006_v31 = vrot.slane %v143_v43, %v12353_v63 }
 0x6fc   :  { %267 = vperm.xlu0 %7387, %v9945_v9   ;;  %v10038_v42 = vpop.permute.xlu1 %287 }
 0x700   :  { %292 = vperm.xlu0 %7387, %v118_v12   ;;  %v10040_v37 = vpop.permute.xlu1 %564 }
 0x701   :  { %12402 = vst [vmem:[#allocation76_spill] sm:$0xff] %v10040_v37 }
 0x704   :  { %297 = vperm.xlu0 %7387, %v119_v15   ;;  %v10042_v9 = vpop.permute.xlu1 %876 }
 0x705   :  { %12403 = vst [vmem:[#allocation78_spill] sm:$0xff] %v10042_v9  ;;  %v1071_v29 = vmul.f32 %v1006_v31, %v10042_v9  ;;  %v10159_v9 = vld [vmem:[%s11821_s1 + $0x68] sm:$0x7] }
 0x708   :  { %307 = vperm.xlu0 %7387, %v121_v8   ;;  %v10044_v5 = vpop.permute.xlu1 %272  ;;  %v398_v8 = vrot.slane %v143_v43, %v12383_v59 }
 0x709   :  { %12404 = vst [vmem:[#allocation61_spill] sm:$0xff] %v10044_v5 }
 0x70c   :  { %312 = vperm.xlu0 %7387, %v122_v33   ;;  %v10055_v10 = vpop.permute.xlu1 %568  ;;  %v686_v33 = vrot.slane %v143_v43, %v12381_v38 }
 0x70d   :  { %12405 = vst [vmem:[#allocation50_spill] sm:$0xff] %v10055_v10 }
 0x710   :  { %v10058_v61 = vpop.permute.xlu1 %584 }
 0x714   :  { %v10060_v12 = vpop.permute.xlu1 %892 }
 0x718   :  { %v10076_v49 = vpop.permute.xlu1 %896 }
 0x71c   :  { %v10087_v3 = vpop.permute.xlu1 %588 }
 0x71d   :  { %12407 = vst [vmem:[#allocation54_spill] sm:$0xff] %v10087_v3 }
 0x720   :  { %v10092_v2 = vpop.permute.xlu1 %884 }
 0x721   :  { %12409 = vst [vmem:[#allocation56_spill] sm:$0xff] %v10092_v2 }
 0x738   :  { %v4840_v60 = vpop.permute.xlu0 %4839 }
 0x739   :  { %6840 = vmatprep.subr.msk.mxu0 %vm4579_vm1, %v4840_v60 }
 0x73a   :  { %6841 = vmatpush3.msk.msra.mxu0 %vm4579_vm1, %v4840_v60  ;;  %v463_v60 = vmul.f32 %v398_v8, %v10023_v24  ;;  %v10168_v24 = vld [vmem:[%s11821_s1 + $0x58] sm:$0x7] }
 0x73b   :  { %6843 = vmatmul.mubr.msk.f32.vlgmr.msra.gmra.mrb[2].mxu0 %vm4841_vm15, %v10049_v26 }
 0x73c   :  { %6847 = vmatprep.mubr.msk.f32.mxu0 %vm4841_vm15, %v68_v4  ;;  %v382_v4 = vrot.slane %v139_v30, %v12383_v59 }
 0x73e   :  { %v459_v53 = vmul.f32 %v382_v4, %v10003_v27 }
 0x740   :  { %v779_v11 = vadd.f32 %v747_v13, %v459_v53  ;;  %v10119_v53 = vld [vmem:[%s11821_s1 + $0x64] sm:$0x7] }
 0x741   :  { %v418_v20 = vrot.slane %v10119_v53, %v12383_v59  ;;  %v706_v57 = vrot.slane %v10119_v53, %v12381_v38 }
 0x749   :  { %v10065_v15 = vpop.permute.xlu0 %556 }
 0x74a   :  { %12406 = vst [vmem:[#allocation82_spill] sm:$0xff] %v10065_v15  ;;  %v751_v25 = vmul.f32 %v686_v33, %v10065_v15  ;;  %v756_v15 = vmul.f32 %v706_v57, %v10034_v28  ;;  %v147_v28 = vld [vmem:[%s11821_s1 + $0x60] sm:$0x7] }
 0x74c   :  { %v783_v58 = vadd.f32 %v751_v25, %v463_v60 }
 0x74d   :  { %v10074_v34 = vpop.permute.xlu0 %572 }
 0x74e   :  { %v1103_v33 = vadd.f32 %v1071_v29, %v783_v58  ;;  %v140_v29 = vld [vmem:[%s11821_s1 + $0x44] sm:$0x7]  ;;  %v144_v58 = vld [vmem:[%s11821_s1 + $0x54] sm:$0x7] }
 0x74f   :  { %v402_v62 = vrot.slane %v144_v58, %v12383_v59  ;;  %v386_v23 = vrot.slane %v140_v29, %v12383_v59  ;;  %v690_v54 = vrot.slane %v144_v58, %v12381_v38 }
 0x750   :  { %v10098_v25 = vmul.f32 0.57735026, %v1103_v33 }
 0x751   :  { %v10083_v36 = vpop.permute.xlu0 %580 }
 0x752   :  { %v1208_v13 = vsel %vm1147_vm0, %v10098_v25, -inf }
 0x756   :  { %v10089_v52 = vpop.permute.xlu0 %860 }
 0x757   :  { %12408 = vst [vmem:[#allocation79_spill] sm:$0xff] %v10089_v52  ;;  %v1067_v8 = vmul.f32 %v990_v19, %v10089_v52  ;;  %v10106_v19 = vpop.permute.xlu1 %302  ;;  %v464_v52 = vmul.f32 %v402_v62, %v10028_v47  ;;  %v698_v62 = vrot.slane %v10146_v17, %v12381_v38 }
 0x759   :  { %v1099_v43 = vadd.f32 %v1067_v8, %v779_v11  ;;  %v674_v8 = vrot.slane %v140_v29, %v12381_v38 }
 0x75a   :  { %v10094_v4 = vpop.permute.xlu0 %880 }
 0x75b   :  { %12410 = vst [vmem:[#allocation69_spill] sm:$0xff] %v10094_v4  ;;  %v10096_v48 = vmul.f32 0.57735026, %v1099_v43  ;;  %v10121_v60 = vpop.permute.xlu1 %592  ;;  %v141_v43 = vld [vmem:[%s11821_s1 + $0x48] sm:$0x7]  ;;  %v748_v46 = vmul.f32 %v674_v8, %v10011_v6  ;;  %v468_v8 = vmul.f32 %v418_v20, %v10030_v22  ;;  %v410_v20 = vrot.slane %v10146_v17, %v12383_v59 }
 0x75c   :  { %v678_v35 = vrot.slane %v141_v43, %v12381_v38  ;;  %v390_v27 = vrot.slane %v141_v43, %v12383_v59  ;;  %v1010_v22 = vrot.slane %v144_v58, %v12353_v63  ;;  %v702_v58 = vrot.slane %v147_v28, %v12381_v38  ;;  %v10198_v6 = vld [vmem:[%s11821_s1 + $0x6c] sm:$0x7] }
 0x75d   :  { %v1196_v31 = vsel %vm1147_vm0, %v10096_v48, -inf }
 0x75e   :  { %1197 = vmax.xlane.f32.xlu1 %v1196_v31  ;;  %v10102_v30 = vpop.permute.xlu0 %900  ;;  %v142_v31 = vld [vmem:[%s11821_s1 + $0x4c] sm:$0x7]  ;;  %v749_v47 = vmul.f32 %v678_v35, %v10013_v1  ;;  %v694_v35 = vrot.slane %v10168_v24, %v12381_v38  ;;  %v754_v1 = vmul.f32 %v698_v62, %v10055_v10  ;;  %v152_v10 = vld [vmem:[%s11821_s1 + $0x74] sm:$0x7] }
 0x75f   :  { %v682_v56 = vrot.slane %v142_v31, %v12381_v38  ;;  %v10152_v55 = vpop.permute.xlu1 %904  ;;  %v1002_v57 = vrot.slane %v142_v31, %v12353_v63 }
 0x760   :  { %v753_v62 = vmul.f32 %v694_v35, %v10040_v37  ;;  %v1030_v35 = vrot.slane %v10159_v9, %v12353_v63 }
 0x762   :  { %1209 = vmax.xlane.f32.xlu1 %v1208_v13  ;;  %v10108_v11 = vpop.permute.xlu0 %888  ;;  %v994_v13 = vrot.slane %v140_v29, %v12353_v63  ;;  %v998_v29 = vrot.slane %v141_v43, %v12353_v63 }
 0x763   :  { %12411 = vst [vmem:[#allocation86_spill] sm:$0xff] %v10108_v11 }
 0x764   :  { %v1068_v7 = vmul.f32 %v994_v13, %v10020_v32  ;;  %v752_v13 = vmul.f32 %v690_v54, %v10032_v45  ;;  %v1069_v54 = vmul.f32 %v998_v29, %v10026_v0  ;;  %v422_v45 = vrot.slane %v10159_v9, %v12383_v59 }
 0x765   :  { %v466_v0 = vmul.f32 %v410_v20, %v10044_v5 }
 0x766   :  { %v10124_v33 = vpop.permute.xlu0 %912  ;;  %v784_v29 = vadd.f32 %v752_v13, %v464_v52  ;;  %v1070_v52 = vmul.f32 %v1002_v57, %v10036_v41  ;;  %v1072_v13 = vmul.f32 %v1010_v22, %v10094_v4  ;;  %v1022_v57 = vrot.slane %v147_v28, %v12353_v63 }
 0x767   :  { %v755_v22 = vmul.f32 %v702_v58, %v10074_v34 }
 0x768   :  { %v1104_v58 = vadd.f32 %v1072_v13, %v784_v29  ;;  %v151_v13 = vld [vmem:[%s11821_s1 + $0x70] sm:$0x7] }
 0x76a   :  { %v10255_v4 = vmul.f32 0.57735026, %v1104_v58 }
 0x76b   :  { %v10150_v16 = vpop.permute.xlu0 %242 }
 0x76c   :  { %12412 = vst [vmem:[#allocation73_spill] sm:$0xff] %v10150_v16  ;;  %v460_v40 = vmul.f32 %v386_v23, %v10150_v16  ;;  %v750_v23 = vmul.f32 %v682_v56, %v10017_v14  ;;  %v788_v14 = vadd.f32 %v756_v15, %v468_v8  ;;  %v10192_v16 = vpop.permute.xlu1 %596  ;;  %v469_v15 = vmul.f32 %v422_v45, %v10038_v42 }
 0x76d   :  { %12413 = vst [vmem:[#allocation85_spill] sm:$0xff] %v10192_v16  ;;  %v710_v8 = vrot.slane %v10159_v9, %v12381_v38  ;;  %v714_v45 = vrot.slane %v10198_v6, %v12381_v38  ;;  %v1014_v9 = vrot.slane %v10168_v24, %v12353_v63 }
 0x76e   :  { %v780_v43 = vadd.f32 %v748_v46, %v460_v40  ;;  %v394_v46 = vrot.slane %v142_v31, %v12383_v59 }
 0x76f   :  { %v10184_v32 = vpop.permute.xlu0 %247  ;;  %v1073_v37 = vmul.f32 %v1014_v9, %v10092_v2 }
 0x770   :  { %v461_v56 = vmul.f32 %v390_v27, %v10184_v32  ;;  %v1100_v40 = vadd.f32 %v1068_v7, %v780_v43  ;;  %v1026_v27 = vrot.slane %v10119_v53, %v12353_v63  ;;  %v414_v53 = vrot.slane %v147_v28, %v12383_v59 }
 0x772   :  { %v781_v31 = vadd.f32 %v749_v47, %v461_v56  ;;  %v10202_v7 = vmul.f32 0.57735026, %v1100_v40  ;;  %v786_v56 = vadd.f32 %v754_v1, %v466_v0  ;;  %v757_v1 = vmul.f32 %v710_v8, %v10083_v36 }
 0x773   :  { %v10209_v20 = vpop.permute.xlu0 %252  ;;  %v1018_v0 = vrot.slane %v10146_v17, %v12353_v63  ;;  %v758_v8 = vmul.f32 %v714_v45, %v10058_v61  ;;  %v1075_v17 = vmul.f32 %v1022_v57, %v10060_v12 }
 0x774   :  { %12414 = vst [vmem:[#allocation90_spill] sm:$0xff] %v10209_v20  ;;  %v462_v43 = vmul.f32 %v394_v46, %v10209_v20  ;;  %v1199_v47 = vsel %vm1147_vm0, %v10202_v7, -inf  ;;  %v1101_v40 = vadd.f32 %v1069_v54, %v781_v31  ;;  %v1076_v46 = vmul.f32 %v1026_v27, %v10076_v49  ;;  %v10233_v31 = vpop.permute.xlu1 %908 }
 0x775   :  { %1200 = vmax.xlane.f32.xlu0 %v1199_v47  ;;  %12415 = vst [vmem:[#allocation88_spill] sm:$0xff] %v10233_v31  ;;  %v434_v47 = vrot.slane %v152_v10, %v12383_v59  ;;  %v1074_v45 = vmul.f32 %v1018_v0, %v10108_v11 }
 0x776   :  { %v782_v5 = vadd.f32 %v750_v23, %v462_v43  ;;  %v10231_v54 = vmul.f32 0.57735026, %v1101_v40  ;;  %v406_v23 = vrot.slane %v10168_v24, %v12383_v59  ;;  %v722_v40 = vrot.slane %v152_v10, %v12381_v38 }
 0x777   :  { %v10229_v28 = vpop.permute.xlu0 %277  ;;  %v1108_v24 = vadd.f32 %v1076_v46, %v788_v14  ;;  %v1042_v14 = vrot.slane %v152_v10, %v12353_v63  ;;  %v472_v0 = vmul.f32 %v434_v47, %v10106_v19  ;;  %v153_v10 = vld [vmem:[%s11821_s1 + $0x78] sm:$0x7] }
 0x778   :  { %v467_v27 = vmul.f32 %v414_v53, %v10229_v28  ;;  %v1102_v43 = vadd.f32 %v1070_v52, %v782_v5  ;;  %v1202_v29 = vsel %vm1147_vm0, %v10231_v54, -inf  ;;  %v789_v5 = vadd.f32 %v757_v1, %v469_v15  ;;  %v10267_v1 = vpop.permute.xlu1 %600 }
 0x779   :  { %1203 = vmax.xlane.f32.xlu0 %v1202_v29  ;;  %v1077_v52 = vmul.f32 %v1030_v35, %v10102_v30  ;;  %v718_v15 = vrot.slane %v151_v13, %v12381_v38  ;;  %v1034_v35 = vrot.slane %v10198_v6, %v12353_v63  ;;  %v760_v58 = vmul.f32 %v722_v40, %v10121_v60 }
 0x77a   :  { %v787_v53 = vadd.f32 %v755_v22, %v467_v27  ;;  %v10249_v20 = vmul.f32 0.57735026, %v1102_v43  ;;  %v426_v27 = vrot.slane %v10198_v6, %v12383_v59  ;;  %v1211_v6 = vsel %vm1147_vm0, %v10255_v4, -inf }
 0x77b   :  { %v10253_v57 = vpop.permute.xlu0 %267  ;;  %v1109_v29 = vadd.f32 %v1077_v52, %v789_v5 }
 0x77c   :  { %12416 = vst [vmem:[#allocation94_spill] sm:$0xff] %v10253_v57  ;;  %v465_v41 = vmul.f32 %v406_v23, %v10253_v57  ;;  %v1205_v22 = vsel %vm1147_vm0, %v10249_v20, -inf  ;;  %v1107_v46 = vadd.f32 %v1075_v17, %v787_v53  ;;  %v10271_v23 = vmul.f32 0.57735026, %v1108_v24 }
 0x77d   :  { %1206 = vmax.xlane.f32.xlu0 %v1205_v22  ;;  %v1106_v53 = vadd.f32 %v1074_v45, %v786_v56  ;;  %v759_v24 = vmul.f32 %v718_v15, %v10087_v3  ;;  %v1078_v22 = vmul.f32 %v1034_v35, %v10152_v55  ;;  %v792_v57 = vadd.f32 %v760_v58, %v472_v0 }
 0x77e   :  { %v785_v9 = vadd.f32 %v753_v62, %v465_v41  ;;  %v10280_v17 = vmul.f32 0.57735026, %v1107_v46  ;;  %v1038_v41 = vrot.slane %v151_v13, %v12353_v63  ;;  %v430_v62 = vrot.slane %v151_v13, %v12383_v59  ;;  %v154_v13 = vld [vmem:[%s11821_s1 + $0x7c] sm:$0x7] }
 0x77f   :  { %v10276_v43 = vpop.permute.xlu0 %292  ;;  %v726_v46 = vrot.slane %v153_v10, %v12381_v38  ;;  %v1223_v52 = vsel %vm1147_vm0, %v10271_v23, -inf  ;;  %v10300_v45 = vmul.f32 0.57735026, %v1109_v29  ;;  %v1046_v0 = vrot.slane %v153_v10, %v12353_v63 }
 0x780   :  { %v470_v47 = vmul.f32 %v426_v27, %v10276_v43  ;;  %v1105_v40 = vadd.f32 %v1073_v37, %v785_v9  ;;  %v1220_v11 = vsel %vm1147_vm0, %v10280_v17, -inf  ;;  %v1080_v37 = vmul.f32 %v1042_v14, %v10124_v33 }
 0x781   :  { %1212 = vmax.xlane.f32.xlu0 %v1211_v6  ;;  %1221 = vmax.xlane.f32.xlu1 %v1220_v11  ;;  %v10302_v27 = vmul.f32 0.57735026, %v1106_v53  ;;  %v1079_v11 = vmul.f32 %v1038_v41, %v10233_v31  ;;  %v438_v14 = vrot.slane %v153_v10, %v12383_v59  ;;  %v761_v9 = vmul.f32 %v726_v46, %v10192_v16 }
 0x782   :  { %v790_v2 = vadd.f32 %v758_v8, %v470_v47  ;;  %v10290_v56 = vmul.f32 0.57735026, %v1105_v40  ;;  %v10304_v8 = vpop.permute.xlu1 %916  ;;  %v730_v29 = vrot.slane %v154_v13, %v12381_v38  ;;  %v1226_v47 = vsel %vm1147_vm0, %v10300_v45, -inf }
 0x783   :  { %v10296_v5 = vpop.permute.xlu0 %297  ;;  %12418 = vst [vmem:[#allocation57_spill] sm:$0xff] %v10304_v8  ;;  %v1217_v41 = vsel %vm1147_vm0, %v10302_v27, -inf  ;;  %v1112_v40 = vadd.f32 %v1080_v37, %v792_v57  ;;  %v442_v10 = vrot.slane %v154_v13, %v12383_v59  ;;  %v1081_v46 = vmul.f32 %v1046_v0, %v10304_v8 }
 0x784   :  { %12417 = vst [vmem:[#allocation20_spill] sm:$0xff] %v10296_v5  ;;  %v471_v15 = vmul.f32 %v430_v62, %v10296_v5  ;;  %v1214_v35 = vsel %vm1147_vm0, %v10290_v56, -inf  ;;  %v1110_v58 = vadd.f32 %v1078_v22, %v790_v2  ;;  %v1050_v22 = vrot.slane %v154_v13, %v12353_v63 }
 0x785   :  { %1224 = vmax.xlane.f32.xlu0 %v1223_v52  ;;  %1215 = vmax.xlane.f32.xlu1 %v1214_v35  ;;  %v10335_v37 = vmul.f32 0.57735026, %v1112_v40 }
 0x786   :  { %v791_v6 = vadd.f32 %v759_v24, %v471_v15  ;;  %v10320_v62 = vmul.f32 0.57735026, %v1110_v58  ;;  %v10326_v52 = vpop.permute.xlu1 %920  ;;  %v762_v15 = vmul.f32 %v730_v29, %v10267_v1 }
 0x787   :  { %v10314_v53 = vpop.permute.xlu0 %307 }
 0x788   :  { %12419 = vst [vmem:[#allocation59_spill] sm:$0xff] %v10314_v53  ;;  %v473_v2 = vmul.f32 %v438_v14, %v10314_v53  ;;  %v1111_v24 = vadd.f32 %v1079_v11, %v791_v6  ;;  %v1229_v57 = vsel %vm1147_vm0, %v10320_v62, -inf  ;;  %v1082_v14 = vmul.f32 %v1050_v22, %v10326_v52 }
 0x789   :  { %1227 = vmax.xlane.f32.xlu0 %v1226_v47  ;;  %1218 = vmax.xlane.f32.xlu1 %v1217_v41  ;;  %v1235_v6 = vsel %vm1147_vm0, %v10335_v37, -inf }
 0x78a   :  { %v793_v35 = vadd.f32 %v761_v9, %v473_v2  ;;  %v10329_v16 = vmul.f32 0.57735026, %v1111_v24 }
 0x78b   :  { %v10331_v58 = vpop.permute.xlu0 %312 }
 0x78c   :  { %v474_v13 = vmul.f32 %v442_v10, %v10331_v58  ;;  %v1232_v11 = vsel %vm1147_vm0, %v10329_v16, -inf  ;;  %v1113_v0 = vadd.f32 %v1081_v46, %v793_v35 }
 0x78d   :  { %1230 = vmax.xlane.f32.xlu0 %v1229_v57  ;;  %1233 = vmax.xlane.f32.xlu1 %v1232_v11 }
 0x78e   :  { %v794_v9 = vadd.f32 %v762_v15, %v474_v13  ;;  %v10343_v29 = vmul.f32 0.57735026, %v1113_v0 }
 0x790   :  { %v1114_v47 = vadd.f32 %v1082_v14, %v794_v9  ;;  %v1238_v41 = vsel %vm1147_vm0, %v10343_v29, -inf }
 0x791   :  { %1236 = vmax.xlane.f32.xlu0 %v1235_v6  ;;  %1239 = vmax.xlane.f32.xlu1 %v1238_v41 }
 0x792   :  { %v10347_v40 = vmul.f32 0.57735026, %v1114_v47 }
 0x794   :  { %v1241_v2 = vsel %vm1147_vm0, %v10347_v40, -inf }
 0x795   :  { %1242 = vmax.xlane.f32.xlu0 %v1241_v2  ;;  %v10363_v2 = vld [vmem:[%s11822_s3 + $0x170] sm:$0xff] }
 0x7eb   :  { %v1198_v10 = vpop.xlane.xlu1 %1197 }
 0x7ec   :  { %v1260_v24 = vsub.f32 %v10096_v48, %v1198_v10 }
 0x7ee   :  { %v1308_v22 = vmul.f32 1.442695, %v1260_v24 }
 0x7ef   :  { %v1210_v13 = vpop.xlane.xlu1 %1209 }
 0x7f0   :  { %7529 = vpow2.f32 %v1308_v22  ;;  %v1264_v14 = vsub.f32 %v10098_v25, %v1210_v13  ;;  %v10368_v25 = vld [vmem:[%s11822_s3 + $0x168] sm:$0xff] }
 0x7f2   :  { %v1316_v6 = vmul.f32 1.442695, %v1264_v14 }
 0x7fa   :  { %v10352_v46 = vpop.eup %7529 }
 0x7fb   :  { %v1388_v15 = vsel %vm1147_vm0, %v10352_v46, 0.0 }
 0x7fc   :  { %1389 = vadd.xlane.f32.xlu1 %v1388_v15 }
 0x802   :  { %v1201_v35 = vpop.xlane.xlu0 %1200 }
 0x803   :  { %v1261_v57 = vsub.f32 %v10202_v7, %v1201_v35 }
 0x805   :  { %v1310_v11 = vmul.f32 1.442695, %v1261_v57 }
 0x806   :  { %v1204_v0 = vpop.xlane.xlu0 %1203 }
 0x807   :  { %7531 = vpow2.f32 %v1310_v11  ;;  %v1262_v9 = vsub.f32 %v10231_v54, %v1204_v0 }
 0x809   :  { %v1312_v48 = vmul.f32 1.442695, %v1262_v9  ;;  %v12420_v9 = vmov 0 }
 0x80a   :  { %v1207_v47 = vpop.xlane.xlu0 %1206  ;;  %v12421_v9 = vsel %vm10380_vm2, 4294967295, %v12420_v9 }
 0x80b   :  { %7533 = vpow2.f32 %v1312_v48  ;;  %v1263_v41 = vsub.f32 %v10249_v20, %v1207_v47  ;;  %12422 = vst [vmem:[#allocation23_spill] sm:$0xff] %v12421_v9 }
 0x80c   :  { %7535 = vpow2.f32 %v1316_v6 }
 0x80d   :  { %v1314_v7 = vmul.f32 1.442695, %v1263_v41 }
 0x80e   :  { %v6844_v10 = vpop.f32.mrb[2].mxu0  ;;  %v1213_v24 = vpop.xlane.xlu0 %1212 }
 0x80f   :  { %v4926_v54 = vmul.f32 %v6844_v10, %v10363_v2  ;;  %v1222_v22 = vpop.xlane.xlu1 %1221  ;;  %7537 = vpow2.f32 %v1314_v7  ;;  %v1265_v20 = vsub.f32 %v10255_v4, %v1213_v24  ;;  %v4916_v35 = vpop.f32.mrb[3].mxu0  ;;  %v12423_v24 = vld [vmem:[#allocation6_spill] sm:$0xff] }
 0x810   :  { %v1268_v15 = vsub.f32 %v10280_v17, %v1222_v22  ;;  %v4925_v13 = vmul.f32 %v4916_v35, %v10368_v25 }
 0x811   :  { %v10373_v57 = vpop.eup %7531  ;;  %v1318_v11 = vmul.f32 1.442695, %v1265_v20 }
 0x812   :  { %v1324_v14 = vmul.f32 1.442695, %v1268_v15  ;;  %v1391_v0 = vsel %vm1147_vm0, %v10373_v57, 0.0  ;;  %v7081_v48 = vpack.c.bf16 %v4926_v54, %v4925_v13  ;;  %v1225_v4 = vpop.xlane.xlu0 %1224 }
 0x813   :  { %v1216_v6 = vpop.xlane.xlu1 %1215  ;;  %1392 = vadd.xlane.f32.xlu0 %v1391_v0  ;;  %7539 = vpow2.f32 %v1318_v11  ;;  %v1269_v17 = vsub.f32 %v10271_v23, %v1225_v4 }
 0x814   :  { %v1266_v47 = vsub.f32 %v10290_v56, %v1216_v6  ;;  %7541 = vpow2.f32 %v1324_v14  ;;  %7083 = vmatpush3.bf16.xpose.msk.msra.mxu1 %vm10380_vm2, %v7081_v48 }
 0x815   :  { %v10388_v41 = vpop.eup %7533  ;;  %v1326_v7 = vmul.f32 1.442695, %v1269_v17  ;;  %7122 = vmatprep.subr.msk.bf16.mxu1 %vm8776_vm3, %v12423_v24  ;;  %v12425_v17 = vld [vmem:[#allocation7_spill] sm:$0xff] }
 0x816   :  { %v1320_v10 = vmul.f32 1.442695, %v1266_v47  ;;  %v1228_v54 = vpop.xlane.xlu0 %1227  ;;  %v1394_v15 = vsel %vm1147_vm0, %v10388_v41, 0.0  ;;  %v10397_v35 = vpop.eup %7535 }
 0x817   :  { %v1219_v20 = vpop.xlane.xlu1 %1218  ;;  %7543 = vpow2.f32 %v1326_v7  ;;  %v1270_v23 = vsub.f32 %v10300_v45, %v1228_v54  ;;  %1395 = vadd.xlane.f32.xlu1 %v1394_v15 }
 0x818   :  { %v1267_v56 = vsub.f32 %v10302_v27, %v1219_v20  ;;  %7545 = vpow2.f32 %v1320_v10  ;;  %v1400_v27 = vsel %vm1147_vm0, %v10397_v35, 0.0 }
 0x819   :  { %v10399_v13 = vpop.eup %7537  ;;  %v1328_v11 = vmul.f32 1.442695, %v1270_v23 }
 0x81a   :  { %v1322_v14 = vmul.f32 1.442695, %v1267_v56  ;;  %v1231_v0 = vpop.xlane.xlu0 %1230  ;;  %v1397_v4 = vsel %vm1147_vm0, %v10399_v13, 0.0 }
 0x81b   :  { %v1234_v48 = vpop.xlane.xlu1 %1233  ;;  %7547 = vpow2.f32 %v1328_v11  ;;  %v1271_v6 = vsub.f32 %v10320_v62, %v1231_v0  ;;  %6855 = vmatmul.mubr.msk.f32.vlgmr.msra.gmra.mrb[6].mxu1 %vm4764_vm14, %v9997_v21  ;;  %1398 = vadd.xlane.f32.xlu0 %v1397_v4 }
 0x81c   :  { %v1272_v45 = vsub.f32 %v10329_v16, %v1234_v48  ;;  %7549 = vpow2.f32 %v1322_v14  ;;  %1401 = vadd.xlane.f32.xlu1 %v1400_v27  ;;  %7125 = vmatpush1.bf16.msk.msra.mxu1 %vm8776_vm3, %v12425_v17  ;;  %vm5087_vm3 = vcmask 125952  }
 0x81d   :  { %v10412_v47 = vpop.eup %7539  ;;  %v1330_v7 = vmul.f32 1.442695, %v1271_v6  ;;  %5727 = vmatprep.mubr.f32.mxu1 %v12359_v18  ;;  %7126 = vmatprep.subr.bf16.mxu1 %v12363_v51 }
 0x81e   :  { %v1332_v10 = vmul.f32 1.442695, %v1272_v45  ;;  %v10416_v16 = vpop.eup %7541  ;;  %v1403_v62 = vsel %vm1147_vm0, %v10412_v47, 0.0 }
 0x81f   :  { %7551 = vpow2.f32 %v1330_v7  ;;  %1404 = vadd.xlane.f32.xlu0 %v1403_v62  ;;  %v1412_v24 = vsel %vm1147_vm0, %v10416_v16, 0.0  ;;  %v1240_v45 = vpop.xlane.xlu1 %1239 }
 0x820   :  { %7553 = vpow2.f32 %v1332_v10  ;;  %1413 = vadd.xlane.f32.xlu1 %v1412_v24  ;;  %v1274_v27 = vsub.f32 %v10343_v29, %v1240_v45 }
 0x821   :  { %v10422_v22 = vpop.eup %7543 }
 0x822   :  { %v10424_v54 = vpop.eup %7545  ;;  %v1415_v20 = vsel %vm1147_vm0, %v10422_v22, 0.0  ;;  %v1336_v17 = vmul.f32 1.442695, %v1274_v27 }
 0x823   :  { %1416 = vadd.xlane.f32.xlu0 %v1415_v20  ;;  %v1406_v15 = vsel %vm1147_vm0, %v10424_v54, 0.0 }
 0x824   :  { %1407 = vadd.xlane.f32.xlu1 %v1406_v15  ;;  %7555 = vpow2.f32 %v1336_v17  ;;  %v1237_v15 = vpop.xlane.xlu0 %1236 }
 0x825   :  { %v10430_v23 = vpop.eup %7547 }
 0x826   :  { %v10432_v56 = vpop.eup %7549  ;;  %v1418_v11 = vsel %vm1147_vm0, %v10430_v23, 0.0 }
 0x827   :  { %1419 = vadd.xlane.f32.xlu0 %v1418_v11  ;;  %v1409_v14 = vsel %vm1147_vm0, %v10432_v56, 0.0 }
 0x828   :  { %1410 = vadd.xlane.f32.xlu1 %v1409_v14 }
 0x829   :  { %v10438_v0 = vpop.eup %7551 }
 0x82a   :  { %v10440_v48 = vpop.eup %7553  ;;  %v1421_v4 = vsel %vm1147_vm0, %v10438_v0, 0.0 }
 0x82b   :  { %1422 = vadd.xlane.f32.xlu0 %v1421_v4  ;;  %v1424_v6 = vsel %vm1147_vm0, %v10440_v48, 0.0 }
 0x82c   :  { %1425 = vadd.xlane.f32.xlu1 %v1424_v6 }
 0x82e   :  { %v10449_v7 = vpop.eup %7555 }
 0x82f   :  { %v1430_v10 = vsel %vm1147_vm0, %v10449_v7, 0.0 }
 0x83d   :  { %4927 = vrot.lane.b32.xlu1 %v9997_v21, %s7631_s6  ;;  %v10458_v21 = vpop.xlane.xlu0 %1242 }
 0x861   :  { %1431 = vadd.xlane.f32.xlu1 %v1430_v10 }
 0x889   :  { %v1390_v62 = vpop.xlane.xlu1 %1389 }
 0x88a   :  { %7557 = vrcp.f32 %v1390_v62 }
 0x894   :  { %v7558_v24 = vpop.eup %7557 }
 0x895   :  { %v10454_v20 = vmul.f32 %v7558_v24, %v10352_v46 }
 0x897   :  { %1754 = vperm.xlu1 %7389, %v10454_v20  }
 0x89b   :  { %7390 = vset.pattern.permute.xlu1 %v12386_v50 }
 0x89c   :  { %2057 = vperm.xlu1 %7390, %v10454_v20  }
 0x8a0   :  { %v1393_v29 = vpop.xlane.xlu0 %1392 }
 0x8a1   :  { %7559 = vrcp.f32 %v1393_v29 }
 0x8a4   :  { %v1396_v11 = vpop.xlane.xlu1 %1395 }
 0x8a5   :  { %7561 = vrcp.f32 %v1396_v11 }
 0x8a8   :  { %v1399_v6 = vpop.xlane.xlu0 %1398 }
 0x8a9   :  { %v1402_v14 = vpop.xlane.xlu1 %1401  ;;  %7563 = vrcp.f32 %v1399_v6 }
 0x8aa   :  { %7565 = vrcp.f32 %v1402_v14 }
 0x8ab   :  { %v7560_v4 = vpop.eup %7559 }
 0x8ac   :  { %v10462_v45 = vmul.f32 %v7560_v4, %v10373_v57  ;;  %v1405_v11 = vpop.xlane.xlu0 %1404 }
 0x8ad   :  { %v10464_v46 = vpop.xlane.xlu1 %1413  ;;  %7567 = vrcp.f32 %v1405_v11 }
 0x8ae   :  { %2061 = vperm.xlu1 %7390, %v10462_v45  }
 0x8af   :  { %v7562_v27 = vpop.eup %7561 }
 0x8b0   :  { %v10468_v17 = vmul.f32 %v7562_v27, %v10388_v41  ;;  %v1417_v14 = vpop.xlane.xlu0 %1416 }
 0x8b1   :  { %v1408_v10 = vpop.xlane.xlu1 %1407  ;;  %7569 = vrcp.f32 %v1417_v14 }
 0x8b2   :  { %7391 = vset.pattern.permute.xlu1 %v12388_v44  ;;  %7571 = vrcp.f32 %v1408_v10 }
 0x8b3   :  { %1764 = vperm.xlu1 %7391, %v10468_v17   ;;  %v7564_v57 = vpop.eup %7563 }
 0x8b4   :  { %v10479_v29 = vmul.f32 %v7564_v57, %v10399_v13  ;;  %v7566_v13 = vpop.eup %7565  ;;  %v1273_v57 = vsub.f32 %v10335_v37, %v1237_v15  ;;  %v1420_v11 = vpop.xlane.xlu0 %1419 }
 0x8b5   :  { %v10472_v62 = vpop.xlane.xlu1 %1410  ;;  %v10495_v4 = vmul.f32 %v7566_v13, %v10397_v35  ;;  %v12428_v13 = vmov 3  }
 0x8b7   :  { %7392 = vset.pattern.permute.xlu1 %v12386_v50  ;;  %12426 = vst [vmem:[#allocation11_spill] sm:$0xff] %v10495_v4 }
 0x8b8   :  { %2065 = vperm.xlu1 %7392, %v10468_v17  }
 0x8b9   :  { %v10476_v24 = vpop.xlane.xlu1 %1425 }
 0x8bc   :  { %7393 = vset.pattern.permute.xlu1 %v12388_v44 }
 0x8bd   :  { %1769 = vperm.xlu1 %7393, %v10479_v29   ;;  %v4928_v41 = vpop.permute.xlu1 %4927 }
 0x8be   :  { %6845 = vmatprep.subr.msk.mxu0 %vm4579_vm1, %v4928_v41 }
 0x8bf   :  { %6846 = vmatpush3.msk.msra.mxu0 %vm4579_vm1, %v4928_v41  ;;  %v1275_v41 = vsub.f32 %v10347_v40, %v10458_v21 }
 0x8c0   :  { %6848 = vmatmul.mubr.msk.f32.vlgmr.msra.gmra.mrb[4].mxu0 %vm4841_vm15, %v10049_v26  ;;  %7084 = vmatprep.subr.bf16.mxu0 %v12363_v51  ;;  %v7568_v26 = vpop.eup %7567 }
 0x8c1   :  { %7394 = vset.pattern.permute.xlu1 %v12386_v50  ;;  %6861 = vmatprep.mubr.msk.f32.mxu0 %vm7629_vm13, %v12359_v18  ;;  %v10502_v6 = vmul.f32 %v7568_v26, %v10412_v47  ;;  %v7570_v27 = vpop.eup %7569  ;;  %v1334_v47 = vmul.f32 1.442695, %v1273_v57 }
 0x8c2   :  { %2069 = vperm.xlu1 %7394, %v10479_v29   ;;  %v10507_v35 = vmul.f32 %v7570_v27, %v10422_v22  ;;  %v1338_v22 = vmul.f32 1.442695, %v1275_v41  ;;  %v7572_v14 = vpop.eup %7571 }
 0x8c3   :  { %12427 = vst [vmem:[#allocation97_spill] sm:$0xff] %v10502_v6  ;;  %7573 = vpow2.f32 %v1334_v47  ;;  %v10521_v15 = vmul.f32 %v7572_v14, %v10424_v54 }
 0x8c4   :  { %7575 = vrcp.f32 %v1420_v11 }
 0x8c5   :  { %7577 = vpow2.f32 %v1338_v22 }
 0x8c6   :  { %7395 = vset.pattern.permute.xlu1 %v12387_v39  ;;  %7579 = vrcp.f32 %v10472_v62  ;;  %v1423_v62 = vpop.xlane.xlu0 %1422 }
 0x8c7   :  { %2377 = vperm.xlu1 %7395, %v10454_v20   ;;  %7581 = vrcp.f32 %v1423_v62 }
 0x8c8   :  { %7583 = vrcp.f32 %v10464_v46  ;;  %v72_v46 = vld [vmem:[%s11822_s3 + $0x178] sm:$0xff] }
 0x8c9   :  { %7585 = vrcp.f32 %v10476_v24  ;;  %v12431_v24 = vmov 4  }
 0x8cb   :  { %7396 = vset.pattern.permute.xlu1 %v12388_v44 }
 0x8cc   :  { %1774 = vperm.xlu1 %7396, %v10495_v4  }
 0x8cd   :  { %v10529_v26 = vpop.eup %7573 }
 0x8ce   :  { %v7576_v27 = vpop.eup %7575  ;;  %v1427_v54 = vsel %vm1147_vm0, %v10529_v26, 0.0 }
 0x8cf   :  { %v10535_v57 = vpop.eup %7577  ;;  %v10539_v47 = vmul.f32 %v7576_v27, %v10430_v23 }
 0x8d0   :  { %7397 = vset.pattern.permute.xlu1 %v12386_v50  ;;  %v1433_v41 = vsel %vm1147_vm0, %v10535_v57, 0.0  ;;  %v7580_v22 = vpop.eup %7579  ;;  %vm5094_vm0 = vcmask 130048  }
 0x8d1   :  { %2073 = vperm.xlu1 %7397, %v10495_v4   ;;  %v10547_v11 = vmul.f32 %v7580_v22, %v10432_v56  ;;  %v7582_v23 = vpop.eup %7581 }
 0x8d2   :  { %v10555_v14 = vmul.f32 %v7582_v23, %v10438_v0  ;;  %v73_v0 = vld [vmem:[%s11822_s3 + $0x180] sm:$0xff] }
 0x8d3   :  { %12429 = vst [vmem:[#allocation64_spill] sm:$0xff] %v10547_v11 }
 0x8d5   :  { %7398 = vset.pattern.permute.xlu1 %v12388_v44 }
 0x8d6   :  { %1779 = vperm.xlu1 %7398, %v10502_v6  }
 0x8da   :  { %1799 = vperm.xlu1 %7398, %v10507_v35  }
 0x8de   :  { %7399 = vset.pattern.permute.xlu1 %v12386_v50 }
 0x8df   :  { %2077 = vperm.xlu1 %7399, %v10502_v6  }
 0x8e3   :  { %2093 = vperm.xlu1 %7399, %v10507_v35  }
 0x8e7   :  { %7400 = vset.pattern.permute.xlu1 %v12387_v39 }
 0x8e8   :  { %2389 = vperm.xlu1 %7400, %v10479_v29  }
 0x8ec   :  { %7401 = vset.pattern.permute.xlu1 %v12428_v13 }
 0x8ed   :  { %2701 = vperm.xlu1 %7401, %v10462_v45  }
 0x8ee   :  { %v5082_v37 = vpop.f32.mrb[6].mxu1 }
 0x8ef   :  { %v10523_v40 = vmul.f32 0.35355338, %v5082_v37  ;;  %v6856_v21 = vpop.f32.mrb[7].mxu1  ;;  %v7584_v37 = vpop.eup %7583 }
 0x8f0   :  { %v10559_v56 = vmul.f32 %v7584_v37, %v10416_v16  ;;  %v10572_v16 = vpack.c.bf16 %v73_v0, %v72_v46  ;;  %v7586_v21 = vpop.eup %7585 }
 0x8f1   :  { %7402 = vset.pattern.permute.xlu1 %v12388_v44  ;;  %v5088_v10 = vsel %vm5087_vm3, %v10523_v40, -inf }
 0x8f2   :  { %1784 = vperm.xlu1 %7402, %v10521_v15   ;;  %5089 = vmax.xlane.f32.xlu0 %v5088_v10  ;;  %12430 = vst [vmem:[#allocation60_spill] sm:$0xff] %v10572_v16  ;;  %v10582_v10 = vmul.f32 %v7586_v21, %v10440_v48  ;;  %v1432_v48 = vpop.xlane.xlu1 %1431 }
 0x8f3   :  { %7086 = vmatpush3.bf16.msra.mxu0 %v10572_v16 }
 0x8f4   :  { %7087 = vmatprep.subr.bf16.mxu0 %v12363_v51  ;;  %12432 = vst [vmem:[#allocation103_spill] sm:$0xff] %v10582_v10 }
 0x8f6   :  { %7403 = vset.pattern.permute.xlu1 %v12386_v50  ;;  %1428 = vadd.xlane.f32.xlu0 %v1427_v54 }
 0x8f7   :  { %2081 = vperm.xlu1 %7403, %v10521_v15  }
 0x8fa   :  { %1434 = vadd.xlane.f32.xlu0 %v1433_v41 }
 0x8fb   :  { %2097 = vperm.xlu1 %7403, %v10539_v47  }
 0x8ff   :  { %7404 = vset.pattern.permute.xlu1 %v12428_v13 }
 0x900   :  { %2705 = vperm.xlu1 %7404, %v10468_v17  }
 0x904   :  { %7405 = vset.pattern.permute.xlu1 %v12388_v44 }
 0x905   :  { %1789 = vperm.xlu1 %7405, %v10547_v11  }
 0x909   :  { %7406 = vset.pattern.permute.xlu1 %v12386_v50 }
 0x90a   :  { %2085 = vperm.xlu1 %7406, %v10547_v11  }
 0x90e   :  { %2101 = vperm.xlu1 %7406, %v10555_v14  }
 0x910   :  { %1759 = vperm.xlu0 %7387, %v10462_v45  }
 0x912   :  { %7407 = vset.pattern.permute.xlu1 %v12387_v39 }
 0x913   :  { %2409 = vperm.xlu1 %7407, %v10559_v56  }
 0x914   :  { %1794 = vperm.xlu0 %7387, %v10559_v56  }
 0x916   :  { %v10595_v27 = vpop.permute.xlu1 %1754 }
 0x917   :  { %2413 = vperm.xlu1 %7407, %v10507_v35   ;;  %12433 = vst [vmem:[#allocation67_spill] sm:$0xff] %v10595_v27 }
 0x918   :  { %1804 = vperm.xlu0 %7387, %v10539_v47  }
 0x91b   :  { %7408 = vset.pattern.permute.xlu1 %v12431_v24  ;;  %v10597_v54 = vpop.permute.xlu1 %2057 }
 0x91c   :  { %3017 = vperm.xlu1 %7408, %v10454_v20   ;;  %1809 = vperm.xlu0 %7387, %v10555_v14   ;;  %12434 = vst [vmem:[#allocation51_spill] sm:$0xff] %v10597_v54 }
 0x920   :  { %3021 = vperm.xlu1 %7408, %v10462_v45   ;;  %1814 = vperm.xlu0 %7387, %v10582_v10  }
 0x924   :  { %7409 = vset.pattern.permute.xlu1 %v12386_v50 }
 0x925   :  { %2105 = vperm.xlu1 %7409, %v10582_v10  }
 0x929   :  { %7410 = vset.pattern.permute.xlu1 %v12387_v39 }
 0x92a   :  { %2401 = vperm.xlu1 %7410, %v10521_v15  }
 0x92d   :  { %v10599_v41 = vpop.permute.xlu1 %2061 }
 0x92e   :  { %7411 = vset.pattern.permute.xlu1 %v12428_v13 }
 0x92f   :  { %2713 = vperm.xlu1 %7411, %v10495_v4  }
 0x932   :  { %v10601_v62 = vpop.permute.xlu1 %1764 }
 0x933   :  { %7412 = vset.pattern.permute.xlu1 %v12431_v24 }
 0x934   :  { %3025 = vperm.xlu1 %7412, %v10468_v17  }
 0x937   :  { %v10603_v22 = vpop.permute.xlu1 %2065 }
 0x938   :  { %7414 = vset.pattern.permute.xlu1 %v12386_v50 }
 0x93c   :  { %v10605_v23 = vpop.permute.xlu1 %1769 }
 0x93d   :  { %12435 = vst [vmem:[#allocation66_spill] sm:$0xff] %v10605_v23  ;;  %v12452_v23 = vmov 6  }
 0x941   :  { %v10607_v37 = vpop.permute.xlu1 %2069 }
 0x942   :  { %12436 = vst [vmem:[#allocation14_spill] sm:$0xff] %v10607_v37 }
 0x946   :  { %v10610_v16 = vpop.permute.xlu1 %2377 }
 0x947   :  { %12437 = vst [vmem:[#allocation74_spill] sm:$0xff] %v10610_v16 }
 0x94b   :  { %v10612_v8 = vpop.permute.xlu1 %1774 }
 0x950   :  { %v10616_v5 = vpop.permute.xlu1 %2073 }
 0x97f   :  { %v5090_v46 = vpop.xlane.xlu0 %5089 }
 0x980   :  { %v5091_v0 = vsub.f32 %v10523_v40, %v5090_v46 }
 0x982   :  { %v5092_v21 = vmul.f32 1.442695, %v5091_v0  ;;  %v12444_v0 = vmov 5  }
 0x983   :  { %v1429_v9 = vpop.xlane.xlu0 %1428 }
 0x984   :  { %7587 = vpow2.f32 %v5092_v21 }
 0x985   :  { %7589 = vrcp.f32 %v1429_v9  ;;  %v10627_v9 = vpop.permute.xlu1 %1779 }
 0x986   :  { %12440 = vst [vmem:[#allocation71_spill] sm:$0xff] %v10627_v9  ;;  %7591 = vrcp.f32 %v1432_v48 }
 0x989   :  { %v10633_v40 = vpop.permute.xlu1 %1799 }
 0x98a   :  { %12441 = vst [vmem:[#allocation19_spill] sm:$0xff] %v10633_v40 }
 0x98e   :  { %v10614_v53 = vpop.eup %7587 }
 0x98f   :  { %12438 = vst [vmem:[#allocation8_spill] sm:$0xff] %v10614_v53  ;;  %v7590_v31 = vpop.eup %7589  ;;  %6862 = vmatmul.mubr.msk.f32.vlgmr.msra.gmra.mrb[6].mxu0 %vm5094_vm0, %v10614_v53 }
 0x990   :  { %v10621_v3 = vmul.f32 %v7590_v31, %v10529_v26  ;;  %6868 = vmatprep.mubr.msk.f32.mxu0 %vm7629_vm13, %v12359_v18  ;;  %v10640_v31 = vpop.permute.xlu1 %2077  ;;  %v1435_v26 = vpop.xlane.xlu0 %1434 }
 0x991   :  { %12442 = vst [vmem:[#allocation77_spill] sm:$0xff] %v10640_v31  ;;  %7593 = vrcp.f32 %v1435_v26  ;;  %v7592_v21 = vpop.eup %7591 }
 0x992   :  { %12439 = vst [vmem:[#allocation10_spill] sm:$0xff] %v10621_v3  ;;  %2109 = vperm.xlu1 %7414, %v10621_v3   ;;  %1819 = vperm.xlu0 %7387, %v10621_v3   ;;  %v10652_v48 = vmul.f32 %v7592_v21, %v10449_v7 }
 0x994   :  { %v10645_v46 = vpop.permute.xlu1 %2093 }
 0x995   :  { %12443 = vst [vmem:[#allocation70_spill] sm:$0xff] %v10645_v46 }
 0x996   :  { %7415 = vset.pattern.permute.xlu1 %v12387_v39  ;;  %7413 = vset.pattern.permute.xlu0 %v12387_v39 }
 0x997   :  { %2405 = vperm.xlu1 %7415, %v10547_v11   ;;  %2381 = vperm.xlu0 %7413, %v10462_v45  }
 0x998   :  { %v10654_v18 = vpop.permute.xlu1 %2389 }
 0x999   :  { %12445 = vst [vmem:[#allocation75_spill] sm:$0xff] %v10654_v18 }
 0x99b   :  { %7416 = vset.pattern.permute.xlu1 %v12428_v13  ;;  %2385 = vperm.xlu0 %7413, %v10468_v17   ;;  %v7594_v53 = vpop.eup %7593 }
 0x99c   :  { %2717 = vperm.xlu1 %7416, %v10502_v6   ;;  %v10659_v26 = vpop.permute.xlu1 %2701  ;;  %v10666_v7 = vmul.f32 %v7594_v53, %v10535_v57 }
 0x99d   :  { %12446 = vst [vmem:[#allocation83_spill] sm:$0xff] %v10659_v26 }
 0x99f   :  { %2393 = vperm.xlu0 %7413, %v10495_v4  }
 0x9a0   :  { %2729 = vperm.xlu1 %7416, %v10559_v56   ;;  %v10670_v21 = vpop.permute.xlu1 %1784 }
 0x9a1   :  { %12447 = vst [vmem:[#allocation22_spill] sm:$0xff] %v10670_v21 }
 0x9a3   :  { %2397 = vperm.xlu0 %7413, %v10502_v6  }
 0x9a4   :  { %7417 = vset.pattern.permute.xlu1 %v12431_v24 }
 0x9a5   :  { %3029 = vperm.xlu1 %7417, %v10479_v29  }
 0x9a7   :  { %2417 = vperm.xlu0 %7413, %v10539_v47  }
 0x9a9   :  { %7418 = vset.pattern.permute.xlu1 %v12444_v0 }
 0x9aa   :  { %3337 = vperm.xlu1 %7418, %v10454_v20  }
 0x9ab   :  { %2421 = vperm.xlu0 %7413, %v10555_v14  }
 0x9ae   :  { %7419 = vset.pattern.permute.xlu1 %v12388_v44 }
 0x9af   :  { %2425 = vperm.xlu0 %7413, %v10582_v10   ;;  %1824 = vperm.xlu1 %7419, %v10652_v48  }
 0x9b3   :  { %7421 = vset.pattern.permute.xlu0 %v12386_v50  ;;  %7420 = vset.pattern.permute.xlu1 %v12386_v50  ;;  %v10676_v50 = vpop.permute.xlu1 %2081 }
 0x9b4   :  { %2089 = vperm.xlu0 %7421, %v10559_v56   ;;  %2113 = vperm.xlu1 %7420, %v10652_v48   ;;  %12448 = vst [vmem:[#allocation102_spill] sm:$0xff] %v10676_v50 }
 0x9b7   :  { %v10681_v53 = vpop.permute.xlu1 %2097 }
 0x9b8   :  { %2117 = vperm.xlu0 %7421, %v10666_v7   ;;  %7422 = vset.pattern.permute.xlu1 %v12428_v13 }
 0x9b9   :  { %2721 = vperm.xlu1 %7422, %v10521_v15  }
 0x9bb   :  { %v10687_v57 = vpop.permute.xlu1 %2705 }
 0x9bc   :  { %7425 = vset.pattern.permute.xlu0 %v12428_v13 }
 0x9bd   :  { %2697 = vperm.xlu0 %7425, %v10454_v20   ;;  %2737 = vperm.xlu1 %7422, %v10539_v47  }
 0x9bf   :  { %v10694_v26 = vpop.permute.xlu1 %1789 }
 0x9c0   :  { %12449 = vst [vmem:[#allocation81_spill] sm:$0xff] %v10694_v26  ;;  %v6849_v26 = vpop.f32.mrb[4].mxu0 }
 0x9c1   :  { %2709 = vperm.xlu0 %7425, %v10479_v29   ;;  %7423 = vset.pattern.permute.xlu1 %v12444_v0  ;;  %v4997_v27 = vpop.f32.mrb[5].mxu0 }
 0x9c2   :  { %3345 = vperm.xlu1 %7423, %v10468_v17   ;;  %v5006_v37 = vmul.f32 %v4997_v27, %v10368_v25  ;;  %v1760_v25 = vpop.permute.xlu0 %1759 }
 0x9c5   :  { %2733 = vperm.xlu0 %7425, %v10507_v35  }
 0x9c6   :  { %7424 = vset.pattern.permute.xlu1 %v12388_v44  ;;  %v10701_v44 = vpop.permute.xlu1 %2085 }
 0x9c7   :  { %1829 = vperm.xlu1 %7424, %v10666_v7   ;;  %12450 = vst [vmem:[#allocation89_spill] sm:$0xff] %v10701_v44  ;;  %v5007_v44 = vmul.f32 %v6849_v26, %v10363_v2 }
 0x9c9   :  { %2741 = vperm.xlu0 %7425, %v10555_v14   ;;  %v7088_v54 = vpack.c.bf16 %v5007_v44, %v5006_v37 }
 0x9ca   :  { %v10705_v18 = vpop.permute.xlu1 %2101 }
 0x9cb   :  { %7426 = vset.pattern.permute.xlu1 %v12387_v39  ;;  %7089 = vmatpush3.bf16.msra.mxu0 %v7088_v54  ;;  %v10739_v54 = vpop.permute.xlu0 %1794 }
 0x9cc   :  { %2429 = vperm.xlu1 %7426, %v10621_v3   ;;  %7090 = vmatprep.subr.bf16.mxu0 %v12363_v51  ;;  %v12458_v51 = vld [vmem:[#allocation44_spill] sm:$0xff] }
 0x9cd   :  { %7428 = vset.pattern.permute.xlu0 %v12431_v24 }
 0x9ce   :  { %3033 = vperm.xlu0 %7428, %v10495_v4   ;;  %v10711_v16 = vpop.permute.xlu1 %2409 }
 0x9cf   :  { %12451 = vst [vmem:[#allocation21_spill] sm:$0xff] %v10711_v16  ;;  %v1805_v26 = vpop.permute.xlu0 %1804  ;;  %v12461_v16 = vld [vmem:[#allocation92_spill] sm:$0xff] }
 0x9d0   :  { %7427 = vset.pattern.permute.xlu1 %v12428_v13 }
 0x9d1   :  { %2725 = vperm.xlu1 %7427, %v10547_v11  }
 0x9d2   :  { %3053 = vperm.xlu0 %7428, %v10507_v35   ;;  %v10719_v21 = vpop.permute.xlu1 %2413 }
 0x9d3   :  { %12453 = vst [vmem:[#allocation25_spill] sm:$0xff] %v10719_v21 }
 0x9d5   :  { %7429 = vset.pattern.permute.xlu1 %v12431_v24 }
 0x9d6   :  { %3041 = vperm.xlu0 %7428, %v10521_v15   ;;  %3037 = vperm.xlu1 %7429, %v10502_v6   ;;  %v10727_v2 = vpop.permute.xlu1 %3017 }
 0x9d7   :  { %12454 = vst [vmem:[#allocation46_spill] sm:$0xff] %v10727_v2  ;;  %v12460_v2 = vld [vmem:[#allocation73_spill] sm:$0xff] }
 0x9da   :  { %3045 = vperm.xlu0 %7428, %v10547_v11   ;;  %3049 = vperm.xlu1 %7429, %v10559_v56   ;;  %v10733_v27 = vpop.permute.xlu1 %3021 }
 0x9db   :  { %12455 = vst [vmem:[#allocation17_spill] sm:$0xff] %v10733_v27  ;;  %v12459_v27 = vld [vmem:[#allocation93_spill] sm:$0xff] }
 0x9de   :  { %3065 = vperm.xlu0 %7428, %v10582_v10   ;;  %7430 = vset.pattern.permute.xlu1 %v12444_v0  ;;  %v10741_v37 = vpop.permute.xlu1 %2105 }
 0x9df   :  { %3349 = vperm.xlu1 %7430, %v10479_v29   ;;  %12456 = vst [vmem:[#allocation9_spill] sm:$0xff] %v10741_v37  ;;  %v1557_v37 = vmul.f32 %v12459_v27, %v12458_v51 }
 0x9e2   :  { %3069 = vperm.xlu0 %7428, %v10621_v3   ;;  %v10747_v44 = vpop.permute.xlu1 %2401 }
 0x9e3   :  { %7431 = vset.pattern.permute.xlu1 %v12452_v23  ;;  %12457 = vst [vmem:[#allocation5_spill] sm:$0xff] %v10747_v44  ;;  %v12463_v44 = vld [vmem:[#allocation40_spill] sm:$0xff] }
 0x9e4   :  { %3657 = vperm.xlu1 %7431, %v10454_v20  }
 0x9e6   :  { %3077 = vperm.xlu0 %7428, %v10666_v7  }
 0x9e8   :  { %7432 = vset.pattern.permute.xlu1 %v12387_v39 }
 0x9e9   :  { %2433 = vperm.xlu1 %7432, %v10652_v48  }
 0x9ea   :  { %7452 = vset.pattern.permute.xlu0 %v12444_v0 }
 0x9eb   :  { %3341 = vperm.xlu0 %7452, %v10462_v45  }
 0x9ed   :  { %7433 = vset.pattern.permute.xlu1 %v12428_v13 }
 0x9ee   :  { %2745 = vperm.xlu1 %7433, %v10582_v10   ;;  %v1521_v10 = vmul.f32 %v12461_v16, %v12460_v2 }
 0x9ef   :  { %3369 = vperm.xlu0 %7452, %v10559_v56  }
 0x9f0   :  { %v1589_v9 = vadd.f32 %v1557_v37, %v1521_v10 }
 0x9f2   :  { %7434 = vset.pattern.permute.xlu1 %v12431_v24 }
 0x9f3   :  { %3397 = vperm.xlu0 %7452, %v10666_v7   ;;  %3057 = vperm.xlu1 %7434, %v10539_v47  }
 0x9f7   :  { %7459 = vset.pattern.permute.xlu0 %v12452_v23  ;;  %7435 = vset.pattern.permute.xlu1 %v12444_v0 }
 0x9f8   :  { %3661 = vperm.xlu0 %7459, %v10462_v45   ;;  %3353 = vperm.xlu1 %7435, %v10495_v4  }
 0x9fc   :  { %3665 = vperm.xlu0 %7459, %v10468_v17   ;;  %7436 = vset.pattern.permute.xlu1 %v12387_v39  ;;  %v10757_v39 = vpop.permute.xlu0 %1809 }
 0x9fd   :  { %2437 = vperm.xlu1 %7436, %v10666_v7  }
 0xa00   :  { %3673 = vperm.xlu0 %7459, %v10495_v4   ;;  %v10759_v4 = vpop.permute.xlu1 %2713  ;;  %v10770_v2 = vpop.permute.xlu0 %1814 }
 0xa01   :  { %7437 = vset.pattern.permute.xlu1 %v12428_v13  ;;  %12462 = vst [vmem:[#allocation15_spill] sm:$0xff] %v10759_v4  ;;  %12466 = vst [vmem:[#allocation91_spill] sm:$0xff] %v10770_v2  ;;  %v1566_v2 = vmul.f32 %v12459_v27, %v10083_v36  ;;  %v12468_v4 = vmov 7   ;;  %v1567_v36 = vmul.f32 %v12459_v27, %v10058_v61 }
 0xa02   :  { %2749 = vperm.xlu1 %7437, %v10621_v3   ;;  %v12464_v3 = vld [vmem:[#allocation95_spill] sm:$0xff] }
 0xa03   :  { %v1625_v50 = vmul.f32 %v12464_v3, %v12463_v44  ;;  %v1635_v61 = vmul.f32 %v12464_v3, %v10152_v55 }
 0xa04   :  { %3677 = vperm.xlu0 %7459, %v10502_v6   ;;  %v10772_v21 = vpop.permute.xlu1 %3025 }
 0xa05   :  { %v10768_v51 = vadd.f32 %v1625_v50, %v1589_v9  ;;  %v1530_v50 = vmul.f32 %v12461_v16, %v10038_v42 }
 0xa06   :  { %7438 = vset.pattern.permute.xlu1 %v12431_v24 }
 0xa07   :  { %3061 = vperm.xlu1 %7438, %v10555_v14   ;;  %12465 = vst [vmem:[#allocation26_spill] sm:$0xff] %v10768_v51  ;;  %v1903_v44 = vrot.slane %v10768_v51, %v12383_v59  ;;  %v2511_v40 = vrot.slane %v10768_v51, %v12353_v63  ;;  %v1598_v24 = vadd.f32 %v1566_v2, %v1530_v50 }
 0xa08   :  { %3681 = vperm.xlu0 %7459, %v10521_v15  }
 0xa09   :  { %v1977_v9 = vmul.f32 %v1903_v44, %v1760_v25 }
 0xa0b   :  { %7439 = vset.pattern.permute.xlu1 %v12444_v0 }
 0xa0c   :  { %3701 = vperm.xlu0 %7459, %v10555_v14   ;;  %3357 = vperm.xlu1 %7439, %v10502_v6   ;;  %v2191_v6 = vrot.slane %v10768_v51, %v12381_v38 }
 0xa0e   :  { %v2265_v31 = vmul.f32 %v2191_v6, %v10599_v41 }
 0xa10   :  { %3717 = vperm.xlu0 %7459, %v10666_v7   ;;  %3373 = vperm.xlu1 %7439, %v10507_v35   ;;  %v2297_v42 = vadd.f32 %v2265_v31, %v1977_v9 }
 0xa11   :  { %v10778_v10 = vpop.permute.xlu0 %1819  ;;  %v10780_v37 = vpop.permute.xlu1 %2109 }
 0xa12   :  { %12467 = vst [vmem:[#allocation13_spill] sm:$0xff] %v10780_v37  ;;  %v1634_v37 = vmul.f32 %v12464_v3, %v10102_v30 }
 0xa14   :  { %7464 = vset.pattern.permute.xlu0 %v12468_v4  ;;  %7440 = vset.pattern.permute.xlu1 %v12452_v23  ;;  %v10812_v31 = vadd.f32 %v1634_v37, %v1598_v24 }
 0xa15   :  { %3977 = vperm.xlu0 %7464, %v10454_v20   ;;  %3669 = vperm.xlu1 %7440, %v10479_v29   ;;  %v1531_v20 = vmul.f32 %v12461_v16, %v10276_v43 }
 0xa16   :  { %v2382_v25 = vpop.permute.xlu0 %2381  ;;  %v10795_v44 = vpop.permute.xlu1 %2405  ;;  %12471 = vst [vmem:[#allocation12_spill] sm:$0xff] %v10812_v31  ;;  %v2227_v55 = vrot.slane %v10812_v31, %v12381_v38 }
 0xa17   :  { %12469 = vst [vmem:[#allocation3_spill] sm:$0xff] %v10795_v44  ;;  %v2585_v46 = vmul.f32 %v2511_v40, %v2382_v25  ;;  %v1599_v30 = vadd.f32 %v1567_v36, %v1531_v20  ;;  %v2547_v25 = vrot.slane %v10812_v31, %v12353_v63 }
 0xa18   :  { %v2274_v9 = vmul.f32 %v2227_v55, %v10681_v53  ;;  %v1528_v53 = vmul.f32 %v12461_v16, %v10229_v28  ;;  %v12476_v28 = vld [vmem:[#allocation49_spill] sm:$0xff] }
 0xa19   :  { %v10803_v6 = vadd.f32 %v2585_v46, %v2297_v42  ;;  %3989 = vperm.xlu0 %7464, %v10479_v29   ;;  %7441 = vset.pattern.permute.xlu1 %v12468_v4  ;;  %v10823_v46 = vadd.f32 %v1635_v61, %v1599_v30  ;;  %v12474_v42 = vld [vmem:[#allocation63_spill] sm:$0xff] }
 0xa1a   :  { %v10807_v41 = vpop.permute.xlu0 %2385  ;;  %3981 = vperm.xlu1 %7441, %v10462_v45   ;;  %v1939_v45 = vrot.slane %v10812_v31, %v12383_v59  ;;  %v1558_v36 = vmul.f32 %v12459_v27, %v12474_v42 }
 0xa1b   :  { %12470 = vst [vmem:[#allocation16_spill] sm:$0xff] %v10803_v6  ;;  %v10810_v40 = vpop.permute.xlu1 %2717  ;;  %12472 = vst [vmem:[#allocation28_spill] sm:$0xff] %v10823_v46  ;;  %v1943_v50 = vrot.slane %v10823_v46, %v12383_v59  ;;  %v2231_v61 = vrot.slane %v10823_v46, %v12381_v38  ;;  %v1626_v6 = vmul.f32 %v12464_v3, %v12476_v28 }
 0xa1c   :  { %v1986_v2 = vmul.f32 %v1939_v45, %v1805_v26  ;;  %v1564_v26 = vmul.f32 %v12459_v27, %v10074_v34  ;;  %v2551_v34 = vrot.slane %v10823_v46, %v12353_v63 }
 0xa1d   :  { %4013 = vperm.xlu0 %7464, %v10507_v35   ;;  %v1987_v45 = vmul.f32 %v1943_v50, %v10757_v39  ;;  %v2275_v42 = vmul.f32 %v2231_v61, %v10705_v18  ;;  %v1632_v39 = vmul.f32 %v12464_v3, %v10060_v12  ;;  %v12477_v61 = vld [vmem:[#allocation47_spill] sm:$0xff] }
 0xa1e   :  { %v10817_v43 = vpop.permute.xlu0 %2393  ;;  %7442 = vset.pattern.permute.xlu1 %v12428_v13  ;;  %v2306_v30 = vadd.f32 %v2274_v9, %v1986_v2  ;;  %v1596_v9 = vadd.f32 %v1564_v26, %v1528_v53 }
 0xa1f   :  { %2753 = vperm.xlu1 %7442, %v10652_v48   ;;  %v10821_v29 = vpop.permute.xlu1 %2729 }
 0xa20   :  { %v10876_v12 = vadd.f32 %v1632_v39, %v1596_v9 }
 0xa21   :  { %4001 = vperm.xlu0 %7464, %v10521_v15  }
 0xa22   :  { %v10828_v24 = vpop.permute.xlu0 %2397 }
 0xa23   :  { %7443 = vset.pattern.permute.xlu1 %v12444_v0 }
 0xa24   :  { %3361 = vperm.xlu1 %7443, %v10521_v15   ;;  %v10834_v37 = vpop.permute.xlu1 %3029  ;;  %v1522_v15 = vmul.f32 %v12461_v16, %v10184_v32 }
 0xa25   :  { %12473 = vst [vmem:[#allocation27_spill] sm:$0xff] %v10834_v37  ;;  %4021 = vperm.xlu0 %7464, %v10555_v14  }
 0xa26   :  { %v2418_v20 = vpop.permute.xlu0 %2417  ;;  %v1590_v2 = vadd.f32 %v1558_v36, %v1522_v15  ;;  %v12482_v15 = vld [vmem:[#allocation43_spill] sm:$0xff] }
 0xa27   :  { %v2594_v55 = vmul.f32 %v2547_v25, %v2418_v20  ;;  %v2307_v25 = vadd.f32 %v2275_v42, %v1987_v45  ;;  %v1524_v53 = vmul.f32 %v12461_v16, %v12482_v15  ;;  %v12483_v45 = vld [vmem:[#allocation82_spill] sm:$0xff]  ;;  %v12484_v42 = vld [vmem:[#allocation53_spill] sm:$0xff]  ;;  %v2219_v15 = vrot.slane %v10876_v12, %v12381_v38 }
 0xa28   :  { %3377 = vperm.xlu1 %7443, %v10539_v47   ;;  %v10874_v51 = vadd.f32 %v1626_v6, %v1590_v2  ;;  %v12486_v6 = vld [vmem:[#allocation72_spill] sm:$0xff] }
 0xa29   :  { %v10855_v44 = vadd.f32 %v2594_v55, %v2306_v30  ;;  %4037 = vperm.xlu0 %7464, %v10666_v7   ;;  %v10858_v32 = vpop.permute.xlu1 %3337  ;;  %v1529_v30 = vmul.f32 %v12461_v16, %v12477_v61  ;;  %v12478_v55 = vld [vmem:[#allocation87_spill] sm:$0xff]  ;;  %v1525_v39 = vmul.f32 %v12461_v16, %v12486_v6  ;;  %v12487_v2 = vld [vmem:[#allocation80_spill] sm:$0xff]  ;;  %v1633_v6 = vmul.f32 %v12464_v3, %v10076_v49 }
 0xa2a   :  { %12475 = vst [vmem:[#allocation24_spill] sm:$0xff] %v10858_v32  ;;  %v2422_v50 = vpop.permute.xlu0 %2421  ;;  %v1565_v28 = vmul.f32 %v12459_v27, %v12478_v55  ;;  %12479 = vst [vmem:[#allocation2_spill] sm:$0xff] %v10874_v51  ;;  %v1561_v9 = vmul.f32 %v12459_v27, %v12487_v2  ;;  %v2195_v61 = vrot.slane %v10874_v51, %v12381_v38 }
 0xa2b   :  { %v2595_v18 = vmul.f32 %v2551_v34, %v2422_v50  ;;  %v1520_v34 = vmul.f32 %v12461_v16, %v12484_v42  ;;  %v12485_v50 = vld [vmem:[#allocation41_spill] sm:$0xff]  ;;  %v1931_v55 = vrot.slane %v10876_v12, %v12383_v59  ;;  %v12488_v42 = vld [vmem:[#allocation78_spill] sm:$0xff]  ;;  %v1569_v49 = vmul.f32 %v12459_v27, %v10121_v60 }
 0xa2c   :  { %7444 = vset.pattern.permute.xlu1 %v12468_v4  ;;  %v2266_v2 = vmul.f32 %v2195_v61, %v10603_v22 }
 0xa2d   :  { %v10867_v20 = vadd.f32 %v2595_v18, %v2307_v25  ;;  %3985 = vperm.xlu1 %7444, %v10468_v17   ;;  %v1560_v17 = vmul.f32 %v12459_v27, %v12483_v45  ;;  %v1556_v25 = vmul.f32 %v12459_v27, %v12485_v50  ;;  %v1597_v18 = vadd.f32 %v1565_v28, %v1529_v30 }
 0xa2e   :  { %v10878_v36 = vpop.permute.xlu0 %2425  ;;  %v10880_v26 = vpop.permute.xlu1 %1824  ;;  %v1628_v50 = vmul.f32 %v12464_v3, %v12488_v42 }
 0xa2f   :  { %12480 = vst [vmem:[#allocation4_spill] sm:$0xff] %v10878_v36  ;;  %12481 = vst [vmem:[#allocation6_spill] sm:$0xff] %v10880_v26  ;;  %v1592_v45 = vadd.f32 %v1560_v17, %v1524_v53  ;;  %v2515_v26 = vrot.slane %v10874_v51, %v12353_v63  ;;  %v1533_v17 = vmul.f32 %v12461_v16, %v10106_v19  ;;  %v12491_v19 = vld [vmem:[#allocation84_spill] sm:$0xff] }
 0xa30   :  { %v1588_v22 = vadd.f32 %v1556_v25, %v1520_v34  ;;  %v10932_v60 = vmul.f32 %v12464_v3, %v12491_v19 }
 0xa31   :  { %7445 = vset.pattern.permute.xlu1 %v12428_v13  ;;  %v1907_v13 = vrot.slane %v10874_v51, %v12383_v59  ;;  %v2586_v36 = vmul.f32 %v2515_v26, %v10807_v41  ;;  %v10936_v26 = vadd.f32 %v1633_v6, %v1597_v18  ;;  %v1639_v18 = vmul.f32 %v12464_v3, %v10326_v52  ;;  %v12495_v6 = vld [vmem:[#allocation96_spill] sm:$0xff] }
 0xa32   :  { %2757 = vperm.xlu1 %7445, %v10666_v7   ;;  %v1984_v7 = vmul.f32 %v1931_v55, %v10739_v54  ;;  %v12490_v54 = vld [vmem:[#allocation68_spill] sm:$0xff]  ;;  %v1593_v55 = vadd.f32 %v1561_v9, %v1525_v39 }
 0xa33   :  { %v2090_v30 = vpop.permute.xlu0 %2089  ;;  %v10908_v28 = vpop.permute.xlu1 %2113  ;;  %v1978_v42 = vmul.f32 %v1907_v13, %v10601_v62  ;;  %v1559_v61 = vmul.f32 %v12459_v27, %v12490_v54  ;;  %v12492_v62 = vld [vmem:[#allocation76_spill] sm:$0xff]  ;;  %v12493_v13 = vld [vmem:[#allocation79_spill] sm:$0xff]  ;;  %v12496_v54 = vld [vmem:[#allocation69_spill] sm:$0xff] }
 0xa34   :  { %12489 = vst [vmem:[#allocation18_spill] sm:$0xff] %v10908_v28  ;;  %v2272_v53 = vmul.f32 %v2219_v15, %v2090_v30  ;;  %v10925_v15 = vadd.f32 %v1628_v50, %v1592_v45  ;;  %v1562_v41 = vmul.f32 %v12459_v27, %v12492_v62  ;;  %v1624_v39 = vmul.f32 %v12464_v3, %v12493_v13  ;;  %v12494_v9 = vld [vmem:[#allocation56_spill] sm:$0xff]  ;;  %v12498_v13 = vld [vmem:[#allocation98_spill] sm:$0xff] }
 0xa35   :  { %v2298_v34 = vadd.f32 %v2266_v2, %v1978_v42  ;;  %v1630_v45 = vmul.f32 %v12464_v3, %v12494_v9  ;;  %v1571_v50 = vmul.f32 %v12459_v27, %v10267_v1  ;;  %v2835_v2 = vrot.slane %v10874_v51, %v12495_v6 }
 0xa36   :  { %v10920_v32 = vadd.f32 %v2272_v53, %v1984_v7  ;;  %7446 = vset.pattern.permute.xlu1 %v12444_v0  ;;  %v1535_v7 = vmul.f32 %v12461_v16, %v10331_v58  ;;  %v1601_v53 = vadd.f32 %v1569_v49, %v1533_v17  ;;  %v1629_v19 = vmul.f32 %v12464_v3, %v12496_v54  ;;  %v12500_v17 = vld [vmem:[#allocation94_spill] sm:$0xff] }
 0xa37   :  { %v10927_v30 = vpop.permute.xlu0 %2117  ;;  %3365 = vperm.xlu1 %7446, %v10547_v11   ;;  %v2618_v42 = vadd.f32 %v2586_v36, %v2298_v34  ;;  %v1915_v62 = vrot.slane %v10925_v15, %v12383_v59  ;;  %v2203_v1 = vrot.slane %v10925_v15, %v12381_v38  ;;  %v2867_v58 = vrot.slane %v10812_v31, %v12495_v6 }
 0xa38   :  { %v10938_v25 = vpop.permute.xlu1 %2721  ;;  %v2906_v52 = vmul.f32 %v2835_v2, %v10687_v57  ;;  %v2523_v36 = vrot.slane %v10925_v15, %v12353_v63  ;;  %v10970_v54 = vadd.f32 %v1624_v39, %v1588_v22  ;;  %v1603_v28 = vadd.f32 %v1571_v50, %v1535_v7  ;;  %v12499_v57 = vld [vmem:[#allocation90_spill] sm:$0xff] }
 0xa39   :  { %v1523_v2 = vmul.f32 %v12461_v16, %v12499_v57  ;;  %v1526_v11 = vmul.f32 %v12461_v16, %v12500_v17  ;;  %v3155_v37 = vrot.slane %v10874_v51, %v12498_v13  ;;  %v1935_v22 = vrot.slane %v10936_v26, %v12383_v59 }
 0xa3a   :  { %v2938_v27 = vadd.f32 %v2906_v52, %v2618_v42  ;;  %v2543_v50 = vrot.slane %v10936_v26, %v12353_v63 }
 0xa3b   :  { %3381 = vperm.xlu1 %7446, %v10555_v14   ;;  %v1637_v14 = vmul.f32 %v12464_v3, %v10124_v33  ;;  %v2223_v33 = vrot.slane %v10936_v26, %v12381_v38  ;;  %v3226_v7 = vmul.f32 %v3155_v37, %v10772_v21  ;;  %v1591_v37 = vadd.f32 %v1559_v61, %v1523_v2 }
 0xa3c   :  { %v10966_v49 = vpop.permute.xlu0 %2697  ;;  %v2738_v34 = vpop.permute.xlu1 %2737  ;;  %v12506_v21 = vmov 4  }
 0xa3d   :  { %12497 = vst [vmem:[#allocation7_spill] sm:$0xff] %v10966_v49  ;;  %v2914_v31 = vmul.f32 %v2867_v58, %v2738_v34  ;;  %v10980_v49 = vadd.f32 %v1629_v19, %v1593_v55  ;;  %v12501_v55 = vld [vmem:[#allocation99_spill] sm:$0xff]  ;;  %v11000_v52 = vadd.f32 %v1637_v14, %v1601_v53  ;;  %v1594_v34 = vadd.f32 %v1562_v41, %v1526_v11 }
 0xa3e   :  { %v3475_v42 = vrot.slane %v10874_v51, %v12501_v55  ;;  %v3258_v57 = vadd.f32 %v3226_v7, %v2938_v27  ;;  %v2268_v14 = vmul.f32 %v2203_v1, %v10616_v5  ;;  %v2871_v11 = vrot.slane %v10823_v46, %v12495_v6 }
 0xa3f   :  { %v10987_v39 = vadd.f32 %v2914_v31, %v10855_v44  ;;  %7447 = vset.pattern.permute.xlu1 %v12452_v23  ;;  %12502 = vst [vmem:[#allocation44_spill] sm:$0xff] %v11000_v52  ;;  %v11002_v44 = vadd.f32 %v1639_v18, %v1603_v28  ;;  %v1919_v28 = vrot.slane %v10980_v49, %v12383_v59 }
 0xa40   :  { %v10993_v58 = vpop.permute.xlu0 %2709  ;;  %3689 = vperm.xlu1 %7447, %v10559_v56   ;;  %v2207_v61 = vrot.slane %v10980_v49, %v12381_v38  ;;  %v1951_v2 = vrot.slane %v11000_v52, %v12383_v59  ;;  %v2239_v7 = vrot.slane %v11000_v52, %v12381_v38  ;;  %v2527_v18 = vrot.slane %v10980_v49, %v12353_v63 }
 0xa41   :  { %v3346_v17 = vpop.permute.xlu1 %3345  ;;  %v2247_v5 = vrot.slane %v11002_v44, %v12381_v38  ;;  %v1959_v1 = vrot.slane %v11002_v44, %v12383_v59 }
 0xa42   :  { %v3546_v9 = vmul.f32 %v3475_v42, %v3346_v17  ;;  %v11033_v42 = vadd.f32 %v10932_v60, %v1591_v37  ;;  %v1980_v17 = vmul.f32 %v1915_v62, %v10612_v8  ;;  %v1989_v60 = vmul.f32 %v1951_v2, %v10778_v10  ;;  %v12505_v37 = vld [vmem:[#allocation13_spill] sm:$0xff] }
 0xa43   :  { %v2279_v53 = vmul.f32 %v2247_v5, %v10927_v30  ;;  %v12508_v5 = vld [vmem:[#allocation19_spill] sm:$0xff] }
 0xa44   :  { %v11021_v27 = vadd.f32 %v3546_v9, %v3258_v57  ;;  %v2734_v41 = vpop.permute.xlu0 %2733  ;;  %3693 = vperm.xlu1 %7447, %v10507_v35   ;;  %v11035_v9 = vadd.f32 %v1630_v45, %v1594_v34  ;;  %v2588_v35 = vmul.f32 %v2523_v36, %v10817_v43  ;;  %v2300_v51 = vadd.f32 %v2268_v14, %v1980_v17  ;;  %v12507_v43 = vld [vmem:[#allocation70_spill] sm:$0xff] }
 0xa45   :  { %v2277_v45 = vmul.f32 %v2239_v7, %v12505_v37  ;;  %v2273_v62 = vmul.f32 %v2223_v33, %v12507_v43  ;;  %v2559_v14 = vrot.slane %v11000_v52, %v12353_v63  ;;  %v1911_v10 = vrot.slane %v11033_v42, %v12383_v59 }
 0xa46   :  { %12503 = vst [vmem:[#allocation73_spill] sm:$0xff] %v11021_v27  ;;  %12504 = vst [vmem:[#allocation92_spill] sm:$0xff] %v11035_v9  ;;  %v1830_v57 = vpop.permute.xlu1 %1829  ;;  %v1923_v2 = vrot.slane %v11035_v9, %v12383_v59  ;;  %v2620_v7 = vadd.f32 %v2588_v35, %v2300_v51  ;;  %v1985_v33 = vmul.f32 %v1935_v22, %v12508_v5  ;;  %v12513_v35 = vld [vmem:[#allocation71_spill] sm:$0xff] }
 0xa47   :  { %v1991_v31 = vmul.f32 %v1959_v1, %v1830_v57  ;;  %v12510_v57 = vld [vmem:[#allocation25_spill] sm:$0xff]  ;;  %v12512_v43 = vrot.slane %v10925_v15, %v12495_v6  ;;  %v2309_v19 = vadd.f32 %v2277_v45, %v1989_v60  ;;  %v1981_v22 = vmul.f32 %v1919_v28, %v12513_v35  ;;  %v12517_v28 = vld [vmem:[#allocation103_spill] sm:$0xff] }
 0xa48   :  { %v2742_v34 = vpop.permute.xlu0 %2741  ;;  %7448 = vset.pattern.permute.xlu1 %v12506_v21  ;;  %v2211_v21 = vrot.slane %v11035_v9, %v12381_v38  ;;  %v2593_v37 = vmul.f32 %v2543_v50, %v12510_v57  ;;  %v2305_v5 = vadd.f32 %v2273_v62, %v1985_v33  ;;  %v2589_v27 = vmul.f32 %v2527_v18, %v10828_v24 }
 0xa49   :  { %v11050_v36 = vadd.f32 %v2279_v53, %v1991_v31  ;;  %v2915_v30 = vmul.f32 %v2871_v11, %v2742_v34  ;;  %3073 = vperm.xlu1 %7448, %v10652_v48   ;;  %v12509_v31 = vld [vmem:[#allocation77_spill] sm:$0xff]  ;;  %v2531_v11 = vrot.slane %v11035_v9, %v12353_v63  ;;  %v12511_v34 = vld [vmem:[#allocation15_spill] sm:$0xff]  ;;  %v12516_v60 = vrot.slane %v10925_v15, %v12498_v13 }
 0xa4a   :  { %v2269_v53 = vmul.f32 %v2207_v61, %v12509_v31  ;;  %v2908_v8 = vmul.f32 %v12512_v43, %v12511_v34  ;;  %v12514_v61 = vld [vmem:[#allocation102_spill] sm:$0xff]  ;;  %v2199_v62 = vrot.slane %v11033_v42, %v12381_v38  ;;  %v2519_v18 = vrot.slane %v11033_v42, %v12353_v63 }
 0xa4b   :  { %v11066_v1 = vadd.f32 %v2915_v30, %v10867_v20  ;;  %v2430_v17 = vpop.permute.xlu1 %2429  ;;  %v2270_v31 = vmul.f32 %v2211_v21, %v12514_v61  ;;  %v12515_v20 = vrot.slane %v10936_v26, %v12495_v6  ;;  %v2625_v21 = vadd.f32 %v2593_v37, %v2305_v5  ;;  %v12522_v5 = vld [vmem:[#allocation51_spill] sm:$0xff] }
 0xa4c   :  { %v2597_v51 = vmul.f32 %v2559_v14, %v2430_v17  ;;  %v2940_v57 = vadd.f32 %v2908_v8, %v2620_v7  ;;  %v2301_v24 = vadd.f32 %v2269_v53, %v1981_v22  ;;  %v2851_v14 = vrot.slane %v11035_v9, %v12495_v6  ;;  %v12519_v8 = vld [vmem:[#allocation5_spill] sm:$0xff] }
 0xa4d   :  { %v3034_v46 = vpop.permute.xlu0 %3033  ;;  %7449 = vset.pattern.permute.xlu1 %v12444_v0  ;;  %v2913_v50 = vmul.f32 %v12515_v20, %v2734_v41  ;;  %v12518_v41 = vld [vmem:[#allocation22_spill] sm:$0xff]  ;;  %v2590_v7 = vmul.f32 %v2531_v11, %v12519_v8  ;;  %v2539_v17 = vrot.slane %v10876_v12, %v12353_v63  ;;  %v2859_v53 = vrot.slane %v10876_v12, %v12495_v6 }
 0xa4e   :  { %v11080_v30 = vadd.f32 %v2597_v51, %v2309_v19  ;;  %v3228_v45 = vmul.f32 %v12516_v60, %v3034_v46  ;;  %3385 = vperm.xlu1 %7449, %v12517_v28   ;;  %v1982_v19 = vmul.f32 %v1923_v2, %v12518_v41  ;;  %v2621_v34 = vadd.f32 %v2589_v27, %v2301_v24  ;;  %v12524_v27 = vld [vmem:[#allocation14_spill] sm:$0xff] }
 0xa4f   :  { %v2839_v43 = vrot.slane %v11033_v42, %v12495_v6  ;;  %v2910_v2 = vmul.f32 %v2851_v14, %v10938_v25  ;;  %v2945_v37 = vadd.f32 %v2913_v50, %v2625_v21  ;;  %v12521_v11 = vrot.slane %v10936_v26, %v12498_v13  ;;  %v12526_v50 = vld [vmem:[#allocation67_spill] sm:$0xff]  ;;  %v12528_v14 = vld [vmem:[#allocation21_spill] sm:$0xff] }
 0xa50   :  { %v11094_v33 = vadd.f32 %v3228_v45, %v2940_v57  ;;  %v11096_v46 = vpop.permute.xlu1 %2725  ;;  %v2302_v35 = vadd.f32 %v2270_v31, %v1982_v19  ;;  %v12523_v61 = vrot.slane %v10970_v54, %v12381_v38  ;;  %v2267_v57 = vmul.f32 %v2199_v62, %v12524_v27  ;;  %v12529_v62 = vld [vmem:[#allocation66_spill] sm:$0xff] }
 0xa51   :  { %12520 = vst [vmem:[#allocation40_spill] sm:$0xff] %v11096_v46  ;;  %v3054_v51 = vpop.permute.xlu0 %3053  ;;  %v12525_v31 = vrot.slane %v10980_v49, %v12495_v6  ;;  %v3171_v25 = vrot.slane %v11035_v9, %v12498_v13  ;;  %v12527_v45 = vrot.slane %v10970_v54, %v12383_v59  ;;  %v2592_v41 = vmul.f32 %v2539_v17, %v12528_v14 }
 0xa52   :  { %v3233_v22 = vmul.f32 %v12521_v11, %v3054_v51  ;;  %7450 = vset.pattern.permute.xlu1 %v12452_v23  ;;  %v2264_v20 = vmul.f32 %v12523_v61, %v12522_v5  ;;  %v2622_v19 = vadd.f32 %v2590_v7, %v2302_v35  ;;  %v1979_v8 = vmul.f32 %v1911_v10, %v12529_v62  ;;  %v12530_v51 = vld [vmem:[#allocation74_spill] sm:$0xff]  ;;  %v12532_v5 = vld [vmem:[#allocation75_spill] sm:$0xff] }
 0xa53   :  { %v2909_v60 = vmul.f32 %v12525_v31, %v10810_v40  ;;  %3697 = vperm.xlu1 %7450, %v10539_v47   ;;  %v1976_v24 = vmul.f32 %v12527_v45, %v12526_v50  ;;  %v12531_v40 = vrot.slane %v10970_v54, %v12353_v63  ;;  %v2587_v61 = vmul.f32 %v2519_v18, %v12532_v5 }
 0xa54   :  { %v11126_v21 = vadd.f32 %v3233_v22, %v2945_v37  ;;  %v2624_v9 = vadd.f32 %v2592_v41, %v10920_v32  ;;  %v2942_v50 = vadd.f32 %v2910_v2, %v2622_v19  ;;  %v12533_v7 = vrot.slane %v10980_v49, %v12498_v13  ;;  %v12534_v22 = vld [vmem:[#allocation7_spill] sm:$0xff]  ;;  %v12539_v41 = vld [vmem:[#allocation20_spill] sm:$0xff] }
 0xa55   :  { %v2584_v11 = vmul.f32 %v12531_v40, %v12530_v51  ;;  %v3042_v27 = vpop.permute.xlu0 %3041  ;;  %v2941_v31 = vadd.f32 %v2909_v60, %v2621_v34  ;;  %v3038_v46 = vpop.permute.xlu1 %3037  ;;  %v2296_v35 = vadd.f32 %v2264_v20, %v1976_v24  ;;  %v2299_v10 = vadd.f32 %v2267_v57, %v1979_v8  ;;  %v12537_v20 = vld [vmem:[#allocation54_spill] sm:$0xff] }
 0xa56   :  { %v3230_v45 = vmul.f32 %v3171_v25, %v3042_v27  ;;  %v3229_v17 = vmul.f32 %v12533_v7, %v3038_v46  ;;  %v2907_v37 = vmul.f32 %v2839_v43, %v10993_v58  ;;  %v3179_v18 = vrot.slane %v10876_v12, %v12498_v13  ;;  %v12536_v46 = vld [vmem:[#allocation11_spill] sm:$0xff]  ;;  %v12538_v58 = vld [vmem:[#allocation93_spill] sm:$0xff] }
 0xa57   :  { %7451 = vset.pattern.permute.xlu1 %v12468_v4  ;;  %v2912_v34 = vmul.f32 %v2859_v53, %v10821_v29  ;;  %v12535_v32 = vrot.slane %v10970_v54, %v12495_v6  ;;  %v1568_v43 = vmul.f32 %v12538_v58, %v12537_v20  ;;  %v2619_v57 = vadd.f32 %v2587_v61, %v2299_v10  ;;  %v12540_v61 = vld [vmem:[#allocation27_spill] sm:$0xff] }
 0xa58   :  { %v11147_v60 = vadd.f32 %v3230_v45, %v2942_v50  ;;  %v11149_v25 = vadd.f32 %v3229_v17, %v2941_v31  ;;  %3993 = vperm.xlu1 %7451, %v12536_v46   ;;  %v1532_v29 = vmul.f32 %v12461_v16, %v12539_v41  ;;  %v2616_v53 = vadd.f32 %v2584_v11, %v2296_v35  ;;  %v12541_v45 = vld [vmem:[#allocation10_spill] sm:$0xff]  ;;  %v12542_v11 = vld [vmem:[#allocation88_spill] sm:$0xff] }
 0xa59   :  { %v2904_v2 = vmul.f32 %v12535_v32, %v12534_v22  ;;  %v11154_v24 = vpop.permute.xlu0 %3045  ;;  %v3050_v14 = vpop.permute.xlu1 %3049  ;;  %v2944_v19 = vadd.f32 %v2912_v34, %v2624_v9  ;;  %v3159_v8 = vrot.slane %v11033_v42, %v12498_v13  ;;  %v2939_v51 = vadd.f32 %v2907_v37, %v2619_v57  ;;  %v12543_v35 = vld [vmem:[#allocation46_spill] sm:$0xff]  ;;  %v12545_v57 = vld [vmem:[#allocation24_spill] sm:$0xff] }
 0xa5a   :  { %v3232_v62 = vmul.f32 %v3179_v18, %v3050_v14  ;;  %v3147_v40 = vrot.slane %v10970_v54, %v12498_v13  ;;  %v3479_v9 = vrot.slane %v11033_v42, %v12501_v55  ;;  %v1636_v7 = vmul.f32 %v12464_v3, %v12542_v11  ;;  %v12549_v11 = vld [vmem:[#allocation9_spill] sm:$0xff] }
 0xa5b   :  { %v2936_v5 = vadd.f32 %v2904_v2, %v2616_v53  ;;  %v3227_v31 = vmul.f32 %v3159_v8, %v12540_v61  ;;  %v1600_v17 = vadd.f32 %v1568_v43, %v1532_v29  ;;  %v3467_v22 = vrot.slane %v10970_v54, %v12501_v55  ;;  %v12546_v43 = vld [vmem:[#allocation64_spill] sm:$0xff] }
 0xa5c   :  { %v11162_v27 = vadd.f32 %v3232_v62, %v2944_v19  ;;  %7453 = vset.pattern.permute.xlu1 %v12444_v0  ;;  %v3224_v10 = vmul.f32 %v3147_v40, %v12543_v35  ;;  %v12547_v29 = vld [vmem:[#allocation100_spill] sm:$0xff] }
 0xa5d   :  { %v3066_v50 = vpop.permute.xlu0 %3065  ;;  %3389 = vperm.xlu1 %7453, %v12541_v45   ;;  %v3259_v18 = vadd.f32 %v3227_v31, %v2939_v51  ;;  %v11179_v20 = vadd.f32 %v1636_v7, %v1600_v17  ;;  %v3544_v14 = vmul.f32 %v3467_v22, %v12545_v57  ;;  %v3787_v53 = vrot.slane %v10970_v54, %v12547_v29  ;;  %v12548_v31 = vld [vmem:[#allocation97_spill] sm:$0xff] }
 0xa5e   :  { %v3350_v37 = vpop.permute.xlu1 %3349  ;;  %v3256_v32 = vadd.f32 %v3224_v10, %v2936_v5  ;;  %v12550_v10 = vld [vmem:[#allocation91_spill] sm:$0xff] }
 0xa5f   :  { %v3547_v34 = vmul.f32 %v3479_v9, %v3350_v37  ;;  %12544 = vst [vmem:[#allocation95_spill] sm:$0xff] %v11179_v20  ;;  %v2235_v5 = vrot.slane %v11179_v20, %v12381_v38  ;;  %v1947_v9 = vrot.slane %v11179_v20, %v12383_v59  ;;  %v2555_v17 = vrot.slane %v11179_v20, %v12353_v63 }
 0xa60   :  { %v3576_v8 = vadd.f32 %v3544_v14, %v3256_v32  ;;  %v2875_v57 = vrot.slane %v11179_v20, %v12495_v6 }
 0xa61   :  { %v11174_v2 = vadd.f32 %v3547_v34, %v3259_v18  ;;  %v11176_v46 = vpop.permute.xlu0 %3069  ;;  %7454 = vset.pattern.permute.xlu1 %v12452_v23  ;;  %v2276_v7 = vmul.f32 %v2235_v5, %v12549_v11  ;;  %v1988_v37 = vmul.f32 %v1947_v9, %v12550_v10  ;;  %v12551_v18 = vld [vmem:[#allocation4_spill] sm:$0xff] }
 0xa62   :  { %3685 = vperm.xlu1 %7454, %v12546_v43   ;;  %v5164_v41 = vpop.f32.mrb[6].mxu0  ;;  %v2596_v34 = vmul.f32 %v2555_v17, %v12551_v18 }
 0xa63   :  { %7595 = vrcp.f32 %v5164_v41  ;;  %v3658_v19 = vpop.permute.xlu1 %3657  ;;  %v6863_v62 = vpop.f32.mrb[7].mxu0  ;;  %v2308_v32 = vadd.f32 %v2276_v7, %v1988_v37  ;;  %v12554_v7 = vmov 0.0  }
 0xa64   :  { %v3864_v51 = vmul.f32 %v3787_v53, %v3658_v19  ;;  %v3195_v19 = vrot.slane %v11179_v20, %v12498_v13  ;;  %v12552_v62 = vld [vmem:[#allocation8_spill] sm:$0xff] }
 0xa65   :  { %v11185_v40 = vpop.permute.xlu0 %3077  ;;  %v2628_v53 = vadd.f32 %v2596_v34, %v2308_v32 }
 0xa66   :  { %v11189_v61 = vadd.f32 %v3864_v51, %v3576_v8  ;;  %7455 = vset.pattern.permute.xlu1 %v12468_v4 }
 0xa67   :  { %3997 = vperm.xlu1 %7455, %v12548_v31   ;;  %v3236_v31 = vmul.f32 %v3195_v19, %v3066_v50  ;;  %v3483_v50 = vrot.slane %v10925_v15, %v12501_v55 }
 0xa68   :  { %v11198_v35 = vpop.permute.xlu1 %2433 }
 0xa6a   :  { %v11202_v22 = vpop.permute.xlu0 %3341 }
 0xa6b   :  { %4009 = vperm.xlu1 %7455, %v10559_v56   ;;  %v12553_v56 = vld [vmem:[#allocation12_spill] sm:$0xff] }
 0xa6c   :  { %v3187_v11 = vrot.slane %v12553_v56, %v12498_v13 }
 0xa6d   :  { %v7596_v14 = vpop.eup %7595  ;;  %v2746_v41 = vpop.permute.xlu1 %2745 }
 0xa6e   :  { %v5169_v8 = vmul.f32 %v7596_v14, %v12552_v62  ;;  %v2916_v51 = vmul.f32 %v2875_v57, %v2746_v41  ;;  %v11210_v5 = vpop.permute.xlu0 %3369 }
 0xa6f   :  { %7456 = vset.pattern.permute.xlu1 %v12444_v0 }
 0xa70   :  { %v2948_v9 = vadd.f32 %v2916_v51, %v2628_v53  ;;  %3393 = vperm.xlu1 %7456, %v10652_v48   ;;  %6869 = vmatmul.mubr.msk.f32.vlgmr.msra.gmra.mrb[8].mxu0 %vm5094_vm0, %v5169_v8  ;;  %v3199_v51 = vrot.slane %v11000_v52, %v12498_v13 }
 0xa71   :  { %6879 = vmatprep.mubr.msk.f32.mxu0 %vm7629_vm13, %v12554_v7 }
 0xa72   :  { %v11219_v17 = vpop.permute.xlu0 %3397  ;;  %v3058_v10 = vpop.permute.xlu1 %3057  ;;  %v11221_v37 = vadd.f32 %v3236_v31, %v2948_v9 }
 0xa73   :  { %v3234_v18 = vmul.f32 %v3187_v11, %v3058_v10  ;;  %v3237_v11 = vmul.f32 %v3199_v51, %v11176_v46  ;;  %v12556_v10 = vld [vmem:[#allocation28_spill] sm:$0xff]  ;;  %v12558_v46 = vld [vmem:[#allocation85_spill] sm:$0xff] }
 0xa74   :  { %12555 = vst [vmem:[#allocation63_spill] sm:$0xff] %v11221_v37  ;;  %7457 = vset.pattern.permute.xlu1 %v12452_v23 }
 0xa75   :  { %v11225_v0 = vadd.f32 %v3234_v18, %v10987_v39  ;;  %3705 = vperm.xlu1 %7457, %v12517_v28   ;;  %v2567_v39 = vrot.slane %v11002_v44, %v12353_v63  ;;  %v3191_v18 = vrot.slane %v12556_v10, %v12498_v13 }
 0xa77   :  { %v11230_v34 = vpop.permute.xlu0 %3661  ;;  %v3354_v32 = vpop.permute.xlu1 %3353 }
 0xa78   :  { %v3548_v57 = vmul.f32 %v3483_v50, %v3354_v32 }
 0xa79   :  { %7458 = vset.pattern.permute.xlu1 %v12468_v4 }
 0xa7a   :  { %v11234_v14 = vadd.f32 %v3548_v57, %v11094_v33  ;;  %4017 = vperm.xlu1 %7458, %v10539_v47   ;;  %v2879_v33 = vrot.slane %v11000_v52, %v12495_v6 }
 0xa7b   :  { %v11237_v41 = vpop.permute.xlu0 %3665 }
 0xa7c   :  { %v2438_v53 = vpop.permute.xlu1 %2437 }
 0xa7d   :  { %v2599_v19 = vmul.f32 %v2567_v39, %v2438_v53 }
 0xa7e   :  { %7460 = vset.pattern.permute.xlu1 %v12452_v23 }
 0xa7f   :  { %v11243_v62 = vadd.f32 %v2599_v19, %v11050_v36  ;;  %v11245_v8 = vpop.permute.xlu0 %3673  ;;  %3709 = vperm.xlu1 %7460, %v12541_v45   ;;  %v12559_v19 = vld [vmem:[#allocation59_spill] sm:$0xff] }
 0xa81   :  { %v2750_v47 = vpop.permute.xlu1 %2749 }
 0xa82   :  { %v2917_v31 = vmul.f32 %v2879_v33, %v2750_v47  ;;  %v1534_v33 = vmul.f32 %v12461_v16, %v12559_v19  ;;  %v12563_v19 = vld [vmem:[#allocation83_spill] sm:$0xff] }
 0xa83   :  { %v11252_v9 = vpop.permute.xlu0 %3677  ;;  %7461 = vset.pattern.permute.xlu1 %v12468_v4 }
 0xa84   :  { %v2949_v36 = vadd.f32 %v2917_v31, %v11080_v30  ;;  %4005 = vperm.xlu1 %7461, %v12546_v43   ;;  %v3487_v30 = vrot.slane %v10980_v49, %v12501_v55  ;;  %v1570_v43 = vmul.f32 %v12538_v58, %v12558_v46 }
 0xa86   :  { %v3062_v50 = vpop.permute.xlu1 %3061  ;;  %v11260_v32 = vadd.f32 %v3237_v11, %v2949_v36  ;;  %v3503_v36 = vrot.slane %v10936_v26, %v12501_v55 }
 0xa87   :  { %v3235_v57 = vmul.f32 %v3191_v18, %v3062_v50  ;;  %v11262_v39 = vpop.permute.xlu0 %3681  ;;  %v1602_v18 = vadd.f32 %v1570_v43, %v1534_v33  ;;  %v12561_v50 = vld [vmem:[#allocation57_spill] sm:$0xff] }
 0xa88   :  { %12557 = vst [vmem:[#allocation49_spill] sm:$0xff] %v11260_v32  ;;  %7462 = vset.pattern.permute.xlu1 %v12452_v23  ;;  %v12560_v23 = vld [vmem:[#allocation26_spill] sm:$0xff]  ;;  %v12565_v33 = vld [vmem:[#allocation101_spill] sm:$0xff] }
 0xa89   :  { %v11266_v53 = vadd.f32 %v3235_v57, %v11066_v1  ;;  %3713 = vperm.xlu1 %7462, %v10652_v48   ;;  %v2831_v1 = vrot.slane %v12560_v23, %v12495_v6  ;;  %v1638_v57 = vmul.f32 %v12464_v3, %v12561_v50  ;;  %v3151_v7 = vrot.slane %v12560_v23, %v12498_v13 }
 0xa8a   :  { %v4107_v50 = vrot.slane %v10970_v54, %v12565_v33 }
 0xa8b   :  { %v11275_v47 = vpop.permute.xlu0 %3701  ;;  %v3358_v51 = vpop.permute.xlu1 %3357  ;;  %v11300_v43 = vadd.f32 %v1638_v57, %v1602_v18 }
 0xa8c   :  { %v3549_v31 = vmul.f32 %v3487_v30, %v3358_v51 }
 0xa8d   :  { %7463 = vset.pattern.permute.xlu1 %v12468_v4  ;;  %v2905_v4 = vmul.f32 %v2831_v1, %v12563_v19  ;;  %v3799_v1 = vrot.slane %v11033_v42, %v12547_v29  ;;  %v2243_v54 = vrot.slane %v11300_v43, %v12381_v38 }
 0xa8e   :  { %v11281_v11 = vadd.f32 %v3549_v31, %v11149_v25  ;;  %4025 = vperm.xlu1 %7463, %v12517_v28   ;;  %v12564_v25 = vld [vmem:[#allocation16_spill] sm:$0xff]  ;;  %v3471_v28 = vrot.slane %v12560_v23, %v12501_v55 }
 0xa8f   :  { %v11288_v46 = vpop.permute.xlu0 %3717  ;;  %v3374_v30 = vpop.permute.xlu1 %3373  ;;  %v2937_v31 = vadd.f32 %v2905_v4, %v12564_v25  ;;  %v3791_v4 = vrot.slane %v12560_v23, %v12547_v29 }
 0xa90   :  { %12562 = vst [vmem:[#allocation47_spill] sm:$0xff] %v11288_v46  ;;  %v3553_v51 = vmul.f32 %v3503_v36, %v3374_v30  ;;  %v12566_v36 = vld [vmem:[#allocation17_spill] sm:$0xff]  ;;  %v3545_v19 = vmul.f32 %v3471_v28, %v11202_v22  ;;  %v4119_v28 = vrot.slane %v11033_v42, %v12565_v33 }
 0xa91   :  { %v3225_v30 = vmul.f32 %v3151_v7, %v12566_v36  ;;  %v3865_v18 = vmul.f32 %v3791_v4, %v11230_v34  ;;  %v1955_v34 = vrot.slane %v11300_v43, %v12383_v59 }
 0xa92   :  { %v11297_v32 = vadd.f32 %v3553_v51, %v11126_v21  ;;  %4029 = vperm.xlu1 %7463, %v12541_v45  }
 0xa93   :  { %v3257_v45 = vadd.f32 %v3225_v30, %v2937_v31  ;;  %v12567_v31 = vld [vmem:[#allocation18_spill] sm:$0xff] }
 0xa94   :  { %v3978_v25 = vpop.permute.xlu0 %3977  ;;  %v3670_v21 = vpop.permute.xlu1 %3669 }
 0xa95   :  { %v4184_v51 = vmul.f32 %v4107_v50, %v3978_v25  ;;  %v3867_v37 = vmul.f32 %v3799_v1, %v3670_v21  ;;  %v3577_v22 = vadd.f32 %v3545_v19, %v3257_v45  ;;  %v4111_v50 = vrot.slane %v12560_v23, %v12565_v33  ;;  %v12568_v23 = vld [vmem:[#allocation6_spill] sm:$0xff] }
 0xa96   :  { %4033 = vperm.xlu1 %7463, %v10652_v48   ;;  %v2278_v48 = vmul.f32 %v2243_v54, %v12567_v31  ;;  %v2563_v1 = vrot.slane %v11300_v43, %v12353_v63  ;;  %v1990_v4 = vmul.f32 %v1955_v34, %v12568_v23  ;;  %v2883_v31 = vrot.slane %v11300_v43, %v12495_v6  ;;  %v12570_v23 = vld [vmem:[#allocation2_spill] sm:$0xff] }
 0xa97   :  { %v4216_v57 = vadd.f32 %v4184_v51, %v11189_v61  ;;  %v3899_v7 = vadd.f32 %v3867_v37, %v11174_v2  ;;  %v11328_v2 = vld [vmem:[%s11822_s3 + $0x8] ss:$0 sm:$0xff]  ;;  %v3897_v37 = vadd.f32 %v3865_v18, %v3577_v22 }
 0xa98   :  { %v3990_v36 = vpop.permute.xlu0 %3989  ;;  %v2598_v25 = vmul.f32 %v2563_v1, %v11198_v35  ;;  %v2310_v45 = vadd.f32 %v2278_v48, %v1990_v4  ;;  %v12569_v1 = vld [vmem:[#allocation92_spill] sm:$0xff] }
 0xa99   :  { %v4252_v61 = vadd.f32 %v11328_v2, %v4216_v57  ;;  %v3982_v42 = vpop.permute.xlu1 %3981  ;;  %v4187_v30 = vmul.f32 %v4119_v28, %v3990_v36 }
 0xa9a   :  { %v4185_v19 = vmul.f32 %v4111_v50, %v3982_v42  ;;  %v2630_v18 = vadd.f32 %v2598_v25, %v2310_v45 }
 0xa9b   :  { %v4284_v21 = vmax.f32 %v4252_v61, 0.0  ;;  %v4219_v20 = vadd.f32 %v4187_v30, %v3899_v7  ;;  %v3491_v61 = vrot.slane %v12569_v1, %v12501_v55 }
 0xa9c   :  { %v4217_v51 = vadd.f32 %v4185_v19, %v3897_v37 }
 0xa9d   :  { %v4413_v54 = vsel %vm4300_vm4, %v4284_v21, -inf  ;;  %v4255_v34 = vadd.f32 %v11328_v2, %v4219_v20  ;;  %v3507_v20 = vrot.slane %v12553_v56, %v12501_v55 }
 0xa9e   :  { %v4414_v52 = vrot.slane %v4413_v54, 4  ;;  %v4253_v57 = vadd.f32 %v11328_v2, %v4217_v51  ;;  %v2754_v46 = vpop.permute.xlu1 %2753 }
 0xa9f   :  { %v2918_v22 = vmul.f32 %v2883_v31, %v2754_v46  ;;  %v3795_v46 = vrot.slane %v12570_v23, %v12547_v29 }
 0xaa0   :  { %v4415_v28 = vmax.f32 %v4413_v54, %v4414_v52  ;;  %v4285_v36 = vmax.f32 %v4253_v57, 0.0  ;;  %v4287_v52 = vmax.f32 %v4255_v34, 0.0 }
 0xaa1   :  { %v11337_v50 = vadd.f32 %v2918_v22, %v2630_v18  ;;  %v3866_v51 = vmul.f32 %v3795_v46, %v11237_v41  ;;  %v63_v41 = vld [vmem:[%s11822_s3 + $0x130] sm:$0xff]  ;;  %v2887_v46 = vrot.slane %v11002_v44, %v12495_v6 }
 0xaa2   :  { %v4416_v35 = vrot.slane %v4415_v28, 2  ;;  %v4420_v48 = vsel %vm4300_vm4, %v4285_v36, -inf  ;;  %v4434_v57 = vsel %vm4300_vm4, %v4287_v52, -inf }
 0xaa3   :  { %v4421_v42 = vrot.slane %v4420_v48, 4  ;;  %v3362_v37 = vpop.permute.xlu1 %3361 }
 0xaa4   :  { %v3550_v7 = vmul.f32 %v3491_v61, %v3362_v37  ;;  %v4417_v30 = vmax.f32 %v4415_v28, %v4416_v35  ;;  %v12571_v28 = vld [vmem:[#allocation73_spill] sm:$0xff]  ;;  %v65_v37 = vld [vmem:[%s11822_s3 + $0x140] sm:$0xff] }
 0xaa5   :  { %v4422_v19 = vmax.f32 %v4420_v48, %v4421_v42  ;;  %v3898_v36 = vadd.f32 %v3866_v51, %v12571_v28  ;;  %v4435_v48 = vrot.slane %v4434_v57, 4  ;;  %v12572_v51 = vmov 0.0|0.0  }
 0xaa6   :  { %v11346_v4 = vadd.f32 %v3550_v7, %v11147_v60  ;;  %v4418_v54 = vrot.slane %v4417_v30, 1  ;;  %v4115_v60 = vrot.slane %v12570_v23, %v12565_v33 }
 0xaa7   :  { %v4423_v25 = vrot.slane %v4422_v19, 2  ;;  %v3378_v21 = vpop.permute.xlu1 %3377 }
 0xaa8   :  { %v3554_v45 = vmul.f32 %v3507_v20, %v3378_v21  ;;  %v4419_v34 = vmax.f32 %v4417_v30, %v4418_v54  ;;  %v66_v30 = vld [vmem:[%s11822_s3 + $0x148] sm:$0xff]  ;;  %v4436_v20 = vmax.f32 %v4434_v57, %v4435_v48 }
 0xaa9   :  { %v4424_v31 = vmax.f32 %v4422_v19, %v4423_v25  ;;  %v11376_v52 = vpack.c.bf16 %v66_v30, %v65_v37 }
 0xaaa   :  { %v11353_v18 = vadd.f32 %v3554_v45, %v11225_v0  ;;  %v64_v0 = vld [vmem:[%s11822_s3 + $0x138] sm:$0xff]  ;;  %v3207_v45 = vrot.slane %v11002_v44, %v12498_v13  ;;  %v4437_v28 = vrot.slane %v4436_v20, 2 }
 0xaab   :  { %v4425_v22 = vrot.slane %v4424_v31, 1  ;;  %v11367_v7 = vpack.c.bf16 %v64_v0, %v63_v41 }
 0xaac   :  { %v3986_v35 = vpop.permute.xlu1 %3985 }
 0xaad   :  { %v4426_v61 = vmax.f32 %v4424_v31, %v4425_v22  ;;  %v4186_v42 = vmul.f32 %v4115_v60, %v3986_v35  ;;  %7092 = vmatpush3.bf16.msra.mxu0 %v11367_v7  ;;  %v3239_v22 = vmul.f32 %v3207_v45, %v11185_v40  ;;  %v3499_v40 = vrot.slane %v10876_v12, %v12501_v55 }
 0xaae   :  { %7093 = vmatprep.subr.bf16.mxu0 %v12572_v51 }
 0xaaf   :  { %v5645_v19 = vsel %vm4554_vm5, %v4426_v61, %v4419_v34  ;;  %v4218_v23 = vadd.f32 %v4186_v42, %v3898_v36  ;;  %v4438_v61 = vmax.f32 %v4436_v20, %v4437_v28  ;;  %v3511_v42 = vrot.slane %v12556_v10, %v12501_v55 }
 0xab0   :  { %v3552_v37 = vmul.f32 %v3499_v40, %v11210_v5 }
 0xab1   :  { %v4254_v25 = vadd.f32 %v11328_v2, %v4218_v23  ;;  %v2758_v21 = vpop.permute.xlu1 %2757  ;;  %7095 = vmatpush3.bf16.msra.mxu0 %v11376_v52  ;;  %v4439_v23 = vrot.slane %v4438_v61, 1 }
 0xab2   :  { %v2919_v54 = vmul.f32 %v2887_v46, %v2758_v21  ;;  %7096 = vmatprep.subr.bf16.mxu0 %v12572_v51  ;;  %v3819_v21 = vrot.slane %v10876_v12, %v12547_v29  ;;  %v3584_v45 = vadd.f32 %v3552_v37, %v11162_v27  ;;  %v3823_v27 = vrot.slane %v10936_v26, %v12547_v29 }
 0xab3   :  { %v4286_v31 = vmax.f32 %v4254_v25, 0.0  ;;  %v4131_v37 = vrot.slane %v12569_v1, %v12565_v33 }
 0xab4   :  { %v2951_v60 = vadd.f32 %v2919_v54, %v11243_v62 }
 0xab5   :  { %v4427_v36 = vsel %vm4300_vm4, %v4286_v31, -inf }
 0xab6   :  { %v4428_v57 = vrot.slane %v4427_v36, 4  ;;  %v11387_v35 = vadd.f32 %v3239_v22, %v2951_v60  ;;  %v11389_v34 = vpop.permute.xlu1 %3365  ;;  %v4440_v22 = vmax.f32 %v4438_v61, %v4439_v23 }
 0xab8   :  { %v4429_v48 = vmax.f32 %v4427_v36, %v4428_v57 }
 0xaba   :  { %v4430_v62 = vrot.slane %v4429_v48, 2  ;;  %v3382_v41 = vpop.permute.xlu1 %3381 }
 0xabb   :  { %v3555_v0 = vmul.f32 %v3511_v42, %v3382_v41  ;;  %v3811_v42 = vrot.slane %v12569_v1, %v12547_v29 }
 0xabc   :  { %v4431_v30 = vmax.f32 %v4429_v48, %v4430_v62 }
 0xabd   :  { %v3587_v46 = vadd.f32 %v3555_v0, %v11266_v53  ;;  %v4014_v53 = vpop.permute.xlu0 %4013  ;;  %v3870_v61 = vmul.f32 %v3811_v42, %v11262_v39 }
 0xabe   :  { %v4432_v25 = vrot.slane %v4431_v30, 1 }
 0xabf   :  { %v3690_v20 = vpop.permute.xlu1 %3689 }
 0xac0   :  { %v4433_v54 = vmax.f32 %v4431_v30, %v4432_v25  ;;  %v3872_v31 = vmul.f32 %v3819_v21, %v3690_v20  ;;  %v3902_v30 = vadd.f32 %v3870_v61, %v11346_v4  ;;  %v4123_v25 = vrot.slane %v10925_v15, %v12565_v33 }
 0xac1   :  { %v4002_v62 = vpop.permute.xlu0 %4001  ;;  %v4143_v21 = vrot.slane %v10936_v26, %v12565_v33 }
 0xac2   :  { %v5646_v60 = vsel %vm4556_vm6, %v4433_v54, %v5645_v19  ;;  %v11401_v28 = vadd.f32 %v3872_v31, %v3584_v45  ;;  %v3803_v19 = vrot.slane %v10925_v15, %v12547_v29  ;;  %v4190_v23 = vmul.f32 %v4131_v37, %v4002_v62 }
 0xac3   :  { %v3694_v36 = vpop.permute.xlu1 %3693  ;;  %v11404_v5 = vsel %vm4558_vm7, %v4440_v22, %v5646_v60 }
 0xac4   :  { %v3873_v41 = vmul.f32 %v3823_v27, %v3694_v36  ;;  %v3868_v0 = vmul.f32 %v3803_v19, %v11245_v8  ;;  %v4222_v54 = vadd.f32 %v4190_v23, %v3902_v30  ;;  %v4193_v8 = vmul.f32 %v4143_v21, %v4014_v53  ;;  %v12573_v30 = vld [vmem:[#allocation61_spill] sm:$0xff] }
 0xac5   :  { %v3831_v53 = vrot.slane %v12556_v10, %v12547_v29  ;;  %v1527_v23 = vmul.f32 %v12461_v16, %v12573_v30 }
 0xac6   :  { %v3905_v39 = vadd.f32 %v3873_v41, %v11297_v32  ;;  %v3900_v45 = vadd.f32 %v3868_v0, %v11234_v14  ;;  %v4258_v1 = vadd.f32 %v11328_v2, %v4222_v54  ;;  %v3807_v14 = vrot.slane %v10980_v49, %v12547_v29 }
 0xac7   :  { %v3875_v0 = vmul.f32 %v3831_v53, %v11275_v47  ;;  %v4151_v54 = vrot.slane %v12556_v10, %v12565_v33 }
 0xac8   :  { %v11406_v57 = vpop.permute.xlu1 %3073  ;;  %v4225_v60 = vadd.f32 %v4193_v8, %v3905_v39  ;;  %v4290_v26 = vmax.f32 %v4258_v1, 0.0  ;;  %v3869_v41 = vmul.f32 %v3807_v14, %v11252_v9  ;;  %v4127_v39 = vrot.slane %v10980_v49, %v12565_v33 }
 0xac9   :  { %v4139_v49 = vrot.slane %v10876_v12, %v12565_v33 }
 0xaca   :  { %v4261_v42 = vadd.f32 %v11328_v2, %v4225_v60  ;;  %v4455_v37 = vsel %vm4300_vm4, %v4290_v26, -inf  ;;  %v3901_v9 = vadd.f32 %v3869_v41, %v11281_v11 }
 0xacb   :  { %v4456_v8 = vrot.slane %v4455_v37, 4 }
 0xacc   :  { %v4293_v61 = vmax.f32 %v4261_v42, 0.0 }
 0xacd   :  { %v11408_v48 = vpop.permute.xlu1 %3385  ;;  %v4457_v11 = vmax.f32 %v4455_v37, %v4456_v8 }
 0xad2   :  { %v11417_v40 = vpop.permute.xlu1 %3697 }
 0xad7   :  { %v3994_v20 = vpop.permute.xlu1 %3993 }
 0xad8   :  { %v4188_v31 = vmul.f32 %v4123_v25, %v3994_v20  ;;  %v4022_v25 = vpop.permute.xlu0 %4021  ;;  %v12574_v20 = vld [vmem:[#allocation50_spill] sm:$0xff] }
 0xad9   :  { %v4195_v1 = vmul.f32 %v4151_v54, %v4022_v25 }
 0xada   :  { %v4220_v22 = vadd.f32 %v4188_v31, %v3900_v45  ;;  %v1563_v45 = vmul.f32 %v12538_v58, %v12574_v20  ;;  %v3907_v31 = vadd.f32 %v3875_v0, %v3587_v46  ;;  %v12575_v58 = vld [vmem:[#allocation86_spill] sm:$0xff] }
 0xadb   :  { %v1631_v26 = vmul.f32 %v12464_v3, %v12575_v58  ;;  %v4458_v3 = vrot.slane %v4457_v11, 2 }
 0xadc   :  { %v4256_v4 = vadd.f32 %v11328_v2, %v4220_v22  ;;  %v11431_v36 = vpop.permute.xlu1 %3389  ;;  %v4476_v22 = vsel %vm4300_vm4, %v4293_v61, -inf  ;;  %v1595_v42 = vadd.f32 %v1563_v45, %v1527_v23  ;;  %v4227_v10 = vadd.f32 %v4195_v1, %v3907_v31 }
 0xadd   :  { %v4477_v46 = vrot.slane %v4476_v22, 4  ;;  %v4459_v31 = vmax.f32 %v4457_v11, %v4458_v3 }
 0xade   :  { %v4288_v15 = vmax.f32 %v4256_v4, 0.0  ;;  %v4263_v12 = vadd.f32 %v11328_v2, %v4227_v10  ;;  %v11463_v30 = vadd.f32 %v1631_v26, %v1595_v42 }
 0xadf   :  { %v4478_v0 = vmax.f32 %v4476_v22, %v4477_v46  ;;  %v12578_v46 = vld [vmem:[#allocation3_spill] sm:$0xff] }
 0xae0   :  { %v4441_v32 = vsel %vm4300_vm4, %v4288_v15, -inf  ;;  %v4295_v20 = vmax.f32 %v4263_v12, 0.0  ;;  %v2215_v54 = vrot.slane %v11463_v30, %v12381_v38  ;;  %v1927_v8 = vrot.slane %v11463_v30, %v12383_v59 }
 0xae1   :  { %v4442_v27 = vrot.slane %v4441_v32, 4  ;;  %v11435_v19 = vpop.permute.xlu1 %3685  ;;  %v4479_v45 = vrot.slane %v4478_v0, 2  ;;  %v2535_v22 = vrot.slane %v11463_v30, %v12353_v63  ;;  %v2855_v38 = vrot.slane %v11463_v30, %v12495_v6  ;;  %v12577_v63 = vld [vmem:[#allocation81_spill] sm:$0xff] }
 0xae2   :  { %v4490_v42 = vsel %vm4300_vm4, %v4295_v20, -inf  ;;  %v1983_v10 = vmul.f32 %v1927_v8, %v12577_v63  ;;  %v3495_v11 = vrot.slane %v11463_v30, %v12501_v55  ;;  %v3527_v6 = vrot.slane %v11002_v44, %v12501_v55 }
 0xae3   :  { %v4443_v62 = vmax.f32 %v4441_v32, %v4442_v27  ;;  %v4480_v59 = vmax.f32 %v4478_v0, %v4479_v45  ;;  %v4491_v0 = vrot.slane %v4490_v42, 4 }
 0xae5   :  { %v4444_v21 = vrot.slane %v4443_v62, 2 }
 0xae6   :  { %v3998_v47 = vpop.permute.xlu1 %3997 }
 0xae7   :  { %v4445_v60 = vmax.f32 %v4443_v62, %v4444_v21  ;;  %v4189_v16 = vmul.f32 %v4127_v39, %v3998_v47  ;;  %v4147_v47 = vrot.slane %v12553_v56, %v12565_v33 }
 0xae9   :  { %v4446_v4 = vrot.slane %v4445_v60, 1  ;;  %v4221_v15 = vadd.f32 %v4189_v16, %v3901_v9 }
 0xaea   :  { %v4010_v32 = vpop.permute.xlu1 %4009 }
 0xaeb   :  { %v4447_v27 = vmax.f32 %v4445_v60, %v4446_v4  ;;  %v4257_v14 = vadd.f32 %v11328_v2, %v4221_v15  ;;  %v4192_v53 = vmul.f32 %v4139_v49, %v4010_v32  ;;  %v12576_v4 = vld [vmem:[#allocation89_spill] sm:$0xff]  ;;  %v3175_v49 = vrot.slane %v11463_v30, %v12498_v13 }
 0xaec   :  { %v2271_v15 = vmul.f32 %v2215_v54, %v12576_v4  ;;  %v2591_v32 = vmul.f32 %v2535_v22, %v12578_v46  ;;  %v3551_v4 = vmul.f32 %v3495_v11, %v11389_v34  ;;  %v4167_v34 = vrot.slane %v11002_v44, %v12565_v33 }
 0xaed   :  { %v4289_v61 = vmax.f32 %v4257_v14, 0.0  ;;  %v4224_v62 = vadd.f32 %v4192_v53, %v11401_v28  ;;  %v5648_v41 = vsel %vm4560_vm8, %v4447_v27, %v11404_v5  ;;  %v3827_v28 = vrot.slane %v12553_v56, %v12547_v29 }
 0xaee   :  { %v4460_v27 = vrot.slane %v4459_v31, 1  ;;  %v3815_v14 = vrot.slane %v11463_v30, %v12547_v29 }
 0xaef   :  { %v4448_v23 = vsel %vm4300_vm4, %v4289_v61, -inf  ;;  %v4260_v37 = vadd.f32 %v11328_v2, %v4224_v62  ;;  %v11467_v25 = vpop.permute.xlu1 %3393  ;;  %v3874_v56 = vmul.f32 %v3827_v28, %v11417_v40  ;;  %v2303_v61 = vadd.f32 %v2271_v15, %v1983_v10  ;;  %v12579_v62 = vld [vmem:[#allocation40_spill] sm:$0xff] }
 0xaf0   :  { %v4449_v21 = vrot.slane %v4448_v23, 4  ;;  %v2911_v12 = vmul.f32 %v2855_v38, %v12579_v62  ;;  %v3559_v28 = vmul.f32 %v3527_v6, %v11219_v17  ;;  %v4461_v54 = vmax.f32 %v4459_v31, %v4460_v27  ;;  %v12581_v62 = vld [vmem:[#allocation95_spill] sm:$0xff] }
 0xaf1   :  { %v4292_v39 = vmax.f32 %v4260_v37, 0.0  ;;  %v3906_v3 = vadd.f32 %v3874_v56, %v11353_v18  ;;  %v4481_v37 = vrot.slane %v4480_v59, 1  ;;  %v2623_v45 = vadd.f32 %v2591_v32, %v2303_v61 }
 0xaf2   :  { %v4450_v5 = vmax.f32 %v4448_v23, %v4449_v21  ;;  %v3591_v18 = vadd.f32 %v3559_v28, %v11387_v35  ;;  %v4492_v15 = vmax.f32 %v4490_v42, %v4491_v0  ;;  %v4135_v32 = vrot.slane %v11463_v30, %v12565_v33 }
 0xaf3   :  { %v4469_v9 = vsel %vm4300_vm4, %v4292_v39, -inf  ;;  %v4482_v17 = vmax.f32 %v4480_v59, %v4481_v37 }
 0xaf4   :  { %v4451_v60 = vrot.slane %v4450_v5, 2  ;;  %v4470_v16 = vrot.slane %v4469_v9, 4  ;;  %v11480_v1 = vpop.permute.xlu1 %3705  ;;  %v4493_v42 = vrot.slane %v4492_v15, 2 }
 0xaf6   :  { %v4452_v58 = vmax.f32 %v4450_v5, %v4451_v60  ;;  %v4471_v26 = vmax.f32 %v4469_v9, %v4470_v16  ;;  %v3847_v5 = vrot.slane %v11002_v44, %v12547_v29  ;;  %v3231_v9 = vmul.f32 %v3175_v49, %v11154_v24 }
 0xaf7   :  { %v2943_v16 = vadd.f32 %v2911_v12, %v2623_v45  ;;  %v4494_v61 = vmax.f32 %v4492_v15, %v4493_v42  ;;  %v3515_v12 = vrot.slane %v12581_v62, %v12501_v55  ;;  %v12582_v45 = vld [vmem:[#allocation44_spill] sm:$0xff] }
 0xaf8   :  { %v4453_v40 = vrot.slane %v4452_v58, 1  ;;  %v4472_v53 = vrot.slane %v4471_v26, 2  ;;  %v3519_v28 = vrot.slane %v12582_v45, %v12501_v55 }
 0xaf9   :  { %v4018_v23 = vpop.permute.xlu1 %4017  ;;  %v3263_v49 = vadd.f32 %v3231_v9, %v2943_v16  ;;  %v3203_v9 = vrot.slane %v11300_v43, %v12498_v13 }
 0xafa   :  { %v4454_v21 = vmax.f32 %v4452_v58, %v4453_v40  ;;  %v4473_v39 = vmax.f32 %v4471_v26, %v4472_v53  ;;  %v4194_v20 = vmul.f32 %v4147_v47, %v4018_v23  ;;  %v12580_v58 = vld [vmem:[#allocation47_spill] sm:$0xff]  ;;  %v4038_v26 = vpop.permute.xlu0 %4037  ;;  %v3835_v23 = vrot.slane %v12581_v62, %v12547_v29 }
 0xafb   :  { %v3879_v24 = vmul.f32 %v3847_v5, %v12580_v58  ;;  %v3583_v46 = vadd.f32 %v3551_v4, %v3263_v49  ;;  %v4199_v11 = vmul.f32 %v4167_v34, %v4038_v26  ;;  %v12584_v34 = vld [vmem:[#allocation49_spill] sm:$0xff] }
 0xafc   :  { %v4474_v8 = vrot.slane %v4473_v39, 1  ;;  %v4226_v22 = vadd.f32 %v4194_v20, %v3906_v3  ;;  %v5649_v60 = vsel %vm4562_vm9, %v4454_v21, %v5648_v41  ;;  %v3871_v41 = vmul.f32 %v3815_v14, %v11435_v19 }
 0xafd   :  { %v11507_v47 = vsel %vm4564_vm10, %v4461_v54, %v5649_v60  ;;  %v3911_v10 = vadd.f32 %v3879_v24, %v3591_v18  ;;  %v3556_v3 = vmul.f32 %v3515_v12, %v11408_v48  ;;  %v4495_v20 = vrot.slane %v4494_v61, 1  ;;  %v12583_v60 = vld [vmem:[#allocation63_spill] sm:$0xff] }
 0xafe   :  { %v4475_v38 = vmax.f32 %v4473_v39, %v4474_v8  ;;  %v4262_v56 = vadd.f32 %v11328_v2, %v4226_v22  ;;  %v3710_v31 = vpop.permute.xlu1 %3709  ;;  %v3903_v40 = vadd.f32 %v3871_v41, %v3583_v46  ;;  %v3876_v5 = vmul.f32 %v3835_v23, %v11480_v1 }
 0xaff   :  { %v4231_v19 = vadd.f32 %v4199_v11, %v3911_v10  ;;  %v3523_v48 = vrot.slane %v11300_v43, %v12501_v55  ;;  %v3839_v22 = vrot.slane %v12582_v45, %v12547_v29  ;;  %v3588_v16 = vadd.f32 %v3556_v3, %v12583_v60 }
 0xb00   :  { %v5652_v63 = vsel %vm4554_vm5, %v4482_v17, %v4475_v38  ;;  %v4294_v35 = vmax.f32 %v4262_v56, 0.0  ;;  %v3557_v18 = vmul.f32 %v3519_v28, %v11431_v36  ;;  %v4155_v1 = vrot.slane %v12581_v62, %v12565_v33 }
 0xb01   :  { %v4267_v21 = vadd.f32 %v11328_v2, %v4231_v19  ;;  %v3238_v17 = vmul.f32 %v3203_v9, %v11406_v57  ;;  %v4496_v55 = vmax.f32 %v4494_v61, %v4495_v20  ;;  %v3908_v58 = vadd.f32 %v3876_v5, %v3588_v16  ;;  %v12586_v9 = vld [vmem:[#allocation48_spill] sm:$0xff] }
 0xb02   :  { %v4483_v59 = vsel %vm4300_vm4, %v4294_v35, -inf  ;;  %v3877_v24 = vmul.f32 %v3839_v22, %v3710_v31  ;;  %v3843_v41 = vrot.slane %v11300_v43, %v12547_v29  ;;  %v4159_v36 = vrot.slane %v12582_v45, %v12565_v33 }
 0xb03   :  { %v4484_v27 = vrot.slane %v4483_v59, 4  ;;  %v4006_v6 = vpop.permute.xlu1 %4005  ;;  %v4299_v15 = vmax.f32 %v4267_v21, 0.0  ;;  %v3589_v10 = vadd.f32 %v3557_v18, %v12584_v34  ;;  %v3558_v57 = vmul.f32 %v3523_v48, %v11467_v25 }
 0xb04   :  { %v4191_v53 = vmul.f32 %v4135_v32, %v4006_v6  ;;  %v4163_v25 = vrot.slane %v11300_v43, %v12565_v33 }
 0xb05   :  { %v4485_v14 = vmax.f32 %v4483_v59, %v4484_v27  ;;  %v3270_v59 = vadd.f32 %v3238_v17, %v11337_v50  ;;  %v4518_v11 = vsel %vm4300_vm4, %v4299_v15, -inf  ;;  %v3909_v27 = vadd.f32 %v3877_v24, %v3589_v10 }
 0xb06   :  { %v4223_v44 = vadd.f32 %v4191_v53, %v3903_v40  ;;  %v4519_v12 = vrot.slane %v4518_v11, 4 }
 0xb07   :  { %v4486_v0 = vrot.slane %v4485_v14, 2 }
 0xb08   :  { %v4259_v30 = vadd.f32 %v11328_v2, %v4223_v44  ;;  %v3714_v37 = vpop.permute.xlu1 %3713  ;;  %v4520_v33 = vmax.f32 %v4518_v11, %v4519_v12  ;;  %v12594_v11 = vld [vmem:[#allocation30_spill] sm:$0xff]  ;;  %v76_v12 = vld [vmem:[%s11822_s3 + $0x198] sm:$0xff] }
 0xb09   :  { %v4487_v39 = vmax.f32 %v4485_v14, %v4486_v0  ;;  %v3878_v29 = vmul.f32 %v3843_v41, %v3714_v37 }
 0xb0a   :  { %v4291_v54 = vmax.f32 %v4259_v30, 0.0  ;;  %v4521_v60 = vrot.slane %v4520_v33, 2 }
 0xb0b   :  { %v4488_v8 = vrot.slane %v4487_v39, 1 }
 0xb0c   :  { %v4462_v4 = vsel %vm4300_vm4, %v4291_v54, -inf  ;;  %v12585_v54 = vmov 0.0  }
 0xb0d   :  { %v4489_v13 = vmax.f32 %v4487_v39, %v4488_v8  ;;  %v4463_v38 = vrot.slane %v4462_v4, 4  ;;  %v4026_v56 = vpop.permute.xlu1 %4025 }
 0xb0e   :  { %v4196_v49 = vmul.f32 %v4155_v1, %v4026_v56 }
 0xb0f   :  { %v4464_v26 = vmax.f32 %v4462_v4, %v4463_v38  ;;  %v5653_v35 = vsel %vm4556_vm6, %v4489_v13, %v5652_v63  ;;  %v3590_v63 = vadd.f32 %v3558_v57, %v3270_v59  ;;  %v12587_v4 = vld [vmem:[#allocation55_spill] sm:$0xff]  ;;  %v4522_v13 = vmax.f32 %v4520_v33, %v4521_v60  ;;  %v12591_v59 = vld [vmem:[#allocation52_spill] sm:$0xff] }
 0xb10   :  { %v4228_v46 = vadd.f32 %v4196_v49, %v3908_v58  ;;  %v5654_v42 = vsel %vm4558_vm7, %v4496_v55, %v5653_v35  ;;  %v12588_v58 = vld [vmem:[#allocation31_spill] sm:$0xff]  ;;  %v12589_v35 = vld [vmem:[#allocation32_spill] sm:$0xff] }
 0xb11   :  { %v4465_v31 = vrot.slane %v4464_v26, 2  ;;  %v4030_v32 = vpop.permute.xlu1 %4029  ;;  %v3910_v50 = vadd.f32 %v3878_v29, %v3590_v63  ;;  %v12598_v63 = vld [vmem:[#allocation38_spill] sm:$0xff] }
 0xb12   :  { %v4264_v6 = vadd.f32 %v11328_v2, %v4228_v46  ;;  %v4197_v40 = vmul.f32 %v4159_v36, %v4030_v32  ;;  %v12590_v46 = vld [vmem:[#allocation29_spill] sm:$0xff]  ;;  %v12593_v32 = vld [vmem:[#allocation34_spill] sm:$0xff] }
 0xb13   :  { %v4466_v53 = vmax.f32 %v4464_v26, %v4465_v31  ;;  %v4523_v26 = vrot.slane %v4522_v13, 1  ;;  %v12592_v31 = vld [vmem:[#allocation33_spill] sm:$0xff] }
 0xb14   :  { %v4296_v19 = vmax.f32 %v4264_v6, 0.0  ;;  %v4229_v14 = vadd.f32 %v4197_v40, %v3909_v27  ;;  %v12595_v27 = vld [vmem:[#allocation35_spill] sm:$0xff]  ;;  %v12596_v6 = vld [vmem:[#allocation37_spill] sm:$0xff] }
 0xb15   :  { %v4467_v61 = vrot.slane %v4466_v53, 1  ;;  %v4034_v62 = vpop.permute.xlu1 %4033  ;;  %v4524_v10 = vmax.f32 %v4522_v13, %v4523_v26 }
 0xb16   :  { %v4497_v44 = vsel %vm4300_vm4, %v4296_v19, -inf  ;;  %v4265_v0 = vadd.f32 %v11328_v2, %v4229_v14  ;;  %v4198_v3 = vmul.f32 %v4163_v25, %v4034_v62  ;;  %v12599_v19 = vld [vmem:[#allocation36_spill] sm:$0xff]  ;;  %v12600_v14 = vld [vmem:[#allocation39_spill] sm:$0xff] }
 0xb17   :  { %v4498_v23 = vrot.slane %v4497_v44, 4  ;;  %v4468_v30 = vmax.f32 %v4466_v53, %v4467_v61  ;;  %v12597_v53 = vld [vmem:[#allocation58_spill] sm:$0xff]  ;;  %v74_v25 = vld [vmem:[%s11822_s3 + $0x188] sm:$0xff]  ;;  %v75_v61 = vld [vmem:[%s11822_s3 + $0x190] sm:$0xff] }
 0xb18   :  { %v4297_v37 = vmax.f32 %v4265_v0, 0.0  ;;  %v4230_v21 = vadd.f32 %v4198_v3, %v3910_v50  ;;  %v11605_v62 = vpack.c.bf16 %v75_v61, %v74_v25  ;;  %v77_v50 = vld [vmem:[%s11822_s3 + $0x1a0] sm:$0xff]  ;;  %v88_v61 = vld [vmem:[%s11822_s3 + $0x1f8] sm:$0xff] }
 0xb19   :  { %v4499_v39 = vmax.f32 %v4497_v44, %v4498_v23  ;;  %v5651_v20 = vsel %vm4566_vm11, %v4468_v30, %v11507_v47  ;;  %v11615_v44 = vpack.c.bf16 %v77_v50, %v76_v12  ;;  %v12601_v23 = vld [vmem:[#allocation42_spill] sm:$0xff] }
 0xb1a   :  { %v4504_v45 = vsel %vm4300_vm4, %v4297_v37, -inf  ;;  %v4266_v43 = vadd.f32 %v11328_v2, %v4230_v21  ;;  %6718 = vmatmul.mubr.msk.f32.vlgmr.msra.gmra.mrb[8].mxu1 %vm4300_vm4, %v5651_v20  ;;  %v12602_v37 = vld [vmem:[#allocation62_spill] sm:$0xff] }
 0xb1b   :  { %v4500_v28 = vrot.slane %v4499_v39, 2  ;;  %v4505_v5 = vrot.slane %v4504_v45, 4  ;;  %5733 = vmatprep.mubr.f32.mxu1 %v12585_v54  ;;  %7128 = vmatpush1.bf16.msra.mxu1 %v12586_v9  ;;  %v89_v12 = vld [vmem:[%s11822_s3 + $0x200] sm:$0xff] }
 0xb1c   :  { %v4298_v48 = vmax.f32 %v4266_v43, 0.0  ;;  %7129 = vmatprep.subr.bf16.mxu1 %v12572_v51  ;;  %v11700_v50 = vpack.c.bf16 %v89_v12, %v88_v61 }
 0xb1d   :  { %v4501_v8 = vmax.f32 %v4499_v39, %v4500_v28  ;;  %v4506_v22 = vmax.f32 %v4504_v45, %v4505_v5 }
 0xb1e   :  { %v4511_v47 = vsel %vm4300_vm4, %v4298_v48, -inf }
 0xb1f   :  { %v4502_v16 = vrot.slane %v4501_v8, 1  ;;  %v4507_v18 = vrot.slane %v4506_v22, 2  ;;  %v4512_v2 = vrot.slane %v4511_v47, 4  ;;  %7131 = vmatpush1.bf16.msra.mxu1 %v12587_v4 }
 0xb20   :  { %7132 = vmatprep.subr.bf16.mxu1 %v12572_v51 }
 0xb21   :  { %v4503_v1 = vmax.f32 %v4501_v8, %v4502_v16  ;;  %v4508_v15 = vmax.f32 %v4506_v22, %v4507_v18  ;;  %v4513_v17 = vmax.f32 %v4511_v47, %v4512_v2 }
 0xb23   :  { %v4509_v38 = vrot.slane %v4508_v15, 1  ;;  %v4514_v56 = vrot.slane %v4513_v17, 2  ;;  %v5655_v55 = vsel %vm4560_vm8, %v4503_v1, %v5654_v42  ;;  %7134 = vmatpush1.bf16.msra.mxu1 %v12588_v58  ;;  %v78_v58 = vld [vmem:[%s11822_s3 + $0x1a8] sm:$0xff] }
 0xb24   :  { %7135 = vmatprep.subr.bf16.mxu1 %v12572_v51 }
 0xb25   :  { %v4510_v24 = vmax.f32 %v4508_v15, %v4509_v38  ;;  %v4515_v49 = vmax.f32 %v4513_v17, %v4514_v56 }
 0xb27   :  { %v4516_v41 = vrot.slane %v4515_v49, 1  ;;  %v5656_v36 = vsel %vm4562_vm9, %v4510_v24, %v5655_v55  ;;  %7137 = vmatpush1.bf16.msra.mxu1 %v12589_v35  ;;  %v79_v24 = vld [vmem:[%s11822_s3 + $0x1b0] sm:$0xff] }
 0xb28   :  { %7138 = vmatprep.subr.bf16.mxu1 %v12572_v51 }
 0xb29   :  { %v4517_v34 = vmax.f32 %v4515_v49, %v4516_v41  ;;  %v7610_v49 = vld [vmem:[%s11823_s2 + $0x38] sm:$0xf]  ;;  %v11637_v41 = vld [vmem:[%s11822_s3 + $0x150] ss:$0 sm:$0xff] }
 0xb2b   :  { %v5657_v57 = vsel %vm4564_vm10, %v4517_v34, %v5656_v36  ;;  %7140 = vmatpush1.bf16.msra.mxu1 %v12590_v46  ;;  %v7611_v36 = vld [vmem:[%s11823_s2 + $0x30] sm:$0xf] }
 0xb2c   :  { %v5658_v42 = vsel %vm4566_vm11, %v4524_v10, %v5657_v57  ;;  %7141 = vmatprep.subr.bf16.mxu1 %v12572_v51  ;;  %v11643_v10 = vpack.c.bf16 %v79_v24, %v78_v58 }
 0xb2d   :  { %6719 = vmatmul.mubr.msk.f32.gmra.mrb[10].mxu1 %vm4300_vm4, %v5658_v42  ;;  %v80_v42 = vld [vmem:[%s11822_s3 + $0x1b8] sm:$0xff] }
 0xb2f   :  { %7143 = vmatpush1.bf16.msra.mxu1 %v12591_v59  ;;  %v81_v59 = vld [vmem:[%s11822_s3 + $0x1c0] sm:$0xff] }
 0xb30   :  { %7144 = vmatprep.subr.bf16.mxu1 %v12572_v51 }
 0xb33   :  { %7146 = vmatpush1.bf16.msra.mxu1 %v12592_v31  ;;  %v11654_v31 = vpack.c.bf16 %v81_v59, %v80_v42 }
 0xb34   :  { %7147 = vmatprep.subr.bf16.mxu1 %v12572_v51 }
 0xb37   :  { %7149 = vmatpush1.bf16.msra.mxu1 %v12593_v32  ;;  %v82_v32 = vld [vmem:[%s11822_s3 + $0x1c8] sm:$0xff] }
 0xb38   :  { %7150 = vmatprep.subr.bf16.mxu1 %v12572_v51 }
 0xb3b   :  { %7152 = vmatpush1.bf16.msra.mxu1 %v12594_v11  ;;  %v83_v11 = vld [vmem:[%s11822_s3 + $0x1d0] sm:$0xff] }
 0xb3c   :  { %7153 = vmatprep.subr.bf16.mxu1 %v12572_v51 }
 0xb3f   :  { %7155 = vmatpush1.bf16.msra.mxu1 %v12595_v27  ;;  %v11666_v27 = vpack.c.bf16 %v83_v11, %v82_v32 }
 0xb40   :  { %7156 = vmatprep.subr.bf16.mxu1 %v12572_v51 }
 0xb43   :  { %v5239_v29 = vpop.f32.mrb[8].mxu0  ;;  %7158 = vmatpush1.bf16.msra.mxu1 %v12596_v6  ;;  %v84_v6 = vld [vmem:[%s11822_s3 + $0x1d8] sm:$0xff] }
 0xb44   :  { %v6870_v40 = vpop.f32.mrb[9].mxu0  ;;  %6880 = vmatmul.mubr.msk.f32.vlgmr.msra.gmra.mrb[10].mxu0 %vm4764_vm14, %v5239_v29  ;;  %7159 = vmatprep.subr.bf16.mxu1 %v12572_v51 }
 0xb45   :  { %6890 = vmatprep.mubr.msk.f32.mxu0 %vm7629_vm13, %v12585_v54  ;;  %7098 = vmatpush3.bf16.msra.mxu0 %v11605_v62  ;;  %v85_v40 = vld [vmem:[%s11822_s3 + $0x1e0] sm:$0xff] }
 0xb46   :  { %7099 = vmatprep.subr.bf16.mxu0 %v12572_v51 }
 0xb47   :  { %7161 = vmatpush1.bf16.msra.mxu1 %v12597_v53  ;;  %v11677_v53 = vpack.c.bf16 %v85_v40, %v84_v6  ;;  %v12607_v6 = vld [vmem:[#allocation60_spill] sm:$0xff] }
 0xb48   :  { %7162 = vmatprep.subr.bf16.mxu1 %v12572_v51 }
 0xb49   :  { %7101 = vmatpush3.bf16.msra.mxu0 %v11615_v44 }
 0xb4a   :  { %7102 = vmatprep.subr.bf16.mxu0 %v12572_v51 }
 0xb4b   :  { %7164 = vmatpush1.bf16.msra.mxu1 %v12598_v63  ;;  %v86_v63 = vld [vmem:[%s11822_s3 + $0x1e8] sm:$0xff] }
 0xb4c   :  { %7165 = vmatprep.subr.bf16.mxu1 %v12572_v51 }
 0xb4f   :  { %7167 = vmatpush1.bf16.msra.mxu1 %v12599_v19  ;;  %v87_v19 = vld [vmem:[%s11822_s3 + $0x1f0] sm:$0xff] }
 0xb50   :  { %7168 = vmatprep.subr.bf16.mxu1 %v12572_v51 }
 0xb53   :  { %7170 = vmatpush1.bf16.msra.mxu1 %v12600_v14  ;;  %v11689_v14 = vpack.c.bf16 %v87_v19, %v86_v63 }
 0xbed   :  { %v5729_v0 = vpop.f32.mrb[8].mxu1 }
 0xbee   :  { %v5731_v3 = vpop.f32.mrb[9].mxu1  ;;  %v5730_v21 = vadd.f32 %v5729_v0, %v12602_v37 }
 0xbef   :  { %v5732_v30 = vadd.f32 %v5731_v3, %v12601_v23  ;;  %v12603_v3 = vld [vmem:[#allocation65_spill] sm:$0xff] }
 0xbf0   :  { %v5740_v28 = vmax.f32 %v5730_v21, 0.0 }
 0xbf1   :  { %v5741_v43 = vmax.f32 %v5732_v30, 0.0 }
 0xbf3   :  { %v5751_v8 = vsel %vm4674_vm12, %v5741_v43, -inf  ;;  %v11724_v43 = vld [vmem:[%s11822_s3 + $0x208] sm:$0x1] }
 0xc00   :  { %v5735_v39 = vpop.f32.mrb[10].mxu1 }
 0xc01   :  { %v5736_v20 = vadd.f32 %v5735_v39, %v12602_v37  ;;  %v5737_v45 = vpop.f32.mrb[11].mxu1  ;;  %v7612_v37 = vld [vmem:[%s11822_s3 + $0x100] sm:$0xf] }
 0xc02   :  { %v5738_v33 = vadd.f32 %v5737_v45, %v12601_v23  ;;  %v12604_v23 = vld [vmem:[#allocation45_spill] sm:$0xff] }
 0xc03   :  { %v5742_v5 = vmax.f32 %v5736_v20, 0.0  ;;  %v7613_v45 = vld [vmem:[%s11822_s3 + $0x158] sm:$0xff] }
 0xc04   :  { %v5743_v9 = vmax.f32 %v5738_v33, 0.0 }
 0xc05   :  { %v5744_v48 = vmax.f32 %v5740_v28, %v5742_v5 }
 0xc06   :  { %v5752_v22 = vsel %vm4674_vm12, %v5743_v9, -inf }
 0xc07   :  { %v5745_v47 = vrot.slane %v5744_v48, 4  ;;  %v5753_v60 = vmax.f32 %v5751_v8, %v5752_v22 }
 0xc09   :  { %v5746_v16 = vmax.f32 %v5744_v48, %v5745_v47  ;;  %v5754_v18 = vrot.slane %v5753_v60, 4  ;;  %v12605_v47 = vlaneseq }
 0xc0b   :  { %v5747_v2 = vrot.slane %v5746_v16, 2  ;;  %v5755_v4 = vmax.f32 %v5753_v60, %v5754_v18  ;;  %v11728_v60 = vand.u32 127, %v12605_v47 }
 0xc0d   :  { %v5748_v1 = vmax.f32 %v5746_v16, %v5747_v2  ;;  %v5756_v15 = vrot.slane %v5755_v4, 2  ;;  %vm5625_vm4 = vcmp.eq.s32.totalorder %v11728_v60, 5  ;;  %vm5624_vm5 = vcmp.eq.s32.totalorder %v11728_v60, 4 }
 0xc0f   :  { %v5749_v17 = vrot.slane %v5748_v1, 1  ;;  %v5757_v13 = vmax.f32 %v5755_v4, %v5756_v15 }
 0xc11   :  { %v5758_v38 = vrot.slane %v5757_v13, 1  ;;  %v5750_v56 = vmax.f32 %v5748_v1, %v5749_v17  ;;  %v7614_v17 = vld [vmem:[%s11822_s3 + $0x128] ss:$0 sm:$0xff] }
 0xc13   :  { %v5759_v55 = vmax.f32 %v5757_v13, %v5758_v38  ;;  %v5760_v35 = vmul.f32 %v7611_v36, %v5750_v56 }
 0xc15   :  { %v5761_v26 = vmul.f32 %v7610_v49, %v5759_v55  ;;  %v7615_v55 = vld [vmem:[%s11822_s3 + $0x160] sm:$0xff]  ;;  %v7616_v49 = vld [vmem:[%s11822_s3 + $0x170] sm:$0xff] }
 0xc17   :  { %6720 = vmatprep.mubr.msk.f32.mxu1 %vm4674_vm12, %v5761_v26  ;;  %v5316_v34 = vpop.f32.mrb[10].mxu0 }
 0xc18   :  { %v5317_v57 = vadd.f32 %v11637_v41, %v5316_v34  ;;  %5830 = vmatmul.mubr.f32.vlgmr.msra.gmra.mrb[12].mxu1 %v5760_v35  ;;  %v6881_v46 = vpop.f32.mrb[11].mxu0  ;;  %v7617_v35 = vld [vmem:[%s11822_s3 + $0x168] sm:$0xff] }
 0xc1a   :  { %6891 = vmatmul.mubr.msk.f32.vlgmr.msra.gmra.mrb[12].mxu0 %vm4764_vm14, %v5317_v57  ;;  %v5394_v29 = vrot.slane %v5317_v57, 1  ;;  %v5468_v25 = vrot.slane %v5317_v57, 2  ;;  %v5542_v0 = vrot.slane %v5317_v57, 3 }
 0xc1b   :  { %7104 = vmatpush3.bf16.msra.mxu0 %v11643_v10  ;;  %6901 = vmatprep.mubr.msk.f32.mxu0 %vm7629_vm13, %v12585_v54 }
 0xc1c   :  { %7105 = vmatprep.subr.bf16.mxu0 %v12572_v51 }
 0xc1f   :  { %7107 = vmatpush3.bf16.msra.mxu0 %v11654_v31 }
 0xc20   :  { %7108 = vmatprep.subr.bf16.mxu0 %v12572_v51 }
 0xc22   :  { %6902 = vmatmul.mubr.msk.f32.vlgmr.msra.gmra.mrb[12].mxu0 %vm4764_vm14, %v5394_v29 }
 0xc23   :  { %7110 = vmatpush3.bf16.msra.mxu0 %v11666_v27  ;;  %6912 = vmatprep.mubr.msk.f32.mxu0 %vm7629_vm13, %v12585_v54 }
 0xc24   :  { %7111 = vmatprep.subr.bf16.mxu0 %v12572_v51 }
 0xc27   :  { %7113 = vmatpush3.bf16.msra.mxu0 %v11677_v53 }
 0xc28   :  { %7114 = vmatprep.subr.bf16.mxu0 %v12572_v51 }
 0xc2a   :  { %6913 = vmatmul.mubr.msk.f32.vlgmr.msra.gmra.mrb[12].mxu0 %vm4764_vm14, %v5468_v25 }
 0xc2b   :  { %7116 = vmatpush3.bf16.msra.mxu0 %v11689_v14  ;;  %6923 = vmatprep.mubr.msk.f32.mxu0 %vm7629_vm13, %v12585_v54 }
 0xc2c   :  { %7117 = vmatprep.subr.bf16.mxu0 %v12572_v51 }
 0xc2f   :  { %7119 = vmatpush3.bf16.msra.mxu0 %v11700_v50 }
 0xc30   :  { %7171 = vmatprep.subr.bf16.mxu0 %v12572_v51 }
 0xc32   :  { %6924 = vmatmul.mubr.msk.f32.vlgmr.msra.gmra.mrb[12].mxu0 %vm4764_vm14, %v5542_v0 }
 0xc33   :  { %7173 = vmatpush3.bf16.msra.mxu0 %v12603_v3  ;;  %6934 = vmatprep.mubr.msk.f32.mxu0 %vm7629_vm13, %v12585_v54 }
 0xc34   :  { %7174 = vmatprep.subr.bf16.mxu0 %v12572_v51 }
 0xc37   :  { %7176 = vmatpush3.bf16.msra.mxu0 %v12604_v23 }
 0xceb   :  { %v5831_v30 = vpop.f32.mrb[12].mxu1 }
 0xcec   :  { %v5832_v21 = vadd.f32 %v7612_v37, %v5831_v30  ;;  %v5833_v39 = vpop.f32.mrb[13].mxu1 }
 0xcee   :  { %v5835_v20 = vmax.f32 %v5832_v21, 0.0 }
 0xcf0   :  { %6935 = vmatmul.mubr.msk.f32.vlgmr.msra.gmra.mrb[14].mxu0 %vm4764_vm14, %v5835_v20 }
 0xcf1   :  { %6939 = vmatprep.mubr.msk.f32.mxu0 %vm4841_vm15, %v7613_v45 }
 0xd05   :  { %v5611_v33 = vpop.f32.mrb[12].mxu0 }
 0xd06   :  { %v7217_v28 = vadd.f32 %v5611_v33, %v11724_v43  ;;  %v6925_v5 = vpop.f32.mrb[13].mxu0 }
 0xd08   :  { %v5616_v9 = vsub.f32 0.0, %v7217_v28 }
 0xd0a   :  { %v5617_v48 = vmul.f32 1.442695, %v5616_v9 }
 0xd0c   :  { %7597 = vpow2.f32 %v5617_v48 }
 0xd16   :  { %v7598_v8 = vpop.eup %7597 }
 0xd17   :  { %v5619_v22 = vadd.f32 1.0, %v7598_v8 }
 0xd19   :  { %7599 = vrcp.f32 %v5619_v22 }
 0xd23   :  { %v7600_v16 = vpop.eup %7599 }
 0xd24   :  { %v5621_v18 = vmul.f32 20.0, %v7600_v16 }
 0xd26   :  { %v5623_v2 = vadd.f32 -10.0, %v5621_v18 }
 0xd28   :  { %v5626_v4 = vsel %vm5625_vm4, %v5623_v2, %v7217_v28 }
 0xd29   :  { %v5627_v1 = vsel %vm5624_vm5, %v5621_v18, %v5626_v4 }
 0xd2a   :  { %5628 = vst [vmem:[%s11824_s4] sm:$0x1] %v5627_v1 }
 0xdc3   :  { %v5905_v15 = vpop.f32.mrb[14].mxu0 }
 0xdc4   :  { %v5906_v13 = vadd.f32 %v7614_v17, %v5905_v15  ;;  %v6936_v38 = vpop.f32.mrb[15].mxu0 }
 0xdc6   :  { %5910 = vrot.lane.b32.xlu1 %v5906_v13, %s7630_s0 }
 0xdca   :  { %5991 = vrot.lane.b32.xlu1 %v5906_v13, %s7631_s6 }
 0xe38   :  { %v5911_v56 = vpop.permute.xlu1 %5910 }
 0xe39   :  { %6937 = vmatprep.subr.msk.mxu0 %vm4579_vm1, %v5911_v56 }
 0xe3a   :  { %6938 = vmatpush3.msk.msra.mxu0 %vm4579_vm1, %v5911_v56 }
 0xe3b   :  { %6940 = vmatmul.mubr.msk.f32.vlgmr.msra.gmra.mrb[16].mxu0 %vm4841_vm15, %v7615_v55 }
 0xe3c   :  { %v5992_v58 = vpop.permute.xlu1 %5991  ;;  %6944 = vmatprep.mubr.msk.f32.mxu0 %vm4841_vm15, %v7613_v45 }
 0xe3d   :  { %6942 = vmatprep.subr.msk.mxu0 %vm4579_vm1, %v5992_v58 }
 0xe3e   :  { %6943 = vmatpush3.msk.msra.mxu0 %vm4579_vm1, %v5992_v58 }
 0xe3f   :  { %7177 = vmatprep.subr.bf16.mxu0 %v12572_v51  ;;  %6945 = vmatmul.mubr.msk.f32.vlgmr.msra.gmra.mrb[18].mxu0 %vm4841_vm15, %v7615_v55 }
 0xe40   :  { %6951 = vmatprep.mubr.msk.f32.mxu0 %vm7629_vm13, %v12585_v54 }
 0xf0e   :  { %v6941_v24 = vpop.f32.mrb[16].mxu0 }
 0xf0f   :  { %v5990_v26 = vmul.f32 %v7616_v49, %v6941_v24  ;;  %v5980_v36 = vpop.f32.mrb[17].mxu0 }
 0xf10   :  { %v5989_v34 = vmul.f32 %v7617_v35, %v5980_v36 }
 0xf12   :  { %v7178_v57 = vpack.c.bf16 %v5990_v26, %v5989_v34  ;;  %v6946_v46 = vpop.f32.mrb[18].mxu0 }
 0xf13   :  { %v6071_v42 = vmul.f32 %v7616_v49, %v6946_v46  ;;  %v6061_v59 = vpop.f32.mrb[19].mxu0 }
 0xf14   :  { %7180 = vmatpush3.bf16.xpose.msk.msra.mxu0 %vm10380_vm2, %v7178_v57  ;;  %v6070_v11 = vmul.f32 %v7617_v35, %v6061_v59 }
 0xf15   :  { %7181 = vmatprep.subr.bf16.mxu0 %v12572_v51 }
 0xf16   :  { %v7185_v29 = vpack.c.bf16 %v6071_v42, %v6070_v11 }
 0xf1b   :  { %6952 = vmatmul.mubr.msk.f32.vlgmr.msra.gmra.mrb[20].mxu0 %vm4764_vm14, %v5906_v13 }
 0xf1c   :  { %7183 = vmatpush3.bf16.msra.mxu0 %v12607_v6  ;;  %6958 = vmatprep.mubr.msk.f32.mxu0 %vm7629_vm13, %v12585_v54 }
 0xf1d   :  { %7184 = vmatprep.subr.bf16.mxu0 %v12572_v51 }
 0xfee   :  { %v6146_v40 = vpop.f32.mrb[20].mxu0 }
 0xfef   :  { %v6150_v63 = vmul.f32 0.35355338, %v6146_v40  ;;  %v6953_v19 = vpop.f32.mrb[21].mxu0 }
 0xff1   :  { %v6151_v25 = vsel %vm5087_vm3, %v6150_v63, -inf }
 0xff2   :  { %6152 = vmax.xlane.f32.xlu0 %v6151_v25 }
0x107f   :  { %v6153_v61 = vpop.xlane.xlu0 %6152 }
0x1080   :  { %v6154_v12 = vsub.f32 %v6150_v63, %v6153_v61 }
0x1082   :  { %v6155_v0 = vmul.f32 1.442695, %v6154_v12 }
0x1084   :  { %7601 = vpow2.f32 %v6155_v0 }
0x108e   :  { %v7602_v3 = vpop.eup %7601 }
0x108f   :  { %6959 = vmatmul.mubr.msk.f32.vlgmr.msra.gmra.mrb[22].mxu0 %vm5094_vm0, %v7602_v3 }
0x1090   :  { %7186 = vmatpush3.bf16.msra.mxu0 %v7185_v29  ;;  %6965 = vmatprep.mubr.msk.f32.mxu0 %vm7629_vm13, %v12585_v54 }
0x1091   :  { %7187 = vmatprep.subr.bf16.mxu0 %v12572_v51 }
0x1162   :  { %v6226_v23 = vpop.f32.mrb[22].mxu0 }
0x1163   :  { %7603 = vrcp.f32 %v6226_v23  ;;  %v6960_v30 = vpop.f32.mrb[23].mxu0 }
0x116d   :  { %v7604_v37 = vpop.eup %7603 }
0x116e   :  { %v6231_v21 = vmul.f32 %v7604_v37, %v7602_v3 }
0x1170   :  { %6966 = vmatmul.mubr.msk.f32.vlgmr.msra.gmra.mrb[24].mxu0 %vm5094_vm0, %v6231_v21 }
0x1171   :  { %7189 = vmatpush3.bf16.msra.mxu0 %v11367_v7  ;;  %6976 = vmatprep.mubr.msk.f32.mxu0 %vm7629_vm13, %v12585_v54 }
0x1172   :  { %7190 = vmatprep.subr.bf16.mxu0 %v12572_v51 }
0x1175   :  { %7192 = vmatpush3.bf16.msra.mxu0 %v11376_v52 }
0x1176   :  { %7193 = vmatprep.subr.bf16.mxu0 %v12572_v51 }
0x1243   :  { %v6301_v39 = vpop.f32.mrb[24].mxu0 }
0x1244   :  { %v6967_v20 = vpop.f32.mrb[25].mxu0  ;;  %6977 = vmatmul.mubr.msk.f32.vlgmr.msra.gmra.mrb[26].mxu0 %vm4764_vm14, %v6301_v39 }
0x1245   :  { %7195 = vmatpush3.bf16.msra.mxu0 %v11605_v62  ;;  %6987 = vmatprep.mubr.msk.f32.mxu0 %vm7629_vm13, %v12585_v54 }
0x1246   :  { %7196 = vmatprep.subr.bf16.mxu0 %v12572_v51 }
0x1249   :  { %7198 = vmatpush3.bf16.msra.mxu0 %v11615_v44 }
0x124a   :  { %7199 = vmatprep.subr.bf16.mxu0 %v12572_v51 }
0x1317   :  { %v6374_v7 = vpop.f32.mrb[26].mxu0 }
0x1318   :  { %v6375_v52 = vadd.f32 %v11637_v41, %v6374_v7  ;;  %v6978_v45 = vpop.f32.mrb[27].mxu0 }
0x131a   :  { %6988 = vmatmul.mubr.msk.f32.vlgmr.msra.gmra.mrb[28].mxu0 %vm4764_vm14, %v6375_v52  ;;  %v6452_v62 = vrot.slane %v6375_v52, 1  ;;  %v6526_v44 = vrot.slane %v6375_v52, 2  ;;  %v6600_v41 = vrot.slane %v6375_v52, 3 }
0x131b   :  { %7201 = vmatpush3.bf16.msra.mxu0 %v11643_v10  ;;  %6998 = vmatprep.mubr.msk.f32.mxu0 %vm7629_vm13, %v12585_v54 }
0x131c   :  { %7202 = vmatprep.subr.bf16.mxu0 %v12572_v51 }
0x131f   :  { %7204 = vmatpush3.bf16.msra.mxu0 %v11654_v31 }
0x1320   :  { %7205 = vmatprep.subr.bf16.mxu0 %v12572_v51 }
0x1322   :  { %6999 = vmatmul.mubr.msk.f32.vlgmr.msra.gmra.mrb[28].mxu0 %vm4764_vm14, %v6452_v62 }
0x1323   :  { %7207 = vmatpush3.bf16.msra.mxu0 %v11666_v27  ;;  %7009 = vmatprep.mubr.msk.f32.mxu0 %vm7629_vm13, %v12585_v54 }
0x1324   :  { %7208 = vmatprep.subr.bf16.mxu0 %v12572_v51 }
0x1327   :  { %7210 = vmatpush3.bf16.msra.mxu0 %v11677_v53 }
0x1328   :  { %7211 = vmatprep.subr.bf16.mxu0 %v12572_v51 }
0x132a   :  { %7010 = vmatmul.mubr.msk.f32.vlgmr.msra.gmra.mrb[28].mxu0 %vm4764_vm14, %v6526_v44 }
0x132b   :  { %7213 = vmatpush3.bf16.msra.mxu0 %v11689_v14  ;;  %7020 = vmatprep.mubr.msk.f32.mxu0 %vm7629_vm13, %v12585_v54 }
0x132c   :  { %7214 = vmatprep.subr.bf16.mxu0 %v12572_v51 }
0x132f   :  { %7216 = vmatpush3.bf16.msra.mxu0 %v11700_v50 }
0x1332   :  { %7021 = vmatmul.mubr.msk.f32.vlgmr.msra.gmra.mrb[28].mxu0 %vm4764_vm14, %v6600_v41 }
0x1405   :  { %v6669_v10 = vpop.f32.mrb[28].mxu0 }
0x1406   :  { %v7218_v31 = vadd.f32 %v6669_v10, %v11724_v43  ;;  %v7022_v27 = vpop.f32.mrb[29].mxu0 }
0x1408   :  { %v6674_v53 = vsub.f32 0.0, %v7218_v31 }
0x140a   :  { %v6675_v33 = vmul.f32 1.442695, %v6674_v53 }
0x140c   :  { %7605 = vpow2.f32 %v6675_v33 }
0x1416   :  { %v7606_v28 = vpop.eup %7605 }
0x1417   :  { %v6677_v5 = vadd.f32 1.0, %v7606_v28 }
0x1419   :  { %7607 = vrcp.f32 %v6677_v5 }
0x1423   :  { %v7608_v14 = vpop.eup %7607 }
0x1424   :  { %v6679_v9 = vmul.f32 20.0, %v7608_v14 }
0x1426   :  { %v6681_v54 = vadd.f32 -10.0, %v6679_v9 }
0x1428   :  { %v6682_v51 = vsel %vm5625_vm4, %v6681_v54, %v7218_v31 }
0x1429   :  { %v6683_v50 = vsel %vm5624_vm5, %v6679_v9, %v6682_v51 }
0x142a   :  { %6738 = vst [vmem:[%s11824_s4 + $0x1] sm:$0x1] %v6683_v50 }

</bundles_post_ra>
